<compile_context>
chip_gen: v7x
topology: tpu7x:2x2x1
jax: 0.10.0
libtpu: 0.0.40
codegen_flags: <defaults>
</compile_context>

<pallas_src>
import functools

import jax
import jax.numpy as jnp
from jax.experimental import pallas as pl
from jax.experimental.pallas import tpu as pltpu


_LP = 2  # left zero-pad (pixels) of each activation row: the interior then
         # starts 2*C = 128 elements into the row -> 128-lane-aligned
         # write-backs and centre-tap reads.


# ---------------------------------------------------------------------------
# Fused Pallas kernel: the whole 17-layer DnCNN for one batch element.
# ---------------------------------------------------------------------------
def _dncnn_fused_kernel(x_ref, wstk_ref, shift_ref, wout_ref, bout_ref,
                        o_ref, act_ref, slab_ref, *, H, W, C, n_layers):
    # x_ref:     (1, H, W, C)    input image (compute dtype, channels padded to C)
    # wstk_ref:  (L, 9*C, C)     conv1 + 15 blocks, BN scale folded in,
    #                            im2col layout (dh, dw, cin) -> rows
    # shift_ref: (L, 1, C)       per-channel shift (conv1 bias / folded BN), f32
    # wout_ref:  (9*C, Cpad)     output conv weight, out-channels zero-padded
    # bout_ref:  (1, Cpad)       output conv bias (zero-padded), f32
    # o_ref:     (1, H*W, Cpad)  lane-dense output slab, f32
    # act_ref:   (H+2, W+3, C)   zero-bordered activation buffer (compute dtype)
    # slab_ref:  (H*W, 9*C)      im2col patch slab (compute dtype)
    cdt = slab_ref.dtype
    Wp = W + _LP + 1

    # Zero only the border ring; the interior is fully overwritten below and
    # after every layer.  Done every grid step (each megacore core has its own
    # scratch), never gated on program_id.
    act_ref[0:1, :, :] = jnp.zeros((1, Wp, C), cdt)
    act_ref[H + 1:H + 2, :, :] = jnp.zeros((1, Wp, C), cdt)
    act_ref[:, 0:_LP, :] = jnp.zeros((H + 2, _LP, C), cdt)
    act_ref[:, W + _LP:Wp, :] = jnp.zeros((H + 2, 1, C), cdt)

    # Load this image into the interior (already in compute dtype).
    act_ref[1:H + 1, _LP:_LP + W, :] = x_ref[0]

    def build_slab():
        # im2col: one (H*W, 9*C) slab -> a single K = 9*C MXU matmul per layer.
        # Adjacent taps are paired (concat of two 64-channel patches) so every
        # store is a 128-wide, 128-aligned lane-dense store; only the last tap
        # is a half-width (aligned) store.
        for t in range(0, 8, 2):
            dh0, dw0 = divmod(t, 3)
            dh1, dw1 = divmod(t + 1, 3)
            p0 = act_ref[dh0:dh0 + H, 1 + dw0:1 + dw0 + W, :]
            p1 = act_ref[dh1:dh1 + H, 1 + dw1:1 + dw1 + W, :]
            pair = jnp.concatenate([p0, p1], axis=-1)            # (H, W, 2C)
            slab_ref[:, t * C:(t + 2) * C] = pair.reshape(H * W, 2 * C)
        # tap (dh=2, dw=2): single 64-wide store at a 128-aligned column (512).
        slab_ref[:, 8 * C:9 * C] = (
            act_ref[2:2 + H, 3:3 + W, :].reshape(H * W, C))

    def layer_step(layer, carry):
        # conv1 (layer 0) + 15x Conv-BN-ReLU; BN scale is pre-folded into W,
        # so only the shift + ReLU remain on the VPU.
        build_slab()
        y = jnp.dot(slab_ref[...], wstk_ref[layer],
                    preferred_element_type=jnp.float32)          # (H*W, C) f32
        y = jnp.maximum(y + shift_ref[layer], 0.0)               # bias/BN + ReLU
        # The slab already holds this layer's full input, so the single
        # activation buffer can be overwritten in place (no ping-pong).
        act_ref[1:H + 1, _LP:_LP + W, :] = y.reshape(H, W, C).astype(cdt)
        return carry

    jax.lax.fori_loop(0, n_layers, layer_step, 0)

    # Output conv: bias, no BN, no ReLU.  Out-channels padded to Cpad so all
    # output stores are full 128-lane vst (lane-dense epilogue).
    build_slab()
    y = jnp.dot(slab_ref[...], wout_ref[...],
                preferred_element_type=jnp.float32) + bout_ref[...]
    o_ref[...] = y.reshape(o_ref.shape).astype(o_ref.dtype)


# ---------------------------------------------------------------------------
# VMEM budget from the actual shapes (item 7 of the review)
# ---------------------------------------------------------------------------
def _vmem_limit_bytes(H, W, C, K, Cpad, L, compute_dtype):
    cb = jnp.dtype(compute_dtype).itemsize
    lane = 128                      # minor dims < 128 lane-pad in VMEM (conservative)
    act = (H + 2) * (W + _LP + 1) * max(C, lane) * cb
    slab = H * W * K * cb
    weights = (L * K * C + K * Cpad) * cb * 2          # default double-buffering
    small = (L * max(C, lane) + Cpad) * 4 * 2
    io = (H * W * max(C, lane) * cb + H * W * Cpad * 4) * 2
    est = act + slab + weights + small + io
    # TODO(synk): production image sizes need the row-stripped slab variant
    # rather than a bigger whole-image budget (v7x physical VMEM is 64 MiB).
    return int(min(max(32 << 20, (est * 3) // 2), 100 << 20))


def _dncnn_pallas(x_nhwc, wstk, shift, wout, bout):
    N, H, W, C = x_nhwc.shape
    L, K, _ = wstk.shape
    Cpad = wout.shape[-1]
    compute_dtype = x_nhwc.dtype

    kernel = functools.partial(_dncnn_fused_kernel, H=H, W=W, C=C, n_layers=L)

    return pl.pallas_call(
        kernel,
        out_shape=jax.ShapeDtypeStruct((N, H * W, Cpad), jnp.float32),
        grid_spec=pltpu.PrefetchScalarGridSpec(
            num_scalar_prefetch=0,
            grid=(N,),     # one image per step; "parallel" -> megacore split
            in_specs=[
                pl.BlockSpec((1, H, W, C), lambda n: (n, 0, 0, 0)),
                # Constant index_maps: weights / shifts are DMA'd once and
                # reused for every batch step.
                pl.BlockSpec((L, K, C), lambda n: (0, 0, 0)),
                pl.BlockSpec((L, 1, C), lambda n: (0, 0, 0)),
                pl.BlockSpec((K, Cpad), lambda n: (0, 0)),
                pl.BlockSpec((1, Cpad), lambda n: (0, 0)),
            ],
            out_specs=pl.BlockSpec((1, H * W, Cpad), lambda n: (n, 0, 0)),
            scratch_shapes=[
                pltpu.VMEM((H + 2, W + _LP + 1, C), compute_dtype),  # activations
                pltpu.VMEM((H * W, K), compute_dtype),               # im2col slab
            ],
        ),
        compiler_params=pltpu.CompilerParams(
            dimension_semantics=("parallel",),
            vmem_limit_bytes=_vmem_limit_bytes(H, W, C, K, Cpad, L,
                                               compute_dtype),
        ),
    )(x_nhwc, wstk, shift, wout, bout)


# ---------------------------------------------------------------------------
# Parameter packing (done once, outside the kernel)
# ---------------------------------------------------------------------------
def _round_up(x, m):
    return ((x + m - 1) // m) * m


def _pack_params(params, compute_dtype):
    """Reshape / stack DnCNN weights into the fused kernel's im2col layout,
    folding the inference-mode BN scale directly into the conv weights."""
    w1, b1 = params["conv1"]                       # (3,3,Cin,C), (C,)
    Cin, C = w1.shape[2], w1.shape[3]

    # conv1: zero-pad the input-channel axis to C so every hidden layer shares
    # the same (9*C, C) weight shape (the padded input channels are zero too).
    w1p = jnp.zeros((3, 3, C, C), jnp.float32).at[:, :, :Cin, :].set(w1)

    ws = [w1p]
    shifts = [b1.astype(jnp.float32)]
    for (w, scale, shift) in params["blocks"]:     # (3,3,C,C), (C,), (C,)
        ws.append(w * scale[None, None, None, :])  # (W @ x)*s == (W*s) @ x
        shifts.append(shift.astype(jnp.float32))

    L = len(ws)
    wstk = jnp.stack([w.reshape(9 * C, C) for w in ws]).astype(compute_dtype)
    shift_all = jnp.stack(shifts).reshape(L, 1, C).astype(jnp.float32)

    wo, bo = params["output"]                      # (3,3,C,Cout), (Cout,)
    Cout = wo.shape[-1]
    Cpad = max(128, _round_up(Cout, 128))          # lane-dense output channels
    wout = (jnp.zeros((9 * C, Cpad), jnp.float32)
            .at[:, :Cout].set(wo.reshape(9 * C, Cout)).astype(compute_dtype))
    bout = jnp.zeros((1, Cpad), jnp.float32).at[0, :Cout].set(bo)
    return wstk, shift_all, wout, bout


# ---------------------------------------------------------------------------
# Deterministic parameter construction (mirrors DnCNN.__init__)
# ---------------------------------------------------------------------------
def init_dncnn_params(key, input_chnl, num_chnl=64, num_layers=15):
    std = (2.0 / (9.0 * 64.0)) ** 0.5
    clip_b = 0.025
    eps = 1e-5
    params = {}

    k = key
    def nkey():
        nonlocal k
        k, sub = jax.random.split(k)
        return sub

    # conv1: Conv2d(input_chnl -> 64, bias=True) + ReLU
    w1 = jax.random.normal(nkey(), (3, 3, input_chnl, num_chnl), jnp.float32) * std
    b1 = jax.random.normal(nkey(), (num_chnl,), jnp.float32) * 0.01
    params["conv1"] = (w1, b1)

    # 15 x Conv_BN_ReLU(64 -> 64, bias=False)
    blocks = []
    for _ in range(num_layers):
        w = jax.random.normal(nkey(), (3, 3, num_chnl, num_chnl), jnp.float32) * std
        gamma = jax.random.normal(nkey(), (num_chnl,), jnp.float32) * std
        gamma = jnp.where((gamma >= 0) & (gamma < clip_b), clip_b, gamma)
        gamma = jnp.where((gamma > -clip_b) & (gamma < 0), -clip_b, gamma)
        beta = jnp.zeros((num_chnl,), jnp.float32)
        running_mean = jnp.zeros((num_chnl,), jnp.float32)
        running_var = jnp.full((num_chnl,), 0.01, jnp.float32)
        # fold BN (inference mode) into per-channel scale/shift
        scale = gamma / jnp.sqrt(running_var + eps)
        shift = beta - running_mean * scale
        blocks.append((w, scale, shift))
    params["blocks"] = blocks

    # output: Conv2d(64 -> input_chnl, bias=True), no ReLU
    wo = jax.random.normal(nkey(), (3, 3, num_chnl, input_chnl), jnp.float32) * std
    bo = jax.random.normal(nkey(), (input_chnl,), jnp.float32) * 0.01
    params["output"] = (wo, bo)
    return params


# ---------------------------------------------------------------------------
# DnCNN forward (NCHW in, NCHW out — same as the PyTorch module)
# ---------------------------------------------------------------------------
def dncnn_forward(params, x_nchw, *, compute_dtype=jnp.bfloat16):
    """compute_dtype=bf16 (default) is the fast MXU path on v5e/v6e/v7x
    (f32 accumulation and f32 bias/BN shifts are kept); compute_dtype=f32
    tracks the PyTorch f32 reference most closely."""
    wstk, shift, wout, bout = _pack_params(params, compute_dtype)
    C = params["conv1"][0].shape[-1]
    Cout = params["output"][0].shape[-1]

    N, Cin, H, W = x_nchw.shape
    x = jnp.transpose(x_nchw, (0, 2, 3, 1))                      # NCHW -> NHWC
    if Cin < C:  # pad input channels once so the in-kernel layout is uniform
        x = jnp.pad(x, ((0, 0), (0, 0), (0, 0), (0, C - Cin)))
    x = x.astype(compute_dtype)                                  # cast once

    y = _dncnn_pallas(x, wstk, shift, wout, bout)                # (N, H*W, Cpad)
    y = y[:, :, :Cout]                                           # drop channel pad
    return jnp.transpose(y, (0, 2, 1)).reshape(N, Cout, H, W)    # -> NCHW


# ---------------------------------------------------------------------------
# Pure-JAX reference (XLA conv) for in-script numerical validation
# ---------------------------------------------------------------------------
def dncnn_reference(params, x_nchw):
    dn = ("NHWC", "HWIO", "NHWC")

    def conv(x, w):
        return jax.lax.conv_general_dilated(
            x, w, window_strides=(1, 1), padding="SAME",
            dimension_numbers=dn, precision=jax.lax.Precision.HIGHEST)

    x = jnp.transpose(x_nchw, (0, 2, 3, 1)).astype(jnp.float32)
    w1, b1 = params["conv1"]
    x = jax.nn.relu(conv(x, w1) + b1)
    for (w, scale, shift) in params["blocks"]:
        x = jax.nn.relu(conv(x, w) * scale + shift)
    wo, bo = params["output"]
    x = conv(x, wo) + bo
    return jnp.transpose(x, (0, 3, 1, 2))


if __name__ == "__main__":
    key = jax.random.PRNGKey(0)
    k_params, k_x = jax.random.split(key)

    N, Cin, H, W = 2, 4, 16, 16
    x = jax.random.normal(k_x, (N, Cin, H, W), jnp.float32)
    params = init_dncnn_params(k_params, input_chnl=Cin)

    # Default (bf16 weights/activations, f32 accumulation) fast path.
    fwd_bf16 = jax.jit(functools.partial(dncnn_forward,
                                         compute_dtype=jnp.bfloat16))
    out = jax.block_until_ready(fwd_bf16(params, x))
    assert out.shape == (N, Cin, H, W), out.shape
    assert out.dtype == jnp.float32

    ref = jax.block_until_ready(jax.jit(dncnn_reference)(params, x))
    denom = float(jnp.max(jnp.abs(ref))) + 1e-8
    err_bf16 = float(jnp.max(jnp.abs(out - ref))) / denom
    assert err_bf16 < 2e-1, f"bf16 kernel mismatch: rel max err {err_bf16}"

    # f32 compute path, validated with a tighter tolerance than v1 (5e-2).
    # Kept above ~1e-4 only because the in-kernel f32 MXU pass count is
    # generation/compiler dependent; layout/indexing bugs give O(1) errors and
    # are still caught.
    fwd_f32 = jax.jit(functools.partial(dncnn_forward,
                                        compute_dtype=jnp.float32))
    out_f32 = jax.block_until_ready(fwd_f32(params, x))
    err_f32 = float(jnp.max(jnp.abs(out_f32 - ref))) / denom
    assert err_f32 < 2e-2, f"f32 kernel mismatch: rel max err {err_f32}"

    print("KERNEL_OK")
</pallas_src>

<mosaic_0001>
module attributes {stable_mosaic.version = 11 : i64} {
  func.func @_dncnn_fused_kernel(%arg0: i32, %arg1: memref<1x16x16x64xbf16, #tpu.memory_space<vmem>>, %arg2: memref<16x576x64xbf16, #tpu.memory_space<vmem>>, %arg3: memref<16x1x64xf32, #tpu.memory_space<vmem>>, %arg4: memref<576x128xbf16, #tpu.memory_space<vmem>>, %arg5: memref<1x128xf32, #tpu.memory_space<vmem>>, %arg6: memref<1x256x128xf32, #tpu.memory_space<vmem>>, %arg7: memref<18x19x64xbf16, #tpu.memory_space<vmem>>, %arg8: memref<256x576xbf16, #tpu.memory_space<vmem>>) attributes {dimension_semantics = [#tpu.dimension_semantics<parallel>], iteration_bounds = array<i64: 2>, scalar_prefetch = 0 : i64, scratch_operands = 2 : i64, tpu.core_type = #tpu.core_type<tc>, window_params = [{transform_indices = @transform_0, window_bounds = array<i64: 1, 16, 16, 64>}, {pipeline_mode = #tpu.pipeline_mode<synchronous>, transform_indices = @transform_1, window_bounds = array<i64: 16, 576, 64>}, {pipeline_mode = #tpu.pipeline_mode<synchronous>, transform_indices = @transform_2, window_bounds = array<i64: 16, 1, 64>}, {pipeline_mode = #tpu.pipeline_mode<synchronous>, transform_indices = @transform_3, window_bounds = array<i64: 576, 128>}, {pipeline_mode = #tpu.pipeline_mode<synchronous>, transform_indices = @transform_4, window_bounds = array<i64: 1, 128>}, {transform_indices = @transform_5, window_bounds = array<i64: 1, 256, 128>}]} {
    %cst = arith.constant 0.000000e+00 : bf16
    %0 = vector.broadcast %cst : bf16 to vector<1x19x64xbf16>
    %c0 = arith.constant 0 : index
    %c0_0 = arith.constant 0 : index
    %c0_1 = arith.constant 0 : index
    %1 = vector.load %arg7[%c0, %c0_0, %c0_1] : memref<18x19x64xbf16, #tpu.memory_space<vmem>>, vector<1x19x64xbf16>
    tpu.vector_store %arg7[%c0, %c0_0, %c0_1], %0 {strides = array<i32>} : memref<18x19x64xbf16, #tpu.memory_space<vmem>>, vector<1x19x64xbf16>,
    %cst_2 = arith.constant 0.000000e+00 : bf16
    %2 = vector.broadcast %cst_2 : bf16 to vector<1x19x64xbf16>
    %c17 = arith.constant 17 : index
    %c0_3 = arith.constant 0 : index
    %c0_4 = arith.constant 0 : index
    %3 = vector.load %arg7[%c17, %c0_3, %c0_4] : memref<18x19x64xbf16, #tpu.memory_space<vmem>>, vector<1x19x64xbf16>
    tpu.vector_store %arg7[%c17, %c0_3, %c0_4], %2 {strides = array<i32>} : memref<18x19x64xbf16, #tpu.memory_space<vmem>>, vector<1x19x64xbf16>,
    %cst_5 = arith.constant 0.000000e+00 : bf16
    %4 = vector.broadcast %cst_5 : bf16 to vector<18x2x64xbf16>
    %c0_6 = arith.constant 0 : index
    %c0_7 = arith.constant 0 : index
    %c0_8 = arith.constant 0 : index
    %5 = vector.load %arg7[%c0_6, %c0_7, %c0_8] : memref<18x19x64xbf16, #tpu.memory_space<vmem>>, vector<18x2x64xbf16>
    tpu.vector_store %arg7[%c0_6, %c0_7, %c0_8], %4 {strides = array<i32>} : memref<18x19x64xbf16, #tpu.memory_space<vmem>>, vector<18x2x64xbf16>,
    %cst_9 = arith.constant 0.000000e+00 : bf16
    %6 = vector.broadcast %cst_9 : bf16 to vector<18x1x64xbf16>
    %c0_10 = arith.constant 0 : index
    %c18 = arith.constant 18 : index
    %c0_11 = arith.constant 0 : index
    %7 = vector.load %arg7[%c0_10, %c18, %c0_11] : memref<18x19x64xbf16, #tpu.memory_space<vmem>>, vector<18x1x64xbf16>
    tpu.vector_store %arg7[%c0_10, %c18, %c0_11], %6 {strides = array<i32>} : memref<18x19x64xbf16, #tpu.memory_space<vmem>>, vector<18x1x64xbf16>,
    %c0_12 = arith.constant 0 : index
    %c0_13 = arith.constant 0 : index
    %c0_14 = arith.constant 0 : index
    %c0_15 = arith.constant 0 : index
    %8 = vector.load %arg1[%c0_12, %c0_13, %c0_14, %c0_15] : memref<1x16x16x64xbf16, #tpu.memory_space<vmem>>, vector<1x16x16x64xbf16>
    %9 = vector.shape_cast %8 : vector<1x16x16x64xbf16> to vector<16x16x64xbf16>
    %c1 = arith.constant 1 : index
    %c2 = arith.constant 2 : index
    %c0_16 = arith.constant 0 : index
    %10 = vector.load %arg7[%c1, %c2, %c0_16] : memref<18x19x64xbf16, #tpu.memory_space<vmem>>, vector<16x16x64xbf16>
    tpu.vector_store %arg7[%c1, %c2, %c0_16], %9 {strides = array<i32>} : memref<18x19x64xbf16, #tpu.memory_space<vmem>>, vector<16x16x64xbf16>,
    %c0_i32 = arith.constant 0 : i32
    %c16_i32 = arith.constant 16 : i32
    %11 = arith.addi %c0_i32, %c16_i32 : i32
    %c1_i32 = arith.constant 1 : i32
    scf.for %arg9 = %c0_i32 to %11 step %c1_i32  : i32 {
      %c0_60 = arith.constant 0 : index
      %c1_61 = arith.constant 1 : index
      %c0_62 = arith.constant 0 : index
      %43 = vector.load %arg7[%c0_60, %c1_61, %c0_62] : memref<18x19x64xbf16, #tpu.memory_space<vmem>>, vector<16x16x64xbf16>
      %c0_63 = arith.constant 0 : index
      %c2_64 = arith.constant 2 : index
      %c0_65 = arith.constant 0 : index
      %44 = vector.load %arg7[%c0_63, %c2_64, %c0_65] : memref<18x19x64xbf16, #tpu.memory_space<vmem>>, vector<16x16x64xbf16>
      %45 = tpu.concatenate %43, %44 in 2 : vector<16x16x64xbf16>, vector<16x16x64xbf16> -> vector<16x16x128xbf16>
      %46 = vector.shape_cast %45 : vector<16x16x128xbf16> to vector<256x128xbf16>
      %c0_66 = arith.constant 0 : index
      %c0_67 = arith.constant 0 : index
      %47 = vector.load %arg8[%c0_66, %c0_67] : memref<256x576xbf16, #tpu.memory_space<vmem>>, vector<256x128xbf16>
      tpu.vector_store %arg8[%c0_66, %c0_67], %46 {strides = array<i32>} : memref<256x576xbf16, #tpu.memory_space<vmem>>, vector<256x128xbf16>,
      %c0_68 = arith.constant 0 : index
      %c3_69 = arith.constant 3 : index
      %c0_70 = arith.constant 0 : index
      %48 = vector.load %arg7[%c0_68, %c3_69, %c0_70] : memref<18x19x64xbf16, #tpu.memory_space<vmem>>, vector<16x16x64xbf16>
      %c1_71 = arith.constant 1 : index
      %c1_72 = arith.constant 1 : index
      %c0_73 = arith.constant 0 : index
      %49 = vector.load %arg7[%c1_71, %c1_72, %c0_73] : memref<18x19x64xbf16, #tpu.memory_space<vmem>>, vector<16x16x64xbf16>
      %50 = tpu.concatenate %48, %49 in 2 : vector<16x16x64xbf16>, vector<16x16x64xbf16> -> vector<16x16x128xbf16>
      %51 = vector.shape_cast %50 : vector<16x16x128xbf16> to vector<256x128xbf16>
      %c0_74 = arith.constant 0 : index
      %c128_75 = arith.constant 128 : index
      %52 = vector.load %arg8[%c0_74, %c128_75] : memref<256x576xbf16, #tpu.memory_space<vmem>>, vector<256x128xbf16>
      tpu.vector_store %arg8[%c0_74, %c128_75], %51 {strides = array<i32>} : memref<256x576xbf16, #tpu.memory_space<vmem>>, vector<256x128xbf16>,
      %c1_76 = arith.constant 1 : index
      %c2_77 = arith.constant 2 : index
      %c0_78 = arith.constant 0 : index
      %53 = vector.load %arg7[%c1_76, %c2_77, %c0_78] : memref<18x19x64xbf16, #tpu.memory_space<vmem>>, vector<16x16x64xbf16>
      %c1_79 = arith.constant 1 : index
      %c3_80 = arith.constant 3 : index
      %c0_81 = arith.constant 0 : index
      %54 = vector.load %arg7[%c1_79, %c3_80, %c0_81] : memref<18x19x64xbf16, #tpu.memory_space<vmem>>, vector<16x16x64xbf16>
      %55 = tpu.concatenate %53, %54 in 2 : vector<16x16x64xbf16>, vector<16x16x64xbf16> -> vector<16x16x128xbf16>
      %56 = vector.shape_cast %55 : vector<16x16x128xbf16> to vector<256x128xbf16>
      %c0_82 = arith.constant 0 : index
      %c256_83 = arith.constant 256 : index
      %57 = vector.load %arg8[%c0_82, %c256_83] : memref<256x576xbf16, #tpu.memory_space<vmem>>, vector<256x128xbf16>
      tpu.vector_store %arg8[%c0_82, %c256_83], %56 {strides = array<i32>} : memref<256x576xbf16, #tpu.memory_space<vmem>>, vector<256x128xbf16>,
      %c2_84 = arith.constant 2 : index
      %c1_85 = arith.constant 1 : index
      %c0_86 = arith.constant 0 : index
      %58 = vector.load %arg7[%c2_84, %c1_85, %c0_86] : memref<18x19x64xbf16, #tpu.memory_space<vmem>>, vector<16x16x64xbf16>
      %c2_87 = arith.constant 2 : index
      %c2_88 = arith.constant 2 : index
      %c0_89 = arith.constant 0 : index
      %59 = vector.load %arg7[%c2_87, %c2_88, %c0_89] : memref<18x19x64xbf16, #tpu.memory_space<vmem>>, vector<16x16x64xbf16>
      %60 = tpu.concatenate %58, %59 in 2 : vector<16x16x64xbf16>, vector<16x16x64xbf16> -> vector<16x16x128xbf16>
      %61 = vector.shape_cast %60 : vector<16x16x128xbf16> to vector<256x128xbf16>
      %c0_90 = arith.constant 0 : index
      %c384_91 = arith.constant 384 : index
      %62 = vector.load %arg8[%c0_90, %c384_91] : memref<256x576xbf16, #tpu.memory_space<vmem>>, vector<256x128xbf16>
      tpu.vector_store %arg8[%c0_90, %c384_91], %61 {strides = array<i32>} : memref<256x576xbf16, #tpu.memory_space<vmem>>, vector<256x128xbf16>,
      %c2_92 = arith.constant 2 : index
      %c3_93 = arith.constant 3 : index
      %c0_94 = arith.constant 0 : index
      %63 = vector.load %arg7[%c2_92, %c3_93, %c0_94] : memref<18x19x64xbf16, #tpu.memory_space<vmem>>, vector<16x16x64xbf16>
      %64 = vector.shape_cast %63 : vector<16x16x64xbf16> to vector<256x64xbf16>
      %c0_95 = arith.constant 0 : index
      %c512_96 = arith.constant 512 : index
      %65 = vector.load %arg8[%c0_95, %c512_96] : memref<256x576xbf16, #tpu.memory_space<vmem>>, vector<256x64xbf16>
      tpu.vector_store %arg8[%c0_95, %c512_96], %64 {strides = array<i32>} : memref<256x576xbf16, #tpu.memory_space<vmem>>, vector<256x64xbf16>,
      %c0_97 = arith.constant 0 : index
      %c0_98 = arith.constant 0 : index
      %66 = vector.load %arg8[%c0_97, %c0_98] : memref<256x576xbf16, #tpu.memory_space<vmem>>, vector<256x576xbf16>
      %67 = arith.index_cast %arg9 : i32 to index
      %c0_99 = arith.constant 0 : index
      %c0_100 = arith.constant 0 : index
      %68 = vector.load %arg2[%67, %c0_99, %c0_100] : memref<16x576x64xbf16, #tpu.memory_space<vmem>>, vector<1x576x64xbf16>
      %69 = vector.shape_cast %68 : vector<1x576x64xbf16> to vector<576x64xbf16>
      %cst_101 = arith.constant dense<0.000000e+00> : vector<256x64xf32>
      %70 = tpu.matmul %66, %69, %cst_101 {dimension_numbers = #tpu.dot_dimension_numbers<[1], [0], [0], [1], [0, 0, 1, 1], [], []>} : vector<256x576xbf16>, vector<576x64xbf16>, vector<256x64xf32> -> vector<256x64xf32>
      %71 = arith.index_cast %arg9 : i32 to index
      %c0_102 = arith.constant 0 : index
      %c0_103 = arith.constant 0 : index
      %72 = vector.load %arg3[%71, %c0_102, %c0_103] : memref<16x1x64xf32, #tpu.memory_space<vmem>>, vector<1x1x64xf32>
      %73 = vector.shape_cast %72 : vector<1x1x64xf32> to vector<1x64xf32>
      %74 = vector.broadcast %73 : vector<1x64xf32> to vector<256x64xf32>
      %75 = arith.addf %70, %74 : vector<256x64xf32>
      %cst_104 = arith.constant 0.000000e+00 : f32
      %76 = vector.broadcast %cst_104 : f32 to vector<256x64xf32>
      %77 = arith.maximumf %75, %76 : vector<256x64xf32>
      %78 = vector.shape_cast %77 : vector<256x64xf32> to vector<16x16x64xf32>
      %79 = arith.truncf %78 : vector<16x16x64xf32> to vector<16x16x64xbf16>
      %c1_105 = arith.constant 1 : index
      %c2_106 = arith.constant 2 : index
      %c0_107 = arith.constant 0 : index
      %80 = vector.load %arg7[%c1_105, %c2_106, %c0_107] : memref<18x19x64xbf16, #tpu.memory_space<vmem>>, vector<16x16x64xbf16>
      tpu.vector_store %arg7[%c1_105, %c2_106, %c0_107], %79 {strides = array<i32>} : memref<18x19x64xbf16, #tpu.memory_space<vmem>>, vector<16x16x64xbf16>,
    }
    %c16_i32_17 = arith.constant 16 : i32
    %c0_18 = arith.constant 0 : index
    %c1_19 = arith.constant 1 : index
    %c0_20 = arith.constant 0 : index
    %12 = vector.load %arg7[%c0_18, %c1_19, %c0_20] : memref<18x19x64xbf16, #tpu.memory_space<vmem>>, vector<16x16x64xbf16>
    %c0_21 = arith.constant 0 : index
    %c2_22 = arith.constant 2 : index
    %c0_23 = arith.constant 0 : index
    %13 = vector.load %arg7[%c0_21, %c2_22, %c0_23] : memref<18x19x64xbf16, #tpu.memory_space<vmem>>, vector<16x16x64xbf16>
    %14 = tpu.concatenate %12, %13 in 2 : vector<16x16x64xbf16>, vector<16x16x64xbf16> -> vector<16x16x128xbf16>
    %15 = vector.shape_cast %14 : vector<16x16x128xbf16> to vector<256x128xbf16>
    %c0_24 = arith.constant 0 : index
    %c0_25 = arith.constant 0 : index
    %16 = vector.load %arg8[%c0_24, %c0_25] : memref<256x576xbf16, #tpu.memory_space<vmem>>, vector<256x128xbf16>
    tpu.vector_store %arg8[%c0_24, %c0_25], %15 {strides = array<i32>} : memref<256x576xbf16, #tpu.memory_space<vmem>>, vector<256x128xbf16>,
    %c0_26 = arith.constant 0 : index
    %c3 = arith.constant 3 : index
    %c0_27 = arith.constant 0 : index
    %17 = vector.load %arg7[%c0_26, %c3, %c0_27] : memref<18x19x64xbf16, #tpu.memory_space<vmem>>, vector<16x16x64xbf16>
    %c1_28 = arith.constant 1 : index
    %c1_29 = arith.constant 1 : index
    %c0_30 = arith.constant 0 : index
    %18 = vector.load %arg7[%c1_28, %c1_29, %c0_30] : memref<18x19x64xbf16, #tpu.memory_space<vmem>>, vector<16x16x64xbf16>
    %19 = tpu.concatenate %17, %18 in 2 : vector<16x16x64xbf16>, vector<16x16x64xbf16> -> vector<16x16x128xbf16>
    %20 = vector.shape_cast %19 : vector<16x16x128xbf16> to vector<256x128xbf16>
    %c0_31 = arith.constant 0 : index
    %c128 = arith.constant 128 : index
    %21 = vector.load %arg8[%c0_31, %c128] : memref<256x576xbf16, #tpu.memory_space<vmem>>, vector<256x128xbf16>
    tpu.vector_store %arg8[%c0_31, %c128], %20 {strides = array<i32>} : memref<256x576xbf16, #tpu.memory_space<vmem>>, vector<256x128xbf16>,
    %c1_32 = arith.constant 1 : index
    %c2_33 = arith.constant 2 : index
    %c0_34 = arith.constant 0 : index
    %22 = vector.load %arg7[%c1_32, %c2_33, %c0_34] : memref<18x19x64xbf16, #tpu.memory_space<vmem>>, vector<16x16x64xbf16>
    %c1_35 = arith.constant 1 : index
    %c3_36 = arith.constant 3 : index
    %c0_37 = arith.constant 0 : index
    %23 = vector.load %arg7[%c1_35, %c3_36, %c0_37] : memref<18x19x64xbf16, #tpu.memory_space<vmem>>, vector<16x16x64xbf16>
    %24 = tpu.concatenate %22, %23 in 2 : vector<16x16x64xbf16>, vector<16x16x64xbf16> -> vector<16x16x128xbf16>
    %25 = vector.shape_cast %24 : vector<16x16x128xbf16> to vector<256x128xbf16>
    %c0_38 = arith.constant 0 : index
    %c256 = arith.constant 256 : index
    %26 = vector.load %arg8[%c0_38, %c256] : memref<256x576xbf16, #tpu.memory_space<vmem>>, vector<256x128xbf16>
    tpu.vector_store %arg8[%c0_38, %c256], %25 {strides = array<i32>} : memref<256x576xbf16, #tpu.memory_space<vmem>>, vector<256x128xbf16>,
    %c2_39 = arith.constant 2 : index
    %c1_40 = arith.constant 1 : index
    %c0_41 = arith.constant 0 : index
    %27 = vector.load %arg7[%c2_39, %c1_40, %c0_41] : memref<18x19x64xbf16, #tpu.memory_space<vmem>>, vector<16x16x64xbf16>
    %c2_42 = arith.constant 2 : index
    %c2_43 = arith.constant 2 : index
    %c0_44 = arith.constant 0 : index
    %28 = vector.load %arg7[%c2_42, %c2_43, %c0_44] : memref<18x19x64xbf16, #tpu.memory_space<vmem>>, vector<16x16x64xbf16>
    %29 = tpu.concatenate %27, %28 in 2 : vector<16x16x64xbf16>, vector<16x16x64xbf16> -> vector<16x16x128xbf16>
    %30 = vector.shape_cast %29 : vector<16x16x128xbf16> to vector<256x128xbf16>
    %c0_45 = arith.constant 0 : index
    %c384 = arith.constant 384 : index
    %31 = vector.load %arg8[%c0_45, %c384] : memref<256x576xbf16, #tpu.memory_space<vmem>>, vector<256x128xbf16>
    tpu.vector_store %arg8[%c0_45, %c384], %30 {strides = array<i32>} : memref<256x576xbf16, #tpu.memory_space<vmem>>, vector<256x128xbf16>,
    %c2_46 = arith.constant 2 : index
    %c3_47 = arith.constant 3 : index
    %c0_48 = arith.constant 0 : index
    %32 = vector.load %arg7[%c2_46, %c3_47, %c0_48] : memref<18x19x64xbf16, #tpu.memory_space<vmem>>, vector<16x16x64xbf16>
    %33 = vector.shape_cast %32 : vector<16x16x64xbf16> to vector<256x64xbf16>
    %c0_49 = arith.constant 0 : index
    %c512 = arith.constant 512 : index
    %34 = vector.load %arg8[%c0_49, %c512] : memref<256x576xbf16, #tpu.memory_space<vmem>>, vector<256x64xbf16>
    tpu.vector_store %arg8[%c0_49, %c512], %33 {strides = array<i32>} : memref<256x576xbf16, #tpu.memory_space<vmem>>, vector<256x64xbf16>,
    %c0_50 = arith.constant 0 : index
    %c0_51 = arith.constant 0 : index
    %35 = vector.load %arg8[%c0_50, %c0_51] : memref<256x576xbf16, #tpu.memory_space<vmem>>, vector<256x576xbf16>
    %c0_52 = arith.constant 0 : index
    %c0_53 = arith.constant 0 : index
    %36 = vector.load %arg4[%c0_52, %c0_53] : memref<576x128xbf16, #tpu.memory_space<vmem>>, vector<576x128xbf16>
    %cst_54 = arith.constant dense<0.000000e+00> : vector<256x128xf32>
    %37 = tpu.matmul %35, %36, %cst_54 {dimension_numbers = #tpu.dot_dimension_numbers<[1], [0], [0], [1], [0, 0, 1, 1], [], []>} : vector<256x576xbf16>, vector<576x128xbf16>, vector<256x128xf32> -> vector<256x128xf32>
    %c0_55 = arith.constant 0 : index
    %c0_56 = arith.constant 0 : index
    %38 = vector.load %arg5[%c0_55, %c0_56] : memref<1x128xf32, #tpu.memory_space<vmem>>, vector<1x128xf32>
    %39 = vector.broadcast %38 : vector<1x128xf32> to vector<256x128xf32>
    %40 = arith.addf %37, %39 : vector<256x128xf32>
    %41 = vector.shape_cast %40 : vector<256x128xf32> to vector<1x256x128xf32>
    %c0_57 = arith.constant 0 : index
    %c0_58 = arith.constant 0 : index
    %c0_59 = arith.constant 0 : index
    %42 = vector.load %arg6[%c0_57, %c0_58, %c0_59] : memref<1x256x128xf32, #tpu.memory_space<vmem>>, vector<1x256x128xf32>
    tpu.vector_store %arg6[%c0_57, %c0_58, %c0_59], %41 {strides = array<i32>} : memref<1x256x128xf32, #tpu.memory_space<vmem>>, vector<1x256x128xf32>,
    return
  }
  func.func @transform_0(%arg0: i32) -> (i32, i32, i32, i32) {
    %c0_i32 = arith.constant 0 : i32
    %c0_i32_0 = arith.constant 0 : i32
    %c0_i32_1 = arith.constant 0 : i32
    %c0_i32_2 = arith.constant 0 : i32
    return %arg0, %c0_i32, %c0_i32_0, %c0_i32_1 : i32, i32, i32, i32
  }
  func.func @transform_1(%arg0: i32) -> (i32, i32, i32) {
    %c0_i32 = arith.constant 0 : i32
    %c0_i32_0 = arith.constant 0 : i32
    %c0_i32_1 = arith.constant 0 : i32
    %c0_i32_2 = arith.constant 0 : i32
    return %c0_i32, %c0_i32_0, %c0_i32_1 : i32, i32, i32
  }
  func.func @transform_2(%arg0: i32) -> (i32, i32, i32) {
    %c0_i32 = arith.constant 0 : i32
    %c0_i32_0 = arith.constant 0 : i32
    %c0_i32_1 = arith.constant 0 : i32
    %c0_i32_2 = arith.constant 0 : i32
    return %c0_i32, %c0_i32_0, %c0_i32_1 : i32, i32, i32
  }
  func.func @transform_3(%arg0: i32) -> (i32, i32) {
    %c0_i32 = arith.constant 0 : i32
    %c0_i32_0 = arith.constant 0 : i32
    %c0_i32_1 = arith.constant 0 : i32
    return %c0_i32, %c0_i32_0 : i32, i32
  }
  func.func @transform_4(%arg0: i32) -> (i32, i32) {
    %c0_i32 = arith.constant 0 : i32
    %c0_i32_0 = arith.constant 0 : i32
    %c0_i32_1 = arith.constant 0 : i32
    return %c0_i32, %c0_i32_0 : i32, i32
  }
  func.func @transform_5(%arg0: i32) -> (i32, i32, i32) {
    %c0_i32 = arith.constant 0 : i32
    %c0_i32_0 = arith.constant 0 : i32
    %c0_i32_1 = arith.constant 0 : i32
    return %arg0, %c0_i32, %c0_i32_0 : i32, i32, i32
  }
}

</mosaic_0001>

<bundles_post_ra>
// kernel: dncnn_forward.1
= control target key start
LH: loop header
LB: loop body
LE: loop exit
PB: predicated region body
PF: predicated region fallthrough
CT: control target
= control target key end

     0   :  { %s12225_s18 = smov 0   ;;  %s15518_s0 = inlined_call_operand.vmem [shape: bf16[2,16,16,64], index: 0, kind: input, shape index: {}]   ;;  %s15519_s1 = inlined_call_operand.vmem [shape: bf16[16,576,64], index: 1, kind: input, shape index: {}]   ;;  %s15520_s2 = inlined_call_operand.vmem [shape: f32[16,1,64], index: 2, kind: input, shape index: {}]   ;;  %s15521_s3 = inlined_call_operand.vmem [shape: bf16[576,128], index: 3, kind: input, shape index: {}]   ;;  %s15522_s4 = inlined_call_operand.vmem [shape: f32[1,128], index: 4, kind: input, shape index: {}]   ;;  %s15523_s5 = inlined_call_operand.vmem [shape: f32[2,256,128], index: 5, kind: output, shape index: {}]  }
   0x1 LB: > { %s10286_s19 = sadd.s32 4294967295, %s12186_s18   ;;  %p10290_p0 = scmp.ge.s32.totalorder %s12186_s18, 1  ;;  %s12186_s18 = sphi %s12225_s18, %s15_s18  }
   0x2   : > { %p187_p1 = scmp.lt.s32.totalorder %s12186_s18, 3 }
   0x4   : > { %p188_p2 = pnand %p10290_p0, %p187_p1 }
   0x5   : > { %vm229_vm0 = vcmask (!%p188_p2), 517120   ;;  %vm230_vm1 = vsmask.f32 (!%p188_p2), 1280  ;;  %v232_v0 = vld [vmem:[#allocation2 + $0x8] sm:$0x3] (!%p188_p2)  ;;  %vm260_vm2 = vcmask (!%p188_p2), 517121  }
   0x6   : > { %191 = sbr.rel (%p188_p2) target bundleno = 1361 (0x551), region = 40  ;;  %vm12233_vm3 = vmand (!%p188_p2), %vm229_vm0, %vm230_vm1  ;;  %v238_v2 = vld [vmem:[#allocation2 + $0xd4] sm:$0x3] (!%p188_p2)  ;;  %vm226_vm4 = vcmask (!%p188_p2), 519168   ;;  %vm241_vm5 = vcmask (!%p188_p2), 516096   ;;  %p12239_p3 = scmp.lt.s32.totalorder (!%p188_p2), %s10286_s19, 1 }
   0x7   : > { %v233_v3 = vsel (!%p188_p2), %vm12233_vm3, 0, %v232_v0  ;;  %vm12245_vm6 = vmand (!%p188_p2), %vm260_vm2, %vm230_vm1  ;;  %v239_v5 = vsel (!%p188_p2), %vm12233_vm3, 0, %v238_v2  ;;  %v12192_v6 = vmov (!%p188_p2), 0   ;;  %v265_v7 = vld [vmem:[#allocation2 + $0x14] sm:$0x2] (!%p188_p2)  ;;  %vm512_vm7 = vcmask (!%p188_p2), 519169  }
   0x8   : > { %227 = vst.msk [vmem:[#allocation2] sm:$0xf] (!%p188_p2), %vm226_vm4, %v12192_v6  ;;  %228 = vst.msk [vmem:[#allocation2 + $0x4] sm:$0xf] (!%p188_p2), %vm226_vm4, %v12192_v6  ;;  %v268_v8 = vld [vmem:[#allocation2 + $0x20] sm:$0x2] (!%p188_p2) }
   0x9   : > { %236 = vst.msk [vmem:[#allocation2 + $0xcc] sm:$0xf] (!%p188_p2), %vm226_vm4, %v12192_v6  ;;  %237 = vst.msk [vmem:[#allocation2 + $0xd0] sm:$0xf] (!%p188_p2), %vm226_vm4, %v12192_v6  ;;  %v266_v9 = vsel (!%p188_p2), %vm12245_vm6, 0, %v265_v7  ;;  %v269_v10 = vsel (!%p188_p2), %vm12245_vm6, 0, %v268_v8 }
   0xa   : > { %243 = vst.msk [vmem:[#allocation2 + $0xc] sm:$0x1] (!%p188_p2), %vm241_vm5, %v12192_v6  ;;  %244 = vst.msk [vmem:[#allocation2 + $0x18] sm:$0x1] (!%p188_p2), %vm241_vm5, %v12192_v6  ;;  %v271_v11 = vld [vmem:[#allocation2 + $0x2c] sm:$0x2] (!%p188_p2) }
   0xb   : > { %245 = vst.msk [vmem:[#allocation2 + $0x24] sm:$0x1] (!%p188_p2), %vm241_vm5, %v12192_v6  ;;  %246 = vst.msk [vmem:[#allocation2 + $0x30] sm:$0x1] (!%p188_p2), %vm241_vm5, %v12192_v6  ;;  %v274_v12 = vld [vmem:[#allocation2 + $0x38] sm:$0x2] (!%p188_p2) }
   0xc   : > { %247 = vst.msk [vmem:[#allocation2 + $0x3c] sm:$0x1] (!%p188_p2), %vm241_vm5, %v12192_v6  ;;  %248 = vst.msk [vmem:[#allocation2 + $0x48] sm:$0x1] (!%p188_p2), %vm241_vm5, %v12192_v6  ;;  %v272_v13 = vsel (!%p188_p2), %vm12245_vm6, 0, %v271_v11  ;;  %v275_v14 = vsel (!%p188_p2), %vm12245_vm6, 0, %v274_v12 }
   0xd   : > { %249 = vst.msk [vmem:[#allocation2 + $0x54] sm:$0x1] %vm241_vm5, %v12192_v6  ;;  %250 = vst.msk [vmem:[#allocation2 + $0x60] sm:$0x1] %vm241_vm5, %v12192_v6  ;;  %v277_v15 = vld [vmem:[#allocation2 + $0x44] sm:$0x2] }
   0xe   : > { %251 = vst.msk [vmem:[#allocation2 + $0x6c] sm:$0x1] %vm241_vm5, %v12192_v6  ;;  %252 = vst.msk [vmem:[#allocation2 + $0x78] sm:$0x1] %vm241_vm5, %v12192_v6  ;;  %v280_v16 = vld [vmem:[#allocation2 + $0x50] sm:$0x2] }
   0xf   : > { %253 = vst.msk [vmem:[#allocation2 + $0x84] sm:$0x1] %vm241_vm5, %v12192_v6  ;;  %254 = vst.msk [vmem:[#allocation2 + $0x90] sm:$0x1] %vm241_vm5, %v12192_v6  ;;  %v278_v17 = vsel %vm12245_vm6, 0, %v277_v15  ;;  %v281_v18 = vsel %vm12245_vm6, 0, %v280_v16 }
  0x10   : > { %255 = vst.msk [vmem:[#allocation2 + $0x9c] sm:$0x1] %vm241_vm5, %v12192_v6  ;;  %256 = vst.msk [vmem:[#allocation2 + $0xa8] sm:$0x1] %vm241_vm5, %v12192_v6  ;;  %v283_v19 = vld [vmem:[#allocation2 + $0x5c] sm:$0x2] }
  0x11   : > { %257 = vst.msk [vmem:[#allocation2 + $0xb4] sm:$0x1] %vm241_vm5, %v12192_v6  ;;  %258 = vst.msk [vmem:[#allocation2 + $0xc0] sm:$0x1] %vm241_vm5, %v12192_v6  ;;  %v286_v20 = vld [vmem:[#allocation2 + $0x68] sm:$0x2] }
  0x12   : > { %234 = vst [vmem:[#allocation2 + $0x8] sm:$0x3] %v233_v3  ;;  %240 = vst [vmem:[#allocation2 + $0xd4] sm:$0x3] %v239_v5  ;;  %v284_v21 = vsel %vm12245_vm6, 0, %v283_v19  ;;  %v287_v22 = vsel %vm12245_vm6, 0, %v286_v20 }
  0x13   : > { %242 = vst.msk [vmem:[#allocation2] sm:$0x1] %vm241_vm5, %v12192_v6  ;;  %259 = vst.msk [vmem:[#allocation2 + $0xcc] sm:$0x1] %vm241_vm5, %v12192_v6  ;;  %v289_v23 = vld [vmem:[#allocation2 + $0x74] sm:$0x2] }
  0x14   : > { %267 = vst [vmem:[#allocation2 + $0x14] sm:$0x2] %v266_v9  ;;  %270 = vst [vmem:[#allocation2 + $0x20] sm:$0x2] %v269_v10  ;;  %v292_v24 = vld [vmem:[#allocation2 + $0x80] sm:$0x2] }
  0x15   : > { %273 = vst [vmem:[#allocation2 + $0x2c] sm:$0x2] %v272_v13  ;;  %276 = vst [vmem:[#allocation2 + $0x38] sm:$0x2] %v275_v14  ;;  %v290_v25 = vsel %vm12245_vm6, 0, %v289_v23  ;;  %v293_v26 = vsel %vm12245_vm6, 0, %v292_v24 }
  0x16   : > { %279 = vst [vmem:[#allocation2 + $0x44] sm:$0x2] %v278_v17  ;;  %282 = vst [vmem:[#allocation2 + $0x50] sm:$0x2] %v281_v18  ;;  %v295_v27 = vld [vmem:[#allocation2 + $0x8c] sm:$0x2] }
  0x17   : > { %285 = vst [vmem:[#allocation2 + $0x5c] sm:$0x2] %v284_v21  ;;  %288 = vst [vmem:[#allocation2 + $0x68] sm:$0x2] %v287_v22  ;;  %v298_v28 = vld [vmem:[#allocation2 + $0x98] sm:$0x2] }
  0x18   : > { %291 = vst [vmem:[#allocation2 + $0x74] sm:$0x2] %v290_v25  ;;  %294 = vst [vmem:[#allocation2 + $0x80] sm:$0x2] %v293_v26  ;;  %v296_v29 = vsel %vm12245_vm6, 0, %v295_v27  ;;  %v299_v30 = vsel %vm12245_vm6, 0, %v298_v28 }
  0x19   : > { %v301_v31 = vld [vmem:[#allocation2 + $0xa4] sm:$0x2]  ;;  %v304_v32 = vld [vmem:[#allocation2 + $0xb0] sm:$0x2]  ;;  %297 = vst [vmem:[#allocation2 + $0x8c] sm:$0x2] %v296_v29 }
  0x1a   : > { %300 = vst [vmem:[#allocation2 + $0x98] sm:$0x2] %v299_v30  ;;  %v302_v33 = vsel %vm12245_vm6, 0, %v301_v31  ;;  %v305_v34 = vsel %vm12245_vm6, 0, %v304_v32  ;;  %v307_v35 = vld [vmem:[#allocation2 + $0xbc] sm:$0x2] }
  0x1b   : > { %v310_v36 = vld [vmem:[#allocation2 + $0xc8] sm:$0x2]  ;;  %303 = vst [vmem:[#allocation2 + $0xa4] sm:$0x2] %v302_v33  ;;  %306 = vst [vmem:[#allocation2 + $0xb0] sm:$0x2] %v305_v34 }
  0x1c   : > { %v262_v37 = vld [vmem:[#allocation2 + $0x8] sm:$0x2]  ;;  %v308_v38 = vsel %vm12245_vm6, 0, %v307_v35  ;;  %v311_v39 = vsel %vm12245_vm6, 0, %v310_v36  ;;  %v313_v40 = vld [vmem:[#allocation2 + $0xd4] sm:$0x2] }
  0x1d   : > { %v263_v41 = vsel %vm12245_vm6, 0, %v262_v37  ;;  %309 = vst [vmem:[#allocation2 + $0xbc] sm:$0x2] %v308_v38  ;;  %312 = vst [vmem:[#allocation2 + $0xc8] sm:$0x2] %v311_v39  ;;  %v314_v42 = vsel %vm12245_vm6, 0, %v313_v40 }
  0x1e   : > { %s15552_s19 = smov (!%p12239_p3, %s10286_s19), 1  ;;  %264 = vst [vmem:[#allocation2 + $0x8] sm:$0x2] %v263_v41  ;;  %315 = vst [vmem:[#allocation2 + $0xd4] sm:$0x2] %v314_v42  ;;  %vm380_vm8 = vcmask 1040384  }
  0x1f   : > { %s10884_s21 = sshll.u32 %s15552_s19, 7  ;;  %s10885_s22 = sshll.u32 %s15552_s19, 8  ;;  %vm381_vm9 = vcmask 1044484  }
  0x20   : > { %s12316_s25 = scalar_lea.vmem %s15518_s0, %s10884_s21  ;;  %s12321_s28 = scalar_lea.vmem %s15523_s5, %s10885_s22  ;;  %vm12328_vm10 = vmor %vm380_vm8, %vm381_vm9 }
  0x21   : > { %v316_v43 = vld [vmem:[%s12316_s25] sm:$0xf]  ;;  %v317_v44 = vld [vmem:[%s12316_s25 + $0x4] sm:$0xf]  ;;  %v318_v45 = vld [vmem:[%s12316_s25 + $0x8] sm:$0xf] }
  0x22   : > { %v383_v46 = vrot.slane %v316_v43, 7  ;;  %v385_v47 = vrot.slane %v317_v44, 7  ;;  %v388_v48 = vrot.slane %v318_v45, 7  ;;  %v319_v49 = vld [vmem:[%s12316_s25 + $0xc] sm:$0xf]  ;;  %s12440_s29 = smov 0  }
  0x23   : > { %v390_v51 = vrot.slane %v319_v49, 7  ;;  %v320_v52 = vld [vmem:[%s12316_s25 + $0x10] sm:$0xf]  ;;  %v321_v53 = vld [vmem:[%s12316_s25 + $0x14] sm:$0xf] }
  0x24   : > { %v384_v54 = vrot.slane %v383_v46, 4  ;;  %513 = vst.msk [vmem:[#allocation2 + $0xc] sm:$0xe] %vm512_vm7, %v383_v46  ;;  %v387_v55 = vrot.slane %v385_v47, 4  ;;  %v389_v56 = vrot.slane %v388_v48, 4  ;;  %v393_v57 = vrot.slane %v320_v52, 7 }
  0x25   : > { %516 = vst.msk [vmem:[#allocation2 + $0x18] sm:$0xe] %vm512_vm7, %v388_v48  ;;  %v322_v58 = vld [vmem:[%s12316_s25 + $0x18] sm:$0xf]  ;;  %v392_v59 = vrot.slane %v390_v51, 4  ;;  %v395_v60 = vrot.slane %v321_v53, 7 }
  0x26   : > { %v398_v61 = vrot.slane %v322_v58, 7  ;;  %v323_v62 = vld [vmem:[%s12316_s25 + $0x1c] sm:$0xf]  ;;  %v386_v63 = vsel %vm12328_vm10, %v384_v54, %v385_v47  ;;  %515 = vst.msk [vmem:[#allocation2 + $0x14] sm:$0x1] %vm241_vm5, %v387_v55  ;;  %v391_v0 = vsel %vm12328_vm10, %v389_v56, %v390_v51  ;;  %v394_v1 = vrot.slane %v393_v57, 4 }
  0x27   : > { %519 = vst.msk [vmem:[#allocation2 + $0x24] sm:$0xe] %vm512_vm7, %v393_v57  ;;  %v400_v2 = vrot.slane %v323_v62, 7  ;;  %v324_v3 = vld [vmem:[%s12316_s25 + $0x20] sm:$0xf]  ;;  %v397_v5 = vrot.slane %v395_v60, 4 }
  0x28   : > { %v325_v4 = vld [vmem:[%s12316_s25 + $0x24] sm:$0xf]  ;;  %514 = vst.msk [vmem:[#allocation2 + $0x10] sm:$0xf] %vm226_vm4, %v386_v63  ;;  %517 = vst.msk [vmem:[#allocation2 + $0x1c] sm:$0xf] %vm226_vm4, %v391_v0  ;;  %v396_v10 = vsel %vm12328_vm10, %v394_v1, %v395_v60 }
  0x29   : > { %518 = vst.msk [vmem:[#allocation2 + $0x20] sm:$0x1] %vm241_vm5, %v392_v59  ;;  %v399_v6 = vrot.slane %v398_v61, 4  ;;  %v403_v7 = vrot.slane %v324_v3, 7  ;;  %v405_v8 = vrot.slane %v325_v4, 7  ;;  %v402_v11 = vrot.slane %v400_v2, 4 }
  0x2a   : > { %522 = vst.msk [vmem:[#allocation2 + $0x30] sm:$0xe] %vm512_vm7, %v398_v61  ;;  %v326_v9 = vld [vmem:[%s12316_s25 + $0x28] sm:$0xf]  ;;  %v327_v13 = vld [vmem:[%s12316_s25 + $0x2c] sm:$0xf] }
  0x2b   : > { %v408_v12 = vrot.slane %v326_v9, 7  ;;  %v328_v14 = vld [vmem:[%s12316_s25 + $0x30] sm:$0xf]  ;;  %520 = vst.msk [vmem:[#allocation2 + $0x28] sm:$0xf] %vm226_vm4, %v396_v10  ;;  %v401_v15 = vsel %vm12328_vm10, %v399_v6, %v400_v2  ;;  %v404_v16 = vrot.slane %v403_v7, 4 }
  0x2c   : > { %521 = vst.msk [vmem:[#allocation2 + $0x2c] sm:$0x1] %vm241_vm5, %v397_v5  ;;  %v407_v17 = vrot.slane %v405_v8, 4  ;;  %v410_v18 = vrot.slane %v327_v13, 7  ;;  %v329_v19 = vld [vmem:[%s12316_s25 + $0x34] sm:$0xf] }
  0x2d   : > { %525 = vst.msk [vmem:[#allocation2 + $0x3c] sm:$0xe] %vm512_vm7, %v403_v7  ;;  %v409_v20 = vrot.slane %v408_v12, 4  ;;  %528 = vst.msk [vmem:[#allocation2 + $0x48] sm:$0xe] %vm512_vm7, %v408_v12  ;;  %v413_v21 = vrot.slane %v328_v14, 7  ;;  %v406_v24 = vsel %vm12328_vm10, %v404_v16, %v405_v8 }
  0x2e   : > { %523 = vst.msk [vmem:[#allocation2 + $0x34] sm:$0xf] %vm226_vm4, %v401_v15  ;;  %v415_v22 = vrot.slane %v329_v19, 7  ;;  %v330_v23 = vld [vmem:[%s12316_s25 + $0x38] sm:$0xf]  ;;  %v412_v25 = vrot.slane %v410_v18, 4 }
  0x2f   : > { %524 = vst.msk [vmem:[#allocation2 + $0x38] sm:$0x1] %vm241_vm5, %v402_v11  ;;  %527 = vst.msk [vmem:[#allocation2 + $0x44] sm:$0x1] %vm241_vm5, %v407_v17  ;;  %v418_v26 = vrot.slane %v330_v23, 7  ;;  %v411_v29 = vsel %vm12328_vm10, %v409_v20, %v410_v18  ;;  %v414_v30 = vrot.slane %v413_v21, 4 }
  0x30   : > { %v331_v27 = vld [vmem:[%s12316_s25 + $0x3c] sm:$0xf]  ;;  %v332_v28 = vld [vmem:[%s12316_s25 + $0x40] sm:$0xf]  ;;  %526 = vst.msk [vmem:[#allocation2 + $0x40] sm:$0xf] %vm226_vm4, %v406_v24 }
  0x31   : > { %531 = vst.msk [vmem:[#allocation2 + $0x54] sm:$0xe] %vm512_vm7, %v413_v21  ;;  %v417_v31 = vrot.slane %v415_v22, 4  ;;  %v420_v32 = vrot.slane %v331_v27, 7  ;;  %v333_v33 = vld [vmem:[%s12316_s25 + $0x44] sm:$0xf]  ;;  %v416_v38 = vsel %vm12328_vm10, %v414_v30, %v415_v22 }
  0x32   : > { %529 = vst.msk [vmem:[#allocation2 + $0x4c] sm:$0xf] %vm226_vm4, %v411_v29  ;;  %v419_v34 = vrot.slane %v418_v26, 4  ;;  %v423_v35 = vrot.slane %v332_v28, 7  ;;  %v425_v36 = vrot.slane %v333_v33, 7 }
  0x33   : > { %530 = vst.msk [vmem:[#allocation2 + $0x50] sm:$0x1] %vm241_vm5, %v412_v25  ;;  %v334_v37 = vld [vmem:[%s12316_s25 + $0x48] sm:$0xf]  ;;  %533 = vst.msk [vmem:[#allocation2 + $0x5c] sm:$0x1] %vm241_vm5, %v417_v31 }
  0x34   : > { %534 = vst.msk [vmem:[#allocation2 + $0x60] sm:$0xe] %vm512_vm7, %v418_v26  ;;  %v422_v39 = vrot.slane %v420_v32, 4  ;;  %v428_v40 = vrot.slane %v334_v37, 7  ;;  %v335_v41 = vld [vmem:[%s12316_s25 + $0x4c] sm:$0xf]  ;;  %v421_v43 = vsel %vm12328_vm10, %v419_v34, %v420_v32 }
  0x35   : > { %v336_v42 = vld [vmem:[%s12316_s25 + $0x50] sm:$0xf]  ;;  %532 = vst.msk [vmem:[#allocation2 + $0x58] sm:$0xf] %vm226_vm4, %v416_v38  ;;  %v424_v44 = vrot.slane %v423_v35, 4  ;;  %v427_v45 = vrot.slane %v425_v36, 4 }
  0x36   : > { %537 = vst.msk [vmem:[#allocation2 + $0x6c] sm:$0xe] %vm512_vm7, %v423_v35  ;;  %v430_v46 = vrot.slane %v335_v41, 7  ;;  %v337_v47 = vld [vmem:[%s12316_s25 + $0x54] sm:$0xf]  ;;  %v429_v48 = vrot.slane %v428_v40, 4 }
  0x37   : > { %535 = vst.msk [vmem:[#allocation2 + $0x64] sm:$0xf] %vm226_vm4, %v421_v43  ;;  %v433_v49 = vrot.slane %v336_v42, 7  ;;  %v435_v51 = vrot.slane %v337_v47, 7  ;;  %v338_v52 = vld [vmem:[%s12316_s25 + $0x58] sm:$0xf]  ;;  %v426_v53 = vsel %vm12328_vm10, %v424_v44, %v425_v36 }
  0x38   : > { %536 = vst.msk [vmem:[#allocation2 + $0x68] sm:$0x1] %vm241_vm5, %v422_v39  ;;  %539 = vst.msk [vmem:[#allocation2 + $0x74] sm:$0x1] %vm241_vm5, %v427_v45  ;;  %v432_v54 = vrot.slane %v430_v46, 4  ;;  %v438_v55 = vrot.slane %v338_v52, 7  ;;  %v431_v58 = vsel %vm12328_vm10, %v429_v48, %v430_v46 }
  0x39   : > { %540 = vst.msk [vmem:[#allocation2 + $0x78] sm:$0xe] %vm512_vm7, %v428_v40  ;;  %v339_v56 = vld [vmem:[%s12316_s25 + $0x5c] sm:$0xf]  ;;  %v340_v57 = vld [vmem:[%s12316_s25 + $0x60] sm:$0xf] }
  0x3a   : > { %538 = vst.msk [vmem:[#allocation2 + $0x70] sm:$0xf] %vm226_vm4, %v426_v53  ;;  %v434_v59 = vrot.slane %v433_v49, 4  ;;  %v437_v60 = vrot.slane %v435_v51, 4  ;;  %v440_v61 = vrot.slane %v339_v56, 7  ;;  %v439_v63 = vrot.slane %v438_v55, 4 }
  0x3b   : > { %543 = vst.msk [vmem:[#allocation2 + $0x84] sm:$0xe] %vm512_vm7, %v433_v49  ;;  %v341_v62 = vld [vmem:[%s12316_s25 + $0x64] sm:$0xf]  ;;  %546 = vst.msk [vmem:[#allocation2 + $0x90] sm:$0xe] %vm512_vm7, %v438_v55 }
  0x3c   : > { %541 = vst.msk [vmem:[#allocation2 + $0x7c] sm:$0xf] %vm226_vm4, %v431_v58  ;;  %v443_v0 = vrot.slane %v340_v57, 7  ;;  %v445_v1 = vrot.slane %v341_v62, 7  ;;  %v342_v2 = vld [vmem:[%s12316_s25 + $0x68] sm:$0xf]  ;;  %v436_v3 = vsel %vm12328_vm10, %v434_v59, %v435_v51  ;;  %v441_v8 = vsel %vm12328_vm10, %v439_v63, %v440_v61 }
  0x3d   : > { %542 = vst.msk [vmem:[#allocation2 + $0x80] sm:$0x1] %vm241_vm5, %v432_v54  ;;  %545 = vst.msk [vmem:[#allocation2 + $0x8c] sm:$0x1] %vm241_vm5, %v437_v60  ;;  %v442_v4 = vrot.slane %v440_v61, 4  ;;  %v448_v5 = vrot.slane %v342_v2, 7 }
  0x3e   : > { %v343_v6 = vld [vmem:[%s12316_s25 + $0x6c] sm:$0xf]  ;;  %v344_v7 = vld [vmem:[%s12316_s25 + $0x70] sm:$0xf]  ;;  %544 = vst.msk [vmem:[#allocation2 + $0x88] sm:$0xf] %vm226_vm4, %v436_v3 }
  0x3f   : > { %v444_v9 = vrot.slane %v443_v0, 4  ;;  %549 = vst.msk [vmem:[#allocation2 + $0x9c] sm:$0xe] %vm512_vm7, %v443_v0  ;;  %v447_v10 = vrot.slane %v445_v1, 4  ;;  %v450_v11 = vrot.slane %v343_v6, 7  ;;  %v449_v13 = vrot.slane %v448_v5, 4 }
  0x40   : > { %v345_v12 = vld [vmem:[%s12316_s25 + $0x74] sm:$0xf]  ;;  %547 = vst.msk [vmem:[#allocation2 + $0x94] sm:$0xf] %vm226_vm4, %v441_v8  ;;  %v453_v14 = vrot.slane %v344_v7, 7 }
  0x41   : > { %548 = vst.msk [vmem:[#allocation2 + $0x98] sm:$0x1] %vm241_vm5, %v442_v4  ;;  %v455_v15 = vrot.slane %v345_v12, 7  ;;  %v346_v16 = vld [vmem:[%s12316_s25 + $0x78] sm:$0xf]  ;;  %v446_v17 = vsel %vm12328_vm10, %v444_v9, %v445_v1  ;;  %v452_v18 = vrot.slane %v450_v11, 4  ;;  %v451_v21 = vsel %vm12328_vm10, %v449_v13, %v450_v11 }
  0x42   : > { %552 = vst.msk [vmem:[#allocation2 + $0xa8] sm:$0xe] %vm512_vm7, %v448_v5  ;;  %v458_v19 = vrot.slane %v346_v16, 7  ;;  %v347_v20 = vld [vmem:[%s12316_s25 + $0x7c] sm:$0xf]  ;;  %v454_v22 = vrot.slane %v453_v14, 4 }
  0x43   : > { %551 = vst.msk [vmem:[#allocation2 + $0xa4] sm:$0x1] %vm241_vm5, %v447_v10  ;;  %v457_v23 = vrot.slane %v455_v15, 4  ;;  %v460_v24 = vrot.slane %v347_v20, 7  ;;  %554 = vst.msk [vmem:[#allocation2 + $0xb0] sm:$0x1] %vm241_vm5, %v452_v18 }
  0x44   : > { %550 = vst.msk [vmem:[#allocation2 + $0xa0] sm:$0xf] %vm226_vm4, %v446_v17  ;;  %553 = vst.msk [vmem:[#allocation2 + $0xac] sm:$0xf] %vm226_vm4, %v451_v21  ;;  %v459_v25 = vrot.slane %v458_v19, 4  ;;  %v456_v26 = vsel %vm12328_vm10, %v454_v22, %v455_v15 }
  0x45   : > { %555 = vst.msk [vmem:[#allocation2 + $0xb4] sm:$0xe] %vm512_vm7, %v453_v14  ;;  %558 = vst.msk [vmem:[#allocation2 + $0xc0] sm:$0xe] %vm512_vm7, %v458_v19  ;;  %v462_v27 = vrot.slane %v460_v24, 4 }
  0x46   : > { %557 = vst.msk [vmem:[#allocation2 + $0xbc] sm:$0x1] %vm241_vm5, %v457_v23  ;;  %v461_v28 = vsel %vm12328_vm10, %v459_v25, %v460_v24 }
  0x47   : > { %556 = vst.msk [vmem:[#allocation2 + $0xb8] sm:$0xf] %vm226_vm4, %v456_v26  ;;  %559 = vst.msk [vmem:[#allocation2 + $0xc4] sm:$0xf] %vm226_vm4, %v461_v28 }
  0x48   : > { %560 = vst.msk [vmem:[#allocation2 + $0xc8] sm:$0x1] %vm241_vm5, %v462_v27 }
  0x49 LB: >> { %v11539_v30 = vld [vmem:[#allocation2 + $0x98] ss:$0 sps:$4 sm:$0x11]   ;;  %v11541_v31 = vld [vmem:[#allocation2 + $0xc] sm:$0xff]   ;;  %s12193_s30 = smov 64   ;;  %s10886_s6 = smul.u32 288, %s12190_s29  ;;  %s12190_s29 = sphi %s12440_s29, %s566_s29  }
  0x4a   : >> { %v11540_v33 = vld [vmem:[#allocation2 + $0xa4] ss:$0 sps:$4 sm:$0x11]   ;;  %v988_v34 = vshrl.u32 %v11539_v30, 16  ;;  %v1721_v35 = vrot.slane %v11541_v31, 7  ;;  %v984_v43 = vshll.u32 %v11539_v30, 16  ;;  %s4474_s12 = scalar_lea.vmem %s15520_s2, %s12190_s29 }
  0x4b   : >> { %v11538_v29 = vld [vmem:[#allocation2 + $0x9c] sm:$0xff]   ;;  %v1758_v36 = vrot.slane %v11540_v33, 7  ;;  %v11542_v37 = vld [vmem:[#allocation2 + $0x14] ss:$0 sps:$4 sm:$0x11]   ;;  %v11546_v58 = vld [vmem:[#allocation2 + $0xa8] sm:$0xff]   ;;  %s12484_s9 = scalar_lea.vmem %s15519_s1, %s10886_s6 }
  0x4c   : >> { %v1757_v32 = vrot.slane %v11538_v29, 7  ;;  %1082 = vrot.lane.b32.xlu1 %v988_v34, %s12193_s30  ;;  %v604_v38 = vld [vmem:[#allocation2 + $0x94] sm:$0xf]  ;;  %v627_v39 = vld [vmem:[#allocation2 + $0x90] sm:$0xe]  ;;  %v1722_v41 = vrot.slane %v11542_v37, 7 }
  0x4d   : >> { %v10339_v42 = vcombine.low %v627_v39, %v604_v38  ;;  %v568_v44 = vld [vmem:[#allocation2 + $0x4] sm:$0xf]  ;;  %v11544_v45 = vld [vmem:[#allocation2 + $0x8] ss:$0 sps:$4 sm:$0x11]   ;;  %v986_v54 = vrot.slane %v984_v43, 1 }
  0x4e   : >> { %1817 = vrot.lane.b32.xlu0 %v1757_v32, %s12193_s30  ;;  %v1759_v40 = vsel %vm380_vm8, %v1757_v32, %v1758_v36  ;;  %v615_v46 = vld [vmem:[#allocation2] sm:$0xe]  ;;  %v1723_v47 = vsel %vm380_vm8, %v1721_v35, %v1722_v41  ;;  %vm807_vm11 = vsmask.f32 7424  ;;  %v816_v52 = vshll.u32 %v11544_v45, 16  ;;  %v11550_v19 = vld [vmem:[#allocation2 + $0x18] sm:$0xff]  }
  0x4f   : >> { %v977_v48 = vshrl.u32 %v10339_v42, 16  ;;  %v979_v49 = vshll.u32 %v10339_v42, 16  ;;  %v10327_v51 = vcombine.low %v615_v46, %v568_v44  ;;  %v11547_v55 = vld [vmem:[#allocation2 + $0xb0] ss:$0 sps:$4 sm:$0x11]   ;;  %v820_v3 = vshrl.u32 %v11544_v45, 16 }
  0x50   : >> { %1771 = vrot.lane.b32.xlu1 %v1723_v47, %s12193_s30  ;;  %v11548_v60 = vld [vmem:[#allocation2 + $0xa4] ss:$0 sps:$4 sm:$0x11]   ;;  %v607_v61 = vld [vmem:[#allocation2 + $0xa0] sm:$0xf]  ;;  %v818_v63 = vrot.slane %v816_v52, 1 }
  0x51   : >> { %v981_v53 = vrot.slane %v979_v49, 1  ;;  %v809_v56 = vshrl.u32 %v10327_v51, 16  ;;  %v811_v57 = vshll.u32 %v10327_v51, 16  ;;  %v628_v0 = vld [vmem:[#allocation2 + $0x9c] sm:$0xe]  ;;  %v1760_v5 = vrot.slane %v11546_v58, 7 }
  0x52   : >> { %1819 = vrot.lane.b32.xlu0 %v1759_v40, %s12193_s30  ;;  %v10340_v2 = vcombine.low %v628_v0, %v607_v61  ;;  %v998_v6 = vshll.u32 %v11548_v60, 16  ;;  %v1761_v7 = vrot.slane %v11547_v55, 7  ;;  %v11552_v10 = vld [vmem:[#allocation2 + $0x14] ss:$0 sps:$4 sm:$0x11]   ;;  %v1002_v23 = vshrl.u32 %v11548_v60, 16 }
  0x53   : >> { %v982_v59 = vor.u32 %v981_v53, %v977_v48  ;;  %v813_v62 = vrot.slane %v811_v57, 1  ;;  %v571_v12 = vld [vmem:[#allocation2 + $0x10] sm:$0xf]  ;;  %v616_v13 = vld [vmem:[#allocation2 + $0xc] sm:$0xe]  ;;  %v830_v24 = vshll.u32 %v11552_v10, 16 }
  0x54   : >> { %v991_v8 = vshrl.u32 %v10340_v2, 16  ;;  %v993_v9 = vshll.u32 %v10340_v2, 16  ;;  %v1000_v15 = vrot.slane %v998_v6, 1  ;;  %v10328_v16 = vcombine.low %v616_v13, %v571_v12  ;;  %v11551_v20 = vld [vmem:[#allocation2 + $0x20] ss:$0 sps:$4 sm:$0x11]  }
  0x55   : >> { %v987_v1 = vsel %vm807_vm11, %v982_v59, %v986_v54  ;;  %v814_v4 = vor.u32 %v813_v62, %v809_v56  ;;  %v1762_v17 = vsel %vm380_vm8, %v1760_v5, %v1761_v7  ;;  %v610_v22 = vld [vmem:[#allocation2 + $0xac] sm:$0xf]  ;;  %v629_v25 = vld [vmem:[#allocation2 + $0xa8] sm:$0xe]  ;;  %v1724_v30 = vrot.slane %v11550_v19, 7  ;;  %v11554_v33 = vld [vmem:[#allocation2 + $0xb4] sm:$0xff]  }
  0x56   : >> { %1769 = vrot.lane.b32.xlu0 %v1721_v35, %s12193_s30  ;;  %1080 = vrot.lane.b32.xlu1 %v987_v1, %s12193_s30  ;;  %v995_v14 = vrot.slane %v993_v9, 1  ;;  %v825_v21 = vshll.u32 %v10328_v16, 16  ;;  %v823_v27 = vshrl.u32 %v10328_v16, 16  ;;  %v10341_v29 = vcombine.low %v629_v25, %v610_v22  ;;  %v11555_v34 = vld [vmem:[#allocation2 + $0xbc] ss:$0 sps:$4 sm:$0x11]  }
  0x57   : >> { %v819_v11 = vsel %vm807_vm11, %v814_v4, %v818_v63  ;;  %v1725_v31 = vrot.slane %v11551_v20, 7  ;;  %v832_v32 = vrot.slane %v830_v24, 1  ;;  %v11556_v35 = vld [vmem:[#allocation2 + $0xb0] ss:$0 sps:$4 sm:$0x11]   ;;  %v834_v41 = vshrl.u32 %v11552_v10, 16 }
  0x58   : >> { %v996_v18 = vor.u32 %v995_v14, %v991_v8  ;;  %v827_v28 = vrot.slane %v825_v21, 1  ;;  %v1007_v36 = vshll.u32 %v10341_v29, 16  ;;  %v574_v38 = vld [vmem:[#allocation2 + $0x1c] sm:$0xf]  ;;  %v617_v39 = vld [vmem:[#allocation2 + $0x18] sm:$0xe] }
  0x59   : >> { %v1726_v40 = vsel %vm380_vm8, %v1724_v30, %v1725_v31  ;;  %v1012_v42 = vshll.u32 %v11556_v35, 16  ;;  %v1005_v44 = vshrl.u32 %v10341_v29, 16  ;;  %v10329_v46 = vcombine.low %v617_v39, %v574_v38  ;;  %v11558_v49 = vld [vmem:[#allocation2 + $0x24] sm:$0xff]   ;;  %v11559_v51 = vld [vmem:[#allocation2 + $0x2c] ss:$0 sps:$4 sm:$0x11]  }
  0x5a   : >> { %1032 = vrot.lane.b32.xlu0 %v819_v11, %s12193_s30  ;;  %1034 = vrot.lane.b32.xlu1 %v820_v3, %s12193_s30  ;;  %v1001_v26 = vsel %vm807_vm11, %v996_v18, %v1000_v15  ;;  %v828_v37 = vor.u32 %v827_v28, %v823_v27  ;;  %v1009_v45 = vrot.slane %v1007_v36, 1  ;;  %v1763_v47 = vrot.slane %v11554_v33, 7  ;;  %v12468_v52 = vld [vmem:[#allocation2 + $0x20] ss:$0 sps:$4 sm:$0x11]   ;;  %v12477_v0 = vld [vmem:[#allocation2 + $0x30] sm:$0xff]  }
  0x5b   : >> { %v1764_v48 = vrot.slane %v11555_v34, 7  ;;  %v1014_v54 = vrot.slane %v1012_v42, 1  ;;  %v839_v55 = vshll.u32 %v10329_v46, 16  ;;  %v613_v57 = vld [vmem:[#allocation2 + $0xb8] sm:$0xf]  ;;  %v1016_v59 = vshrl.u32 %v11556_v35, 16 }
  0x5c   : >> { %v833_v43 = vsel %vm807_vm11, %v828_v37, %v832_v32  ;;  %v1010_v53 = vor.u32 %v1009_v45, %v1005_v44  ;;  %v630_v58 = vld [vmem:[#allocation2 + $0xb4] sm:$0xe]  ;;  %v1727_v60 = vrot.slane %v11558_v49, 7  ;;  %v1728_v61 = vrot.slane %v11559_v51, 7  ;;  %v12475_v63 = vld [vmem:[#allocation2 + $0xc0] sm:$0xff]   ;;  %v11596_v38 = vld [vmem:[%s12484_s9 + $0x48] sm:$0xff]  }
  0x5d   : >> { %v1765_v56 = vsel %vm380_vm8, %v1763_v47, %v1764_v48  ;;  %v844_v62 = vshll.u32 %v12468_v52, 16  ;;  %v837_v2 = vshrl.u32 %v10329_v46, 16  ;;  %v841_v3 = vrot.slane %v839_v55, 1  ;;  %v11563_v4 = vld [vmem:[#allocation2 + $0xc8] ss:$0 sps:$4 sm:$0x11]  }
  0x5e   : >> { %1821 = vrot.lane.b32.xlu0 %v1760_v5, %s12193_s30  ;;  %1823 = vrot.lane.b32.xlu1 %v1762_v17, %s12193_s30  ;;  %v1015_v1 = vsel %vm807_vm11, %v1010_v53, %v1014_v54  ;;  %v10342_v5 = vcombine.low %v630_v58, %v613_v57  ;;  %v12486_v6 = vld [vmem:[#allocation2 + $0xbc] ss:$0 sps:$4 sm:$0x11]   ;;  %v577_v8 = vld [vmem:[#allocation2 + $0x28] sm:$0xf]  ;;  %v1766_v10 = vrot.slane %v12475_v63, 7  ;;  %v1729_v17 = vsel %vm380_vm8, %v1727_v60, %v1728_v61 }
  0x5f   : >> { %v12488_v7 = vld [vmem:[#allocation2 + $0x3c] sm:$0xff]   ;;  %v618_v9 = vld [vmem:[#allocation2 + $0x24] sm:$0xe]  ;;  %v842_v12 = vor.u32 %v841_v3, %v837_v2  ;;  %v846_v13 = vrot.slane %v844_v62, 1  ;;  %v1730_v16 = vrot.slane %v12477_v0, 7  ;;  %v1026_v18 = vshll.u32 %v12486_v6, 16 }
  0x60   : >> { %v11594_v11 = vld [vmem:[%s12484_s9 + $0x40] sm:$0xff]   ;;  %v1021_v14 = vshll.u32 %v10342_v5, 16  ;;  %v12494_v15 = vld [vmem:[#allocation2 + $0x38] ss:$0 sps:$4 sm:$0x11]   ;;  %v848_v20 = vshrl.u32 %v12468_v52, 16  ;;  %v12502_v22 = vcombine.low %v618_v9, %v577_v8 }
  0x61   : >> { %v12499_v19 = vld [vmem:[#allocation2 + $0x2c] ss:$0 sps:$4 sm:$0x11]   ;;  %11487 = vmatprep.subr.bf16.mxu1 %v11594_v11  ;;  %10919 = vmatprep.subr.bf16.mxu0 %v11594_v11  ;;  %v1767_v21 = vrot.slane %v11563_v4, 7  ;;  %v2941_v24 = vld [vmem:[#allocation2 + $0x1c] sm:$0xf] }
  0x62   : >> { %1084 = vrot.lane.b32.xlu0 %v1001_v26, %s12193_s30  ;;  %1086 = vrot.lane.b32.xlu1 %v1002_v23, %s12193_s30  ;;  %v1733_v23 = vrot.slane %v12488_v7, 7  ;;  %v2988_v25 = vld [vmem:[#allocation2 + $0x18] sm:$0xe]  ;;  %v847_v26 = vsel %vm807_vm11, %v842_v12, %v846_v13  ;;  %v1030_v27 = vshrl.u32 %v12486_v6, 16  ;;  %v1019_v28 = vshrl.u32 %v10342_v5, 16  ;;  %v11595_v31 = vld [vmem:[%s12484_s9] sm:$0xff]  }
  0x63   : >> { %v1023_v29 = vrot.slane %v1021_v14, 1  ;;  %v1028_v32 = vrot.slane %v1026_v18, 1  ;;  %v1731_v33 = vrot.slane %v12494_v15, 7  ;;  %v858_v34 = vshll.u32 %v12499_v19, 16  ;;  %11495 = vmatpush3.bf16.msra.mxu1 %v11595_v31  ;;  %10920 = vmatpush3.bf16.msra.mxu0 %v11595_v31  ;;  %v12521_v39 = vld [vmem:[#allocation2 + $0xc] sm:$0xfe]  }
  0x64   : >> { %v12514_v35 = vld [vmem:[#allocation2 + $0x20] ss:$0 sps:$4 sm:$0x11]   ;;  %v853_v36 = vshll.u32 %v12502_v22, 16  ;;  %v12517_v37 = vcombine.low %v2988_v25, %v2941_v24  ;;  %11488 = vmatprep.subr.bf16.mxu1 %v11596_v38  ;;  %v11599_v45 = vld [vmem:[%s12484_s9 + $0x8] sm:$0xff]   ;;  %v1768_v46 = vsel %vm380_vm8, %v1766_v10, %v1767_v21  ;;  %v12533_v48 = vld [vmem:[#allocation2 + $0x54] sm:$0xff]   ;;  %10921 = vmatprep.subr.bf16.mxu0 %v11596_v38 }
  0x65   : >> { %v12525_v42 = vld [vmem:[#allocation2 + $0x44] ss:$0 sps:$4 sm:$0x11]   ;;  %v3188_v51 = vshll.u32 %v12514_v35, 16  ;;  %v580_v52 = vld [vmem:[#allocation2 + $0x34] sm:$0xf] }
  0x66   : >> { %1773 = vrot.lane.b32.xlu0 %v1724_v30, %s12193_s30  ;;  %1775 = vrot.lane.b32.xlu1 %v1726_v40, %s12193_s30  ;;  %v12509_v30 = vld [vmem:[#allocation2 + $0x48] sm:$0xff]   ;;  %v1024_v40 = vor.u32 %v1023_v29, %v1019_v28  ;;  %v3183_v49 = vshll.u32 %v12517_v37, 16  ;;  %v619_v53 = vld [vmem:[#allocation2 + $0x30] sm:$0xe]  ;;  %v855_v54 = vrot.slane %v853_v36, 1  ;;  %v860_v55 = vrot.slane %v858_v34, 1 }
  0x67   : >> { %v1736_v44 = vrot.slane %v12509_v30, 7  ;;  %11496 = vmatpush3.bf16.msra.mxu1 %v11599_v45  ;;  %10922 = vmatpush3.bf16.msra.mxu0 %v11599_v45  ;;  %v11601_v57 = vld [vmem:[%s12484_s9 + $0x50] sm:$0xff]   ;;  %v3192_v61 = vshrl.u32 %v12514_v35, 16  ;;  %v3181_v62 = vshrl.u32 %v12517_v37, 16  ;;  %v12547_v63 = vcombine.low %v619_v53, %v580_v52  ;;  %v2989_v2 = vld [vmem:[#allocation2 + $0x24] sm:$0xe] }
  0x68   : >> { %v1029_v58 = vsel %vm807_vm11, %v1024_v40, %v1028_v32  ;;  %11489 = vmatprep.subr.bf16.mxu1 %v11601_v57  ;;  %10923 = vmatprep.subr.bf16.mxu0 %v11601_v57  ;;  %v3185_v3 = vrot.slane %v3183_v49, 1  ;;  %v3190_v4 = vrot.slane %v3188_v51, 1  ;;  %v1734_v5 = vrot.slane %v12525_v42, 7  ;;  %v12556_v11 = vld [vmem:[#allocation2 + $0x2c] ss:$0 sps:$4 sm:$0x11]  }
  0x69   : >> { %v1739_v6 = vrot.slane %v12533_v48, 7  ;;  %v2443_v8 = vshrl.u32 %v12521_v39, 16  ;;  %v865_v18 = vshrl.u32 %v12547_v63, 16  ;;  %v12571_v24 = vld [vmem:[#allocation2 + $0x18] sm:$0xfe]   ;;  %v12580_v28 = vld [vmem:[#allocation2 + $0x60] sm:$0xff]  }
  0x6a   : >> { %1036 = vrot.lane.b32.xlu0 %v833_v43, %s12193_s30  ;;  %1038 = vrot.lane.b32.xlu1 %v834_v41, %s12193_s30  ;;  %v862_v41 = vshrl.u32 %v12499_v19, 16  ;;  %v12527_v43 = vld [vmem:[#allocation2 + $0x14] ss:$0 sps:$4 sm:$0x33]   ;;  %v11612_v29 = vld [vmem:[%s12484_s9 + $0x18] sm:$0xff]   ;;  %v3186_v32 = vor.u32 %v3185_v3, %v3181_v62  ;;  %v3206_v0 = vshrl.u32 %v12556_v11, 16 }
  0x6b   : >> { %v12573_v25 = vld [vmem:[#allocation2 + $0x20] ss:$0 sps:$4 sm:$0x33]   ;;  %v12586_v34 = vld [vmem:[#allocation2 + $0x50] ss:$0 sps:$4 sm:$0x11]  }
  0x6c   : >> { %v583_v36 = vld [vmem:[#allocation2 + $0x40] sm:$0xf]  ;;  %v12594_v49 = vld [vmem:[#allocation2 + $0x44] ss:$0 sps:$4 sm:$0x11]   ;;  %v3191_v51 = vsel %vm807_vm11, %v3186_v32, %v3190_v4  ;;  %v2469_v57 = vshrl.u32 %v12573_v25, 16 }
  0x6d   : >> { %v11615_v37 = vld [vmem:[%s12484_s9 + $0x60] sm:$0xff]   ;;  %v886_v4 = vshll.u32 %v12594_v49, 16  ;;  %v621_v42 = vld [vmem:[#allocation2 + $0x48] sm:$0xe]  ;;  %vm1096_vm12 = vcmask 523264   ;;  %vm2858_vm14 = vcmask 1046528  }
  0x6e   : >> { %1825 = vrot.lane.b32.xlu0 %v1763_v47, %s12193_s30  ;;  %1827 = vrot.lane.b32.xlu1 %v1765_v56, %s12193_s30  ;;  %v851_v47 = vshrl.u32 %v12502_v22, 16  ;;  %v2445_v56 = vshll.u32 %v12521_v39, 16  ;;  %v11604_v22 = vld [vmem:[%s12484_s9 + $0x10] sm:$0xff]   ;;  %v2950_v32 = vld [vmem:[#allocation2 + $0x40] sm:$0xf]  ;;  %s566_s29 = sadd.s32 1, %s12190_s29  }
  0x6f   : >> { %11497 = vmatpush3.bf16.msra.mxu1 %v11604_v22  ;;  %10924 = vmatpush3.bf16.msra.mxu0 %v11604_v22  ;;  %vm1929_vm13 = vsmask.f32 6400  ;;  %vm3788_vm15 = vsmask.f32 2304  ;;  %vm3789_vm0 = vsmask.f32 6416 }
  0x70   : >> { %v12553_v9 = vrot.slane %v2445_v56, 1  ;;  %v856_v12 = vor.u32 %v855_v54, %v851_v47  ;;  %v2465_v47 = vshll.u32 %v12573_v25, 16  ;;  %v2458_v56 = vshrl.u32 %v12571_v24, 16  ;;  %vm13470_vm1 = vmor %vm3788_vm15, %vm3789_vm0  ;;  %p563_p4 = scmp.ge.s32.totalorder %s566_s29, 16  }
  0x71   : > { %s12194_s13 = smov (%p563_p4), 64  }
  0x72   : >> { %1088 = vrot.lane.b32.xlu0 %v1015_v1, %s12193_s30  ;;  %1090 = vrot.lane.b32.xlu1 %v1016_v59, %s12193_s30  ;;  %v2450_v59 = vshll.u32 %v12527_v43, 16  ;;  %v2944_v1 = vld [vmem:[#allocation2 + $0x28] sm:$0xf]  ;;  %v861_v31 = vsel %vm807_vm11, %v856_v12, %v860_v55  ;;  %v1737_v55 = vrot.slane %v12586_v34, 7  ;;  %v890_v12 = vshrl.u32 %v12594_v49, 16 }
  0x73   : >> { %v12562_v15 = vcombine.low %v2989_v2, %v2944_v1  ;;  %v2947_v1 = vld [vmem:[#allocation2 + $0x34] sm:$0xf]  ;;  %v2448_v35 = vor.u32 %v12553_v9, %v2443_v8  ;;  %v11621_v8 = vld [vmem:[%s12484_s9 + $0x28] sm:$0xff]   ;;  %v592_v49 = vld [vmem:[#allocation2 + $0x64] sm:$0xf] }
  0x74   : >> { %v12559_v13 = vrot.slane %v2450_v59, 1  ;;  %v12612_v59 = vrot.slane %v2465_v47, 1 }
  0x75   : >> { %v3195_v45 = vshrl.u32 %v12562_v15, 16 }
  0x76   : >> { %1777 = vrot.lane.b32.xlu0 %v1727_v60, %s12193_s30  ;;  %1779 = vrot.lane.b32.xlu1 %v1729_v17, %s12193_s30  ;;  %v12543_v60 = vld [vmem:[#allocation2 + $0x38] ss:$0 sps:$4 sm:$0x11]   ;;  %v1732_v17 = vsel %vm380_vm8, %v1730_v16, %v1731_v33  ;;  %v3197_v33 = vshll.u32 %v12562_v15, 16  ;;  %v11618_v15 = vld [vmem:[%s12484_s9 + $0x68] sm:$0xff]   ;;  %v2453_v9 = vsel %vm807_vm11, %v2448_v35, %v12559_v13 }
  0x77   : >> { %v872_v14 = vshll.u32 %v12543_v60, 16  ;;  %v876_v21 = vshrl.u32 %v12543_v60, 16 }
  0x78   : >> { %v3199_v52 = vrot.slane %v3197_v33, 1 }
  0x79   : >> { %v874_v40 = vrot.slane %v872_v14, 1  ;;  %v2990_v14 = vld [vmem:[#allocation2 + $0x30] sm:$0xe] }
  0x7a   : >> { %1040 = vrot.lane.b32.xlu0 %v847_v26, %s12193_s30  ;;  %1042 = vrot.lane.b32.xlu1 %v848_v20, %s12193_s30  ;;  %v867_v20 = vshll.u32 %v12547_v63, 16  ;;  %v11607_v26 = vld [vmem:[%s12484_s9 + $0x58] sm:$0xff]   ;;  %v3200_v33 = vor.u32 %v3199_v52, %v3195_v45 }
  0x7b   : >> { %11490 = vmatprep.subr.bf16.mxu1 %v11607_v26  ;;  %10925 = vmatprep.subr.bf16.mxu0 %v11607_v26  ;;  %v12615_v63 = vld [vmem:[#allocation2 + $0x38] ss:$0 sps:$4 sm:$0x11]   ;;  %v12646_v26 = vld [vmem:[#allocation2 + $0x2c] ss:$0 sps:$4 sm:$0x33]  }
  0x7c   : >> { %v869_v38 = vrot.slane %v867_v20, 1  ;;  %11498 = vmatpush3.bf16.msra.mxu1 %v11612_v29  ;;  %10926 = vmatpush3.bf16.msra.mxu0 %v11612_v29  ;;  %v12637_v20 = vcombine.low %v2990_v14, %v2947_v1  ;;  %v3220_v39 = vshrl.u32 %v12615_v63, 16  ;;  %v3216_v22 = vshll.u32 %v12615_v63, 16  ;;  %v12655_v29 = vld [vmem:[#allocation2 + $0x50] ss:$0 sps:$4 sm:$0x11]  }
  0x7d   : >> { %11491 = vmatprep.subr.bf16.mxu1 %v11615_v37  ;;  %10927 = vmatprep.subr.bf16.mxu0 %v11615_v37  ;;  %v11624_v37 = vld [vmem:[%s12484_s9 + $0x70] sm:$0xff]   ;;  %v2484_v60 = vshrl.u32 %v12646_v26, 16 }
  0x7e   : >> { %1829 = vrot.lane.b32.xlu0 %v1766_v10, %s12193_s30  ;;  %1831 = vrot.lane.b32.xlu1 %v1768_v46, %s12193_s30  ;;  %v2454_v10 = vshrl.u32 %v12527_v43, 16  ;;  %v2460_v46 = vshll.u32 %v12571_v24, 16  ;;  %v870_v2 = vor.u32 %v869_v38, %v865_v18  ;;  %v586_v18 = vld [vmem:[#allocation2 + $0x4c] sm:$0xf]  ;;  %v2480_v43 = vshll.u32 %v12646_v26, 16 }
  0x7f   : >> { %v3218_v47 = vrot.slane %v3216_v22, 1  ;;  %v12715_v24 = vld [vmem:[#allocation2 + $0x68] ss:$0 sps:$4 sm:$0x11]   ;;  %v2471_v22 = vor.u32 %v2469_v57, %v12612_v59 }
  0x80   : >> { %v12608_v19 = vrot.slane %v2460_v46, 1  ;;  %v2456_v7 = vor.u32 %v2454_v10, %v12559_v13  ;;  %v888_v10 = vrot.slane %v886_v4, 1  ;;  %v3209_v13 = vshrl.u32 %v12637_v20, 16 }
  0x81   : >> { %v900_v46 = vshll.u32 %v12655_v29, 16  ;;  %v12680_v4 = vrot.slane %v2480_v43, 1  ;;  %v1743_v43 = vrot.slane %v12715_v24, 7 }
  0x82   : >> { %1092 = vrot.lane.b32.xlu0 %v1029_v58, %s12193_s30  ;;  %1094 = vrot.lane.b32.xlu1 %v1030_v27, %s12193_s30  ;;  %v3202_v27 = vshll.u32 %v12556_v11, 16  ;;  %v1742_v58 = vrot.slane %v12580_v28, 7  ;;  %v12703_v11 = vld [vmem:[#allocation2 + $0x38] ss:$0 sps:$4 sm:$0x33]  }
  0x83   : >> { %v12685_v14 = vrot.slane %v900_v46, 1 }
  0x84   : >> { %v12600_v53 = vrot.slane %v3202_v27, 1  ;;  %v12653_v27 = vld [vmem:[#allocation2 + $0x5c] ss:$0 sps:$4 sm:$0x11]  }
  0x86   : >> { %1781 = vrot.lane.b32.xlu0 %v1730_v16, %s12193_s30  ;;  %1783 = vrot.lane.b32.xlu1 %v1732_v17, %s12193_s30  ;;  %v620_v16 = vld [vmem:[#allocation2 + $0x3c] sm:$0xe]  ;;  %v1735_v17 = vsel %vm380_vm8, %v1733_v23, %v1734_v5  ;;  %v875_v5 = vsel %vm807_vm11, %v870_v2, %v874_v40  ;;  %v3205_v45 = vsel %vm807_vm11, %v3200_v33, %v12600_v53 }
  0x87   : >> { %v12602_v54 = vcombine.low %v620_v16, %v583_v36  ;;  %v2991_v16 = vld [vmem:[#allocation2 + $0x3c] sm:$0xe] }
  0x88   : >> { %v12674_v52 = vcombine.low %v2991_v16, %v2950_v32  ;;  %v2953_v16 = vld [vmem:[#allocation2 + $0x4c] sm:$0xf] }
  0x89   : >> { %v879_v62 = vshrl.u32 %v12602_v54, 16  ;;  %v881_v3 = vshll.u32 %v12602_v54, 16 }
  0x8a   : >> { %1044 = vrot.lane.b32.xlu0 %v861_v31, %s12193_s30  ;;  %1046 = vrot.lane.b32.xlu1 %v862_v41, %s12193_s30  ;;  %v11616_v41 = vld [vmem:[%s12484_s9 + $0x20] sm:$0xff]   ;;  %v12657_v31 = vcombine.low %v621_v42, %v586_v18  ;;  %v3225_v35 = vshll.u32 %v12674_v52, 16  ;;  %v2463_v42 = vor.u32 %v12608_v19, %v2458_v56  ;;  %v589_v56 = vld [vmem:[#allocation2 + $0x58] sm:$0xf] }
  0x8b   : >> { %11499 = vmatpush3.bf16.msra.mxu1 %v11616_v41  ;;  %10928 = vmatpush3.bf16.msra.mxu0 %v11616_v41  ;;  %v883_v38 = vrot.slane %v881_v3, 1  ;;  %v1740_v41 = vrot.slane %v12653_v27, 7 }
  0x8c   : >> { %11492 = vmatprep.subr.bf16.mxu1 %v11618_v15  ;;  %10929 = vmatprep.subr.bf16.mxu0 %v11618_v15  ;;  %v895_v40 = vshll.u32 %v12657_v31, 16  ;;  %v904_v15 = vshrl.u32 %v12655_v29, 16  ;;  %v2468_v19 = vsel %vm807_vm11, %v2463_v42, %v12612_v59  ;;  %v3227_v33 = vrot.slane %v3225_v35, 1  ;;  %v12753_v42 = vld [vmem:[#allocation2 + $0x44] ss:$0 sps:$4 sm:$0x33]  }
  0x8d   : >> { %v884_v3 = vor.u32 %v883_v38, %v879_v62  ;;  %v11634_v38 = vld [vmem:[%s12484_s9 + $0x38] sm:$0xff]   ;;  %v2499_v59 = vshrl.u32 %v12703_v11, 16 }
  0x8e   : >> { %3404 = vrot.lane.b32.xlu0 %v3191_v51, %s12193_s30  ;;  %3406 = vrot.lane.b32.xlu1 %v3192_v61, %s12193_s30  ;;  %v12632_v61 = vld [vmem:[#allocation2 + $0x24] sm:$0xfe]   ;;  %v12672_v51 = vld [vmem:[#allocation2 + $0x44] ss:$0 sps:$4 sm:$0x11]   ;;  %v897_v53 = vrot.slane %v895_v40, 1 }
  0x8f   : >> { %11500 = vmatpush3.bf16.msra.mxu1 %v11621_v8  ;;  %10930 = vmatpush3.bf16.msra.mxu0 %v11621_v8  ;;  %v2475_v36 = vshll.u32 %v12632_v61, 16  ;;  %v2473_v1 = vshrl.u32 %v12632_v61, 16  ;;  %v3234_v62 = vshrl.u32 %v12672_v51, 16  ;;  %v3230_v18 = vshll.u32 %v12672_v51, 16  ;;  %v622_v8 = vld [vmem:[#allocation2 + $0x54] sm:$0xe] }
  0x90   : >> { %11493 = vmatprep.subr.bf16.mxu1 %v11624_v37  ;;  %10931 = vmatprep.subr.bf16.mxu0 %v11624_v37  ;;  %v889_v34 = vsel %vm807_vm11, %v884_v3, %v888_v10  ;;  %v2992_v37 = vld [vmem:[#allocation2 + $0x48] sm:$0xe]  ;;  %v11781_v51 = vld [vmem:[#allocation2 + $0x98] ss:$0 sps:$4 sm:$0x11]  }
  0x91   : >> { %v12678_v2 = vrot.slane %v2475_v36, 1  ;;  %v12731_v36 = vcombine.low %v622_v8, %v589_v56  ;;  %v1741_v56 = vsel %vm380_vm8, %v1739_v6, %v1740_v41 }
  0x92   : >> { %1785 = vrot.lane.b32.xlu0 %v1733_v23, %s12193_s30  ;;  %1787 = vrot.lane.b32.xlu1 %v1735_v17, %s12193_s30  ;;  %v3211_v23 = vshll.u32 %v12637_v20, 16  ;;  %v3223_v17 = vshrl.u32 %v12674_v52, 16  ;;  %v1738_v20 = vsel %vm380_vm8, %v1736_v44, %v1737_v55  ;;  %v12713_v55 = vrot.slane %v3230_v18, 1  ;;  %v12750_v18 = vld [vmem:[#allocation2 + $0x3c] sm:$0xfe]  }
  0x93   : >> { %v909_v46 = vshll.u32 %v12731_v36, 16  ;;  %v907_v3 = vshrl.u32 %v12731_v36, 16  ;;  %v2505_v63 = vshll.u32 %v12750_v18, 16  ;;  %v2503_v48 = vshrl.u32 %v12750_v18, 16 }
  0x94   : >> { %v3213_v54 = vrot.slane %v3211_v23, 1  ;;  %v11629_v23 = vld [vmem:[%s12484_s9 + $0x78] sm:$0xff]  }
  0x96   : >> { %1048 = vrot.lane.b32.xlu0 %v875_v5, %s12193_s30  ;;  %2682 = vrot.lane.b32.xlu1 %v2453_v9, %s12193_s30  ;;  %v12706_v5 = vld [vmem:[#allocation2 + $0x30] sm:$0xfe]   ;;  %v12721_v9 = vld [vmem:[#allocation2 + $0x5c] ss:$0 sps:$4 sm:$0x11]   ;;  %v3214_v32 = vor.u32 %v3213_v54, %v3209_v13  ;;  %v10491_v13 = vcombine.low %v2992_v37, %v2953_v16 }
  0x97   : >> { %v2490_v30 = vshll.u32 %v12706_v5, 16  ;;  %v2488_v10 = vshrl.u32 %v12706_v5, 16  ;;  %v12746_v54 = vld [vmem:[#allocation2 + $0x6c] sm:$0xff]  }
  0x98   : >> { %v3219_v40 = vsel %vm807_vm11, %v3214_v32, %v3218_v47  ;;  %v12793_v32 = vld [vmem:[#allocation2 + $0x5c] ss:$0 sps:$4 sm:$0x11]   ;;  %v12802_v37 = vld [vmem:[#allocation2 + $0x90] sm:$0xf] }
  0x99   : >> { %v2492_v25 = vrot.slane %v2490_v30, 1  ;;  %v2510_v30 = vshll.u32 %v12753_v42, 16 }
  0x9a   : >> { %2684 = vrot.lane.b32.xlu0 %v2456_v7, %s12193_s30  ;;  %1050 = vrot.lane.b32.xlu1 %v876_v21, %s12193_s30  ;;  %v893_v21 = vshrl.u32 %v12657_v31, 16  ;;  %v12727_v7 = vld [vmem:[#allocation2 + $0x50] ss:$0 sps:$4 sm:$0x11]   ;;  %v918_v31 = vshrl.u32 %v12721_v9, 16 }
  0x9b   : >> { %v3244_v35 = vshll.u32 %v12727_v7, 16  ;;  %v3248_v27 = vshrl.u32 %v12727_v7, 16  ;;  %v2493_v16 = vor.u32 %v2492_v25, %v2488_v10  ;;  %v11600_v25 = vld [vmem:[#allocation2 + $0x90] sm:$0xfe]  }
  0x9c   : >> { %v898_v47 = vor.u32 %v897_v53, %v893_v21  ;;  %v3237_v21 = vshrl.u32 %v10491_v13, 16 }
  0x9d   : >> { %v3246_v53 = vrot.slane %v3244_v35, 1 }
  0x9e   : >> { %3408 = vrot.lane.b32.xlu0 %v3205_v45, %s12193_s30  ;;  %3410 = vrot.lane.b32.xlu1 %v3206_v0, %s12193_s30  ;;  %v11627_v0 = vld [vmem:[%s12484_s9 + $0x30] sm:$0xff]   ;;  %v914_v45 = vshll.u32 %v12721_v9, 16 }
  0x9f   : >> { %11501 = vmatpush3.bf16.msra.mxu1 %v11627_v0  ;;  %10932 = vmatpush3.bf16.msra.mxu0 %v11627_v0  ;;  %v911_v0 = vrot.slane %v909_v46, 1 }
  0xa0   : >> { %11494 = vmatprep.subr.bf16.mxu1 %v11629_v23  ;;  %10933 = vmatprep.subr.bf16.mxu0 %v11629_v23  ;;  %v12763_v5 = vrot.slane %v914_v45, 1  ;;  %v12791_v23 = vld [vmem:[#allocation2 + $0x84] sm:$0xff]  }
  0xa1   : >> { %v912_v26 = vor.u32 %v911_v0, %v907_v3  ;;  %v1744_v3 = vsel %vm380_vm8, %v1742_v58, %v1743_v43 }
  0xa2   : >> { %1789 = vrot.lane.b32.xlu0 %v1736_v44, %s12193_s30  ;;  %1791 = vrot.lane.b32.xlu1 %v1738_v20, %s12193_s30  ;;  %v2495_v44 = vshll.u32 %v12703_v11, 16  ;;  %v3239_v20 = vshll.u32 %v10491_v13, 16  ;;  %v2993_v13 = vld [vmem:[#allocation2 + $0x54] sm:$0xe]  ;;  %v12863_v11 = vld [vmem:[#allocation2 + $0xa0] sm:$0xf] }
  0xa3   : >> { %11502 = vmatpush3.bf16.msra.mxu1 %v11634_v38  ;;  %10934 = vmatpush3.bf16.msra.mxu0 %v11634_v38  ;;  %v2956_v38 = vld [vmem:[#allocation2 + $0x58] sm:$0xf]  ;;  %v12842_v29 = vsel %vm807_vm11, %v912_v26, %v12763_v5 }
  0xa4   : >> { %v12737_v57 = vrot.slane %v2495_v44, 1  ;;  %v3241_v41 = vrot.slane %v3239_v20, 1  ;;  %v12807_v18 = vcombine.low %v2993_v13, %v2956_v38  ;;  %v2512_v20 = vrot.slane %v2510_v30, 1  ;;  %v12867_v30 = vld [vmem:[#allocation2 + $0x50] ss:$0 sps:$4 sm:$0x33]  }
  0xa5   : >> { %v624_v13 = vld [vmem:[#allocation2 + $0x6c] sm:$0xe]  ;;  %v2525_v26 = vshll.u32 %v12867_v30, 16 }
  0xa6   : >> { %1052 = vrot.lane.b32.xlu0 %v889_v34, %s12193_s30  ;;  %2686 = vrot.lane.b32.xlu1 %v2468_v19, %s12193_s30  ;;  %v623_v34 = vld [vmem:[#allocation2 + $0x60] sm:$0xe]  ;;  %v11626_v19 = vld [vmem:[#allocation2 + $0x74] ss:$0 sps:$4 sm:$0x11]   ;;  %v3251_v43 = vshrl.u32 %v12807_v18, 16 }
  0xa7   : >> { %v10335_v61 = vcombine.low %v623_v34, %v592_v49  ;;  %v1746_v46 = vrot.slane %v11626_v19, 7  ;;  %v12853_v19 = vld [vmem:[#allocation2 + $0x80] ss:$0 sps:$4 sm:$0x11]  }
  0xa9   : >> { %v923_v8 = vshll.u32 %v10335_v61, 16  ;;  %v921_v45 = vshrl.u32 %v10335_v61, 16 }
  0xaa   : >> { %2688 = vrot.lane.b32.xlu0 %v2471_v22, %s12193_s30  ;;  %1054 = vrot.lane.b32.xlu1 %v890_v12, %s12193_s30  ;;  %v2478_v12 = vor.u32 %v12678_v2, %v2473_v1  ;;  %v3228_v1 = vor.u32 %v3227_v33, %v3223_v17  ;;  %v15524_v2 = vrot.slane %v12746_v54, 7  ;;  %v903_v17 = vsel %vm807_vm11, %v898_v47, %v12685_v14  ;;  %v12789_v22 = vld [vmem:[#allocation2 + $0x78] sm:$0xff]   ;;  %v11665_v33 = vld [vmem:[%s12484_s9 + $0xc0] sm:$0xff]  }
  0xab   : >> { %v2486_v14 = vor.u32 %v2484_v60, %v12680_v4  ;;  %v925_v35 = vrot.slane %v923_v8, 1  ;;  %11031 = vmatprep.subr.bf16.mxu1 %v11665_v33  ;;  %v12809_v60 = vld [vmem:[#allocation2 + $0x9c] sm:$0xf]  ;;  %v3253_v47 = vshll.u32 %v12807_v18, 16  ;;  %v11645_v8 = vld [vmem:[#allocation2 + $0x48] sm:$0xfe]  }
  0xac   : >> { %v2483_v52 = vsel %vm807_vm11, %v2478_v12, %v12680_v4  ;;  %v3233_v36 = vsel %vm807_vm11, %v3228_v1, %v12713_v55  ;;  %v3242_v4 = vor.u32 %v3241_v41, %v3237_v21  ;;  %v1748_v55 = vrot.slane %v12789_v22, 7  ;;  %v12834_v21 = vld [vmem:[#allocation2 + $0xa8] sm:$0xf] }
  0xad   : >> { %v2514_v12 = vshrl.u32 %v12753_v42, 16  ;;  %v12828_v42 = vld [vmem:[#allocation2 + $0x94] sm:$0xf]  ;;  %v926_v24 = vor.u32 %v925_v35, %v921_v45  ;;  %v12838_v41 = vsel %vm807_vm11, %v2493_v16, %v12737_v57  ;;  %v12861_v5 = vsel %vm380_vm8, %v15524_v2, %v1746_v46  ;;  %v11692_v22 = vld [vmem:[%s12484_s9 + $0xa8] sm:$0xff]  }
  0xae   : >> { %3412 = vrot.lane.b32.xlu0 %v3219_v40, %s12193_s30  ;;  %3414 = vrot.lane.b32.xlu1 %v3220_v39, %s12193_s30  ;;  %v12771_v39 = vld [vmem:[#allocation2 + $0x68] ss:$0 sps:$4 sm:$0x11]   ;;  %v12805_v40 = vld [vmem:[#allocation2] sm:$0xf]  ;;  %v10319_v61 = vcombine.low %v12802_v37, %v12828_v42  ;;  %v2520_v38 = vshll.u32 %v11645_v8, 16 }
  0xaf   : >> { %v928_v44 = vshll.u32 %v12771_v39, 16  ;;  %v12898_v18 = vrot.slane %v2525_v26, 1 }
  0xb1   : >> { %v930_v34 = vrot.slane %v928_v44, 1  ;;  %v595_v44 = vld [vmem:[#allocation2 + $0x70] sm:$0xf] }
  0xb2   : >> { %1793 = vrot.lane.b32.xlu0 %v1739_v6, %s12193_s30  ;;  %1795 = vrot.lane.b32.xlu1 %v1741_v56, %s12193_s30  ;;  %v2507_v6 = vrot.slane %v2505_v63, 1  ;;  %v12822_v56 = vld [vmem:[#allocation2 + $0xc] sm:$0xf]  ;;  %v3258_v63 = vshll.u32 %v12793_v32, 16 }
  0xb3   : >> { %v12880_v35 = vsel %vm807_vm11, %v926_v24, %v930_v34  ;;  %v2522_v24 = vrot.slane %v2520_v38, 1 }
  0xb4   : >> { %v2508_v0 = vor.u32 %v2507_v6, %v2503_v48  ;;  %v11605_v48 = vld [vmem:[#allocation2 + $0x98] ss:$0 sps:$4 sm:$0x33]   ;;  %v12856_v6 = vsel %vm807_vm11, %v3242_v4, %v3246_v53  ;;  %v3260_v16 = vrot.slane %v3258_v63, 1  ;;  %v2518_v63 = vshrl.u32 %v11645_v8, 16 }
  0xb5   : >> { %v12887_v4 = vld [vmem:[#allocation2 + $0x74] ss:$0 sps:$4 sm:$0x11]  }
  0xb6   : >> { %1056 = vrot.lane.b32.xlu0 %v903_v17, %s12193_s30  ;;  %2690 = vrot.lane.b32.xlu1 %v2483_v52, %s12193_s30  ;;  %v12849_v52 = vld [vmem:[#allocation2 + $0x4] sm:$0xf]  ;;  %v12871_v53 = vsel %vm807_vm11, %v2508_v0, %v2512_v20  ;;  %v2523_v26 = vor.u32 %v2522_v24, %v2518_v63 }
  0xb7   : >> { %v10295_v17 = vcombine.low %v12805_v40, %v12849_v52  ;;  %v12955_v40 = vld [vmem:[#allocation2 + $0x54] sm:$0xfe]  }
  0xb8   : >> { %v2535_v7 = vshll.u32 %v12955_v40, 16 }
  0xba   : >> { %2692 = vrot.lane.b32.xlu0 %v2486_v14, %s12193_s30  ;;  %1058 = vrot.lane.b32.xlu1 %v904_v15, %s12193_s30  ;;  %v12847_v15 = vor.u32 %v2499_v59, %v12737_v57  ;;  %v3255_v59 = vrot.slane %v3253_v47, 1  ;;  %v12873_v14 = vor.u32 %v2514_v12, %v2512_v20  ;;  %v12890_v47 = vld [vmem:[#allocation2 + $0xac] sm:$0xf] }
  0xbc   : >> { %v3256_v34 = vor.u32 %v3255_v59, %v3251_v43  ;;  %v11613_v59 = vld [vmem:[#allocation2] sm:$0xfe]  }
  0xbe   : >> { %3416 = vrot.lane.b32.xlu0 %v3233_v36, %s12193_s30  ;;  %3418 = vrot.lane.b32.xlu1 %v3234_v62, %s12193_s30  ;;  %v1083_v45 = vpop.permute.xlu1 %1082  ;;  %v12882_v36 = vld [vmem:[#allocation2 + $0x10] sm:$0xf] }
  0xbf   : >> { %v1161_v62 = vsel %vm1096_vm12, %v11781_v51, %v1083_v45  ;;  %v942_v45 = vshll.u32 %v12887_v4, 16 }
  0xc0   : >> { %v1818_v33 = vpop.permute.xlu0 %1817  ;;  %v1303_v10 = vshll.u32 %v1161_v62, 16 }
  0xc1   : >> { %v1907_v46 = vsel %vm1096_vm12, %v11600_v25, %v1818_v33  ;;  %v11606_v25 = vld [vmem:[#allocation2 + $0x8] ss:$0 sps:$4 sm:$0x33]   ;;  %v10336_v33 = vcombine.low %v624_v13, %v595_v44 }
  0xc2   : >> { %v2110_v20 = vshrl.u32 %v1907_v46, 16  ;;  %v2113_v12 = vshll.u32 %v1907_v46, 16  ;;  %1797 = vrot.lane.b32.xlu0 %v1742_v58, %s12193_s30  ;;  %v1749_v46 = vrot.slane %v12853_v19, 7  ;;  %1799 = vrot.lane.b32.xlu1 %v1744_v3, %s12193_s30  ;;  %v1772_v8 = vpop.permute.xlu1 %1771 }
  0xc3   : >> { %v937_v44 = vshll.u32 %v10336_v33, 16  ;;  %v1838_v28 = vsel %vm1096_vm12, %v11606_v25, %v1772_v8  ;;  %v935_v58 = vshrl.u32 %v10336_v33, 16 }
  0xc4   : >> { %v1820_v1 = vpop.permute.xlu0 %1819  ;;  %v2112_v51 = vrot.slane %v2110_v20, 1  ;;  %v2115_v49 = vrot.slane %v2113_v12, 2  ;;  %v1937_v62 = vshrl.u32 %v1838_v28, 16  ;;  %v1940_v19 = vshll.u32 %v1838_v28, 16 }
  0xc5   : >> { %v1910_v43 = vsel %vm1096_vm12, %v11605_v48, %v1820_v1  ;;  %v939_v0 = vrot.slane %v937_v44, 1  ;;  %v12907_v1 = vsel %vm807_vm11, %v3256_v34, %v3260_v16  ;;  %v944_v48 = vrot.slane %v942_v45, 1  ;;  %v12909_v20 = vld [vmem:[#allocation2 + $0x68] ss:$0 sps:$4 sm:$0x11]  }
  0xc6   : >> { %v2117_v38 = vshrl.u32 %v1910_v43, 16  ;;  %v2120_v13 = vshll.u32 %v1910_v43, 16  ;;  %1060 = vrot.lane.b32.xlu0 %v12842_v29, %s12193_s30  ;;  %v2116_v12 = vor.u32 %v2115_v49, %v2112_v51  ;;  %v1939_v43 = vrot.slane %v1937_v62, 1  ;;  %2694 = vrot.lane.b32.xlu1 %v12838_v41, %s12193_s30  ;;  %v2959_v29 = vld [vmem:[#allocation2 + $0x64] sm:$0xf] }
  0xc7   : >> { %v1942_v25 = vrot.slane %v1940_v19, 2  ;;  %v940_v44 = vor.u32 %v939_v0, %v935_v58  ;;  %v12917_v34 = vsel %vm380_vm8, %v1748_v55, %v1749_v46  ;;  %v12921_v49 = vsel %vm807_vm11, %v2523_v26, %v12898_v18  ;;  %v11623_v51 = vld [vmem:[#allocation2 + $0x9c] sm:$0xfe]  }
  0xc8   : >> { %v2119_v57 = vrot.slane %v2117_v38, 1  ;;  %v2122_v2 = vrot.slane %v2120_v13, 2  ;;  %v1770_v3 = vpop.permute.xlu0 %1769  ;;  %v2994_v38 = vld [vmem:[#allocation2 + $0x60] sm:$0xe]  ;;  %v1305_v13 = vrot.slane %v1303_v10, 1  ;;  %v1081_v16 = vpop.permute.xlu1 %1080  ;;  %v946_v41 = vshrl.u32 %v12887_v4, 16 }
  0xc9   : >> { %v1835_v63 = vsel %vm1096_vm12, %v11613_v59, %v1770_v3  ;;  %v1159_v10 = vsel %vm1096_vm12, %v10319_v61, %v1081_v16  ;;  %v2529_v59 = vshrl.u32 %v12867_v30, 16  ;;  %v12935_v28 = vcombine.low %v2994_v38, %v2959_v29  ;;  %v11622_v61 = vld [vmem:[#allocation2 + $0xa4] ss:$0 sps:$4 sm:$0x33]   ;;  %v11668_v29 = vld [vmem:[%s12484_s9 + $0xc8] sm:$0xff]  }
  0xca   : >> { %v2123_v24 = vor.u32 %v2122_v2, %v2119_v57  ;;  %v1930_v33 = vshrl.u32 %v1835_v63, 16  ;;  %v1933_v8 = vshll.u32 %v1835_v63, 16  ;;  %2696 = vrot.lane.b32.xlu0 %v12847_v15, %s12193_s30  ;;  %v1297_v0 = vshrl.u32 %v1159_v10, 16  ;;  %1062 = vrot.lane.b32.xlu1 %v918_v31, %s12193_s30  ;;  %v12940_v15 = vld [vmem:[#allocation2 + $0x18] sm:$0xf] }
  0xcb   : >> { %v1299_v46 = vshll.u32 %v1159_v10, 16  ;;  %v1943_v58 = vor.u32 %v1942_v25, %v1939_v43  ;;  %v12938_v62 = vsel %vm807_vm11, %v940_v44, %v944_v48  ;;  %v3272_v19 = vshll.u32 %v12909_v20, 16  ;;  %v11783_v43 = vld [vmem:[#allocation2 + $0x8] ss:$0 sps:$4 sm:$0x11]  }
  0xcc   : >> { %v2124_v2 = vsel %vm1929_vm13, %v2116_v12, %v2123_v24  ;;  %v1932_v57 = vrot.slane %v1930_v33, 1  ;;  %v1935_v45 = vrot.slane %v1933_v8, 2  ;;  %v1033_v42 = vpop.permute.xlu0 %1032  ;;  %v1035_v31 = vpop.permute.xlu1 %1034  ;;  %v3276_v26 = vshrl.u32 %v12909_v20, 16  ;;  %v11666_v12 = vld [vmem:[%s12484_s9 + $0x80] sm:$0xff]   ;;  %v12960_v44 = vld [vmem:[#allocation2 + $0xb4] sm:$0xf] }
  0xcd   : >> { %4874 = vmatprep.mubr.bf16.mxu1 %v2124_v2  ;;  %v1301_v9 = vrot.slane %v1299_v46, 1  ;;  %v1099_v30 = vsel %vm1096_vm12, %v10295_v17, %v1033_v42  ;;  %v3267_v3 = vshll.u32 %v12935_v28, 16  ;;  %v1101_v25 = vsel %vm1096_vm12, %v11783_v43, %v1035_v31  ;;  %v601_v4 = vld [vmem:[#allocation2 + $0x88] sm:$0xf] }
  0xce   : >> { %v1936_v37 = vor.u32 %v1935_v45, %v1932_v57  ;;  %v1179_v63 = vshll.u32 %v1099_v30, 16  ;;  %3420 = vrot.lane.b32.xlu0 %v12856_v6, %s12193_s30  ;;  %v3265_v24 = vshrl.u32 %v12935_v28, 16  ;;  %v1183_v17 = vshll.u32 %v1101_v25, 16  ;;  %3422 = vrot.lane.b32.xlu1 %v3248_v27, %s12193_s30  ;;  %v12963_v6 = vld [vmem:[#allocation2 + $0x1c] sm:$0xf] }
  0xcf   : >> { %v1302_v52 = vor.u32 %v1301_v9, %v1297_v0  ;;  %v1177_v33 = vshrl.u32 %v1099_v30, 16  ;;  %v3269_v8 = vrot.slane %v3267_v3, 1  ;;  %v10299_v2 = vcombine.low %v12940_v15, %v12963_v6  ;;  %v12969_v45 = vld [vmem:[#allocation2 + $0x5c] ss:$0 sps:$4 sm:$0x33]  }
  0xd0   : >> { %v1944_v48 = vsel %vm1929_vm13, %v1936_v37, %v1943_v58  ;;  %v1181_v38 = vrot.slane %v1179_v63, 1  ;;  %v1822_v16 = vpop.permute.xlu0 %1821  ;;  %v12967_v57 = vrot.slane %v3272_v19, 1  ;;  %v1185_v10 = vrot.slane %v1183_v17, 1  ;;  %v1824_v0 = vpop.permute.xlu1 %1823  ;;  %v11671_v37 = vld [vmem:[%s12484_s9 + $0x88] sm:$0xff]  }
  0xd1   : >> { %4778 = vmatprep.mubr.bf16.mxu0 %v1944_v48  ;;  %v1306_v27 = vsel %vm807_vm11, %v1302_v52, %v1305_v13  ;;  %v1913_v46 = vsel %vm1096_vm12, %v11623_v51, %v1822_v16  ;;  %v2533_v58 = vshrl.u32 %v12955_v40, 16  ;;  %v1916_v9 = vsel %vm1096_vm12, %v11622_v61, %v1824_v0  ;;  %v12980_v3 = vld [vmem:[#allocation2 + $0x8c] ss:$0 sps:$4 sm:$0x11]   ;;  %v11673_v13 = vld [vmem:[%s12484_s9 + $0xd0] sm:$0xff]  }
  0xd2   : >> { %v1182_v42 = vor.u32 %v1181_v38, %v1177_v33  ;;  %v2125_v31 = vshrl.u32 %v1913_v46, 16  ;;  %v2128_v19 = vshll.u32 %v1913_v46, 16  ;;  %v15533_v30 = vrot.slane %v12746_v54, 7  ;;  %4875 = vmatmul.mubr.bf16.vlgmr.msra.gmra.mrb[0].mxu1 %v1306_v27  ;;  %1803 = vrot.lane.b32.xlu1 %v12861_v5, %s12193_s30  ;;  %v11636_v51 = vld [vmem:[#allocation2 + $0xc] sm:$0xfe]  }
  0xd3   : >> { %v2132_v48 = vshrl.u32 %v1916_v9, 16  ;;  %v2135_v43 = vshll.u32 %v1916_v9, 16  ;;  %v12986_v25 = vor.u32 %v2529_v59, %v12898_v18  ;;  %v12988_v61 = vld [vmem:[#allocation2 + $0xb8] sm:$0xf]  ;;  %v598_v54 = vld [vmem:[#allocation2 + $0x7c] sm:$0xf]  ;;  %11032 = vmatpush3.bf16.msra.mxu1 %v11666_v12  ;;  %v15534_v46 = vcombine.low %v12809_v60, %v12863_v11 }
  0xd4   : >> { %1801 = vrot.lane.b32.xlu0 %v15533_v30, %s12193_s30  ;;  %v10325_v63 = vcombine.low %v12960_v44, %v12988_v61  ;;  %v625_v40 = vld [vmem:[#allocation2 + $0x78] sm:$0xe]  ;;  %v1186_v52 = vsel %vm807_vm11, %v1182_v42, %v1185_v10  ;;  %v2127_v17 = vrot.slane %v2125_v31, 1  ;;  %v2130_v33 = vrot.slane %v2128_v19, 2  ;;  %v1085_v38 = vpop.permute.xlu0 %1084  ;;  %11033 = vmatprep.subr.bf16.mxu1 %v11668_v29  ;;  %v1087_v0 = vpop.permute.xlu1 %1086 }
  0xd5   : >> { %v11635_v16 = vld [vmem:[#allocation2 + $0x14] ss:$0 sps:$4 sm:$0x33]   ;;  %v2537_v5 = vrot.slane %v2535_v7, 1  ;;  %v2134_v18 = vrot.slane %v2132_v48, 1  ;;  %v2137_v59 = vrot.slane %v2135_v43, 2  ;;  %v1164_v9 = vsel %vm1096_vm12, %v15534_v46, %v1085_v38  ;;  %4779 = vmatmul.mubr.bf16.vlgmr.msra.gmra.mrb[0].mxu0 %v1186_v52 }
  0xd6   : >> { %v12993_v27 = vld [vmem:[#allocation2 + $0x80] ss:$0 sps:$4 sm:$0x11]   ;;  %v2540_v12 = vshll.u32 %v12969_v45, 16  ;;  %v2131_v10 = vor.u32 %v2130_v33, %v2127_v17  ;;  %v1309_v19 = vshll.u32 %v1164_v9, 16  ;;  %v1752_v29 = vrot.slane %v12980_v3, 7  ;;  %2698 = vrot.lane.b32.xlu1 %v12871_v53, %s12193_s30 }
  0xd7   : >> { %v11786_v42 = vld [vmem:[#allocation2 + $0xa4] ss:$0 sps:$4 sm:$0x11]   ;;  %v11676_v7 = vld [vmem:[%s12484_s9 + $0x90] sm:$0xff]   ;;  %v2138_v30 = vor.u32 %v2137_v59, %v2134_v18  ;;  %v1307_v60 = vshrl.u32 %v1164_v9, 16  ;;  %v3270_v11 = vor.u32 %v3269_v8, %v3265_v24  ;;  %11034 = vmatpush3.bf16.msra.mxu1 %v11671_v37  ;;  %v2538_v17 = vor.u32 %v2537_v5, %v2533_v58 }
  0xd8   : >> { %v1166_v31 = vsel %vm1096_vm12, %v11786_v42, %v1087_v0  ;;  %1064 = vrot.lane.b32.xlu0 %v12880_v35, %s12193_s30  ;;  %v1311_v43 = vrot.slane %v1309_v19, 1  ;;  %v1774_v52 = vpop.permute.xlu0 %1773  ;;  %v13009_v33 = vrot.slane %v2540_v12, 1  ;;  %v13011_v38 = vcombine.low %v625_v40, %v598_v54  ;;  %11035 = vmatprep.subr.bf16.mxu1 %v11673_v13  ;;  %v11679_v35 = vld [vmem:[%s12484_s9 + $0xd8] sm:$0xff]   ;;  %v1776_v0 = vpop.permute.xlu1 %1775  ;;  %v11641_v5 = vld [vmem:[#allocation2 + $0xa8] sm:$0xfe]  }
  0xd9   : >> { %v1313_v48 = vshll.u32 %v1166_v31, 16  ;;  %v2139_v18 = vsel %vm1929_vm13, %v2131_v10, %v2138_v30  ;;  %v1841_v53 = vsel %vm1096_vm12, %v11636_v51, %v1774_v52  ;;  %v956_v28 = vshll.u32 %v12993_v27, 16  ;;  %v11640_v42 = vld [vmem:[#allocation2 + $0xb0] ss:$0 sps:$4 sm:$0x33]  }
  0xda   : >> { %v1312_v24 = vor.u32 %v1311_v43, %v1307_v60  ;;  %v1844_v8 = vsel %vm1096_vm12, %v11635_v16, %v1776_v0  ;;  %v1945_v37 = vshrl.u32 %v1841_v53, 16  ;;  %v1948_v58 = vshll.u32 %v1841_v53, 16  ;;  %4882 = vmatprep.mubr.bf16.mxu1 %v2139_v18  ;;  %v11684_v16 = vld [vmem:[%s12484_s9 + $0x98] sm:$0xff]   ;;  %v2962_v19 = vld [vmem:[#allocation2 + $0x70] sm:$0xf] }
  0xdb   : >> { %v1315_v59 = vrot.slane %v1313_v48, 1  ;;  %v1952_v13 = vshrl.u32 %v1844_v8, 16  ;;  %v1955_v54 = vshll.u32 %v1844_v8, 16  ;;  %v15535_v40 = vshrl.u32 %v12771_v39, 16  ;;  %11036 = vmatpush3.bf16.msra.mxu1 %v11676_v7  ;;  %v11686_v39 = vld [vmem:[%s12484_s9 + $0xe0] sm:$0xff]  }
  0xdc   : >> { %2700 = vrot.lane.b32.xlu0 %v12873_v14, %s12193_s30  ;;  %v951_v51 = vshll.u32 %v13011_v38, 16  ;;  %v960_v46 = vshrl.u32 %v12993_v27, 16  ;;  %v1947_v12 = vrot.slane %v1945_v37, 1  ;;  %v1950_v14 = vrot.slane %v1948_v58, 2  ;;  %v1037_v10 = vpop.permute.xlu0 %1036  ;;  %11037 = vmatprep.subr.bf16.mxu1 %v11679_v35  ;;  %v1039_v60 = vpop.permute.xlu1 %1038  ;;  %v2995_v18 = vld [vmem:[#allocation2 + $0x6c] sm:$0xe] }
  0xdd   : >> { %1066 = vrot.lane.b32.xlu1 %v15535_v40, %s12193_s30  ;;  %v1316_v9 = vsel %vm807_vm11, %v1312_v24, %v1315_v59  ;;  %v949_v31 = vshrl.u32 %v13011_v38, 16  ;;  %v1954_v30 = vrot.slane %v1952_v13, 1  ;;  %v1957_v48 = vrot.slane %v1955_v54, 2  ;;  %v11687_v59 = vld [vmem:[%s12484_s9 + $0xa0] sm:$0xff]   ;;  %v11689_v37 = vld [vmem:[%s12484_s9 + $0xe8] sm:$0xff]  }
  0xde   : >> { %v15536_v7 = vcombine.low %v12822_v56, %v12882_v36  ;;  %4883 = vmatmul.mubr.bf16.gmra.mrb[4].mxu1 %v1316_v9  ;;  %v953_v52 = vrot.slane %v951_v51, 1  ;;  %v1951_v0 = vor.u32 %v1950_v14, %v1947_v12  ;;  %v11787_v53 = vld [vmem:[#allocation2 + $0x14] ss:$0 sps:$4 sm:$0x11]   ;;  %v13037_v35 = vrot.slane %v956_v28, 1 }
  0xdf   : >> { %v1106_v38 = vsel %vm1096_vm12, %v11787_v53, %v1039_v60  ;;  %v13039_v8 = vld [vmem:[#allocation2 + $0x24] sm:$0xf]  ;;  %v1958_v56 = vor.u32 %v1957_v48, %v1954_v30  ;;  %v15537_v58 = vshrl.u32 %v12793_v32, 16  ;;  %v13047_v13 = vsel %vm807_vm11, %v3270_v11, %v12967_v57  ;;  %v13056_v28 = vld [vmem:[#allocation2 + $0x74] ss:$0 sps:$4 sm:$0x11]   ;;  %11038 = vmatpush3.bf16.msra.mxu1 %v11684_v16 }
  0xe0   : >> { %v1104_v43 = vsel %vm1096_vm12, %v15536_v7, %v1037_v10  ;;  %3424 = vrot.lane.b32.xlu0 %v12907_v1, %s12193_s30  ;;  %v1193_v36 = vshll.u32 %v1106_v38, 16  ;;  %v15538_v54 = vrot.slane %v12791_v23, 7  ;;  %v1826_v9 = vpop.permute.xlu0 %1825  ;;  %v13060_v32 = vsel %vm807_vm11, %v2538_v17, %v13009_v33  ;;  %11039 = vmatprep.subr.bf16.mxu1 %v11686_v39  ;;  %v1828_v11 = vpop.permute.xlu1 %1827  ;;  %v11650_v39 = vld [vmem:[#allocation2 + $0x18] sm:$0xfe]   ;;  %v13077_v60 = vld [vmem:[#allocation2 + $0x90] sm:$0xff]  }
  0xe1   : >> { %v1189_v24 = vshll.u32 %v1104_v43, 16  ;;  %3426 = vrot.lane.b32.xlu1 %v15537_v58, %s12193_s30  ;;  %v1187_v40 = vshrl.u32 %v1104_v43, 16  ;;  %v13062_v12 = vcombine.low %v2995_v18, %v2962_v19  ;;  %v1959_v57 = vsel %vm1929_vm13, %v1951_v0, %v1958_v56  ;;  %v11649_v18 = vld [vmem:[#allocation2 + $0x20] ss:$0 sps:$4 sm:$0x33]  }
  0xe2   : >> { %v13054_v1 = vsel %vm380_vm8, %v15538_v54, %v1752_v29  ;;  %v1195_v3 = vrot.slane %v1193_v36, 1  ;;  %v1919_v29 = vsel %vm1096_vm12, %v11641_v5, %v1826_v9  ;;  %v954_v14 = vor.u32 %v953_v52, %v949_v31  ;;  %4786 = vmatprep.mubr.bf16.mxu0 %v1959_v57  ;;  %v13073_v31 = vld [vmem:[#allocation2 + $0x28] sm:$0xf]  ;;  %v11728_v36 = vld [vmem:[%s12484_s9 + $0x100] sm:$0xff]   ;;  %v13093_v9 = vld [vmem:[#allocation2 + $0x18] sm:$0xf] }
  0xe3   : >> { %v1191_v51 = vrot.slane %v1189_v24, 1  ;;  %v1922_v16 = vsel %vm1096_vm12, %v11640_v42, %v1828_v11  ;;  %v2140_v30 = vshrl.u32 %v1919_v29, 16  ;;  %v2143_v48 = vshll.u32 %v1919_v29, 16  ;;  %11040 = vmatpush3.bf16.msra.mxu1 %v11687_v59  ;;  %v11789_v54 = vld [vmem:[#allocation2 + $0xb0] ss:$0 sps:$4 sm:$0x11]   ;;  %11407 = vmatprep.subr.bf16.mxu0 %v11728_v36 }
  0xe4   : >> { %1805 = vrot.lane.b32.xlu0 %v1748_v55, %s12193_s30  ;;  %v2147_v17 = vshrl.u32 %v1922_v16, 16  ;;  %v2150_v19 = vshll.u32 %v1922_v16, 16  ;;  %v2544_v5 = vshrl.u32 %v12969_v45, 16  ;;  %v10301_v42 = vcombine.low %v13039_v8, %v13073_v31  ;;  %v1089_v52 = vpop.permute.xlu0 %1088  ;;  %11041 = vmatprep.subr.bf16.mxu1 %v11689_v37  ;;  %v11694_v45 = vld [vmem:[%s12484_s9 + $0xf0] sm:$0xff]   ;;  %v1091_v38 = vpop.permute.xlu1 %1090 }
  0xe5   : >> { %v1192_v10 = vor.u32 %v1191_v51, %v1187_v40  ;;  %1807 = vrot.lane.b32.xlu1 %v12917_v34, %s12193_s30  ;;  %v2142_v7 = vrot.slane %v2140_v30, 1  ;;  %v2145_v43 = vrot.slane %v2143_v48, 2  ;;  %v3281_v34 = vshll.u32 %v13062_v12, 16  ;;  %v13099_v29 = vld [vmem:[#allocation2 + $0x98] ss:$0 sps:$4 sm:$0x11]   ;;  %11408 = vmatpush3.bf16.msra.mxu0 %v11728_v36 }
  0xe6   : >> { %v2149_v0 = vrot.slane %v2147_v17, 1  ;;  %v2152_v53 = vrot.slane %v2150_v19, 2  ;;  %v15539_v24 = vcombine.low %v12834_v21, %v12890_v47  ;;  %v3286_v56 = vshll.u32 %v13056_v28, 16  ;;  %v11697_v21 = vld [vmem:[%s12484_s9 + $0xb0] sm:$0xff]   ;;  %v11748_v19 = vld [vmem:[%s12484_s9 + $0x108] sm:$0xff]  }
  0xe7   : >> { %v1196_v55 = vsel %vm807_vm11, %v1192_v10, %v1195_v3  ;;  %v2146_v58 = vor.u32 %v2145_v43, %v2142_v7  ;;  %v1171_v40 = vsel %vm1096_vm12, %v11789_v54, %v1091_v38  ;;  %v3290_v51 = vshrl.u32 %v13056_v28, 16  ;;  %11042 = vmatpush3.bf16.msra.mxu1 %v11692_v22  ;;  %v11700_v10 = vld [vmem:[%s12484_s9 + $0xf8] sm:$0xff]   ;;  %v11680_v54 = vld [vmem:[#allocation2 + $0x60] sm:$0xfe]   ;;  %11409 = vmatprep.subr.bf16.mxu0 %v11748_v19 }
  0xe8   : >> { %v1169_v59 = vsel %vm1096_vm12, %v15539_v24, %v1089_v52  ;;  %4787 = vmatmul.mubr.bf16.gmra.mrb[4].mxu0 %v1196_v55  ;;  %1068 = vrot.lane.b32.xlu0 %v12938_v62, %s12193_s30  ;;  %v2153_v47 = vor.u32 %v2152_v53, %v2149_v0  ;;  %v1323_v57 = vshll.u32 %v1171_v40, 16  ;;  %v3279_v11 = vshrl.u32 %v13062_v12, 16  ;;  %v1778_v16 = vpop.permute.xlu0 %1777  ;;  %v1780_v12 = vpop.permute.xlu1 %1779  ;;  %v11703_v43 = vld [vmem:[%s12484_s9 + $0xb8] sm:$0xff]  }
  0xe9   : >> { %v1319_v37 = vshll.u32 %v1169_v59, 16  ;;  %v1317_v3 = vshrl.u32 %v1169_v59, 16  ;;  %2702 = vrot.lane.b32.xlu1 %v12921_v49, %s12193_s30  ;;  %v13104_v30 = vsel %vm807_vm11, %v954_v14, %v13037_v35  ;;  %v3283_v48 = vrot.slane %v3281_v34, 1  ;;  %11043 = vmatprep.subr.bf16.mxu1 %v11694_v45  ;;  %v13120_v38 = vld [vmem:[#allocation2 + $0x1c] sm:$0xf] }
  0xea   : >> { %v3288_v17 = vrot.slane %v3286_v56, 1  ;;  %v2154_v49 = vsel %vm1929_vm13, %v2146_v58, %v2153_v47  ;;  %v1325_v55 = vrot.slane %v1323_v57, 1  ;;  %v1847_v7 = vsel %vm1096_vm12, %v11650_v39, %v1778_v16  ;;  %v11655_v39 = vld [vmem:[#allocation2 + $0xb4] sm:$0xfe]   ;;  %11410 = vmatpush3.bf16.msra.mxu0 %v11748_v19 }
  0xeb   : >> { %v1321_v62 = vrot.slane %v1319_v37, 1  ;;  %v1754_v22 = vrot.slane %v13077_v60, 7  ;;  %v1850_v0 = vsel %vm1096_vm12, %v11649_v18, %v1780_v12  ;;  %v1960_v35 = vshrl.u32 %v1847_v7, 16  ;;  %4890 = vmatprep.mubr.bf16.mxu1 %v2154_v49  ;;  %11044 = vmatpush3.bf16.msra.mxu1 %v11697_v21  ;;  %v11654_v36 = vld [vmem:[#allocation2 + $0xbc] ss:$0 sps:$4 sm:$0x33]  }
  0xec   : >> { %v1963_v14 = vshll.u32 %v1847_v7, 16  ;;  %2704 = vrot.lane.b32.xlu0 %v12986_v25, %s12193_s30  ;;  %v1967_v34 = vshrl.u32 %v1850_v0, 16  ;;  %v1970_v45 = vshll.u32 %v1850_v0, 16  ;;  %v13118_v53 = vor.u32 %v2544_v5, %v13009_v33  ;;  %v1041_v56 = vpop.permute.xlu0 %1040  ;;  %11045 = vmatprep.subr.bf16.mxu1 %v11700_v10  ;;  %v1043_v5 = vpop.permute.xlu1 %1042  ;;  %v13130_v21 = vld [vmem:[#allocation2 + $0x68] ss:$0 sps:$4 sm:$0x33]  }
  0xed   : >> { %v1322_v52 = vor.u32 %v1321_v62, %v1317_v3  ;;  %1070 = vrot.lane.b32.xlu1 %v946_v41, %s12193_s30  ;;  %v10455_v18 = vcombine.low %v13093_v9, %v13120_v38  ;;  %v1962_v25 = vrot.slane %v1960_v35, 1  ;;  %v3284_v58 = vor.u32 %v3283_v48, %v3279_v11  ;;  %v11791_v57 = vld [vmem:[#allocation2 + $0x20] ss:$0 sps:$4 sm:$0x11]   ;;  %v626_v62 = vld [vmem:[#allocation2 + $0x84] sm:$0xe] }
  0xee   : >> { %v1965_v59 = vrot.slane %v1963_v14, 2  ;;  %v1969_v41 = vrot.slane %v1967_v34, 1  ;;  %v1972_v33 = vrot.slane %v1970_v45, 2  ;;  %v1109_v40 = vsel %vm1096_vm12, %v10299_v2, %v1041_v56 }
  0xef   : >> { %v1326_v24 = vsel %vm807_vm11, %v1322_v52, %v1325_v55  ;;  %v1755_v37 = vrot.slane %v13099_v29, 7  ;;  %v1111_v3 = vsel %vm1096_vm12, %v11791_v57, %v1043_v5  ;;  %v1197_v11 = vshrl.u32 %v1109_v40, 16  ;;  %11046 = vmatpush3.bf16.msra.mxu1 %v11703_v43  ;;  %v13146_v52 = vld [vmem:[#allocation2 + $0x8c] ss:$0 sps:$4 sm:$0x11]  }
  0xf0   : >> { %4891 = vmatmul.mubr.bf16.gmra.mrb[8].mxu1 %v1326_v24  ;;  %v1966_v47 = vor.u32 %v1965_v59, %v1962_v25  ;;  %v1199_v10 = vshll.u32 %v1109_v40, 16  ;;  %3428 = vrot.lane.b32.xlu0 %v13047_v13, %s12193_s30  ;;  %v1973_v16 = vor.u32 %v1972_v33, %v1969_v41  ;;  %v1203_v15 = vshll.u32 %v1111_v3, 16  ;;  %v1830_v48 = vpop.permute.xlu0 %1829  ;;  %v1832_v7 = vpop.permute.xlu1 %1831  ;;  %v11757_v25 = vld [vmem:[%s12484_s9 + $0x110] sm:$0xff]   ;;  %v11664_v5 = vld [vmem:[#allocation2 + $0x24] sm:$0xfe]  }
  0xf1   : >> { %3430 = vrot.lane.b32.xlu1 %v3276_v26, %s12193_s30  ;;  %v2548_v6 = vshrl.u32 %v11680_v54, 16  ;;  %v2550_v2 = vshll.u32 %v11680_v54, 16  ;;  %v13139_v19 = vsel %vm807_vm11, %v3284_v58, %v3288_v17  ;;  %v2555_v49 = vshll.u32 %v13130_v21, 16  ;;  %v11663_v54 = vld [vmem:[#allocation2 + $0x2c] ss:$0 sps:$4 sm:$0x33]   ;;  %11411 = vmatprep.subr.bf16.mxu0 %v11757_v25 }
  0xf2   : >> { %v1201_v29 = vrot.slane %v1199_v10, 1  ;;  %v13142_v55 = vcombine.low %v626_v62, %v601_v4  ;;  %v1974_v13 = vsel %vm1929_vm13, %v1966_v47, %v1973_v16  ;;  %v1205_v12 = vrot.slane %v1203_v15, 1  ;;  %v11792_v57 = vld [vmem:[#allocation2 + $0xbc] ss:$0 sps:$4 sm:$0x11]   ;;  %11412 = vmatpush3.bf16.msra.mxu0 %v11757_v25 }
  0xf3   : >> { %v1925_v20 = vsel %vm1096_vm12, %v11655_v39, %v1830_v48  ;;  %v2552_v26 = vrot.slane %v2550_v2, 1  ;;  %v1928_v0 = vsel %vm1096_vm12, %v11654_v36, %v1832_v7  ;;  %v15540_v14 = vrot.slane %v12791_v23, 7  ;;  %4794 = vmatprep.mubr.bf16.mxu0 %v1974_v13 }
  0xf4   : >> { %v1202_v43 = vor.u32 %v1201_v29, %v1197_v11  ;;  %v2155_v35 = vshrl.u32 %v1925_v20, 16  ;;  %v2158_v17 = vshll.u32 %v1925_v20, 16  ;;  %v2162_v34 = vshrl.u32 %v1928_v0, 16  ;;  %v1093_v58 = vpop.permute.xlu0 %1092  ;;  %v1095_v33 = vpop.permute.xlu1 %1094 }
  0xf5   : >> { %1809 = vrot.lane.b32.xlu0 %v15540_v14, %s12193_s30  ;;  %v2165_v45 = vshll.u32 %v1928_v0, 16  ;;  %1811 = vrot.lane.b32.xlu1 %v13054_v1, %s12193_s30  ;;  %v2553_v24 = vor.u32 %v2552_v26, %v2548_v6  ;;  %v13154_v39 = vrot.slane %v2555_v49, 1  ;;  %v13161_v23 = vsel %vm380_vm8, %v1754_v22, %v1755_v37  ;;  %v13188_v26 = vld [vmem:[#allocation2 + $0x80] ss:$0 sps:$4 sm:$0x11]  }
  0xf6   : >> { %v1206_v59 = vsel %vm807_vm11, %v1202_v43, %v1205_v12  ;;  %v2157_v56 = vrot.slane %v2155_v35, 1  ;;  %v2160_v36 = vrot.slane %v2158_v17, 2  ;;  %v2164_v4 = vrot.slane %v2162_v34, 1  ;;  %v13183_v12 = vld [vmem:[#allocation2 + $0x30] sm:$0xf] }
  0xf7   : >> { %v2167_v41 = vrot.slane %v2165_v45, 2  ;;  %v1174_v1 = vsel %vm1096_vm12, %v10325_v63, %v1093_v58  ;;  %4795 = vmatmul.mubr.bf16.gmra.mrb[8].mxu0 %v1206_v59  ;;  %v963_v40 = vshrl.u32 %v13142_v55, 16  ;;  %v1176_v3 = vsel %vm1096_vm12, %v11792_v57, %v1095_v33  ;;  %v2996_v14 = vld [vmem:[#allocation2 + $0x78] sm:$0xe]  ;;  %v13194_v59 = vld [vmem:[#allocation2 + $0x34] sm:$0xf] }
  0xf8   : >> { %v2161_v47 = vor.u32 %v2160_v36, %v2157_v56  ;;  %v1329_v11 = vshll.u32 %v1174_v1, 16  ;;  %v13173_v37 = vsel %vm807_vm11, %v2553_v24, %v13154_v39  ;;  %v1333_v61 = vshll.u32 %v1176_v3, 16  ;;  %v1782_v15 = vpop.permute.xlu0 %1781  ;;  %v1784_v48 = vpop.permute.xlu1 %1783 }
  0xf9   : >> { %1072 = vrot.lane.b32.xlu0 %v13104_v30, %s12193_s30  ;;  %v2168_v44 = vor.u32 %v2167_v41, %v2164_v4  ;;  %2706 = vrot.lane.b32.xlu1 %v13060_v32, %s12193_s30  ;;  %v965_v63 = vshll.u32 %v13142_v55, 16  ;;  %v970_v10 = vshll.u32 %v13146_v52, 16  ;;  %v1327_v62 = vshrl.u32 %v1174_v1, 16  ;;  %v11794_v4 = vld [vmem:[#allocation2 + $0x2c] ss:$0 sps:$4 sm:$0x11]  }
  0xfa   : >> { %v1331_v16 = vrot.slane %v1329_v11, 1  ;;  %v974_v6 = vshrl.u32 %v13146_v52, 16  ;;  %v2559_v30 = vshrl.u32 %v13130_v21, 16  ;;  %v1335_v29 = vrot.slane %v1333_v61, 1  ;;  %v2965_v21 = vld [vmem:[#allocation2 + $0x7c] sm:$0xf] }
  0xfb   : >> { %v2169_v2 = vsel %vm1929_vm13, %v2161_v47, %v2168_v44  ;;  %v1853_v49 = vsel %vm1096_vm12, %v11664_v5, %v1782_v15  ;;  %v967_v13 = vrot.slane %v965_v63, 1  ;;  %v1856_v55 = vsel %vm1096_vm12, %v11663_v54, %v1784_v48  ;;  %v13209_v5 = vld [vmem:[#allocation2 + $0x74] ss:$0 sps:$4 sm:$0x33]   ;;  %v13214_v47 = vld [vmem:[#allocation2 + $0x6c] sm:$0xfe]  }
  0xfc   : >> { %v1332_v32 = vor.u32 %v1331_v16, %v1327_v62  ;;  %v1975_v7 = vshrl.u32 %v1853_v49, 16  ;;  %v1978_v20 = vshll.u32 %v1853_v49, 16  ;;  %4898 = vmatprep.mubr.bf16.mxu1 %v2169_v2  ;;  %v1982_v43 = vshrl.u32 %v1856_v55, 16  ;;  %v1045_v25 = vpop.permute.xlu0 %1044  ;;  %v1047_v58 = vpop.permute.xlu1 %1046  ;;  %v11677_v11 = vld [vmem:[#allocation2 + $0x38] ss:$0 sps:$4 sm:$0x33]  }
  0xfd   : >> { %2708 = vrot.lane.b32.xlu0 %v13118_v53, %s12193_s30  ;;  %v1985_v0 = vshll.u32 %v1856_v55, 16  ;;  %1074 = vrot.lane.b32.xlu1 %v960_v46, %s12193_s30  ;;  %v968_v35 = vor.u32 %v967_v13, %v963_v40  ;;  %v972_v17 = vrot.slane %v970_v10, 1  ;;  %v10303_v53 = vcombine.low %v13183_v12, %v13194_v59  ;;  %v11795_v15 = vld [vmem:[#allocation2 + $0x20] ss:$0 sps:$4 sm:$0x11]  }
  0xfe   : >> { %v1336_v34 = vsel %vm807_vm11, %v1332_v32, %v1335_v29  ;;  %v1977_v45 = vrot.slane %v1975_v7, 1  ;;  %v1980_v24 = vrot.slane %v1978_v20, 2  ;;  %v1984_v56 = vrot.slane %v1982_v43, 1  ;;  %v13228_v48 = vld [vmem:[#allocation2 + $0x24] sm:$0xf] }
  0xff   : >> { %v1987_v36 = vrot.slane %v1985_v0, 2  ;;  %v1114_v27 = vsel %vm1096_vm12, %v10301_v42, %v1045_v25  ;;  %4899 = vmatmul.mubr.bf16.gmra.mrb[12].mxu1 %v1336_v34  ;;  %v13203_v46 = vor.u32 %v2559_v30, %v13154_v39  ;;  %v1116_v41 = vsel %vm1096_vm12, %v11794_v4, %v1047_v58  ;;  %v11678_v42 = vld [vmem:[#allocation2 + $0x30] sm:$0xfe]  }
 0x100   : >> { %v1981_v54 = vor.u32 %v1980_v24, %v1977_v45  ;;  %v1209_v33 = vshll.u32 %v1114_v27, 16  ;;  %v973_v1 = vsel %vm807_vm11, %v968_v35, %v972_v17  ;;  %v1213_v8 = vshll.u32 %v1116_v41, 16  ;;  %v3405_v3 = vpop.permute.xlu0 %3404  ;;  %v3407_v62 = vpop.permute.xlu1 %3406  ;;  %v11688_v25 = vld [vmem:[#allocation2 + $0x14] ss:$0 sps:$4 sm:$0x11]  }
 0x101   : >> { %3432 = vrot.lane.b32.xlu0 %v13139_v19, %s12193_s30  ;;  %v1988_v40 = vor.u32 %v1987_v36, %v1984_v56  ;;  %v1207_v31 = vshrl.u32 %v1114_v27, 16  ;;  %3434 = vrot.lane.b32.xlu1 %v3290_v51, %s12193_s30  ;;  %v10495_v39 = vcombine.low %v2996_v14, %v2965_v21  ;;  %v3304_v19 = vshrl.u32 %v13188_v26, 16  ;;  %v13244_v36 = vld [vmem:[#allocation2 + $0x28] sm:$0xf] }
 0x102   : >> { %v1211_v57 = vrot.slane %v1209_v33, 1  ;;  %v3300_v44 = vshll.u32 %v13188_v26, 16  ;;  %v2570_v61 = vshll.u32 %v13209_v5, 16  ;;  %v1215_v10 = vrot.slane %v1213_v8, 1  ;;  %v2968_v27 = vld [vmem:[#allocation2 + $0x88] sm:$0xf] }
 0x103   : >> { %v1989_v63 = vsel %vm1929_vm13, %v1981_v54, %v1988_v40  ;;  %v3470_v28 = vsel %vm1096_vm12, %v10455_v18, %v3405_v3  ;;  %v3293_v51 = vshrl.u32 %v10495_v39, 16  ;;  %v3472_v30 = vsel %vm1096_vm12, %v11795_v15, %v3407_v62 }
 0x104   : >> { %v1212_v16 = vor.u32 %v1211_v57, %v1207_v31  ;;  %v3548_v2 = vshrl.u32 %v3470_v28, 16  ;;  %v3550_v29 = vshll.u32 %v3470_v28, 16  ;;  %4802 = vmatprep.mubr.bf16.mxu0 %v1989_v63  ;;  %v3554_v49 = vshll.u32 %v3472_v30, 16  ;;  %v1786_v55 = vpop.permute.xlu0 %1785  ;;  %v1788_v21 = vpop.permute.xlu1 %1787  ;;  %v11797_v57 = vld [vmem:[#allocation2 + $0xc] sm:$0xfe]  }
 0x105   : >> { %1813 = vrot.lane.b32.xlu0 %v1754_v22, %s12193_s30  ;;  %1815 = vrot.lane.b32.xlu1 %v13161_v23, %s12193_s30  ;;  %v3295_v9 = vshll.u32 %v10495_v39, 16  ;;  %v3302_v38 = vrot.slane %v3300_v44, 1  ;;  %v13232_v18 = vrot.slane %v2570_v61, 1  ;;  %v2574_v7 = vshrl.u32 %v13209_v5, 16  ;;  %v11765_v22 = vld [vmem:[%s12484_s9 + $0x118] sm:$0xff]  }
 0x106   : >> { %v1216_v13 = vsel %vm807_vm11, %v1212_v16, %v1215_v10  ;;  %v3552_v32 = vrot.slane %v3550_v29, 1  ;;  %v2563_v60 = vshrl.u32 %v13214_v47, 16  ;;  %v3556_v20 = vrot.slane %v3554_v49, 1  ;;  %11413 = vmatprep.subr.bf16.mxu0 %v11765_v22  ;;  %v13249_v5 = vld [vmem:[#allocation2 + $0x8c] ss:$0 sps:$4 sm:$0x11]  }
 0x107   : >> { %v1859_v43 = vsel %vm1096_vm12, %v11678_v42, %v1786_v55  ;;  %4803 = vmatmul.mubr.bf16.gmra.mrb[12].mxu0 %v1216_v13  ;;  %v3297_v23 = vrot.slane %v3295_v9, 1  ;;  %v2565_v0 = vshll.u32 %v13214_v47, 16  ;;  %v1862_v17 = vsel %vm1096_vm12, %v11677_v11, %v1788_v21  ;;  %v2997_v39 = vld [vmem:[#allocation2 + $0x84] sm:$0xe]  ;;  %v13262_v61 = vld [vmem:[#allocation2 + $0x3c] sm:$0xf] }
 0x108   : >> { %v3553_v35 = vor.u32 %v3552_v32, %v3548_v2  ;;  %v1990_v14 = vshrl.u32 %v1859_v43, 16  ;;  %v1993_v34 = vshll.u32 %v1859_v43, 16  ;;  %v1997_v45 = vshrl.u32 %v1862_v17, 16  ;;  %11414 = vmatpush3.bf16.msra.mxu0 %v11765_v22  ;;  %v1049_v33 = vpop.permute.xlu0 %1048  ;;  %v13273_v49 = vld [vmem:[#allocation2 + $0x40] sm:$0xf] }
 0x109   : >> { %1076 = vrot.lane.b32.xlu0 %v973_v1, %s12193_s30  ;;  %v2000_v24 = vshll.u32 %v1862_v17, 16  ;;  %2710 = vrot.lane.b32.xlu1 %v13173_v37, %s12193_s30  ;;  %v3298_v56 = vor.u32 %v3297_v23, %v3293_v51  ;;  %v10457_v58 = vcombine.low %v13228_v48, %v13244_v36  ;;  %v2567_v1 = vrot.slane %v2565_v0, 1  ;;  %v2683_v37 = vpop.permute.xlu1 %2682  ;;  %v11698_v23 = vld [vmem:[#allocation2 + $0x44] ss:$0 sps:$4 sm:$0x33]  }
 0x10a   : >> { %v3557_v54 = vsel %vm807_vm11, %v3553_v35, %v3556_v20  ;;  %v1992_v4 = vrot.slane %v1990_v14, 1  ;;  %v1995_v41 = vrot.slane %v1993_v34, 2  ;;  %v1999_v40 = vrot.slane %v1997_v45, 1  ;;  %v13283_v14 = vld [vmem:[#allocation2 + $0x98] ss:$0 sps:$4 sm:$0x11]  }
 0x10b   : >> { %v2002_v8 = vrot.slane %v2000_v24, 2  ;;  %v1119_v31 = vsel %vm1096_vm12, %v10303_v53, %v1049_v33  ;;  %4939 = vmatprep.mubr.bf16.mxu1 %v3557_v54  ;;  %v13256_v42 = vor.u32 %v2574_v7, %v13232_v18  ;;  %v2747_v3 = vsel %vm1096_vm12, %v11797_v57, %v2683_v37  ;;  %v2998_v33 = vld [vmem:[#allocation2 + $0x90] sm:$0xe] }
 0x10c   : >> { %v1996_v47 = vor.u32 %v1995_v41, %v1992_v4  ;;  %v1219_v11 = vshll.u32 %v1119_v31, 16  ;;  %v3303_v44 = vsel %vm807_vm11, %v3298_v56, %v3302_v38  ;;  %v2859_v59 = vrot.slane %v2747_v3, 1  ;;  %v2685_v62 = vpop.permute.xlu0 %2684  ;;  %v11799_v38 = vld [vmem:[#allocation2 + $0x38] ss:$0 sps:$4 sm:$0x11]  }
 0x10d   : >> { %2712 = vrot.lane.b32.xlu0 %v13203_v46, %s12193_s30  ;;  %v2003_v12 = vor.u32 %v2002_v8, %v1999_v40  ;;  %v1217_v53 = vshrl.u32 %v1119_v31, 16  ;;  %1078 = vrot.lane.b32.xlu1 %v974_v6, %s12193_s30  ;;  %v2568_v63 = vor.u32 %v2567_v1, %v2563_v60  ;;  %v3318_v28 = vshrl.u32 %v13249_v5, 16  ;;  %v11705_v46 = vld [vmem:[#allocation2 + $0x80] ss:$0 sps:$4 sm:$0x33]   ;;  %v1051_v30 = vpop.permute.xlu1 %1050 }
 0x10e   : >> { %v1221_v10 = vrot.slane %v1219_v11, 1  ;;  %v10496_v51 = vcombine.low %v2997_v39, %v2968_v27  ;;  %v3314_v16 = vshll.u32 %v13249_v5, 16  ;;  %v2750_v2 = vsel %vm1096_vm12, %v11688_v25, %v2685_v62  ;;  %v11706_v6 = vld [vmem:[#allocation2 + $0x78] sm:$0xfe]   ;;  %v2971_v25 = vld [vmem:[#allocation2 + $0x94] sm:$0xf] }
 0x10f   : >> { %v2004_v15 = vsel %vm1929_vm13, %v1996_v47, %v2003_v12  ;;  %v2573_v29 = vsel %vm807_vm11, %v2568_v63, %v13232_v18  ;;  %v10305_v52 = vcombine.low %v13262_v61, %v13273_v49  ;;  %v1121_v13 = vsel %vm1096_vm12, %v11799_v38, %v1051_v30  ;;  %v11699_v18 = vld [vmem:[#allocation2 + $0x3c] sm:$0xfe]   ;;  %v11800_v56 = vld [vmem:[#allocation2 + $0x2c] ss:$0 sps:$4 sm:$0x11]  }
 0x110   : >> { %v1222_v9 = vor.u32 %v1221_v10, %v1217_v53  ;;  %v2860_v32 = vrot.slane %v2750_v2, 1  ;;  %4810 = vmatprep.mubr.bf16.mxu0 %v2004_v15  ;;  %v3307_v55 = vshrl.u32 %v10496_v51, 16  ;;  %v1223_v7 = vshll.u32 %v1121_v13, 16  ;;  %v3409_v43 = vpop.permute.xlu0 %3408  ;;  %v13300_v63 = vld [vmem:[#allocation2 + $0x30] sm:$0xf] }
 0x111   : >> { %3436 = vrot.lane.b32.xlu0 %v3303_v44, %s12193_s30  ;;  %3438 = vrot.lane.b32.xlu1 %v3304_v19, %s12193_s30  ;;  %v3309_v60 = vshll.u32 %v10496_v51, 16  ;;  %v3316_v22 = vrot.slane %v3314_v16, 1  ;;  %v2585_v20 = vshll.u32 %v11705_v46, 16  ;;  %v2589_v0 = vshrl.u32 %v11705_v46, 16  ;;  %v3411_v45 = vpop.permute.xlu1 %3410  ;;  %v11712_v30 = vld [vmem:[#allocation2 + $0x84] sm:$0xfe]  }
 0x112   : >> { %v2861_v21 = vsel %vm2858_vm14, %v2859_v59, %v2860_v32  ;;  %v2578_v35 = vshrl.u32 %v11706_v6, 16  ;;  %v2580_v17 = vshll.u32 %v11706_v6, 16  ;;  %v1225_v34 = vrot.slane %v1223_v7, 1  ;;  %v11711_v10 = vld [vmem:[#allocation2 + $0x8c] ss:$0 sps:$4 sm:$0x33]  }
 0x113   : >> { %v3475_v26 = vsel %vm1096_vm12, %v10457_v58, %v3409_v43  ;;  %v3311_v19 = vrot.slane %v3309_v60, 1  ;;  %4940 = vmatmul.mubr.bf16.vlgmr.msra.gmra.mrb[16].mxu1 %v2861_v21  ;;  %v2587_v24 = vrot.slane %v2585_v20, 1  ;;  %v3477_v27 = vsel %vm1096_vm12, %v11800_v56, %v3411_v45  ;;  %v11707_v46 = vld [vmem:[#allocation2 + $0x20] ss:$0 sps:$4 sm:$0x11]  }
 0x114   : >> { %v3558_v54 = vshrl.u32 %v3475_v26, 16  ;;  %v3560_v4 = vshll.u32 %v3475_v26, 16  ;;  %v2582_v41 = vrot.slane %v2580_v17, 1  ;;  %v1226_v1 = vsel %vm807_vm11, %v1222_v9, %v1225_v34  ;;  %v1790_v8 = vpop.permute.xlu0 %1789  ;;  %v13315_v49 = vld [vmem:[#allocation2 + $0xa4] ss:$0 sps:$4 sm:$0x11]  }
 0x115   : >> { %2714 = vrot.lane.b32.xlu0 %v2573_v29, %s12193_s30  ;;  %v3564_v40 = vshll.u32 %v3477_v27, 16  ;;  %2716 = vrot.lane.b32.xlu1 %v13256_v42, %s12193_s30  ;;  %v3312_v48 = vor.u32 %v3311_v19, %v3307_v55  ;;  %v2591_v36 = vor.u32 %v2589_v0, %v2587_v24  ;;  %v3332_v31 = vshrl.u32 %v13283_v14, 16  ;;  %v1792_v57 = vpop.permute.xlu1 %1791  ;;  %v11802_v0 = vld [vmem:[#allocation2 + $0x34] sm:$0xf]  ;;  %v2974_v26 = vld [vmem:[#allocation2 + $0xa0] sm:$0xf] }
 0x116   : >> { %v3562_v58 = vrot.slane %v3560_v4, 1  ;;  %v2583_v37 = vor.u32 %v2582_v41, %v2578_v35  ;;  %4811 = vmatmul.mubr.bf16.gmra.mrb[16].mxu0 %v1226_v1  ;;  %v10497_v39 = vcombine.low %v2998_v33, %v2971_v25  ;;  %v1865_v3 = vsel %vm1096_vm12, %v11699_v18, %v1790_v8  ;;  %v11801_v18 = vld [vmem:[#allocation2 + $0x18] sm:$0xfe]   ;;  %v13319_v4 = vld [vmem:[#allocation2 + $0x48] sm:$0xf] }
 0x117   : >> { %v3566_v47 = vrot.slane %v3564_v40, 1  ;;  %v3317_v11 = vsel %vm807_vm11, %v3312_v48, %v3316_v22  ;;  %v3328_v44 = vshll.u32 %v13283_v14, 16  ;;  %v1868_v42 = vsel %vm1096_vm12, %v11698_v23, %v1792_v57  ;;  %v11803_v33 = vld [vmem:[#allocation2 + $0x44] ss:$0 sps:$4 sm:$0x11]  }
 0x118   : >> { %v3563_v12 = vor.u32 %v3562_v58, %v3558_v54  ;;  %v2005_v59 = vshrl.u32 %v1865_v3, 16  ;;  %v2008_v53 = vshll.u32 %v1865_v3, 16  ;;  %v2012_v62 = vshrl.u32 %v1868_v42, 16  ;;  %v1053_v9 = vpop.permute.xlu0 %1052  ;;  %v2999_v54 = vld [vmem:[#allocation2 + $0x9c] sm:$0xe] }
 0x119   : >> { %3440 = vrot.lane.b32.xlu0 %v3317_v11, %s12193_s30  ;;  %v2015_v51 = vshll.u32 %v1868_v42, 16  ;;  %3442 = vrot.lane.b32.xlu1 %v3318_v28, %s12193_s30  ;;  %v2588_v16 = vsel %vm807_vm11, %v2583_v37, %v2587_v24  ;;  %v3321_v15 = vshrl.u32 %v10497_v39, 16  ;;  %v3323_v38 = vshll.u32 %v10497_v39, 16  ;;  %v2687_v55 = vpop.permute.xlu1 %2686  ;;  %v11713_v3 = vld [vmem:[#allocation2 + $0x50] ss:$0 sps:$4 sm:$0x33]  }
 0x11a   : >> { %v3567_v2 = vsel %vm807_vm11, %v3563_v12, %v3566_v47  ;;  %v2007_v29 = vrot.slane %v2005_v59, 1  ;;  %v2010_v6 = vrot.slane %v2008_v53, 2  ;;  %v2014_v13 = vrot.slane %v2012_v62, 1  ;;  %v13330_v12 = vld [vmem:[#allocation2 + $0x98] ss:$0 sps:$4 sm:$0x33]  }
 0x11b   : >> { %v2017_v32 = vrot.slane %v2015_v51, 2  ;;  %v1124_v5 = vsel %vm1096_vm12, %v10305_v52, %v1053_v9  ;;  %v3330_v28 = vrot.slane %v3328_v44, 1  ;;  %4947 = vmatprep.mubr.bf16.mxu1 %v3567_v2  ;;  %v2752_v60 = vsel %vm1096_vm12, %v11801_v18, %v2687_v55  ;;  %v11714_v53 = vld [vmem:[#allocation2 + $0x48] sm:$0xfe]   ;;  %v11719_v9 = vld [vmem:[#allocation2 + $0x90] sm:$0xfe]  }
 0x11c   : >> { %v2011_v7 = vor.u32 %v2010_v6, %v2007_v29  ;;  %v1227_v22 = vshrl.u32 %v1124_v5, 16  ;;  %v1229_v20 = vshll.u32 %v1124_v5, 16  ;;  %v2862_v43 = vrot.slane %v2752_v60, 1  ;;  %v2689_v35 = vpop.permute.xlu0 %2688  ;;  %v11805_v62 = vld [vmem:[#allocation2 + $0x38] ss:$0 sps:$4 sm:$0x11]  }
 0x11d   : >> { %2718 = vrot.lane.b32.xlu0 %v2588_v16, %s12193_s30  ;;  %v2018_v21 = vor.u32 %v2017_v32, %v2014_v13  ;;  %2720 = vrot.lane.b32.xlu1 %v2591_v36, %s12193_s30  ;;  %v3325_v23 = vrot.slane %v3323_v38, 1  ;;  %v10459_v61 = vcombine.low %v13300_v63, %v11802_v0  ;;  %v2600_v17 = vshll.u32 %v11711_v10, 16  ;;  %v1055_v24 = vpop.permute.xlu1 %1054  ;;  %v11804_v63 = vld [vmem:[#allocation2 + $0x4c] sm:$0xf] }
 0x11e   : >> { %v1231_v52 = vrot.slane %v1229_v20, 1  ;;  %v2604_v34 = vshrl.u32 %v11711_v10, 16  ;;  %v2593_v45 = vshrl.u32 %v11712_v30, 16  ;;  %v2755_v25 = vsel %vm1096_vm12, %v11707_v46, %v2689_v35  ;;  %v13343_v0 = vld [vmem:[#allocation2 + $0xb0] ss:$0 sps:$4 sm:$0x11]  }
 0x11f   : >> { %v2019_v19 = vsel %vm1929_vm13, %v2011_v7, %v2018_v21  ;;  %v3326_v56 = vor.u32 %v3325_v23, %v3321_v15  ;;  %v2595_v27 = vshll.u32 %v11712_v30, 16  ;;  %v1126_v1 = vsel %vm1096_vm12, %v11803_v33, %v1055_v24 }
 0x120   : >> { %v1232_v41 = vor.u32 %v1231_v52, %v1227_v22  ;;  %v2863_v40 = vrot.slane %v2755_v25, 1  ;;  %v2602_v48 = vrot.slane %v2600_v17, 1  ;;  %4818 = vmatprep.mubr.bf16.mxu0 %v2019_v19  ;;  %v1233_v36 = vshll.u32 %v1126_v1, 16  ;;  %v3413_v47 = vpop.permute.xlu0 %3412  ;;  %v11720_v17 = vld [vmem:[#allocation2 + $0x2c] ss:$0 sps:$4 sm:$0x11]  }
 0x121   : >> { %3446 = vrot.lane.b32.xlu1 %v3332_v31, %s12193_s30  ;;  %v3331_v58 = vsel %vm807_vm11, %v3326_v56, %v3330_v28  ;;  %v2597_v8 = vrot.slane %v2595_v27, 1  ;;  %v3346_v37 = vshrl.u32 %v13315_v49, 16  ;;  %v10498_v11 = vcombine.low %v2999_v54, %v2974_v26  ;;  %v3415_v14 = vpop.permute.xlu1 %3414  ;;  %v2949_v1 = vld [vmem:[#allocation2 + $0x3c] sm:$0xf] }
 0x122   : >> { %v2864_v39 = vsel %vm2858_vm14, %v2862_v43, %v2863_v40  ;;  %3444 = vrot.lane.b32.xlu0 %v3331_v58, %s12193_s30  ;;  %v2606_v57 = vor.u32 %v2604_v34, %v2602_v48  ;;  %v3342_v44 = vshll.u32 %v13315_v49, 16  ;;  %v1235_v42 = vrot.slane %v1233_v36, 1  ;;  %v2977_v34 = vld [vmem:[#allocation2 + $0xac] sm:$0xf] }
 0x123   : >> { %v3480_v31 = vsel %vm1096_vm12, %v10459_v61, %v3413_v47  ;;  %v2598_v59 = vor.u32 %v2597_v8, %v2593_v45  ;;  %v10307_v10 = vcombine.low %v13319_v4, %v11804_v63  ;;  %4948 = vmatmul.mubr.bf16.gmra.mrb[20].mxu1 %v2864_v39  ;;  %v3482_v51 = vsel %vm1096_vm12, %v11805_v62, %v3415_v14  ;;  %v3000_v45 = vld [vmem:[#allocation2 + $0xa8] sm:$0xe] }
 0x124   : >> { %v3568_v16 = vshrl.u32 %v3480_v31, 16  ;;  %v3570_v46 = vshll.u32 %v3480_v31, 16  ;;  %v3335_v15 = vshrl.u32 %v10498_v11, 16  ;;  %v1236_v30 = vsel %vm807_vm11, %v1232_v41, %v1235_v42  ;;  %v1794_v13 = vpop.permute.xlu0 %1793 }
 0x125   : >> { %v3574_v2 = vshll.u32 %v3482_v51, 16  ;;  %2724 = vrot.lane.b32.xlu1 %v2606_v57, %s12193_s30  ;;  %v2603_v29 = vsel %vm807_vm11, %v2598_v59, %v2602_v48  ;;  %v3337_v6 = vshll.u32 %v10498_v11, 16  ;;  %v3344_v32 = vrot.slane %v3342_v44, 1  ;;  %4819 = vmatmul.mubr.bf16.gmra.mrb[20].mxu0 %v1236_v30  ;;  %v1796_v7 = vpop.permute.xlu1 %1795  ;;  %v11806_v48 = vld [vmem:[#allocation2 + $0x24] sm:$0xfe]  }
 0x126   : >> { %v3572_v38 = vrot.slane %v3570_v46, 1  ;;  %2722 = vrot.lane.b32.xlu0 %v2603_v29, %s12193_s30  ;;  %v2615_v55 = vshll.u32 %v13330_v12, 16  ;;  %v2619_v5 = vshrl.u32 %v13330_v12, 16  ;;  %v1871_v18 = vsel %vm1096_vm12, %v11714_v53, %v1794_v13  ;;  %v11725_v51 = vld [vmem:[#allocation2 + $0x9c] sm:$0xfe]  }
 0x127   : >> { %v3576_v28 = vrot.slane %v3574_v2, 1  ;;  %v3339_v60 = vrot.slane %v3337_v6, 1  ;;  %v2608_v22 = vshrl.u32 %v11719_v9, 16  ;;  %v1874_v21 = vsel %vm1096_vm12, %v11713_v3, %v1796_v7  ;;  %v11724_v3 = vld [vmem:[#allocation2 + $0xa4] ss:$0 sps:$4 sm:$0x33]  }
 0x128   : >> { %v3573_v20 = vor.u32 %v3572_v38, %v3568_v16  ;;  %v2020_v43 = vshrl.u32 %v1871_v18, 16  ;;  %v2023_v23 = vshll.u32 %v1871_v18, 16  ;;  %v2027_v61 = vshrl.u32 %v1874_v21, 16  ;;  %v1057_v25 = vpop.permute.xlu0 %1056  ;;  %v11808_v46 = vld [vmem:[#allocation2 + $0x50] ss:$0 sps:$4 sm:$0x11]  }
 0x129   : >> { %v2030_v49 = vshll.u32 %v1874_v21, 16  ;;  %3450 = vrot.lane.b32.xlu1 %v3346_v37, %s12193_s30  ;;  %v3340_v52 = vor.u32 %v3339_v60, %v3335_v15  ;;  %v2617_v35 = vrot.slane %v2615_v55, 1  ;;  %v2610_v56 = vshll.u32 %v11719_v9, 16  ;;  %v2691_v41 = vpop.permute.xlu1 %2690  ;;  %v11727_v13 = vld [vmem:[#allocation2 + $0x54] sm:$0xfe]  }
 0x12a   : >> { %v3577_v26 = vsel %vm807_vm11, %v3573_v20, %v3576_v28  ;;  %v2022_v19 = vrot.slane %v2020_v43, 1  ;;  %v2025_v24 = vrot.slane %v2023_v23, 2  ;;  %v2029_v27 = vrot.slane %v2027_v61, 1  ;;  %v11726_v60 = vld [vmem:[#allocation2 + $0x5c] ss:$0 sps:$4 sm:$0x33]  }
 0x12b   : >> { %v2032_v54 = vrot.slane %v2030_v49, 2  ;;  %v3345_v4 = vsel %vm807_vm11, %v3340_v52, %v3344_v32  ;;  %v1129_v33 = vsel %vm1096_vm12, %v10307_v10, %v1057_v25  ;;  %4955 = vmatprep.mubr.bf16.mxu1 %v3577_v26  ;;  %v2757_v36 = vsel %vm1096_vm12, %v11806_v48, %v2691_v41  ;;  %v11807_v10 = vld [vmem:[#allocation2 + $0x40] sm:$0xf]  ;;  %v2980_v32 = vld [vmem:[#allocation2 + $0xb8] sm:$0xf] }
 0x12c   : >> { %v2026_v40 = vor.u32 %v2025_v24, %v2022_v19  ;;  %3448 = vrot.lane.b32.xlu0 %v3345_v4, %s12193_s30  ;;  %v1237_v58 = vshrl.u32 %v1129_v33, 16  ;;  %v1239_v8 = vshll.u32 %v1129_v33, 16  ;;  %v2865_v39 = vrot.slane %v2757_v36, 1  ;;  %v2693_v44 = vpop.permute.xlu0 %2692  ;;  %v3001_v61 = vld [vmem:[#allocation2 + $0xb4] sm:$0xe] }
 0x12d   : >> { %v2033_v37 = vor.u32 %v2032_v54, %v2029_v27  ;;  %v2621_v47 = vor.u32 %v2619_v5, %v2617_v35  ;;  %v2612_v57 = vrot.slane %v2610_v56, 1  ;;  %v3360_v12 = vshrl.u32 %v13343_v0, 16  ;;  %v1059_v53 = vpop.permute.xlu1 %1058  ;;  %v11809_v49 = vld [vmem:[#allocation2 + $0x44] ss:$0 sps:$4 sm:$0x11]  }
 0x12e   : >> { %v1241_v11 = vrot.slane %v1239_v8, 1  ;;  %v10499_v42 = vcombine.low %v3000_v45, %v2977_v34  ;;  %v3356_v14 = vshll.u32 %v13343_v0, 16  ;;  %v2760_v63 = vsel %vm1096_vm12, %v11720_v17, %v2693_v44  ;;  %v588_v36 = vld [vmem:[#allocation2 + $0x54] sm:$0xf] }
 0x12f   : >> { %v2034_v31 = vsel %vm1929_vm13, %v2026_v40, %v2033_v37  ;;  %2728 = vrot.lane.b32.xlu1 %v2621_v47, %s12193_s30  ;;  %v2613_v59 = vor.u32 %v2612_v57, %v2608_v22  ;;  %v10461_v62 = vcombine.low %v2949_v1, %v11807_v10  ;;  %v1131_v15 = vsel %vm1096_vm12, %v11808_v46, %v1059_v53  ;;  %v13360_v22 = vld [vmem:[#allocation2 + $0xbc] ss:$0 sps:$4 sm:$0x11]   ;;  %v11732_v47 = vld [vmem:[#allocation2 + $0xb0] ss:$0 sps:$4 sm:$0x33]  }
 0x130   : >> { %v1242_v16 = vor.u32 %v1241_v11, %v1237_v58  ;;  %v2866_v30 = vrot.slane %v2760_v63, 1  ;;  %v3349_v2 = vshrl.u32 %v10499_v42, 16  ;;  %4826 = vmatprep.mubr.bf16.mxu0 %v2034_v31  ;;  %v1243_v6 = vshll.u32 %v1131_v15, 16  ;;  %v3417_v5 = vpop.permute.xlu0 %3416  ;;  %v11733_v53 = vld [vmem:[#allocation2 + $0xa8] sm:$0xfe]  }
 0x131   : >> { %v2618_v29 = vsel %vm807_vm11, %v2613_v59, %v2617_v35  ;;  %v3351_v9 = vshll.u32 %v10499_v42, 16  ;;  %v3358_v38 = vrot.slane %v3356_v14, 1  ;;  %v2630_v28 = vshll.u32 %v11724_v3, 16  ;;  %v3419_v43 = vpop.permute.xlu1 %3418  ;;  %v11734_v15 = vld [vmem:[#allocation2 + $0x38] ss:$0 sps:$4 sm:$0x11]  }
 0x132   : >> { %2726 = vrot.lane.b32.xlu0 %v2618_v29, %s12193_s30  ;;  %v2867_v55 = vsel %vm2858_vm14, %v2865_v39, %v2866_v30  ;;  %v2634_v7 = vshrl.u32 %v11724_v3, 16  ;;  %v2623_v18 = vshrl.u32 %v11725_v51, 16  ;;  %v1245_v20 = vrot.slane %v1243_v6, 1  ;;  %v11811_v29 = vld [vmem:[#allocation2 + $0x30] sm:$0xfe]  }
 0x133   : >> { %3454 = vrot.lane.b32.xlu1 %v3360_v12, %s12193_s30  ;;  %v3353_v21 = vrot.slane %v3351_v9, 1  ;;  %v3485_v23 = vsel %vm1096_vm12, %v10461_v62, %v3417_v5  ;;  %v2625_v0 = vshll.u32 %v11725_v51, 16  ;;  %4956 = vmatmul.mubr.bf16.gmra.mrb[24].mxu1 %v2867_v55  ;;  %v3487_v52 = vsel %vm1096_vm12, %v11809_v49, %v3419_v43 }
 0x134   : >> { %v3578_v35 = vshrl.u32 %v3485_v23, 16  ;;  %v3580_v17 = vshll.u32 %v3485_v23, 16  ;;  %v2632_v34 = vrot.slane %v2630_v28, 1  ;;  %v1246_v45 = vsel %vm807_vm11, %v1242_v16, %v1245_v20  ;;  %v1798_v27 = vpop.permute.xlu0 %1797  ;;  %v11810_v16 = vld [vmem:[#allocation2 + $0x58] sm:$0xf] }
 0x135   : >> { %v3354_v26 = vor.u32 %v3353_v21, %v3349_v2  ;;  %v3584_v19 = vshll.u32 %v3487_v52, 16  ;;  %v2627_v24 = vrot.slane %v2625_v0, 1  ;;  %v3374_v54 = vshrl.u32 %v13360_v22, 16  ;;  %4827 = vmatmul.mubr.bf16.gmra.mrb[24].mxu0 %v1246_v45  ;;  %v1800_v40 = vpop.permute.xlu1 %1799  ;;  %v2983_v28 = vld [vmem:[#allocation2 + $0xc4] sm:$0xf] }
 0x136   : >> { %v3582_v25 = vrot.slane %v3580_v17, 1  ;;  %v2636_v56 = vor.u32 %v2634_v7, %v2632_v34  ;;  %v10500_v4 = vcombine.low %v3001_v61, %v2980_v32  ;;  %v1877_v48 = vsel %vm1096_vm12, %v11727_v13, %v1798_v27  ;;  %v3002_v21 = vld [vmem:[#allocation2 + $0xc0] sm:$0xe]  ;;  %v11812_v17 = vld [vmem:[#allocation2 + $0x5c] ss:$0 sps:$4 sm:$0x11]  }
 0x137   : >> { %v3359_v41 = vsel %vm807_vm11, %v3354_v26, %v3358_v38  ;;  %v3586_v33 = vrot.slane %v3584_v19, 1  ;;  %v2628_v1 = vor.u32 %v2627_v24, %v2623_v18  ;;  %v1880_v8 = vsel %vm1096_vm12, %v11726_v60, %v1800_v40  ;;  %v11735_v38 = vld [vmem:[#allocation2 + $0xc8] ss:$0 sps:$4 sm:$0x11]  }
 0x138   : >> { %3452 = vrot.lane.b32.xlu0 %v3359_v41, %s12193_s30  ;;  %v3583_v58 = vor.u32 %v3582_v25, %v3578_v35  ;;  %2732 = vrot.lane.b32.xlu1 %v2636_v56, %s12193_s30  ;;  %v2035_v37 = vshrl.u32 %v1877_v48, 16  ;;  %v2038_v39 = vshll.u32 %v1877_v48, 16  ;;  %v2042_v3 = vshrl.u32 %v1880_v8, 16  ;;  %v1061_v59 = vpop.permute.xlu0 %1060  ;;  %v2952_v26 = vld [vmem:[#allocation2 + $0x48] sm:$0xf] }
 0x139   : >> { %v2633_v57 = vsel %vm807_vm11, %v2628_v1, %v2632_v34  ;;  %v2045_v11 = vshll.u32 %v1880_v8, 16  ;;  %v3363_v44 = vshrl.u32 %v10500_v4, 16  ;;  %v3365_v31 = vshll.u32 %v10500_v4, 16  ;;  %v2695_v51 = vpop.permute.xlu1 %2694  ;;  %v11738_v27 = vld [vmem:[#allocation2 + $0xbc] ss:$0 sps:$4 sm:$0x33]  }
 0x13a   : >> { %v3587_v12 = vsel %vm807_vm11, %v3583_v58, %v3586_v33  ;;  %v2037_v42 = vrot.slane %v2035_v37, 1  ;;  %v2040_v14 = vrot.slane %v2038_v39, 2  ;;  %v2044_v63 = vrot.slane %v2042_v3, 1  ;;  %v11813_v8 = vld [vmem:[#allocation2 + $0x4c] sm:$0xf] }
 0x13b   : >> { %v2047_v10 = vrot.slane %v2045_v11, 2  ;;  %v3370_v62 = vshll.u32 %v13360_v22, 16  ;;  %v10309_v46 = vcombine.low %v588_v36, %v11810_v16  ;;  %4963 = vmatprep.mubr.bf16.mxu1 %v3587_v12  ;;  %v3367_v2 = vrot.slane %v3365_v31, 1  ;;  %v11739_v39 = vld [vmem:[#allocation2 + $0xb4] sm:$0xfe]  }
 0x13c   : >> { %2730 = vrot.lane.b32.xlu0 %v2633_v57, %s12193_s30  ;;  %v2041_v30 = vor.u32 %v2040_v14, %v2037_v42  ;;  %3458 = vrot.lane.b32.xlu1 %v3374_v54, %s12193_s30  ;;  %v2762_v6 = vsel %vm1096_vm12, %v11811_v29, %v2695_v51  ;;  %v2645_v9 = vshll.u32 %v11732_v47, 16  ;;  %v2697_v20 = vpop.permute.xlu0 %2696  ;;  %v2649_v23 = vshrl.u32 %v11732_v47, 16  ;;  %v11740_v47 = vld [vmem:[#allocation2 + $0x68] ss:$0 sps:$4 sm:$0x33]  }
 0x13d   : >> { %v2048_v13 = vor.u32 %v2047_v10, %v2044_v63  ;;  %v3372_v32 = vrot.slane %v3370_v62, 1  ;;  %v2868_v55 = vrot.slane %v2762_v6, 1  ;;  %v1134_v5 = vsel %vm1096_vm12, %v10309_v46, %v1061_v59  ;;  %v1063_v49 = vpop.permute.xlu1 %1062  ;;  %v2986_v6 = vld [vmem:[#allocation2 + $0xd0] sm:$0xf] }
 0x13e   : >> { %v3368_v7 = vor.u32 %v3367_v2, %v3363_v44  ;;  %v1247_v18 = vshrl.u32 %v1134_v5, 16  ;;  %v1249_v60 = vshll.u32 %v1134_v5, 16  ;;  %v2647_v22 = vrot.slane %v2645_v9, 1  ;;  %v11814_v44 = vld [vmem:[#allocation2 + $0x50] ss:$0 sps:$4 sm:$0x11]  }
 0x13f   : >> { %v2049_v43 = vsel %vm1929_vm13, %v2041_v30, %v2048_v13  ;;  %v2638_v0 = vshrl.u32 %v11733_v53, 16  ;;  %v2640_v61 = vshll.u32 %v11733_v53, 16  ;;  %v1136_v34 = vsel %vm1096_vm12, %v11812_v17, %v1063_v49  ;;  %v11741_v53 = vld [vmem:[#allocation2 + $0x60] sm:$0xfe]   ;;  %v3003_v9 = vld [vmem:[#allocation2 + $0xcc] sm:$0xe] }
 0x140   : >> { %v3373_v52 = vsel %vm807_vm11, %v3368_v7, %v3372_v32  ;;  %v1251_v35 = vrot.slane %v1249_v60, 1  ;;  %v2765_v45 = vsel %vm1096_vm12, %v11734_v15, %v2697_v20  ;;  %4834 = vmatprep.mubr.bf16.mxu0 %v2049_v43  ;;  %v2651_v19 = vor.u32 %v2649_v23, %v2647_v22  ;;  %v3421_v1 = vpop.permute.xlu0 %3420  ;;  %v11742_v5 = vld [vmem:[#allocation2 + $0xd4] ss:$0 sps:$4 sm:$0x11]  }
 0x141   : >> { %3456 = vrot.lane.b32.xlu0 %v3373_v52, %s12193_s30  ;;  %v2642_v24 = vrot.slane %v2640_v61, 1  ;;  %v1253_v25 = vshll.u32 %v1136_v34, 16  ;;  %v2869_v56 = vrot.slane %v2765_v45, 1  ;;  %v3388_v4 = vshrl.u32 %v11735_v38, 16  ;;  %v3423_v58 = vpop.permute.xlu1 %3422 }
 0x142   : >> { %v1252_v54 = vor.u32 %v1251_v35, %v1247_v18  ;;  %v10501_v41 = vcombine.low %v3002_v21, %v2983_v28  ;;  %v3384_v33 = vshll.u32 %v11735_v38, 16  ;;  %2736 = vrot.lane.b32.xlu1 %v2651_v19, %s12193_s30  ;;  %v10463_v37 = vcombine.low %v2952_v26, %v11813_v8  ;;  %v2955_v8 = vld [vmem:[#allocation2 + $0x54] sm:$0xf] }
 0x143   : >> { %v2643_v40 = vor.u32 %v2642_v24, %v2638_v0  ;;  %v1255_v48 = vrot.slane %v1253_v25, 1  ;;  %v2870_v36 = vsel %vm2858_vm14, %v2868_v55, %v2869_v56  ;;  %v3492_v12 = vsel %vm1096_vm12, %v11814_v44, %v3423_v58  ;;  %v11745_v0 = vld [vmem:[#allocation2 + $0xc8] ss:$0 sps:$4 sm:$0x33]   ;;  %v591_v24 = vld [vmem:[#allocation2 + $0x60] sm:$0xf] }
 0x144   : >> { %v3377_v57 = vshrl.u32 %v10501_v41, 16  ;;  %v3379_v3 = vshll.u32 %v10501_v41, 16  ;;  %v3386_v11 = vrot.slane %v3384_v33, 1  ;;  %4964 = vmatmul.mubr.bf16.gmra.mrb[28].mxu1 %v2870_v36  ;;  %v3594_v31 = vshll.u32 %v3492_v12, 16  ;;  %v11746_v25 = vld [vmem:[#allocation2 + $0xc0] sm:$0xfe]  }
 0x145   : >> { %v2648_v42 = vsel %vm807_vm11, %v2643_v40, %v2647_v22  ;;  %v1256_v14 = vsel %vm807_vm11, %v1252_v54, %v1255_v48  ;;  %v3490_v59 = vsel %vm1096_vm12, %v10463_v37, %v3421_v1  ;;  %v2660_v51 = vshll.u32 %v11738_v27, 16  ;;  %v1804_v29 = vpop.permute.xlu1 %1803  ;;  %v11747_v41 = vld [vmem:[#allocation2 + $0x44] ss:$0 sps:$4 sm:$0x11]   ;;  %v11815_v48 = vld [vmem:[#allocation2 + $0x3c] sm:$0xfe]  }
 0x146   : >> { %2734 = vrot.lane.b32.xlu0 %v2648_v42, %s12193_s30  ;;  %v3381_v63 = vrot.slane %v3379_v3, 1  ;;  %v3588_v10 = vshrl.u32 %v3490_v59, 16  ;;  %v3590_v62 = vshll.u32 %v3490_v59, 16  ;;  %v1802_v16 = vpop.permute.xlu0 %1801  ;;  %4835 = vmatmul.mubr.bf16.gmra.mrb[28].mxu0 %v1256_v14  ;;  %v3596_v46 = vrot.slane %v3594_v31, 1 }
 0x147   : >> { %3462 = vrot.lane.b32.xlu1 %v3388_v4, %s12193_s30  ;;  %v2664_v15 = vshrl.u32 %v11738_v27, 16  ;;  %v2653_v30 = vshrl.u32 %v11739_v39, 16  ;;  %v2655_v2 = vshll.u32 %v11739_v39, 16  ;;  %v2662_v32 = vrot.slane %v2660_v51, 1 }
 0x148   : >> { %v3382_v38 = vor.u32 %v3381_v63, %v3377_v57  ;;  %v3592_v13 = vrot.slane %v3590_v62, 1  ;;  %v1886_v55 = vsel %vm1096_vm12, %v11740_v47, %v1804_v29  ;;  %v1883_v60 = vsel %vm1096_vm12, %v11741_v53, %v1802_v16  ;;  %v11816_v47 = vld [vmem:[#allocation2 + $0x64] sm:$0xf]  ;;  %v11817_v63 = vld [vmem:[#allocation2 + $0x68] ss:$0 sps:$4 sm:$0x11]  }
 0x149   : >> { %v2657_v28 = vrot.slane %v2655_v2, 1  ;;  %v2057_v7 = vshrl.u32 %v1886_v55, 16  ;;  %v2060_v18 = vshll.u32 %v1886_v55, 16  ;;  %v2666_v21 = vor.u32 %v2664_v15, %v2662_v32  ;;  %v2699_v17 = vpop.permute.xlu1 %2698 }
 0x14a   : >> { %v3387_v22 = vsel %vm807_vm11, %v3382_v38, %v3386_v11  ;;  %v3593_v20 = vor.u32 %v3592_v13, %v3588_v10  ;;  %v2050_v43 = vshrl.u32 %v1883_v60, 16  ;;  %v1065_v23 = vpop.permute.xlu0 %1064  ;;  %v2053_v35 = vshll.u32 %v1883_v60, 16  ;;  %v11818_v38 = vld [vmem:[#allocation2 + $0x58] sm:$0xf] }
 0x14b   : >> { %3460 = vrot.lane.b32.xlu0 %v3387_v22, %s12193_s30  ;;  %v2658_v61 = vor.u32 %v2657_v28, %v2653_v30  ;;  %v2059_v49 = vrot.slane %v2057_v7, 1  ;;  %v2062_v52 = vrot.slane %v2060_v18, 2  ;;  %2740 = vrot.lane.b32.xlu1 %v2666_v21, %s12193_s30  ;;  %v10502_v26 = vcombine.low %v3003_v9, %v2986_v6  ;;  %v11750_v30 = vld [vmem:[#allocation2 + $0x74] ss:$0 sps:$4 sm:$0x33]  }
 0x14c   : >> { %v3597_v34 = vsel %vm807_vm11, %v3593_v20, %v3596_v46  ;;  %v2052_v45 = vrot.slane %v2050_v43, 1  ;;  %v3398_v19 = vshll.u32 %v11742_v5, 16  ;;  %v2055_v54 = vrot.slane %v2053_v35, 2  ;;  %v594_v18 = vld [vmem:[#allocation2 + $0x6c] sm:$0xf] }
 0x14d   : >> { %v2663_v56 = vsel %vm807_vm11, %v2658_v61, %v2662_v32  ;;  %v2063_v27 = vor.u32 %v2062_v52, %v2059_v49  ;;  %v3402_v4 = vshrl.u32 %v11742_v5, 16  ;;  %4971 = vmatprep.mubr.bf16.mxu1 %v3597_v34  ;;  %v3391_v33 = vshrl.u32 %v10502_v26, 16  ;;  %v11751_v32 = vld [vmem:[#allocation2 + $0x6c] sm:$0xfe]  }
 0x14e   : >> { %v3393_v1 = vshll.u32 %v10502_v26, 16  ;;  %v3400_v40 = vrot.slane %v3398_v19, 1  ;;  %v2767_v36 = vsel %vm1096_vm12, %v11815_v48, %v2699_v17  ;;  %v2701_v58 = vpop.permute.xlu0 %2700  ;;  %v2056_v37 = vor.u32 %v2055_v54, %v2052_v45  ;;  %v11819_v22 = vld [vmem:[#allocation2 + $0x5c] ss:$0 sps:$4 sm:$0x11]  }
 0x14f   : >> { %2738 = vrot.lane.b32.xlu0 %v2663_v56, %s12193_s30  ;;  %v2871_v39 = vrot.slane %v2767_v36, 1  ;;  %v10311_v57 = vcombine.low %v591_v24, %v11816_v47  ;;  %v2675_v3 = vshll.u32 %v11745_v0, 16  ;;  %v1067_v11 = vpop.permute.xlu1 %1066  ;;  %3466 = vrot.lane.b32.xlu1 %v3402_v4, %s12193_s30  ;;  %v2679_v12 = vshrl.u32 %v11745_v0, 16  ;;  %v11820_v45 = vld [vmem:[#allocation2 + $0x70] sm:$0xf] }
 0x150   : >> { %v3395_v44 = vrot.slane %v3393_v1, 1  ;;  %v2668_v42 = vshrl.u32 %v11746_v25, 16  ;;  %v2670_v14 = vshll.u32 %v11746_v25, 16  ;;  %v2064_v31 = vsel %vm1929_vm13, %v2056_v37, %v2063_v27  ;;  %v11753_v37 = vld [vmem:[#allocation2 + $0x50] ss:$0 sps:$4 sm:$0x11]  }
 0x151   : >> { %v1139_v59 = vsel %vm1096_vm12, %v10311_v57, %v1065_v23  ;;  %v2677_v53 = vrot.slane %v2675_v3, 1  ;;  %v1141_v10 = vsel %vm1096_vm12, %v11817_v63, %v1067_v11  ;;  %4842 = vmatprep.mubr.bf16.mxu0 %v2064_v31  ;;  %v2770_v6 = vsel %vm1096_vm12, %v11747_v41, %v2701_v58  ;;  %v2958_v3 = vld [vmem:[#allocation2 + $0x60] sm:$0xf]  ;;  %v13424_v63 = vld [vmem:[#allocation2 + $0x84] sm:$0xf] }
 0x152   : >> { %v3396_v62 = vor.u32 %v3395_v44, %v3391_v33  ;;  %v1257_v51 = vshrl.u32 %v1139_v59, 16  ;;  %v1259_v16 = vshll.u32 %v1139_v59, 16  ;;  %v2672_v46 = vrot.slane %v2670_v14, 1  ;;  %v3425_v15 = vpop.permute.xlu0 %3424 }
 0x153   : >> { %v2681_v2 = vor.u32 %v2679_v12, %v2677_v53  ;;  %v1263_v29 = vshll.u32 %v1141_v10, 16  ;;  %v3427_v9 = vpop.permute.xlu1 %3426  ;;  %v10465_v13 = vcombine.low %v2955_v8, %v11818_v38  ;;  %v2872_v7 = vrot.slane %v2770_v6, 1 }
 0x154   : >> { %v3401_v55 = vsel %vm807_vm11, %v3396_v62, %v3400_v40  ;;  %v1261_v5 = vrot.slane %v1259_v16, 1  ;;  %v2673_v28 = vor.u32 %v2672_v46, %v2668_v42  ;;  %v3497_v20 = vsel %vm1096_vm12, %v11819_v22, %v3427_v9  ;;  %v13420_v42 = vld [vmem:[#allocation2 + $0x78] sm:$0xf]  ;;  %v11822_v16 = vld [vmem:[#allocation2 + $0x64] sm:$0xf] }
 0x155   : >> { %3464 = vrot.lane.b32.xlu0 %v3401_v55, %s12193_s30  ;;  %2744 = vrot.lane.b32.xlu1 %v2681_v2, %s12193_s30  ;;  %v1265_v60 = vrot.slane %v1263_v29, 1  ;;  %v3495_v21 = vsel %vm1096_vm12, %v10465_v13, %v3425_v15  ;;  %v2873_v0 = vsel %vm2858_vm14, %v2871_v39, %v2872_v7  ;;  %v3604_v61 = vshll.u32 %v3497_v20, 16  ;;  %v11821_v39 = vld [vmem:[#allocation2 + $0x48] sm:$0xfe]   ;;  %v13428_v15 = vld [vmem:[#allocation2 + $0x78] sm:$0xf] }
 0x156   : >> { %v1262_v43 = vor.u32 %v1261_v5, %v1257_v51  ;;  %v2678_v23 = vsel %vm807_vm11, %v2673_v28, %v2677_v53  ;;  %v1806_v49 = vpop.permute.xlu0 %1805  ;;  %v3598_v52 = vshrl.u32 %v3495_v21, 16  ;;  %v3600_v35 = vshll.u32 %v3495_v21, 16  ;;  %4972 = vmatmul.mubr.bf16.gmra.mrb[32].mxu1 %v2873_v0  ;;  %v13422_v53 = vld [vmem:[#allocation2 + $0x6c] sm:$0xf]  ;;  %v13431_v9 = vld [vmem:[#allocation2 + $0x84] sm:$0xf] }
 0x157   : >> { %v1808_v17 = vpop.permute.xlu1 %1807  ;;  %v1889_v34 = vsel %vm1096_vm12, %v11751_v32, %v1806_v49  ;;  %v10313_v26 = vcombine.low %v594_v18, %v11820_v45  ;;  %v3606_v24 = vrot.slane %v3604_v61, 1  ;;  %v10467_v46 = vcombine.low %v2958_v3, %v11822_v16  ;;  %v11823_v2 = vld [vmem:[#allocation2 + $0x74] ss:$0 sps:$4 sm:$0x11]   ;;  %v11824_v32 = vld [vmem:[#allocation2 + $0x7c] sm:$0xf] }
 0x158   : >> { %v1266_v19 = vsel %vm807_vm11, %v1262_v43, %v1265_v60  ;;  %v1892_v25 = vsel %vm1096_vm12, %v11750_v30, %v1808_v17  ;;  %v2065_v56 = vshrl.u32 %v1889_v34, 16  ;;  %v3602_v27 = vrot.slane %v3600_v35, 1  ;;  %v11755_v7 = vld [vmem:[#allocation2 + $0x80] ss:$0 sps:$4 sm:$0x33]  }
 0x159   : >> { %2742 = vrot.lane.b32.xlu0 %v2678_v23, %s12193_s30  ;;  %v2072_v54 = vshrl.u32 %v1892_v25, 16  ;;  %v2075_v4 = vshll.u32 %v1892_v25, 16  ;;  %v2068_v41 = vshll.u32 %v1889_v34, 16  ;;  %4843 = vmatmul.mubr.bf16.gmra.mrb[32].mxu0 %v1266_v19  ;;  %v10315_v55 = vcombine.low %v13420_v42, %v11824_v32  ;;  %v11756_v18 = vld [vmem:[#allocation2 + $0x78] sm:$0xfe]  }
 0x15a   : >> { %v2067_v33 = vrot.slane %v2065_v56, 1  ;;  %v1069_v1 = vpop.permute.xlu0 %1068  ;;  %v3603_v40 = vor.u32 %v3602_v27, %v3598_v52  ;;  %v13435_v60 = vld [vmem:[#allocation2 + $0x70] sm:$0xf]  ;;  %v13439_v20 = vld [vmem:[#allocation2 + $0x88] sm:$0xf] }
 0x15b   : >> { %v2074_v48 = vrot.slane %v2072_v54, 1  ;;  %v2077_v36 = vrot.slane %v2075_v4, 2  ;;  %v2070_v58 = vrot.slane %v2068_v41, 2  ;;  %v2703_v8 = vpop.permute.xlu1 %2702  ;;  %v1144_v57 = vsel %vm1096_vm12, %v10313_v26, %v1069_v1  ;;  %v13443_v43 = vld [vmem:[#allocation2 + $0x7c] sm:$0xf] }
 0x15c   : >> { %v2772_v47 = vsel %vm1096_vm12, %v11821_v39, %v2703_v8  ;;  %v3607_v11 = vsel %vm807_vm11, %v3603_v40, %v3606_v24  ;;  %v1269_v31 = vshll.u32 %v1144_v57, 16  ;;  %v1267_v38 = vshrl.u32 %v1144_v57, 16  ;;  %v13448_v35 = vld [vmem:[#allocation2 + $0x88] sm:$0xf]  ;;  %v3740_v34 = vld [vmem:[#allocation2 + $0x18] sm:$0xe] }
 0x15d   : >> { %v2078_v44 = vor.u32 %v2077_v36, %v2074_v48  ;;  %v2071_v12 = vor.u32 %v2070_v58, %v2067_v33  ;;  %v2874_v14 = vrot.slane %v2772_v47, 1  ;;  %4979 = vmatprep.mubr.bf16.mxu1 %v3607_v11  ;;  %v10469_v22 = vcombine.low %v13422_v53, %v13435_v60  ;;  %v3741_v45 = vld [vmem:[#allocation2 + $0x1c] sm:$0xf]  ;;  %v11829_v26 = vld [vmem:[#allocation2 + $0x68] ss:$0 sps:$4 sm:$0x11]  }
 0x15e   : >> { %v2705_v59 = vpop.permute.xlu0 %2704  ;;  %v1271_v30 = vrot.slane %v1269_v31, 1  ;;  %v10317_v21 = vcombine.low %v13424_v63, %v13439_v20  ;;  %v10471_v23 = vcombine.low %v13428_v15, %v13443_v43  ;;  %v10473_v17 = vcombine.low %v13431_v9, %v13448_v35  ;;  %v13453_v56 = vld [vmem:[#allocation2 + $0x20] sm:$0x3]  ;;  %v13459_v42 = vld [vmem:[#allocation2 + $0x90] sm:$0xf] }
 0x15f   : >> { %v2079_v10 = vsel %vm1929_vm13, %v2071_v12, %v2078_v44  ;;  %v1071_v62 = vpop.permute.xlu1 %1070  ;;  %v2775_v51 = vsel %vm1096_vm12, %v11753_v37, %v2705_v59  ;;  %v3792_v4 = vshrl.u32 %v3740_v34, 16  ;;  %v3795_v1 = vshll.u32 %v3740_v34, 16  ;;  %v11759_v16 = vld [vmem:[#allocation2 + $0x5c] ss:$0 sps:$4 sm:$0x11]  }
 0x160   : >> { %v1146_v29 = vsel %vm1096_vm12, %v11823_v2, %v1071_v62  ;;  %v2875_v6 = vrot.slane %v2775_v51, 1  ;;  %4850 = vmatprep.mubr.bf16.mxu0 %v2079_v10  ;;  %v1272_v0 = vor.u32 %v1271_v30, %v1267_v38  ;;  %v3801_v40 = vshrl.u32 %v3741_v45, 16 }
 0x161   : >> { %v1273_v13 = vshll.u32 %v1146_v29, 16  ;;  %v3804_v48 = vshll.u32 %v3741_v45, 16  ;;  %v3794_v37 = vrot.slane %v3792_v4, 5  ;;  %v3811_v39 = vshrl.u32 %v13453_v56, 16 }
 0x162   : >> { %v2876_v5 = vsel %vm2858_vm14, %v2874_v14, %v2875_v6  ;;  %v3429_v28 = vpop.permute.xlu0 %3428  ;;  %v3797_v14 = vrot.slane %v3795_v1, 6  ;;  %v3803_v31 = vrot.slane %v3801_v40, 5  ;;  %v11832_v40 = vld [vmem:[#allocation2 + $0x80] ss:$0 sps:$4 sm:$0x11]  }
 0x163   : >> { %v1275_v61 = vrot.slane %v1273_v13, 1  ;;  %v3431_v49 = vpop.permute.xlu1 %3430  ;;  %v3500_v52 = vsel %vm1096_vm12, %v10467_v46, %v3429_v28  ;;  %4980 = vmatmul.mubr.bf16.gmra.mrb[36].mxu1 %v2876_v5  ;;  %v3806_v46 = vrot.slane %v3804_v48, 6  ;;  %v3743_v13 = vld [vmem:[#allocation2 + $0x24] sm:$0xe]  ;;  %v11830_v5 = vld [vmem:[#allocation2 + $0x54] sm:$0xfe]  }
 0x164   : >> { %v3502_v19 = vsel %vm1096_vm12, %v11829_v26, %v3431_v49  ;;  %v3608_v24 = vshrl.u32 %v3500_v52, 16  ;;  %v3610_v25 = vshll.u32 %v3500_v52, 16  ;;  %v3798_v38 = vor.u32 %v3797_v14, %v3794_v37  ;;  %v3745_v37 = vld [vmem:[#allocation2 + $0x2c] sm:$0x3] }
 0x165   : >> { %v1276_v27 = vsel %vm807_vm11, %v1272_v0, %v1275_v61  ;;  %v3614_v54 = vshll.u32 %v3502_v19, 16  ;;  %v3807_v34 = vor.u32 %v3806_v46, %v3803_v31  ;;  %v3813_v19 = vrot.slane %v3811_v39, 5  ;;  %v11833_v46 = vld [vmem:[#allocation2 + $0x74] ss:$0 sps:$4 sm:$0x11]  }
 0x166   : >> { %v3612_v41 = vrot.slane %v3610_v25, 1  ;;  %4851 = vmatmul.mubr.bf16.gmra.mrb[36].mxu0 %v1276_v27  ;;  %v3799_v52 = vrot.slane %v3798_v38, 4  ;;  %v3744_v25 = vld [vmem:[#allocation2 + $0x28] sm:$0xf]  ;;  %v3820_v27 = vshrl.u32 %v3743_v13, 16 }
 0x167   : >> { %v1810_v33 = vpop.permute.xlu0 %1809  ;;  %v3616_v36 = vrot.slane %v3614_v54, 1  ;;  %v1812_v58 = vpop.permute.xlu1 %1811  ;;  %v3832_v31 = vshll.u32 %v3744_v25, 16 }
 0x168   : >> { %v1895_v8 = vsel %vm1096_vm12, %v11756_v18, %v1810_v33  ;;  %v3613_v47 = vor.u32 %v3612_v41, %v3608_v24  ;;  %v1898_v57 = vsel %vm1096_vm12, %v11755_v7, %v1812_v58  ;;  %v13464_v18 = vld [vmem:[#allocation2 + $0x94] sm:$0xf]  ;;  %v3814_v24 = vshll.u32 %v13453_v56, 16 }
 0x169   : >> { %v2080_v3 = vshrl.u32 %v1895_v8, 16  ;;  %v2083_v11 = vshll.u32 %v1895_v8, 16  ;;  %v2087_v44 = vshrl.u32 %v1898_v57, 16  ;;  %v2090_v12 = vshll.u32 %v1898_v57, 16 }
 0x16a   : >> { %v3617_v59 = vsel %vm807_vm11, %v3613_v47, %v3616_v36  ;;  %v10475_v0 = vcombine.low %v13459_v42, %v13464_v18  ;;  %v3808_v1 = vsel %vm13470_vm1, %v3799_v52, %v3807_v34  ;;  %v3809_v58 = vrot.slane %v3807_v34, 4 }
 0x16b   : >> { %v2082_v10 = vrot.slane %v2080_v3, 1  ;;  %v2085_v62 = vrot.slane %v2083_v11, 2  ;;  %v1073_v51 = vpop.permute.xlu0 %1072  ;;  %v2089_v30 = vrot.slane %v2087_v44, 1  ;;  %v2092_v2 = vrot.slane %v2090_v12, 2  ;;  %v2707_v29 = vpop.permute.xlu1 %2706  ;;  %4987 = vmatprep.mubr.bf16.mxu1 %v3617_v59  ;;  %v11762_v12 = vld [vmem:[#allocation2 + $0x84] sm:$0xfe]  }
 0x16c   : >> { %v1149_v6 = vsel %vm1096_vm12, %v10315_v55, %v1073_v51  ;;  %v2777_v28 = vsel %vm1096_vm12, %v11830_v5, %v2707_v29  ;;  %v3816_v8 = vrot.slane %v3814_v24, 6  ;;  %v3822_v39 = vrot.slane %v3820_v27, 5  ;;  %v11761_v29 = vld [vmem:[#allocation2 + $0x8c] ss:$0 sps:$4 sm:$0x33]  }
 0x16d   : >> { %v2086_v32 = vor.u32 %v2085_v62, %v2082_v10  ;;  %v1279_v7 = vshll.u32 %v1149_v6, 16  ;;  %v2093_v55 = vor.u32 %v2092_v2, %v2089_v30  ;;  %v1277_v49 = vshrl.u32 %v1149_v6, 16 }
 0x16e   : >> { %v2877_v4 = vrot.slane %v2777_v28, 1  ;;  %v3823_v47 = vshll.u32 %v3743_v13, 16  ;;  %v3829_v57 = vshrl.u32 %v3744_v25, 16  ;;  %v3817_v14 = vor.u32 %v3816_v8, %v3813_v19  ;;  %v3746_v19 = vld [vmem:[#allocation2 + $0x30] sm:$0xe] }
 0x16f   : >> { %v1281_v45 = vrot.slane %v1279_v7, 1  ;;  %v2709_v26 = vpop.permute.xlu0 %2708  ;;  %v2094_v54 = vsel %vm1929_vm13, %v2086_v32, %v2093_v55  ;;  %v1075_v41 = vpop.permute.xlu1 %1074  ;;  %v3834_v7 = vrot.slane %v3832_v31, 6  ;;  %v3842_v55 = vshll.u32 %v3745_v37, 16  ;;  %v11764_v8 = vld [vmem:[#allocation2 + $0x68] ss:$0 sps:$4 sm:$0x11]  }
 0x170   : >> { %v2780_v33 = vsel %vm1096_vm12, %v11759_v16, %v2709_v26  ;;  %v1151_v48 = vsel %vm1096_vm12, %v11832_v40, %v1075_v41  ;;  %4858 = vmatprep.mubr.bf16.mxu0 %v2094_v54  ;;  %v3825_v51 = vrot.slane %v3823_v47, 6  ;;  %v3839_v16 = vshrl.u32 %v3745_v37, 16 }
 0x171   : >> { %v2878_v36 = vrot.slane %v2780_v33, 1  ;;  %v1283_v56 = vshll.u32 %v1151_v48, 16  ;;  %v1282_v3 = vor.u32 %v1281_v45, %v1277_v49  ;;  %v3818_v6 = vsel %vm13470_vm1, %v3809_v58, %v3817_v14 }
 0x172   : >> { %v3831_v38 = vrot.slane %v3829_v57, 5  ;;  %v10503_v5 = vcombine.low %v3808_v1, %v3818_v6  ;;  %v3826_v28 = vor.u32 %v3825_v51, %v3822_v39  ;;  %v3841_v26 = vrot.slane %v3839_v16, 5 }
 0x173   : >> { %v2879_v11 = vsel %vm2858_vm14, %v2877_v4, %v2878_v36  ;;  %v3433_v44 = vpop.permute.xlu0 %3432  ;;  %v1285_v59 = vrot.slane %v1283_v56, 1  ;;  %v3435_v10 = vpop.permute.xlu1 %3434  ;;  %v3844_v1 = vrot.slane %v3842_v55, 6  ;;  %v3848_v37 = vshrl.u32 %v3746_v19, 16 }
 0x174   : >> { %v3505_v62 = vsel %vm1096_vm12, %v10469_v22, %v3433_v44  ;;  %4988 = vmatmul.mubr.bf16.gmra.mrb[40].mxu1 %v2879_v11  ;;  %v3507_v30 = vsel %vm1096_vm12, %v11833_v46, %v3435_v10  ;;  %4303 = vst.msk [vmem:[#allocation3 + $0x20] sm:$0xff] %vm1096_vm12, %v10503_v5  ;;  %v3827_v45 = vrot.slane %v3826_v28, 4  ;;  %v3835_v33 = vor.u32 %v3834_v7, %v3831_v38  ;;  %v3747_v11 = vld [vmem:[#allocation2 + $0x34] sm:$0xf]  ;;  %v3749_v5 = vld [vmem:[#allocation2 + $0x3c] sm:$0xe] }
 0x175   : >> { %v3620_v2 = vshll.u32 %v3505_v62, 16  ;;  %v1286_v13 = vsel %vm807_vm11, %v1282_v3, %v1285_v59  ;;  %v3624_v32 = vshll.u32 %v3507_v30, 16  ;;  %v3618_v53 = vshrl.u32 %v3505_v62, 16 }
 0x176   : >> { %4859 = vmatmul.mubr.bf16.gmra.mrb[40].mxu0 %v1286_v13  ;;  %v3836_v3 = vsel %vm13470_vm1, %v3827_v45, %v3835_v33  ;;  %v3837_v51 = vrot.slane %v3835_v33, 4  ;;  %v3845_v16 = vor.u32 %v3844_v1, %v3841_v26  ;;  %v3850_v63 = vrot.slane %v3848_v37, 5  ;;  %v3748_v13 = vld [vmem:[#allocation2 + $0x38] sm:$0x3] }
 0x177   : >> { %v3622_v60 = vrot.slane %v3620_v2, 1  ;;  %v1814_v22 = vpop.permute.xlu0 %1813  ;;  %v3626_v49 = vrot.slane %v3624_v32, 1  ;;  %v1816_v52 = vpop.permute.xlu1 %1815  ;;  %v3851_v20 = vshll.u32 %v3746_v19, 16  ;;  %v3860_v32 = vshll.u32 %v3747_v11, 16 }
 0x178   : >> { %v1901_v34 = vsel %vm1096_vm12, %v11762_v12, %v1814_v22  ;;  %v1904_v25 = vsel %vm1096_vm12, %v11761_v29, %v1816_v52  ;;  %v11834_v12 = vld [vmem:[#allocation2 + $0x60] sm:$0xfe]   ;;  %v3846_v38 = vsel %vm13470_vm1, %v3837_v51, %v3845_v16  ;;  %v3867_v19 = vshrl.u32 %v3748_v13, 16 }
 0x179   : >> { %v3623_v24 = vor.u32 %v3622_v60, %v3618_v53  ;;  %v2095_v27 = vshrl.u32 %v1901_v34, 16  ;;  %v2098_v54 = vshll.u32 %v1901_v34, 16  ;;  %v2102_v4 = vshrl.u32 %v1904_v25, 16  ;;  %v11835_v53 = vld [vmem:[#allocation2 + $0x8c] ss:$0 sps:$4 sm:$0x11]  }
 0x17a   : >> { %v2105_v41 = vshll.u32 %v1904_v25, 16  ;;  %v10504_v7 = vcombine.low %v3836_v3, %v3846_v38  ;;  %v3862_v34 = vrot.slane %v3860_v32, 6  ;;  %v3876_v25 = vshrl.u32 %v3749_v5, 16 }
 0x17b   : >> { %v3627_v40 = vsel %vm807_vm11, %v3623_v24, %v3626_v49  ;;  %v2097_v48 = vrot.slane %v2095_v27, 1  ;;  %v2100_v36 = vrot.slane %v2098_v54, 2  ;;  %v1077_v58 = vpop.permute.xlu0 %1076  ;;  %v2104_v56 = vrot.slane %v2102_v4, 1  ;;  %v2711_v47 = vpop.permute.xlu1 %2710 }
 0x17c   : >> { %v2107_v39 = vrot.slane %v2105_v41, 2  ;;  %v1154_v57 = vsel %vm1096_vm12, %v10317_v21, %v1077_v58  ;;  %4995 = vmatprep.mubr.bf16.mxu1 %v3627_v40  ;;  %v2782_v14 = vsel %vm1096_vm12, %v11834_v12, %v2711_v47  ;;  %v3857_v21 = vshrl.u32 %v3747_v11, 16  ;;  %4304 = vst.msk [vmem:[#allocation3 + $0x48] sm:$0xff] %vm1096_vm12, %v10504_v7  ;;  %v11767_v41 = vld [vmem:[#allocation2 + $0x74] ss:$0 sps:$4 sm:$0x11]  }
 0x17d   : >> { %v2101_v44 = vor.u32 %v2100_v36, %v2097_v48  ;;  %v1287_v31 = vshrl.u32 %v1154_v57, 16  ;;  %v1289_v59 = vshll.u32 %v1154_v57, 16  ;;  %v2880_v62 = vrot.slane %v2782_v14, 1  ;;  %v11836_v40 = vld [vmem:[#allocation2 + $0x80] ss:$0 sps:$4 sm:$0x11]  }
 0x17e   : >> { %v2108_v10 = vor.u32 %v2107_v39, %v2104_v56  ;;  %v3853_v49 = vrot.slane %v3851_v20, 6  ;;  %v3859_v52 = vrot.slane %v3857_v21, 5  ;;  %v3870_v24 = vshll.u32 %v3748_v13, 16  ;;  %v3750_v56 = vld [vmem:[#allocation2 + $0x40] sm:$0xf] }
 0x17f   : >> { %v1291_v46 = vrot.slane %v1289_v59, 1  ;;  %v2713_v30 = vpop.permute.xlu0 %2712  ;;  %v1079_v29 = vpop.permute.xlu1 %1078  ;;  %v3869_v37 = vrot.slane %v3867_v19, 5  ;;  %v3878_v11 = vrot.slane %v3876_v25, 5  ;;  %v3885_v51 = vshrl.u32 %v3750_v56, 16  ;;  %v13518_v21 = vld [vmem:[#allocation2 + $0x9c] sm:$0xf] }
 0x180   : >> { %v2109_v2 = vsel %vm1929_vm13, %v2101_v44, %v2108_v10  ;;  %v2785_v6 = vsel %vm1096_vm12, %v11764_v8, %v2713_v30  ;;  %v1156_v60 = vsel %vm1096_vm12, %v11835_v53, %v1079_v29  ;;  %v3854_v33 = vor.u32 %v3853_v49, %v3850_v63  ;;  %v4323_v8 = vld [vmem:[#allocation3 + $0x20] sm:$0xff]  ;;  %v11769_v19 = vld [vmem:[#allocation2 + $0x80] ss:$0 sps:$4 sm:$0x11]  }
 0x181   : >> { %v1292_v28 = vor.u32 %v1291_v46, %v1287_v31  ;;  %v2881_v22 = vrot.slane %v2785_v6, 1  ;;  %4866 = vmatprep.mubr.bf16.mxu0 %v2109_v2  ;;  %v1293_v55 = vshll.u32 %v1156_v60, 16  ;;  %v3863_v1 = vor.u32 %v3862_v34, %v3859_v52  ;;  %v11837_v31 = vld [vmem:[#allocation2 + $0x6c] sm:$0xfe]   ;;  %v3752_v52 = vld [vmem:[#allocation2 + $0x48] sm:$0xe] }
 0x182   : >> { %v3855_v57 = vrot.slane %v3854_v33, 4  ;;  %v3879_v44 = vshll.u32 %v3749_v5, 16  ;;  %v3887_v29 = vrot.slane %v3885_v51, 5  ;;  %v3888_v6 = vshll.u32 %v3750_v56, 16  ;;  %v3753_v56 = vld [vmem:[#allocation2 + $0x4c] sm:$0xf] }
 0x183   : >> { %v2882_v45 = vsel %vm2858_vm14, %v2880_v62, %v2881_v22  ;;  %v3437_v26 = vpop.permute.xlu0 %3436  ;;  %v1295_v27 = vrot.slane %v1293_v55, 1  ;;  %v3439_v54 = vpop.permute.xlu1 %3438  ;;  %v3865_v3 = vrot.slane %v3863_v1, 4  ;;  %v3751_v62 = vld [vmem:[#allocation2 + $0x44] sm:$0x3] }
 0x184   : >> { %v3510_v4 = vsel %vm1096_vm12, %v10471_v23, %v3437_v26  ;;  %4996 = vmatmul.mubr.bf16.gmra.mrb[44].mxu1 %v2882_v45  ;;  %v3512_v48 = vsel %vm1096_vm12, %v11836_v40, %v3439_v54  ;;  %v3872_v23 = vrot.slane %v3870_v24, 6  ;;  %v3864_v10 = vsel %vm13470_vm1, %v3855_v57, %v3863_v1  ;;  %v4328_v7 = vld [vmem:[#allocation3 + $0x48] sm:$0xff]  ;;  %v11838_v34 = vld [vmem:[#allocation2 + $0x8c] ss:$0 sps:$4 sm:$0x11]  }
 0x185   : >> { %v3628_v36 = vshrl.u32 %v3510_v4, 16  ;;  %v3630_v58 = vshll.u32 %v3510_v4, 16  ;;  %v1296_v39 = vsel %vm807_vm11, %v1292_v28, %v1295_v27  ;;  %v3634_v47 = vshll.u32 %v3512_v48, 16  ;;  %v13529_v24 = vld [vmem:[#allocation2 + $0xa0] sm:$0xf] }
 0x186   : >> { %4867 = vmatmul.mubr.bf16.gmra.mrb[44].mxu0 %v1296_v39  ;;  %v3873_v63 = vor.u32 %v3872_v23, %v3869_v37  ;;  %v3881_v2 = vrot.slane %v3879_v44, 6  ;;  %v3895_v5 = vshrl.u32 %v3751_v62, 16  ;;  %v3898_v28 = vshll.u32 %v3751_v62, 16  ;;  %v3754_v39 = vld [vmem:[#allocation2 + $0x50] sm:$0x3] }
 0x187   : >> { %v3632_v15 = vrot.slane %v3630_v58, 1  ;;  %v2715_v43 = vpop.permute.xlu0 %2714  ;;  %v3636_v12 = vrot.slane %v3634_v47, 1  ;;  %v2717_v14 = vpop.permute.xlu1 %2716  ;;  %11415 = vmatprep.mubr.msk.bf16.mxu0 %vm1096_vm12, %v4323_v8  ;;  %v10477_v25 = vcombine.low %v13518_v21, %v13529_v24  ;;  %v3890_v27 = vrot.slane %v3888_v6, 6  ;;  %v11840_v58 = vld [vmem:[#allocation2 + $0x78] sm:$0xfe]  }
 0x188   : >> { %v2787_v59 = vsel %vm1096_vm12, %v11837_v31, %v2715_v43  ;;  %v2790_v46 = vsel %vm1096_vm12, %v11767_v41, %v2717_v14  ;;  %v3874_v32 = vsel %vm13470_vm1, %v3865_v3, %v3873_v63  ;;  %v3882_v49 = vor.u32 %v3881_v2, %v3878_v11  ;;  %v11841_v2 = vld [vmem:[#allocation2 + $0x98] ss:$0 sps:$4 sm:$0x11]  }
 0x189   : >> { %v3633_v16 = vor.u32 %v3632_v15, %v3628_v36  ;;  %v2883_v30 = vrot.slane %v2787_v59, 1  ;;  %v2884_v20 = vrot.slane %v2790_v46, 1  ;;  %v10505_v55 = vcombine.low %v3864_v10, %v3874_v32 }
 0x18a   : >> { %v3883_v35 = vrot.slane %v3882_v49, 4  ;;  %v3900_v54 = vrot.slane %v3898_v28, 6  ;;  %v3891_v1 = vor.u32 %v3890_v27, %v3887_v29  ;;  %v3904_v40 = vshrl.u32 %v3752_v52, 16  ;;  %v3756_v28 = vld [vmem:[#allocation2 + $0x58] sm:$0xf] }
 0x18b   : >> { %v3637_v38 = vsel %vm807_vm11, %v3633_v16, %v3636_v12  ;;  %v3441_v13 = vpop.permute.xlu0 %3440  ;;  %v2885_v53 = vsel %vm2858_vm14, %v2883_v30, %v2884_v20  ;;  %v3443_v60 = vpop.permute.xlu1 %3442  ;;  %4305 = vst.msk [vmem:[#allocation3 + $0x70] sm:$0xff] %vm1096_vm12, %v10505_v55  ;;  %v3907_v47 = vshll.u32 %v3752_v52, 16  ;;  %v3913_v31 = vshrl.u32 %v3753_v56, 16  ;;  %v11771_v16 = vld [vmem:[#allocation2 + $0x8c] ss:$0 sps:$4 sm:$0x11]  }
 0x18c   : >> { %v3515_v22 = vsel %vm1096_vm12, %v10473_v17, %v3441_v13  ;;  %5003 = vmatprep.mubr.bf16.mxu1 %v3637_v38  ;;  %v3517_v45 = vsel %vm1096_vm12, %v11838_v34, %v3443_v60  ;;  %v3897_v17 = vrot.slane %v3895_v5, 5  ;;  %v3892_v43 = vsel %vm13470_vm1, %v3883_v35, %v3891_v1  ;;  %v3755_v20 = vld [vmem:[#allocation2 + $0x54] sm:$0xe] }
 0x18d   : >> { %v3640_v26 = vshll.u32 %v3515_v22, 16  ;;  %5004 = vmatmul.mubr.bf16.gmra.mrb[48].mxu1 %v2885_v53  ;;  %v3644_v9 = vshll.u32 %v3517_v45, 16  ;;  %v3638_v4 = vshrl.u32 %v3515_v22, 16  ;;  %v3893_v11 = vrot.slane %v3891_v1, 4 }
 0x18e   : >> { %11416 = vmatmul.mubr.msk.bf16.vlgmr.msra.gmra.mrb[48].mxu0 %vm1096_vm12, %v4328_v7  ;;  %v3901_v37 = vor.u32 %v3900_v54, %v3897_v17  ;;  %v3906_v44 = vrot.slane %v3904_v40, 5  ;;  %v3909_v12 = vrot.slane %v3907_v47, 6  ;;  %v3916_v59 = vshll.u32 %v3753_v56, 16  ;;  %v3757_v54 = vld [vmem:[#allocation2 + $0x5c] sm:$0x3] }
 0x18f   : >> { %v3642_v41 = vrot.slane %v3640_v26, 1  ;;  %v2719_v33 = vpop.permute.xlu0 %2718  ;;  %v3646_v48 = vrot.slane %v3644_v9, 1  ;;  %v2721_v36 = vpop.permute.xlu1 %2720  ;;  %v3923_v10 = vshrl.u32 %v3754_v39, 16  ;;  %v3926_v63 = vshll.u32 %v3754_v39, 16 }
 0x190   : >> { %v2792_v8 = vsel %vm1096_vm12, %v11840_v58, %v2719_v33  ;;  %v2795_v3 = vsel %vm1096_vm12, %v11769_v19, %v2721_v36  ;;  %v3902_v46 = vsel %vm13470_vm1, %v3893_v11, %v3901_v37  ;;  %v3910_v30 = vor.u32 %v3909_v12, %v3906_v44  ;;  %v11772_v44 = vld [vmem:[#allocation2 + $0x98] ss:$0 sps:$4 sm:$0x11]  }
 0x191   : >> { %v3643_v57 = vor.u32 %v3642_v41, %v3638_v4  ;;  %v2886_v15 = vrot.slane %v2792_v8, 1  ;;  %v2887_v23 = vrot.slane %v2795_v3, 1  ;;  %v10506_v13 = vcombine.low %v3892_v43, %v3902_v46  ;;  %v11842_v41 = vld [vmem:[#allocation2 + $0x84] sm:$0xfe]   ;;  %v3758_v3 = vld [vmem:[#allocation2 + $0x60] sm:$0xe] }
 0x192   : >> { %v4333_v38 = vld [vmem:[#allocation3 + $0x70] sm:$0xff]  ;;  %v3915_v32 = vrot.slane %v3913_v31, 5  ;;  %v3918_v5 = vrot.slane %v3916_v59, 6  ;;  %v3911_v22 = vrot.slane %v3910_v30, 4  ;;  %v3925_v7 = vrot.slane %v3923_v10, 5 }
 0x193   : >> { %v3647_v14 = vsel %vm807_vm11, %v3643_v57, %v3646_v48  ;;  %v2888_v62 = vsel %vm2858_vm14, %v2886_v15, %v2887_v23  ;;  %v3447_v51 = vpop.permute.xlu1 %3446  ;;  %11419 = vmatprep.mubr.msk.bf16.mxu0 %vm1096_vm12, %v4333_v38  ;;  %4306 = vst.msk [vmem:[#allocation3 + $0x98] sm:$0xff] %vm1096_vm12, %v10506_v13  ;;  %v3928_v34 = vrot.slane %v3926_v63, 6  ;;  %v3932_v19 = vshrl.u32 %v3755_v20, 16  ;;  %v11843_v23 = vld [vmem:[#allocation2 + $0xa4] ss:$0 sps:$4 sm:$0x11]  }
 0x194   : >> { %5011 = vmatprep.mubr.bf16.mxu1 %v3647_v14  ;;  %v3522_v29 = vsel %vm1096_vm12, %v11841_v2, %v3447_v51  ;;  %v3445_v6 = vpop.permute.xlu0 %3444  ;;  %v3919_v52 = vor.u32 %v3918_v5, %v3915_v32  ;;  %v3935_v27 = vshll.u32 %v3755_v20, 16  ;;  %v3941_v9 = vshrl.u32 %v3756_v28, 16  ;;  %v3759_v46 = vld [vmem:[#allocation2 + $0x64] sm:$0xf]  ;;  %v3760_v38 = vld [vmem:[#allocation2 + $0x68] sm:$0x3] }
 0x195   : >> { %5012 = vmatmul.mubr.bf16.gmra.mrb[52].mxu1 %v2888_v62  ;;  %v3654_v53 = vshll.u32 %v3522_v29, 16  ;;  %v3520_v60 = vsel %vm1096_vm12, %v10475_v0, %v3445_v6  ;;  %v3929_v1 = vor.u32 %v3928_v34, %v3925_v7  ;;  %v3934_v40 = vrot.slane %v3932_v19, 5 }
 0x196   : >> { %v3648_v55 = vshrl.u32 %v3520_v60, 16  ;;  %v3650_v49 = vshll.u32 %v3520_v60, 16  ;;  %v3920_v0 = vsel %vm13470_vm1, %v3911_v22, %v3919_v52  ;;  %v3921_v17 = vrot.slane %v3919_v52, 4 }
 0x197   : >> { %v3656_v45 = vrot.slane %v3654_v53, 1  ;;  %v2725_v26 = vpop.permute.xlu1 %2724  ;;  %v3937_v58 = vrot.slane %v3935_v27, 6  ;;  %v3943_v8 = vrot.slane %v3941_v9, 5  ;;  %v3944_v39 = vshll.u32 %v3756_v28, 16 }
 0x198   : >> { %v3652_v35 = vrot.slane %v3650_v49, 1  ;;  %v2800_v42 = vsel %vm1096_vm12, %v11771_v16, %v2725_v26  ;;  %v2723_v18 = vpop.permute.xlu0 %2722  ;;  %v3930_v56 = vsel %vm13470_vm1, %v3921_v17, %v3929_v1  ;;  %v3951_v47 = vshrl.u32 %v3757_v54, 16  ;;  %v11844_v17 = vld [vmem:[#allocation2 + $0x90] sm:$0xfe]  }
 0x199   : >> { %v2890_v4 = vrot.slane %v2800_v42, 1  ;;  %v2797_v33 = vsel %vm1096_vm12, %v11842_v41, %v2723_v18  ;;  %v3954_v57 = vshll.u32 %v3757_v54, 16  ;;  %v10507_v12 = vcombine.low %v3920_v0, %v3930_v56  ;;  %v11773_v56 = vld [vmem:[#allocation2 + $0xa4] ss:$0 sps:$4 sm:$0x11]  }
 0x19a   : >> { %v3653_v48 = vor.u32 %v3652_v35, %v3648_v55  ;;  %v2889_v36 = vrot.slane %v2797_v33, 1  ;;  %v4338_v31 = vld [vmem:[#allocation3 + $0x98] sm:$0xff]  ;;  %v3938_v59 = vor.u32 %v3937_v58, %v3934_v40  ;;  %v3946_v10 = vrot.slane %v3944_v39, 6  ;;  %v2976_v35 = vld [vmem:[#allocation2 + $0xa8] sm:$0xf] }
 0x19b   : >> { %v3451_v37 = vpop.permute.xlu1 %3450  ;;  %v3953_v62 = vrot.slane %v3951_v47, 5  ;;  %11420 = vmatmul.mubr.msk.bf16.gmra.mrb[52].mxu0 %vm1096_vm12, %v4338_v31  ;;  %4307 = vst.msk [vmem:[#allocation3 + $0xc0] sm:$0xff] %vm1096_vm12, %v10507_v12  ;;  %v3956_v16 = vrot.slane %v3954_v57, 6  ;;  %v3960_v30 = vshrl.u32 %v3758_v3, 16  ;;  %v3963_v63 = vshll.u32 %v3758_v3, 16 }
 0x19c   : >> { %v3657_v15 = vsel %vm807_vm11, %v3653_v48, %v3656_v45  ;;  %v2891_v43 = vsel %vm2858_vm14, %v2889_v36, %v2890_v4  ;;  %v3527_v11 = vsel %vm1096_vm12, %v11843_v23, %v3451_v37  ;;  %v3939_v29 = vrot.slane %v3938_v59, 4  ;;  %v3762_v40 = vld [vmem:[#allocation2 + $0x70] sm:$0xf]  ;;  %v11846_v47 = vld [vmem:[#allocation2 + $0xac] sm:$0xf] }
 0x19d   : >> { %v3664_v14 = vshll.u32 %v3527_v11, 16  ;;  %5019 = vmatprep.mubr.bf16.mxu1 %v3657_v15  ;;  %v3947_v6 = vor.u32 %v3946_v10, %v3943_v8  ;;  %v3957_v5 = vor.u32 %v3956_v16, %v3953_v62  ;;  %v3962_v28 = vrot.slane %v3960_v30, 5  ;;  %v11845_v8 = vld [vmem:[#allocation2 + $0xb0] ss:$0 sps:$4 sm:$0x11]  }
 0x19e   : >> { %v3449_v51 = vpop.permute.xlu0 %3448  ;;  %5020 = vmatmul.mubr.bf16.gmra.mrb[56].mxu1 %v2891_v43  ;;  %v3965_v7 = vrot.slane %v3963_v63, 6  ;;  %v3969_v55 = vshrl.u32 %v3759_v46, 16  ;;  %v3972_v21 = vshll.u32 %v3759_v46, 16  ;;  %v3979_v24 = vshrl.u32 %v3760_v38, 16  ;;  %v3763_v15 = vld [vmem:[#allocation2 + $0x74] sm:$0x3] }
 0x19f   : >> { %v3666_v20 = vrot.slane %v3664_v14, 1  ;;  %v3525_v2 = vsel %vm1096_vm12, %v10477_v25, %v3449_v51  ;;  %v3948_v60 = vsel %vm13470_vm1, %v3939_v29, %v3947_v6  ;;  %v3949_v22 = vrot.slane %v3947_v6, 4  ;;  %v3761_v25 = vld [vmem:[#allocation2 + $0x6c] sm:$0xe] }
 0x1a0   : >> { %v3658_v13 = vshrl.u32 %v3525_v2, 16  ;;  %v3660_v32 = vshll.u32 %v3525_v2, 16  ;;  %v3966_v26 = vor.u32 %v3965_v7, %v3962_v28  ;;  %v3971_v19 = vrot.slane %v3969_v55, 5  ;;  %v2979_v7 = vld [vmem:[#allocation2 + $0xb4] sm:$0xf] }
 0x1a1   : >> { %v2729_v53 = vpop.permute.xlu1 %2728  ;;  %v3958_v45 = vsel %vm13470_vm1, %v3949_v22, %v3957_v5  ;;  %v3974_v18 = vrot.slane %v3972_v21, 6  ;;  %v3981_v0 = vrot.slane %v3979_v24, 5  ;;  %v3982_v1 = vshll.u32 %v3760_v38, 16 }
 0x1a2   : >> { %v3662_v49 = vrot.slane %v3660_v32, 1  ;;  %v2805_v52 = vsel %vm1096_vm12, %v11772_v44, %v2729_v53  ;;  %v10508_v42 = vcombine.low %v3948_v60, %v3958_v45  ;;  %v4343_v41 = vld [vmem:[#allocation3 + $0xc0] sm:$0xff]  ;;  %v3967_v33 = vrot.slane %v3966_v26, 4 }
 0x1a3   : >> { %v2893_v34 = vrot.slane %v2805_v52, 1  ;;  %v3988_v48 = vshrl.u32 %v3761_v25, 16  ;;  %11423 = vmatprep.mubr.msk.bf16.mxu0 %vm1096_vm12, %v4343_v41  ;;  %v3975_v39 = vor.u32 %v3974_v18, %v3971_v19  ;;  %v10479_v57 = vcombine.low %v2976_v35, %v11846_v47  ;;  %v3764_v18 = vld [vmem:[#allocation2 + $0x78] sm:$0xe] }
 0x1a4   : >> { %v3663_v27 = vor.u32 %v3662_v49, %v3658_v13  ;;  %v2727_v9 = vpop.permute.xlu0 %2726  ;;  %4308 = vst.msk [vmem:[#allocation3 + $0xe8] sm:$0xff] %vm1096_vm12, %v10508_v42  ;;  %v3984_v3 = vrot.slane %v3982_v1, 6  ;;  %v3991_v23 = vshll.u32 %v3761_v25, 16  ;;  %v3997_v31 = vshrl.u32 %v3762_v40, 16 }
 0x1a5   : >> { %v2802_v54 = vsel %vm1096_vm12, %v11844_v17, %v2727_v9  ;;  %v3455_v4 = vpop.permute.xlu1 %3454  ;;  %v3990_v43 = vrot.slane %v3988_v48, 5  ;;  %v11007_v11 = vpop.f32.mrb[0].mxu1  ;;  %v3977_v14 = vrot.slane %v3975_v39, 4  ;;  %v3976_v10 = vsel %vm13470_vm1, %v3967_v33, %v3975_v39  ;;  %v11774_v47 = vld [vmem:[#allocation2 + $0xb0] ss:$0 sps:$4 sm:$0x11]  }
 0x1a6   : >> { %v3667_v36 = vsel %vm807_vm11, %v3663_v27, %v3666_v20  ;;  %v2892_v58 = vrot.slane %v2802_v54, 1  ;;  %v3532_v37 = vsel %vm1096_vm12, %v11845_v8, %v3455_v4  ;;  %v11008_v59 = vpop.f32.mrb[1].mxu1  ;;  %v3985_v62 = vor.u32 %v3984_v3, %v3981_v0  ;;  %v11847_v0 = vld [vmem:[#allocation2 + $0x9c] sm:$0xfe]  }
 0x1a7   : >> { %5027 = vmatprep.mubr.bf16.mxu1 %v3667_v36  ;;  %v3674_v12 = vshll.u32 %v3532_v37, 16  ;;  %v3993_v51 = vrot.slane %v3991_v23, 6  ;;  %v4000_v16 = vshll.u32 %v3762_v40, 16  ;;  %v11010_v46 = vpop.f32.mrb[2].mxu1  ;;  %v3999_v20 = vrot.slane %v3997_v31, 5 }
 0x1a8   : >> { %v2894_v44 = vsel %vm2858_vm14, %v2892_v58, %v2893_v34  ;;  %v4007_v2 = vshrl.u32 %v3763_v15, 16  ;;  %v4010_v29 = vshll.u32 %v3763_v15, 16  ;;  %v13578_v6 = vadd.f32 %v11008_v59, %v11007_v11  ;;  %v11011_v28 = vpop.f32.mrb[3].mxu1  ;;  %v10935_v53 = vpop.f32.mrb[0].mxu0  ;;  %v11849_v58 = vld [vmem:[#allocation2 + $0xb8] sm:$0xf] }
 0x1a9   : >> { %5028 = vmatmul.mubr.bf16.gmra.mrb[60].mxu1 %v2894_v44  ;;  %v3986_v32 = vsel %vm13470_vm1, %v3977_v14, %v3985_v62  ;;  %v3994_v5 = vor.u32 %v3993_v51, %v3990_v43  ;;  %v3676_v60 = vrot.slane %v3674_v12, 1  ;;  %v10936_v49 = vpop.f32.mrb[1].mxu0  ;;  %v4002_v24 = vrot.slane %v4000_v16, 6  ;;  %v11848_v54 = vld [vmem:[#allocation2 + $0xbc] ss:$0 sps:$4 sm:$0x11]  }
 0x1aa   : >> { %v3453_v30 = vpop.permute.xlu0 %3452  ;;  %v2733_v63 = vpop.permute.xlu1 %2732  ;;  %v10509_v55 = vcombine.low %v3976_v10, %v3986_v32  ;;  %v4009_v25 = vrot.slane %v4007_v2, 5  ;;  %v4012_v34 = vrot.slane %v4010_v29, 6  ;;  %v13588_v42 = vadd.f32 %v11011_v28, %v11010_v46  ;;  %v3765_v37 = vld [vmem:[#allocation2 + $0x7c] sm:$0xf]  ;;  %v3766_v23 = vld [vmem:[#allocation2 + $0x80] sm:$0x3] }
 0x1ab   : >> { %v3530_v38 = vsel %vm1096_vm12, %v10479_v57, %v3453_v30  ;;  %v2810_v13 = vsel %vm1096_vm12, %v11773_v56, %v2733_v63  ;;  %v4348_v52 = vld [vmem:[#allocation3 + $0xe8] sm:$0xff]  ;;  %v3995_v21 = vrot.slane %v3994_v5, 4  ;;  %v13584_v45 = vpop.f32.mrb[2].mxu0  ;;  %v4003_v41 = vor.u32 %v4002_v24, %v3999_v20 }
 0x1ac   : >> { %v3670_v22 = vshll.u32 %v3530_v38, 16  ;;  %v3668_v26 = vshrl.u32 %v3530_v38, 16  ;;  %11424 = vmatmul.mubr.msk.bf16.gmra.mrb[56].mxu0 %vm1096_vm12, %v4348_v52  ;;  %v2896_v27 = vrot.slane %v2810_v13, 1  ;;  %4309 = vst.msk [vmem:[#allocation3 + $0x110] sm:$0xff] %vm1096_vm12, %v10509_v55  ;;  %v4013_v33 = vor.u32 %v4012_v34, %v4009_v25  ;;  %v10939_v1 = vpop.f32.mrb[3].mxu0 }
 0x1ad   : >> { %v10481_v8 = vcombine.low %v2979_v7, %v11849_v58  ;;  %v4004_v56 = vsel %vm13470_vm1, %v3995_v21, %v4003_v41  ;;  %v4005_v39 = vrot.slane %v4003_v41, 4  ;;  %v13594_v57 = vadd.f32 %v10936_v49, %v10935_v53  ;;  %v3767_v63 = vld [vmem:[#allocation2 + $0x84] sm:$0xe] }
 0x1ae   : >> { %v3672_v19 = vrot.slane %v3670_v22, 1  ;;  %v2731_v9 = vpop.permute.xlu0 %2730  ;;  %v3459_v35 = vpop.permute.xlu1 %3458  ;;  %v4016_v3 = vshrl.u32 %v3764_v18, 16  ;;  %v4019_v11 = vshll.u32 %v3764_v18, 16  ;;  %v4025_v10 = vshrl.u32 %v3765_v37, 16 }
 0x1af   : >> { %v2807_v17 = vsel %vm1096_vm12, %v11847_v0, %v2731_v9  ;;  %v3537_v4 = vsel %vm1096_vm12, %v11848_v54, %v3459_v35  ;;  %v4014_v31 = vsel %vm13470_vm1, %v4005_v39, %v4013_v33  ;;  %v4028_v30 = vshll.u32 %v3765_v37, 16  ;;  %v11850_v35 = vld [vmem:[#allocation2 + $0xa8] sm:$0xfe]  }
 0x1b0   : >> { %v3673_v40 = vor.u32 %v3672_v19, %v3668_v26  ;;  %v2895_v48 = vrot.slane %v2807_v17, 1  ;;  %v3684_v36 = vshll.u32 %v3537_v4, 16  ;;  %v4018_v59 = vrot.slane %v4016_v3, 5  ;;  %v11851_v17 = vld [vmem:[#allocation2 + $0xc4] sm:$0xf] }
 0x1b1   : >> { %v13598_v44 = vpop.f32.mrb[4].mxu1  ;;  %v10510_v16 = vcombine.low %v4004_v56, %v4014_v31  ;;  %v4021_v46 = vrot.slane %v4019_v11, 6  ;;  %v4027_v32 = vrot.slane %v4025_v10, 5  ;;  %v4035_v5 = vshrl.u32 %v3766_v23, 16  ;;  %v3768_v4 = vld [vmem:[#allocation2 + $0x88] sm:$0xf] }
 0x1b2   : >> { %v3677_v15 = vsel %vm807_vm11, %v3673_v40, %v3676_v60  ;;  %v2897_v43 = vsel %vm2858_vm14, %v2895_v48, %v2896_v27  ;;  %v3686_v12 = vrot.slane %v3684_v36, 1  ;;  %v13602_v62 = vpop.f32.mrb[5].mxu1  ;;  %v2982_v60 = vld [vmem:[#allocation2 + $0xc0] sm:$0xf]  ;;  %v4030_v7 = vrot.slane %v4028_v30, 6 }
 0x1b3   : >> { %v3457_v14 = vpop.permute.xlu0 %3456  ;;  %5035 = vmatprep.mubr.bf16.mxu1 %v3677_v15  ;;  %v13605_v20 = vpop.f32.mrb[6].mxu1  ;;  %v4353_v38 = vld [vmem:[#allocation3 + $0x110] sm:$0xff]  ;;  %4310 = vst.msk [vmem:[#allocation3 + $0x138] sm:$0xff] %vm1096_vm12, %v10510_v16  ;;  %v4022_v22 = vor.u32 %v4021_v46, %v4018_v59  ;;  %v4038_v55 = vshll.u32 %v3766_v23, 16  ;;  %v4037_v21 = vrot.slane %v4035_v5, 5  ;;  %v13613_v24 = vadd.f32 %v10939_v1, %v13584_v45 }
 0x1b4   : >> { %v3535_v51 = vsel %vm1096_vm12, %v10481_v8, %v3457_v14  ;;  %5036 = vmatmul.mubr.bf16.gmra.mrb[64].mxu1 %v2897_v43  ;;  %v2737_v13 = vpop.permute.xlu1 %2736  ;;  %v13607_v28 = vpop.f32.mrb[7].mxu1  ;;  %11427 = vmatprep.mubr.msk.bf16.mxu0 %vm1096_vm12, %v4353_v38  ;;  %v4031_v26 = vor.u32 %v4030_v7, %v4027_v32  ;;  %v4044_v27 = vshrl.u32 %v3767_v63, 16  ;;  %v10483_v54 = vcombine.low %v2982_v60, %v11851_v17  ;;  %v11852_v40 = vld [vmem:[#allocation2 + $0xc8] ss:$0 sps:$4 sm:$0x11]  }
 0x1b5   : >> { %v3678_v2 = vshrl.u32 %v3535_v51, 16  ;;  %v3680_v29 = vshll.u32 %v3535_v51, 16  ;;  %v2815_v53 = vsel %vm1096_vm12, %v11774_v47, %v2737_v13  ;;  %v4023_v34 = vrot.slane %v4022_v22, 4  ;;  %v3769_v36 = vld [vmem:[#allocation2 + $0x8c] sm:$0x3] }
 0x1b6   : >> { %v2899_v52 = vrot.slane %v2815_v53, 1  ;;  %v4040_v19 = vrot.slane %v4038_v55, 6  ;;  %v4047_v41 = vshll.u32 %v3767_v63, 16  ;;  %v4033_v1 = vrot.slane %v4031_v26, 4  ;;  %v3770_v53 = vld [vmem:[#allocation2 + $0x90] sm:$0xe] }
 0x1b7   : >> { %v3682_v49 = vrot.slane %v3680_v29, 1  ;;  %v4032_v45 = vsel %vm13470_vm1, %v4023_v34, %v4031_v26  ;;  %v4046_v39 = vrot.slane %v4044_v27, 5  ;;  %v11775_v47 = vld [vmem:[#allocation2 + $0xbc] ss:$0 sps:$4 sm:$0x11]   ;;  %v4053_v23 = vshrl.u32 %v3768_v4, 16 }
 0x1b8   : >> { %v2735_v25 = vpop.permute.xlu0 %2734  ;;  %v4041_v56 = vor.u32 %v4040_v19, %v4037_v21  ;;  %v4049_v43 = vrot.slane %v4047_v41, 6  ;;  %v4056_v11 = vshll.u32 %v3768_v4, 16  ;;  %v4066_v51 = vshll.u32 %v3769_v36, 16  ;;  %v2985_v34 = vld [vmem:[#allocation2 + $0xcc] sm:$0xf] }
 0x1b9   : >> { %v3683_v9 = vor.u32 %v3682_v49, %v3678_v2  ;;  %v2812_v18 = vsel %vm1096_vm12, %v11850_v35, %v2735_v25  ;;  %v3463_v0 = vpop.permute.xlu1 %3462  ;;  %v4055_v2 = vrot.slane %v4053_v23, 5  ;;  %v13637_v26 = vadd.f32 %v13602_v62, %v13598_v44  ;;  %v11853_v27 = vld [vmem:[#allocation2 + $0xb4] sm:$0xfe]   ;;  %v11854_v44 = vld [vmem:[#allocation2 + $0xd0] sm:$0xf] }
 0x1ba   : >> { %v2898_v33 = vrot.slane %v2812_v18, 1  ;;  %v3542_v48 = vsel %vm1096_vm12, %v11852_v40, %v3463_v0  ;;  %v4358_v31 = vld [vmem:[#allocation3 + $0x138] sm:$0xff]  ;;  %v4042_v10 = vsel %vm13470_vm1, %v4033_v1, %v4041_v56  ;;  %v4050_v63 = vor.u32 %v4049_v43, %v4046_v39 }
 0x1bb   : >> { %v13619_v58 = vpop.f32.mrb[4].mxu0  ;;  %v3687_v8 = vsel %vm807_vm11, %v3683_v9, %v3686_v12  ;;  %v3694_v37 = vshll.u32 %v3542_v48, 16  ;;  %v4063_v12 = vshrl.u32 %v3769_v36, 16  ;;  %11428 = vmatmul.mubr.msk.bf16.gmra.mrb[60].mxu0 %vm1096_vm12, %v4358_v31  ;;  %v10511_v30 = vcombine.low %v4032_v45, %v4042_v10  ;;  %v3771_v40 = vld [vmem:[#allocation2 + $0x94] sm:$0xf] }
 0x1bc   : >> { %v13622_v3 = vpop.f32.mrb[5].mxu0  ;;  %v2900_v15 = vsel %vm2858_vm14, %v2898_v33, %v2899_v52  ;;  %5043 = vmatprep.mubr.bf16.mxu1 %v3687_v8  ;;  %v4058_v32 = vrot.slane %v4056_v11, 6  ;;  %v4051_v22 = vrot.slane %v4050_v63, 4  ;;  %v4068_v7 = vrot.slane %v4066_v51, 6  ;;  %v3772_v36 = vld [vmem:[#allocation2 + $0x98] sm:$0x3] }
 0x1bd   : >> { %v13625_v14 = vpop.f32.mrb[6].mxu0  ;;  %v3461_v59 = vpop.permute.xlu0 %3460  ;;  %5044 = vmatmul.mubr.bf16.gmra.mrb[68].mxu1 %v2900_v15  ;;  %v3696_v38 = vrot.slane %v3694_v37, 1  ;;  %v4065_v5 = vrot.slane %v4063_v12, 5  ;;  %4311 = vst.msk [vmem:[#allocation3 + $0x160] sm:$0xff] %vm1096_vm12, %v10511_v30  ;;  %v4072_v18 = vshrl.u32 %v3770_v53, 16  ;;  %v4075_v0 = vshll.u32 %v3770_v53, 16 }
 0x1be   : >> { %v13629_v16 = vpop.f32.mrb[7].mxu0  ;;  %v3540_v46 = vsel %vm1096_vm12, %v10483_v54, %v3461_v59  ;;  %v2741_v29 = vpop.permute.xlu1 %2740  ;;  %v4059_v52 = vor.u32 %v4058_v32, %v4055_v2  ;;  %v10485_v62 = vcombine.low %v2985_v34, %v11854_v44  ;;  %v11855_v45 = vld [vmem:[#allocation2 + $0xd4] ss:$0 sps:$4 sm:$0x11]   ;;  %v4081_v59 = vshrl.u32 %v3771_v40, 16 }
 0x1bf   : >> { %v3690_v13 = vshll.u32 %v3540_v46, 16  ;;  %v3688_v60 = vshrl.u32 %v3540_v46, 16  ;;  %v2820_v55 = vsel %vm1096_vm12, %v11775_v47, %v2741_v29  ;;  %v4069_v19 = vor.u32 %v4068_v7, %v4065_v5  ;;  %v3773_v12 = vld [vmem:[#allocation2 + $0x9c] sm:$0xe]  ;;  %v3774_v29 = vld [vmem:[#allocation2 + $0xa0] sm:$0xf] }
 0x1c0   : >> { %v2902_v21 = vrot.slane %v2820_v55, 1  ;;  %v4060_v4 = vsel %vm13470_vm1, %v4051_v22, %v4059_v52  ;;  %v4061_v41 = vrot.slane %v4059_v52, 4  ;;  %v4074_v8 = vrot.slane %v4072_v18, 5  ;;  %v11776_v53 = vld [vmem:[#allocation2 + $0xc8] ss:$0 sps:$4 sm:$0x11]  }
 0x1c1   : >> { %v3692_v49 = vrot.slane %v3690_v13, 1  ;;  %v2739_v25 = vpop.permute.xlu0 %2738  ;;  %v4077_v37 = vrot.slane %v4075_v0, 6  ;;  %v4084_v10 = vshll.u32 %v3771_v40, 16  ;;  %v4091_v30 = vshrl.u32 %v3772_v36, 16 }
 0x1c2   : >> { %v2817_v9 = vsel %vm1096_vm12, %v11853_v27, %v2739_v25  ;;  %v3467_v35 = vpop.permute.xlu1 %3466  ;;  %v4070_v47 = vsel %vm13470_vm1, %v4061_v41, %v4069_v19  ;;  %v4094_v63 = vshll.u32 %v3772_v36, 16  ;;  %v13657_v2 = vadd.f32 %v13607_v28, %v13605_v20  ;;  %v3775_v20 = vld [vmem:[#allocation2 + $0xa4] sm:$0x3] }
 0x1c3   : >> { %v13640_v17 = vpop.f32.mrb[8].mxu1  ;;  %v3693_v54 = vor.u32 %v3692_v49, %v3688_v60  ;;  %v2901_v33 = vrot.slane %v2817_v9, 1  ;;  %v3547_v1 = vsel %vm1096_vm12, %v11855_v45, %v3467_v35  ;;  %v10512_v11 = vcombine.low %v4060_v4, %v4070_v47 }
 0x1c4   : >> { %v13644_v48 = vpop.f32.mrb[9].mxu1  ;;  %v3704_v43 = vshll.u32 %v3547_v1, 16  ;;  %v4078_v31 = vor.u32 %v4077_v37, %v4074_v8  ;;  %v4363_v51 = vld [vmem:[#allocation3 + $0x160] sm:$0xff]  ;;  %v4083_v32 = vrot.slane %v4081_v59, 5  ;;  %v4086_v5 = vrot.slane %v4084_v10, 6 }
 0x1c5   : >> { %v13647_v56 = vpop.f32.mrb[10].mxu1  ;;  %v3697_v39 = vsel %vm807_vm11, %v3693_v54, %v3696_v38  ;;  %v2903_v15 = vsel %vm2858_vm14, %v2901_v33, %v2902_v21  ;;  %11431 = vmatprep.mubr.msk.bf16.mxu0 %vm1096_vm12, %v4363_v51  ;;  %4312 = vst.msk [vmem:[#allocation3 + $0x188] sm:$0xff] %vm1096_vm12, %v10512_v11  ;;  %v4093_v7 = vrot.slane %v4091_v30, 5  ;;  %v4096_v55 = vrot.slane %v4094_v63, 6  ;;  %v11856_v63 = vld [vmem:[#allocation2 + $0xc0] sm:$0xfe]  }
 0x1c6   : >> { %v13653_v23 = vpop.f32.mrb[11].mxu1  ;;  %5051 = vmatprep.mubr.bf16.mxu1 %v3697_v39  ;;  %v4079_v13 = vrot.slane %v4078_v31, 4  ;;  %v3706_v22 = vrot.slane %v3704_v43, 1  ;;  %v4087_v52 = vor.u32 %v4086_v5, %v4083_v32  ;;  %v4100_v28 = vshrl.u32 %v3773_v12, 16  ;;  %v3778_v5 = vld [vmem:[#allocation2 + $0xb0] sm:$0x3] }
 0x1c7   : >> { %v3465_v46 = vpop.permute.xlu0 %3464  ;;  %5052 = vmatmul.mubr.bf16.gmra.mrb[72].mxu1 %v2903_v15  ;;  %v4103_v21 = vshll.u32 %v3773_v12, 16  ;;  %v4097_v19 = vor.u32 %v4096_v55, %v4093_v7  ;;  %v4109_v27 = vshrl.u32 %v3774_v29, 16  ;;  %v4112_v9 = vshll.u32 %v3774_v29, 16  ;;  %v2745_v35 = vpop.permute.xlu1 %2744  ;;  %v3776_v15 = vld [vmem:[#allocation2 + $0xa8] sm:$0xe] }
 0x1c8   : >> { %v3545_v38 = vsel %vm1096_vm12, %v10485_v62, %v3465_v46  ;;  %v4088_v0 = vsel %vm13470_vm1, %v4079_v13, %v4087_v52  ;;  %v4089_v54 = vrot.slane %v4087_v52, 4  ;;  %v4102_v4 = vrot.slane %v4100_v28, 5  ;;  %v3777_v12 = vld [vmem:[#allocation2 + $0xac] sm:$0xf] }
 0x1c9   : >> { %v3700_v60 = vshll.u32 %v3545_v38, 16  ;;  %v3698_v49 = vshrl.u32 %v3545_v38, 16  ;;  %v4105_v41 = vrot.slane %v4103_v21, 6  ;;  %v4111_v44 = vrot.slane %v4109_v27, 5  ;;  %v3779_v21 = vld [vmem:[#allocation2 + $0xb4] sm:$0xe] }
 0x1ca   : >> { %v13662_v25 = vpop.f32.mrb[8].mxu0  ;;  %v4114_v62 = vrot.slane %v4112_v9, 6  ;;  %v4119_v45 = vshrl.u32 %v3775_v20, 16  ;;  %v4098_v8 = vsel %vm13470_vm1, %v4089_v54, %v4097_v19  ;;  %v4122_v39 = vshll.u32 %v3775_v20, 16  ;;  %v3780_v9 = vld [vmem:[#allocation2 + $0xb8] sm:$0xf] }
 0x1cb   : >> { %v3702_v34 = vrot.slane %v3700_v60, 1  ;;  %v13664_v18 = vpop.f32.mrb[9].mxu0  ;;  %v2743_v1 = vpop.permute.xlu0 %2742  ;;  %v4106_v37 = vor.u32 %v4105_v41, %v4102_v4  ;;  %v2825_v47 = vsel %vm1096_vm12, %v11776_v53, %v2745_v35  ;;  %v10513_v31 = vcombine.low %v4088_v0, %v4098_v8 }
 0x1cc   : >> { %v13668_v33 = vpop.f32.mrb[10].mxu0  ;;  %v4368_v43 = vld [vmem:[#allocation3 + $0x188] sm:$0xff]  ;;  %v4115_v59 = vor.u32 %v4114_v62, %v4111_v44  ;;  %v4121_v10 = vrot.slane %v4119_v45, 5  ;;  %v4124_v46 = vrot.slane %v4122_v39, 6  ;;  %v2905_v30 = vrot.slane %v2825_v47, 1 }
 0x1cd   : >> { %v3703_v40 = vor.u32 %v3702_v34, %v3698_v49  ;;  %v13670_v36 = vpop.f32.mrb[11].mxu0  ;;  %11432 = vmatmul.mubr.msk.bf16.gmra.mrb[64].mxu0 %vm1096_vm12, %v4368_v43  ;;  %v4107_v51 = vrot.slane %v4106_v37, 4  ;;  %v2822_v29 = vsel %vm1096_vm12, %v11856_v63, %v2743_v1  ;;  %4313 = vst.msk [vmem:[#allocation3 + $0x1b0] sm:$0xff] %vm1096_vm12, %v10513_v31  ;;  %v13681_v32 = vadd.f32 %v13622_v3, %v13619_v58  ;;  %v3781_v45 = vld [vmem:[#allocation2 + $0xbc] sm:$0x3] }
 0x1ce   : >> { %v4117_v38 = vrot.slane %v4115_v59, 4  ;;  %v2904_v13 = vrot.slane %v2822_v29, 1  ;;  %v4128_v53 = vshrl.u32 %v3776_v15, 16  ;;  %v4131_v7 = vshll.u32 %v3776_v15, 16  ;;  %v3782_v15 = vld [vmem:[#allocation2 + $0xc0] sm:$0xe] }
 0x1cf   : >> { %v3707_v11 = vsel %vm807_vm11, %v3703_v40, %v3706_v22  ;;  %v4116_v60 = vsel %vm13470_vm1, %v4107_v51, %v4115_v59  ;;  %v4125_v22 = vor.u32 %v4124_v46, %v4121_v10  ;;  %v4137_v55 = vshrl.u32 %v3777_v12, 16 }
 0x1d0   : >> { %5059 = vmatprep.mubr.bf16.mxu1 %v3707_v11  ;;  %v2906_v52 = vsel %vm2858_vm14, %v2904_v13, %v2905_v30  ;;  %v4130_v20 = vrot.slane %v4128_v53, 5  ;;  %v4140_v28 = vshll.u32 %v3777_v12, 16  ;;  %v4133_v3 = vrot.slane %v4131_v7, 6 }
 0x1d1   : >> { %v4126_v58 = vsel %vm13470_vm1, %v4117_v38, %v4125_v22  ;;  %v4139_v19 = vrot.slane %v4137_v55, 5  ;;  %v4147_v27 = vshrl.u32 %v3778_v5, 16  ;;  %5060 = vmatmul.mubr.bf16.gmra.mrb[76].mxu1 %v2906_v52  ;;  %v4150_v4 = vshll.u32 %v3778_v5, 16  ;;  %v3783_v38 = vld [vmem:[#allocation2 + $0xc4] sm:$0xf] }
 0x1d2   : >> { %v13685_v49 = vpop.f32.mrb[12].mxu1  ;;  %v10514_v0 = vcombine.low %v4116_v60, %v4126_v58  ;;  %v4142_v54 = vrot.slane %v4140_v28, 6  ;;  %v13696_v41 = vadd.f32 %v13629_v16, %v13625_v14  ;;  %v4134_v44 = vor.u32 %v4133_v3, %v4130_v20 }
 0x1d3   : >> { %v13688_v34 = vpop.f32.mrb[13].mxu1  ;;  %v4149_v62 = vrot.slane %v4147_v27, 5  ;;  %v4156_v1 = vshrl.u32 %v3779_v21, 16  ;;  %v4159_v8 = vshll.u32 %v3779_v21, 16  ;;  %v4152_v39 = vrot.slane %v4150_v4, 6 }
 0x1d4   : >> { %v13692_v35 = vpop.f32.mrb[14].mxu1  ;;  %4314 = vst.msk [vmem:[#allocation3 + $0x1d8] sm:$0xff] %vm1096_vm12, %v10514_v0  ;;  %v4143_v37 = vor.u32 %v4142_v54, %v4139_v19  ;;  %v4165_v47 = vshrl.u32 %v3780_v9, 16  ;;  %v4373_v43 = vld [vmem:[#allocation3 + $0x1b0] sm:$0xff]  ;;  %v4135_v11 = vrot.slane %v4134_v44, 4  ;;  %v4168_v10 = vshll.u32 %v3780_v9, 16 }
 0x1d5   : >> { %v13698_v40 = vpop.f32.mrb[15].mxu1  ;;  %v4158_v31 = vrot.slane %v4156_v1, 5  ;;  %v4161_v59 = vrot.slane %v4159_v8, 6  ;;  %11435 = vmatprep.mubr.msk.bf16.mxu0 %vm1096_vm12, %v4373_v43  ;;  %v4153_v16 = vor.u32 %v4152_v39, %v4149_v62  ;;  %v4175_v51 = vshrl.u32 %v3781_v45, 16  ;;  %v3784_v21 = vld [vmem:[#allocation2 + $0xc8] sm:$0x3] }
 0x1d6   : >> { %v4145_v14 = vrot.slane %v4143_v37, 4  ;;  %v4167_v12 = vrot.slane %v4165_v47, 5  ;;  %v4144_v46 = vsel %vm13470_vm1, %v4135_v11, %v4143_v37  ;;  %v4170_v63 = vrot.slane %v4168_v10, 6  ;;  %v3785_v9 = vld [vmem:[#allocation2 + $0xcc] sm:$0xe] }
 0x1d7   : >> { %v4162_v30 = vor.u32 %v4161_v59, %v4158_v31  ;;  %v4178_v29 = vshll.u32 %v3781_v45, 16  ;;  %v4177_v53 = vrot.slane %v4175_v51, 5  ;;  %v13710_v60 = vadd.f32 %v13644_v48, %v13640_v17 }
 0x1d8   : >> { %v4154_v5 = vsel %vm13470_vm1, %v4145_v14, %v4153_v16  ;;  %v4184_v22 = vshrl.u32 %v3782_v15, 16  ;;  %v4171_v20 = vor.u32 %v4170_v63, %v4167_v12  ;;  %v4187_v19 = vshll.u32 %v3782_v15, 16  ;;  %v3786_v15 = vld [vmem:[#allocation2 + $0xd0] sm:$0xf]  ;;  %v3787_v14 = vld [vmem:[#allocation2 + $0xd4] sm:$0x3] }
 0x1d9   : >> { %v10515_v55 = vcombine.low %v4144_v46, %v4154_v5  ;;  %v4163_v52 = vrot.slane %v4162_v30, 4  ;;  %v4180_v28 = vrot.slane %v4178_v29, 6  ;;  %v4193_v27 = vshrl.u32 %v3783_v38, 16 }
 0x1da   : >> { %v13704_v13 = vpop.f32.mrb[12].mxu0  ;;  %v4186_v3 = vrot.slane %v4184_v22, 5  ;;  %v4173_v48 = vrot.slane %v4171_v20, 4  ;;  %v4196_v44 = vshll.u32 %v3783_v38, 16  ;;  %v4189_v62 = vrot.slane %v4187_v19, 6 }
 0x1db   : >> { %v13712_v7 = vpop.f32.mrb[13].mxu0  ;;  %v4378_v54 = vld [vmem:[#allocation3 + $0x1d8] sm:$0xff]  ;;  %4315 = vst.msk [vmem:[#allocation3 + $0x200] sm:$0xff] %vm1096_vm12, %v10515_v55  ;;  %v4172_v17 = vsel %vm13470_vm1, %v4163_v52, %v4171_v20  ;;  %v4181_v4 = vor.u32 %v4180_v28, %v4177_v53  ;;  %v4195_v45 = vrot.slane %v4193_v27, 5  ;;  %v4203_v1 = vshrl.u32 %v3784_v21, 16 }
 0x1dc   : >> { %v13714_v58 = vpop.f32.mrb[14].mxu0  ;;  %11436 = vmatmul.mubr.msk.bf16.gmra.mrb[68].mxu0 %vm1096_vm12, %v4378_v54  ;;  %v4206_v8 = vshll.u32 %v3784_v21, 16  ;;  %v4198_v39 = vrot.slane %v4196_v44, 6  ;;  %v13724_v47 = vadd.f32 %v13653_v23, %v13647_v56  ;;  %v4212_v43 = vshrl.u32 %v3785_v9, 16 }
 0x1dd   : >> { %v10957_v0 = vpop.f32.mrb[15].mxu0  ;;  %v4182_v37 = vsel %vm13470_vm1, %v4173_v48, %v4181_v4  ;;  %v4190_v31 = vor.u32 %v4189_v62, %v4186_v3  ;;  %v4205_v59 = vrot.slane %v4203_v1, 5  ;;  %v4215_v51 = vshll.u32 %v3785_v9, 16 }
 0x1de   : >> { %v10516_v11 = vcombine.low %v4172_v17, %v4182_v37  ;;  %v4208_v10 = vrot.slane %v4206_v8, 6  ;;  %v4199_v16 = vor.u32 %v4198_v39, %v4195_v45  ;;  %v4214_v12 = vrot.slane %v4212_v43, 5  ;;  %v13750_v45 = vld [vmem:[%s4474_s12] ss:$0 sm:$0xff] }
 0x1df   : >> { %v4191_v46 = vrot.slane %v4190_v31, 4  ;;  %v4221_v63 = vshrl.u32 %v3786_v15, 16  ;;  %v4224_v29 = vshll.u32 %v3786_v15, 16  ;;  %v4217_v56 = vrot.slane %v4215_v51, 6 }
 0x1e0   : >> { %4316 = vst.msk [vmem:[#allocation3 + $0x228] sm:$0xff] %vm1096_vm12, %v10516_v11  ;;  %v4209_v30 = vor.u32 %v4208_v10, %v4205_v59  ;;  %v4201_v38 = vrot.slane %v4199_v16, 4  ;;  %v4231_v23 = vshrl.u32 %v3787_v14, 16  ;;  %v4234_v5 = vshll.u32 %v3787_v14, 16 }
 0x1e1   : >> { %v4200_v22 = vsel %vm13470_vm1, %v4191_v46, %v4199_v16  ;;  %v4223_v55 = vrot.slane %v4221_v63, 5  ;;  %v4226_v52 = vrot.slane %v4224_v29, 6  ;;  %v13731_v20 = vadd.f32 %v13664_v18, %v13662_v25 }
 0x1e2   : >> { %v4383_v53 = vld [vmem:[#allocation3 + $0x200] sm:$0xff]  ;;  %v4210_v28 = vsel %vm13470_vm1, %v4201_v38, %v4209_v30  ;;  %v4218_v21 = vor.u32 %v4217_v56, %v4214_v12  ;;  %v4233_v3 = vrot.slane %v4231_v23, 5  ;;  %v4236_v19 = vrot.slane %v4234_v5, 6 }
 0x1e3   : >> { %11439 = vmatprep.mubr.msk.bf16.mxu0 %vm1096_vm12, %v4383_v53  ;;  %v10517_v9 = vcombine.low %v4200_v22, %v4210_v28  ;;  %v4227_v54 = vor.u32 %v4226_v52, %v4223_v55  ;;  %v10952_v17 = vadd.f32 %v13670_v36, %v13668_v33  ;;  %v13744_v4 = vadd.f32 %v13688_v34, %v13685_v49 }
 0x1e4   : >> { %v4219_v18 = vrot.slane %v4218_v21, 4  ;;  %v4237_v48 = vor.u32 %v4236_v19, %v4233_v3  ;;  %v13748_v44 = vadd.f32 %v13698_v40, %v13692_v35  ;;  %v10955_v33 = vadd.f32 %v13712_v7, %v13704_v13 }
 0x1e5   : >> { %4317 = vst.msk [vmem:[#allocation3 + $0x250] sm:$0xff] %vm1096_vm12, %v10517_v9  ;;  %v4229_v1 = vrot.slane %v4227_v54, 4  ;;  %v13756_v36 = vadd.f32 %v10957_v0, %v13714_v58  ;;  %v4781_v49 = vadd.f32 %v13594_v57, %v13750_v45  ;;  %v4784_v58 = vadd.f32 %v13613_v24, %v13750_v45 }
 0x1e6   : >> { %v11047_v27 = vpop.f32.mrb[16].mxu1  ;;  %v4228_v35 = vsel %vm13470_vm1, %v4219_v18, %v4227_v54  ;;  %v4789_v24 = vadd.f32 %v13681_v32, %v13750_v45  ;;  %v4792_v29 = vadd.f32 %v13696_v41, %v13750_v45  ;;  %v4797_v32 = vadd.f32 %v13731_v20, %v13750_v45 }
 0x1e7   : >> { %v11048_v25 = vpop.f32.mrb[17].mxu1  ;;  %v4388_v34 = vld [vmem:[#allocation3 + $0x228] sm:$0xff]  ;;  %v4238_v15 = vsel %vm13470_vm1, %v4229_v1, %v4237_v48  ;;  %v4800_v41 = vadd.f32 %v10952_v17, %v13750_v45  ;;  %v4805_v20 = vadd.f32 %v10955_v33, %v13750_v45  ;;  %v4808_v17 = vadd.f32 %v13756_v36, %v13750_v45 }
 0x1e8   : >> { %v11050_v62 = vpop.f32.mrb[18].mxu1  ;;  %v11049_v40 = vadd.f32 %v11048_v25, %v11047_v27  ;;  %11440 = vmatmul.mubr.msk.bf16.gmra.mrb[72].mxu0 %vm1096_vm12, %v4388_v34  ;;  %v10518_v0 = vcombine.low %v4228_v35, %v4238_v15 }
 0x1e9   : >> { %v10959_v8 = vpop.f32.mrb[16].mxu0  ;;  %v11051_v37 = vpop.f32.mrb[19].mxu1 }
 0x1ea   : >> { %v10960_v39 = vpop.f32.mrb[17].mxu0  ;;  %v11052_v43 = vadd.f32 %v11051_v37, %v11050_v62  ;;  %v13769_v11 = vadd.f32 %v11049_v40, %v4781_v49  ;;  %4318 = vst.msk [vmem:[#allocation3 + $0x278] sm:$0xff] %vm1096_vm12, %v10518_v0 }
 0x1eb   : >> { %v13765_v13 = vadd.f32 %v10960_v39, %v10959_v8  ;;  %v10962_v7 = vpop.f32.mrb[18].mxu0 }
 0x1ec   : >> { %v10963_v57 = vpop.f32.mrb[19].mxu0  ;;  %v13774_v59 = vadd.f32 %v11052_v43, %v4784_v58  ;;  %v4393_v10 = vld [vmem:[#allocation3 + $0x250] sm:$0xff] }
 0x1ed   : >> { %v13771_v31 = vadd.f32 %v10963_v57, %v10962_v7  ;;  %11443 = vmatprep.mubr.msk.bf16.mxu0 %vm1096_vm12, %v4393_v10  ;;  %v4813_v33 = vadd.f32 %v13765_v13, %v13750_v45 }
 0x1ef   : >> { %v4816_v36 = vadd.f32 %v13771_v31, %v13750_v45 }
 0x1f1   : >> { %v4398_v14 = vld [vmem:[#allocation3 + $0x278] sm:$0xff] }
 0x1f2   : >> { %11444 = vmatmul.mubr.msk.bf16.gmra.mrb[76].mxu0 %vm1096_vm12, %v4398_v14 }
 0x1f6   : >> { %v11053_v16 = vpop.f32.mrb[20].mxu1 }
 0x1f7   : >> { %v11054_v12 = vpop.f32.mrb[21].mxu1 }
 0x1f8   : >> { %v11055_v51 = vadd.f32 %v11054_v12, %v11053_v16  ;;  %v11056_v46 = vpop.f32.mrb[22].mxu1  ;;  %v10965_v30 = vpop.f32.mrb[20].mxu0 }
 0x1f9   : >> { %v11057_v63 = vpop.f32.mrb[23].mxu1  ;;  %v10966_v38 = vpop.f32.mrb[21].mxu0 }
 0x1fa   : >> { %v11058_v56 = vadd.f32 %v11057_v63, %v11056_v46  ;;  %v13782_v23 = vadd.f32 %v11055_v51, %v4789_v24  ;;  %v10967_v5 = vadd.f32 %v10966_v38, %v10965_v30  ;;  %v10968_v53 = vpop.f32.mrb[22].mxu0 }
 0x1fb   : >> { %v10969_v22 = vpop.f32.mrb[23].mxu0 }
 0x1fc   : >> { %v13784_v55 = vadd.f32 %v11058_v56, %v4792_v29  ;;  %v10970_v52 = vadd.f32 %v10969_v22, %v10968_v53  ;;  %v4821_v13 = vadd.f32 %v10967_v5, %v13750_v45 }
 0x206   : >> { %v11059_v28 = vpop.f32.mrb[24].mxu1 }
 0x207   : >> { %v11060_v21 = vpop.f32.mrb[25].mxu1 }
 0x208   : >> { %v11061_v3 = vadd.f32 %v11060_v21, %v11059_v28  ;;  %v11062_v19 = vpop.f32.mrb[26].mxu1  ;;  %v10971_v27 = vpop.f32.mrb[24].mxu0 }
 0x209   : >> { %v11063_v9 = vpop.f32.mrb[27].mxu1  ;;  %v10972_v54 = vpop.f32.mrb[25].mxu0 }
 0x20a   : >> { %v11064_v25 = vadd.f32 %v11063_v9, %v11062_v19  ;;  %v13789_v18 = vadd.f32 %v11061_v3, %v4797_v32  ;;  %v10973_v48 = vadd.f32 %v10972_v54, %v10971_v27  ;;  %v10974_v62 = vpop.f32.mrb[26].mxu0 }
 0x20b   : >> { %v10975_v1 = vpop.f32.mrb[27].mxu0 }
 0x20c   : >> { %v13791_v8 = vadd.f32 %v11064_v25, %v4800_v41  ;;  %v10976_v37 = vadd.f32 %v10975_v1, %v10974_v62  ;;  %v4824_v25 = vadd.f32 %v10970_v52, %v13750_v45 }
 0x217   : >> { %v11065_v49 = vpop.f32.mrb[28].mxu1 }
 0x218   : >> { %v11066_v34 = vpop.f32.mrb[29].mxu1 }
 0x219   : >> { %v11067_v35 = vadd.f32 %v11066_v34, %v11065_v49  ;;  %v10977_v40 = vpop.f32.mrb[28].mxu0  ;;  %v11068_v39 = vpop.f32.mrb[30].mxu1 }
 0x21a   : >> { %v10978_v15 = vpop.f32.mrb[29].mxu0  ;;  %v11069_v7 = vpop.f32.mrb[31].mxu1 }
 0x21b   : >> { %v10979_v58 = vadd.f32 %v10978_v15, %v10977_v40  ;;  %v11070_v0 = vadd.f32 %v11069_v7, %v11068_v39  ;;  %v10980_v43 = vpop.f32.mrb[30].mxu0  ;;  %v13796_v57 = vadd.f32 %v11067_v35, %v4805_v20  ;;  %v4829_v15 = vadd.f32 %v10973_v48, %v13750_v45 }
 0x21c   : >> { %v10981_v10 = vpop.f32.mrb[31].mxu0 }
 0x21d   : >> { %v10982_v14 = vadd.f32 %v10981_v10, %v10980_v43  ;;  %v13798_v16 = vadd.f32 %v11070_v0, %v4808_v17  ;;  %v4832_v43 = vadd.f32 %v10976_v37, %v13750_v45 }
 0x229   : >> { %v11071_v12 = vpop.f32.mrb[32].mxu1 }
 0x22a   : >> { %v11072_v24 = vpop.f32.mrb[33].mxu1 }
 0x22b   : >> { %v11073_v51 = vadd.f32 %v11072_v24, %v11071_v12  ;;  %v11074_v30 = vpop.f32.mrb[34].mxu1 }
 0x22c   : >> { %v10983_v46 = vpop.f32.mrb[32].mxu0  ;;  %v11075_v29 = vpop.f32.mrb[35].mxu1 }
 0x22d   : >> { %v10984_v63 = vpop.f32.mrb[33].mxu0  ;;  %v11076_v56 = vadd.f32 %v11075_v29, %v11074_v30  ;;  %v13804_v22 = vadd.f32 %v11073_v51, %v4813_v33 }
 0x22e   : >> { %v10985_v38 = vadd.f32 %v10984_v63, %v10983_v46  ;;  %v10986_v53 = vpop.f32.mrb[34].mxu0 }
 0x22f   : >> { %v10987_v28 = vpop.f32.mrb[35].mxu0  ;;  %v13806_v32 = vadd.f32 %v11076_v56, %v4816_v36  ;;  %v4837_v36 = vadd.f32 %v10979_v58, %v13750_v45 }
 0x230   : >> { %v10988_v21 = vadd.f32 %v10987_v28, %v10986_v53 }
 0x236   : >> { %v11077_v3 = vpop.f32.mrb[36].mxu1 }
 0x237   : >> { %v11078_v19 = vpop.f32.mrb[37].mxu1 }
 0x238   : >> { %v11079_v27 = vadd.f32 %v11078_v19, %v11077_v3  ;;  %v11080_v9 = vpop.f32.mrb[38].mxu1  ;;  %v4840_v3 = vadd.f32 %v10982_v14, %v13750_v45 }
 0x239   : >> { %v10989_v41 = vpop.f32.mrb[36].mxu0  ;;  %v11081_v54 = vpop.f32.mrb[39].mxu1 }
 0x23a   : >> { %v10990_v31 = vpop.f32.mrb[37].mxu0  ;;  %v11082_v62 = vadd.f32 %v11081_v54, %v11080_v9  ;;  %v13810_v1 = vadd.f32 %v11079_v27, %v4821_v13 }
 0x23b   : >> { %v13812_v49 = vadd.f32 %v10990_v31, %v10989_v41  ;;  %v10992_v34 = vpop.f32.mrb[38].mxu0 }
 0x23c   : >> { %v10993_v20 = vpop.f32.mrb[39].mxu0  ;;  %v13814_v35 = vadd.f32 %v11082_v62, %v4824_v25 }
 0x23d   : >> { %v13816_v40 = vadd.f32 %v10993_v20, %v10992_v34  ;;  %v4845_v34 = vadd.f32 %v10985_v38, %v13750_v45 }
 0x247   : >> { %v11083_v39 = vpop.f32.mrb[40].mxu1 }
 0x248   : >> { %v11084_v5 = vpop.f32.mrb[41].mxu1 }
 0x249   : >> { %v11085_v7 = vadd.f32 %v11084_v5, %v11083_v39  ;;  %v11086_v17 = vpop.f32.mrb[42].mxu1  ;;  %v10995_v0 = vpop.f32.mrb[40].mxu0 }
 0x24a   : >> { %v11087_v52 = vpop.f32.mrb[43].mxu1  ;;  %v10996_v10 = vpop.f32.mrb[41].mxu0 }
 0x24b   : >> { %v11088_v12 = vadd.f32 %v11087_v52, %v11086_v17  ;;  %v13820_v24 = vadd.f32 %v11085_v7, %v4829_v15  ;;  %v13822_v33 = vadd.f32 %v10996_v10, %v10995_v0  ;;  %v10998_v51 = vpop.f32.mrb[42].mxu0  ;;  %v4848_v17 = vadd.f32 %v10988_v21, %v13750_v45 }
 0x24c   : >> { %v10999_v46 = vpop.f32.mrb[43].mxu0 }
 0x24d   : >> { %v13824_v30 = vadd.f32 %v11088_v12, %v4832_v43  ;;  %v13826_v63 = vadd.f32 %v10999_v46, %v10998_v51 }
 0x257   : >> { %v11089_v29 = vpop.f32.mrb[44].mxu1 }
 0x258   : >> { %v11090_v48 = vpop.f32.mrb[45].mxu1 }
 0x259   : >> { %v11091_v56 = vadd.f32 %v11090_v48, %v11089_v29  ;;  %v11092_v53 = vpop.f32.mrb[46].mxu1  ;;  %v11001_v28 = vpop.f32.mrb[44].mxu0 }
 0x25a   : >> { %v11093_v37 = vpop.f32.mrb[47].mxu1  ;;  %v11002_v19 = vpop.f32.mrb[45].mxu0 }
 0x25b   : >> { %v11094_v13 = vadd.f32 %v11093_v37, %v11092_v53  ;;  %v13830_v27 = vadd.f32 %v11091_v56, %v4837_v36  ;;  %v13832_v9 = vadd.f32 %v11002_v19, %v11001_v28  ;;  %v11004_v41 = vpop.f32.mrb[46].mxu0 }
 0x25c   : >> { %v11005_v54 = vpop.f32.mrb[47].mxu0 }
 0x25d   : >> { %v13834_v25 = vadd.f32 %v11094_v13, %v4840_v3  ;;  %v13836_v31 = vadd.f32 %v11005_v54, %v11004_v41  ;;  %v4853_v3 = vadd.f32 %v13812_v49, %v13750_v45 }
 0x260   : >> { %v11095_v62 = vpop.f32.mrb[48].mxu1 }
 0x261   : >> { %v11096_v58 = vpop.f32.mrb[49].mxu1  ;;  %v11417_v39 = vpop.f32.mrb[48].mxu0 }
 0x262   : >> { %v11097_v20 = vadd.f32 %v11096_v58, %v11095_v62  ;;  %v11098_v5 = vpop.f32.mrb[50].mxu1  ;;  %v5111_v14 = vadd.f32 %v11417_v39, %v13782_v23  ;;  %v5102_v15 = vpop.f32.mrb[49].mxu0 }
 0x263   : >> { %v11099_v7 = vpop.f32.mrb[51].mxu1  ;;  %v5103_v0 = vadd.f32 %v5102_v15, %v13769_v11  ;;  %v11418_v43 = vpop.f32.mrb[50].mxu0 }
 0x264   : >> { %v11100_v52 = vadd.f32 %v11099_v7, %v11098_v5  ;;  %v13842_v10 = vadd.f32 %v11097_v20, %v4845_v34  ;;  %v5231_v12 = vmax.f32 %v5111_v14, 0.0  ;;  %v5114_v51 = vadd.f32 %v11418_v43, %v13784_v55  ;;  %v5105_v46 = vpop.f32.mrb[51].mxu0 }
 0x265   : >> { %v5229_v38 = vmax.f32 %v5103_v0, 0.0  ;;  %v5106_v29 = vadd.f32 %v5105_v46, %v13774_v59  ;;  %v4856_v59 = vadd.f32 %v13816_v40, %v13750_v45 }
 0x266   : >> { %v13846_v48 = vadd.f32 %v11100_v52, %v4848_v17  ;;  %v10889_v23 = vpack.c.bf16 %v5231_v12, %v5231_v12  ;;  %v5232_v36 = vmax.f32 %v5114_v51, 0.0  ;;  %v4861_v51 = vadd.f32 %v13822_v33, %v13750_v45 }
 0x267   : >> { %v10887_v56 = vpack.c.bf16 %v5229_v38, %v5229_v38  ;;  %v5230_v53 = vmax.f32 %v5106_v29, 0.0 }
 0x268   : >> { %v11101_v21 = vpop.f32.mrb[52].mxu1  ;;  %v5362_v28 = vrot.slane %v10889_v23, 7  ;;  %v10890_v11 = vpack.c.bf16 %v5232_v36, %v5232_v36  ;;  %v4864_v36 = vadd.f32 %v13826_v63, %v13750_v45 }
 0x269   : >> { %v11102_v37 = vpop.f32.mrb[53].mxu1  ;;  %v5357_v19 = vrot.slane %v10887_v56, 7  ;;  %v10888_v13 = vpack.c.bf16 %v5230_v53, %v5230_v53 }
 0x26a   : >> { %v11103_v55 = vadd.f32 %v11102_v37, %v11101_v21  ;;  %v11104_v41 = vpop.f32.mrb[54].mxu1  ;;  %v5363_v54 = vrot.slane %v5362_v28, 4  ;;  %5488 = vst.msk [vmem:[#allocation2 + $0x18] sm:$0xe] %vm512_vm7, %v5362_v28  ;;  %v5364_v62 = vrot.slane %v10890_v11, 7 }
 0x26b   : >> { %v11105_v58 = vpop.f32.mrb[55].mxu1  ;;  %v5358_v34 = vrot.slane %v5357_v19, 4  ;;  %5485 = vst.msk [vmem:[#allocation2 + $0xc] sm:$0xe] %vm512_vm7, %v5357_v19  ;;  %v5359_v20 = vrot.slane %v10888_v13, 7 }
 0x26c   : >> { %v11106_v39 = vadd.f32 %v11105_v58, %v11104_v41  ;;  %v13854_v5 = vadd.f32 %v11103_v55, %v4853_v3  ;;  %v5365_v49 = vsel %vm12328_vm10, %v5363_v54, %v5364_v62  ;;  %v5366_v14 = vrot.slane %v5364_v62, 4 }
 0x26d   : >> { %5489 = vst.msk [vmem:[#allocation2 + $0x1c] sm:$0xf] %vm226_vm4, %v5365_v49  ;;  %v5360_v40 = vsel %vm12328_vm10, %v5358_v34, %v5359_v20  ;;  %v5361_v15 = vrot.slane %v5359_v20, 4 }
 0x26e   : >> { %v13861_v7 = vadd.f32 %v11106_v39, %v4856_v59  ;;  %5490 = vst.msk [vmem:[#allocation2 + $0x20] sm:$0x1] %vm241_vm5, %v5366_v14  ;;  %v11421_v17 = vpop.f32.mrb[52].mxu0 }
 0x26f   : >> { %5486 = vst.msk [vmem:[#allocation2 + $0x10] sm:$0xf] %vm226_vm4, %v5360_v40  ;;  %v5127_v52 = vadd.f32 %v11421_v17, %v13796_v57  ;;  %v5118_v43 = vpop.f32.mrb[53].mxu0 }
 0x270   : >> { %5487 = vst.msk [vmem:[#allocation2 + $0x14] sm:$0x1] %vm241_vm5, %v5361_v15  ;;  %v5119_v46 = vadd.f32 %v5118_v43, %v13789_v18  ;;  %v11422_v38 = vpop.f32.mrb[54].mxu0  ;;  %v4869_v15 = vadd.f32 %v13832_v9, %v13750_v45  ;;  %v4872_v43 = vadd.f32 %v13836_v31, %v13750_v45 }
 0x271   : >> { %v11107_v0 = vpop.f32.mrb[56].mxu1  ;;  %v5235_v56 = vmax.f32 %v5127_v52, 0.0  ;;  %v5130_v53 = vadd.f32 %v11422_v38, %v13798_v16  ;;  %v5121_v21 = vpop.f32.mrb[55].mxu0 }
 0x272   : >> { %v11108_v12 = vpop.f32.mrb[57].mxu1  ;;  %v5233_v11 = vmax.f32 %v5119_v46, 0.0  ;;  %v5122_v57 = vadd.f32 %v5121_v21, %v13791_v8 }
 0x273   : >> { %v11109_v29 = vadd.f32 %v11108_v12, %v11107_v0  ;;  %v11110_v23 = vpop.f32.mrb[58].mxu1  ;;  %v10893_v33 = vpack.c.bf16 %v5235_v56, %v5235_v56  ;;  %v5236_v19 = vmax.f32 %v5130_v53, 0.0 }
 0x274   : >> { %v11111_v28 = vpop.f32.mrb[59].mxu1  ;;  %v10891_v18 = vpack.c.bf16 %v5233_v11, %v5233_v11  ;;  %v5234_v13 = vmax.f32 %v5122_v57, 0.0 }
 0x275   : >> { %v11112_v37 = vadd.f32 %v11111_v28, %v11110_v23  ;;  %v13874_v3 = vadd.f32 %v11109_v29, %v4861_v51  ;;  %v5372_v41 = vrot.slane %v10893_v33, 7  ;;  %v10894_v59 = vpack.c.bf16 %v5236_v19, %v5236_v19 }
 0x276   : >> { %v5367_v63 = vrot.slane %v10891_v18, 7  ;;  %v10892_v54 = vpack.c.bf16 %v5234_v13, %v5234_v13 }
 0x277   : >> { %v13876_v55 = vadd.f32 %v11112_v37, %v4864_v36  ;;  %v5373_v62 = vrot.slane %v5372_v41, 4  ;;  %5494 = vst.msk [vmem:[#allocation2 + $0x30] sm:$0xe] %vm512_vm7, %v5372_v41  ;;  %v5374_v16 = vrot.slane %v10894_v59, 7  ;;  %v4877_v41 = vadd.f32 %v13578_v6, %v13750_v45 }
 0x278   : >> { %v5368_v58 = vrot.slane %v5367_v63, 4  ;;  %5491 = vst.msk [vmem:[#allocation2 + $0x24] sm:$0xe] %vm512_vm7, %v5367_v63  ;;  %v5369_v8 = vrot.slane %v10892_v54, 7 }
 0x279   : >> { %v5375_v34 = vsel %vm12328_vm10, %v5373_v62, %v5374_v16  ;;  %v5376_v20 = vrot.slane %v5374_v16, 4 }
 0x27a   : >> { %5495 = vst.msk [vmem:[#allocation2 + $0x34] sm:$0xf] %vm226_vm4, %v5375_v34  ;;  %v5370_v49 = vsel %vm12328_vm10, %v5368_v58, %v5369_v8  ;;  %v5371_v14 = vrot.slane %v5369_v8, 4 }
 0x27b   : >> { %5496 = vst.msk [vmem:[#allocation2 + $0x38] sm:$0x1] %vm241_vm5, %v5376_v20 }
 0x27c   : >> { %v11113_v39 = vpop.f32.mrb[60].mxu1  ;;  %5492 = vst.msk [vmem:[#allocation2 + $0x28] sm:$0xf] %vm226_vm4, %v5370_v49 }
 0x27d   : >> { %v11114_v40 = vpop.f32.mrb[61].mxu1  ;;  %5493 = vst.msk [vmem:[#allocation2 + $0x2c] sm:$0x1] %vm241_vm5, %v5371_v14 }
 0x27e   : >> { %v11115_v17 = vadd.f32 %v11114_v40, %v11113_v39  ;;  %v11116_v0 = vpop.f32.mrb[62].mxu1 }
 0x27f   : >> { %v11117_v52 = vpop.f32.mrb[63].mxu1  ;;  %v11425_v46 = vpop.f32.mrb[56].mxu0 }
 0x280   : >> { %v11118_v12 = vadd.f32 %v11117_v52, %v11116_v0  ;;  %v13892_v51 = vadd.f32 %v11115_v17, %v4869_v15  ;;  %v5143_v38 = vadd.f32 %v11425_v46, %v13810_v1  ;;  %v5134_v29 = vpop.f32.mrb[57].mxu0  ;;  %v4885_v0 = vadd.f32 %v13637_v26, %v13750_v45 }
 0x281   : >> { %v5135_v23 = vadd.f32 %v5134_v29, %v13804_v22  ;;  %v11426_v36 = vpop.f32.mrb[58].mxu0 }
 0x282   : >> { %v13895_v9 = vadd.f32 %v11118_v12, %v4872_v43  ;;  %v5239_v56 = vmax.f32 %v5143_v38, 0.0  ;;  %v5146_v53 = vadd.f32 %v11426_v36, %v13814_v35  ;;  %v5137_v21 = vpop.f32.mrb[59].mxu0  ;;  %v4880_v35 = vadd.f32 %v13588_v42, %v13750_v45 }
 0x283   : >> { %v5237_v28 = vmax.f32 %v5135_v23, 0.0  ;;  %v5138_v11 = vadd.f32 %v5137_v21, %v13806_v32  ;;  %v4888_v38 = vadd.f32 %v13657_v2, %v13750_v45 }
 0x284   : >> { %v10897_v31 = vpack.c.bf16 %v5239_v56, %v5239_v56  ;;  %v5240_v57 = vmax.f32 %v5146_v53, 0.0 }
 0x285   : >> { %v10895_v37 = vpack.c.bf16 %v5237_v28, %v5237_v28  ;;  %v5238_v33 = vmax.f32 %v5138_v11, 0.0 }
 0x286   : >> { %v5382_v18 = vrot.slane %v10897_v31, 7  ;;  %v10898_v1 = vpack.c.bf16 %v5240_v57, %v5240_v57 }
 0x287   : >> { %v11119_v19 = vpop.f32.mrb[64].mxu1  ;;  %v5377_v22 = vrot.slane %v10895_v37, 7  ;;  %v10896_v59 = vpack.c.bf16 %v5238_v33, %v5238_v33 }
 0x288   : >> { %v11120_v13 = vpop.f32.mrb[65].mxu1  ;;  %v5383_v62 = vrot.slane %v5382_v18, 4  ;;  %5500 = vst.msk [vmem:[#allocation2 + $0x48] sm:$0xe] %vm512_vm7, %v5382_v18  ;;  %v5384_v32 = vrot.slane %v10898_v1, 7 }
 0x289   : >> { %v11121_v63 = vadd.f32 %v11120_v13, %v11119_v19  ;;  %v11122_v54 = vpop.f32.mrb[66].mxu1  ;;  %v5378_v58 = vrot.slane %v5377_v22, 4  ;;  %5497 = vst.msk [vmem:[#allocation2 + $0x3c] sm:$0xe] %vm512_vm7, %v5377_v22  ;;  %v5379_v8 = vrot.slane %v10896_v59, 7 }
 0x28a   : >> { %v11123_v16 = vpop.f32.mrb[67].mxu1  ;;  %v5385_v6 = vsel %vm12328_vm10, %v5383_v62, %v5384_v32  ;;  %v5386_v39 = vrot.slane %v5384_v32, 4 }
 0x28b   : >> { %v11124_v34 = vadd.f32 %v11123_v16, %v11122_v54  ;;  %v13906_v20 = vadd.f32 %v11121_v63, %v4877_v41  ;;  %5501 = vst.msk [vmem:[#allocation2 + $0x4c] sm:$0xf] %vm226_vm4, %v5385_v6  ;;  %v5380_v42 = vsel %vm12328_vm10, %v5378_v58, %v5379_v8  ;;  %v5381_v49 = vrot.slane %v5379_v8, 4 }
 0x28c   : >> { %5502 = vst.msk [vmem:[#allocation2 + $0x50] sm:$0x1] %vm241_vm5, %v5386_v39  ;;  %v4893_v63 = vadd.f32 %v13710_v60, %v13750_v45 }
 0x28d   : >> { %v13913_v14 = vadd.f32 %v11124_v34, %v4880_v35  ;;  %5498 = vst.msk [vmem:[#allocation2 + $0x40] sm:$0xf] %vm226_vm4, %v5380_v42  ;;  %v4896_v34 = vadd.f32 %v13724_v47, %v13750_v45 }
 0x28e   : >> { %5499 = vst.msk [vmem:[#allocation2 + $0x44] sm:$0x1] %vm241_vm5, %v5381_v49  ;;  %v11429_v15 = vpop.f32.mrb[60].mxu0 }
 0x28f   : >> { %v5159_v52 = vadd.f32 %v11429_v15, %v13830_v27  ;;  %v5150_v43 = vpop.f32.mrb[61].mxu0 }
 0x290   : >> { %v11125_v40 = vpop.f32.mrb[68].mxu1  ;;  %v5151_v29 = vadd.f32 %v5150_v43, %v13820_v24  ;;  %v11430_v23 = vpop.f32.mrb[62].mxu0 }
 0x291   : >> { %v11126_v17 = vpop.f32.mrb[69].mxu1  ;;  %v5243_v56 = vmax.f32 %v5159_v52, 0.0  ;;  %v5162_v53 = vadd.f32 %v11430_v23, %v13834_v25  ;;  %v5153_v21 = vpop.f32.mrb[63].mxu0 }
 0x292   : >> { %v11127_v12 = vadd.f32 %v11126_v17, %v11125_v40  ;;  %v11128_v46 = vpop.f32.mrb[70].mxu1  ;;  %v5241_v26 = vmax.f32 %v5151_v29, 0.0  ;;  %v5154_v27 = vadd.f32 %v5153_v21, %v13824_v30 }
 0x293   : >> { %v11129_v36 = vpop.f32.mrb[71].mxu1  ;;  %v10901_v31 = vpack.c.bf16 %v5243_v56, %v5243_v56  ;;  %v5244_v57 = vmax.f32 %v5162_v53, 0.0 }
 0x294   : >> { %v11130_v28 = vadd.f32 %v11129_v36, %v11128_v46  ;;  %v13925_v11 = vadd.f32 %v11127_v12, %v4885_v0  ;;  %v10899_v33 = vpack.c.bf16 %v5241_v26, %v5241_v26  ;;  %v5242_v2 = vmax.f32 %v5154_v27, 0.0 }
 0x295   : >> { %v5392_v19 = vrot.slane %v10901_v31, 7  ;;  %v10902_v24 = vpack.c.bf16 %v5244_v57, %v5244_v57  ;;  %v4901_v36 = vadd.f32 %v13744_v4, %v13750_v45 }
 0x296   : >> { %v13928_v37 = vadd.f32 %v11130_v28, %v4888_v38  ;;  %v5387_v18 = vrot.slane %v10899_v33, 7  ;;  %v10900_v1 = vpack.c.bf16 %v5242_v2, %v5242_v2 }
 0x297   : >> { %v5393_v13 = vrot.slane %v5392_v19, 4  ;;  %5506 = vst.msk [vmem:[#allocation2 + $0x60] sm:$0xe] %vm512_vm7, %v5392_v19  ;;  %v5394_v25 = vrot.slane %v10902_v24, 7 }
 0x298   : >> { %v5388_v22 = vrot.slane %v5387_v18, 4  ;;  %5503 = vst.msk [vmem:[#allocation2 + $0x54] sm:$0xe] %vm512_vm7, %v5387_v18  ;;  %v5389_v59 = vrot.slane %v10900_v1, 7 }
 0x299   : >> { %v5395_v54 = vsel %vm12328_vm10, %v5393_v13, %v5394_v25  ;;  %v5396_v35 = vrot.slane %v5394_v25, 4 }
 0x29a   : >> { %v11131_v41 = vpop.f32.mrb[72].mxu1  ;;  %5507 = vst.msk [vmem:[#allocation2 + $0x64] sm:$0xf] %vm226_vm4, %v5395_v54  ;;  %v5390_v16 = vsel %vm12328_vm10, %v5388_v22, %v5389_v59  ;;  %v5391_v58 = vrot.slane %v5389_v59, 4 }
 0x29b   : >> { %v11132_v30 = vpop.f32.mrb[73].mxu1  ;;  %5508 = vst.msk [vmem:[#allocation2 + $0x68] sm:$0x1] %vm241_vm5, %v5396_v35 }
 0x29c   : >> { %v11133_v62 = vadd.f32 %v11132_v30, %v11131_v41  ;;  %v11134_v32 = vpop.f32.mrb[74].mxu1  ;;  %5504 = vst.msk [vmem:[#allocation2 + $0x58] sm:$0xf] %vm226_vm4, %v5390_v16 }
 0x29d   : >> { %v11135_v8 = vpop.f32.mrb[75].mxu1  ;;  %5505 = vst.msk [vmem:[#allocation2 + $0x5c] sm:$0x1] %vm241_vm5, %v5391_v58 }
 0x29e   : >> { %v11136_v60 = vadd.f32 %v11135_v8, %v11134_v32  ;;  %v13943_v6 = vadd.f32 %v11133_v62, %v4893_v63 }
 0x2a0   : >> { %v13946_v39 = vadd.f32 %v11136_v60, %v4896_v34  ;;  %v11433_v42 = vpop.f32.mrb[64].mxu0 }
 0x2a1   : >> { %v5175_v49 = vadd.f32 %v11433_v42, %v13854_v5  ;;  %v5166_v40 = vpop.f32.mrb[65].mxu0 }
 0x2a2   : >> { %v5167_v15 = vadd.f32 %v5166_v40, %v13842_v10  ;;  %v11434_v17 = vpop.f32.mrb[66].mxu0  ;;  %v4904_v10 = vadd.f32 %v13748_v44, %v13750_v45 }
 0x2a3   : >> { %v5247_v0 = vmax.f32 %v5175_v49, 0.0  ;;  %v5178_v47 = vadd.f32 %v11434_v17, %v13861_v7  ;;  %v5169_v52 = vpop.f32.mrb[67].mxu0 }
 0x2a4   : >> { %v5245_v43 = vmax.f32 %v5167_v15, 0.0  ;;  %v5170_v12 = vadd.f32 %v5169_v52, %v13846_v48  ;;  %v11137_v46 = vpop.f32.mrb[76].mxu1 }
 0x2a5   : >> { %v10905_v38 = vpack.c.bf16 %v5247_v0, %v5247_v0  ;;  %v5248_v29 = vmax.f32 %v5178_v47, 0.0  ;;  %v11138_v23 = vpop.f32.mrb[77].mxu1 }
 0x2a6   : >> { %v10903_v56 = vpack.c.bf16 %v5245_v43, %v5245_v43  ;;  %v5246_v5 = vmax.f32 %v5170_v12, 0.0  ;;  %v11139_v53 = vadd.f32 %v11138_v23, %v11137_v46  ;;  %v11140_v21 = vpop.f32.mrb[78].mxu1 }
 0x2a7   : >> { %v5402_v28 = vrot.slane %v10905_v38, 7  ;;  %v10906_v7 = vpack.c.bf16 %v5248_v29, %v5248_v29  ;;  %v11141_v26 = vpop.f32.mrb[79].mxu1 }
 0x2a8   : >> { %v5397_v27 = vrot.slane %v10903_v56, 7  ;;  %v10904_v31 = vpack.c.bf16 %v5246_v5, %v5246_v5  ;;  %v13956_v48 = vadd.f32 %v11139_v53, %v4901_v36  ;;  %v11142_v57 = vadd.f32 %v11141_v26, %v11140_v21 }
 0x2a9   : >> { %v5403_v33 = vrot.slane %v5402_v28, 4  ;;  %5512 = vst.msk [vmem:[#allocation2 + $0x78] sm:$0xe] %vm512_vm7, %v5402_v28  ;;  %v5404_v2 = vrot.slane %v10906_v7, 7 }
 0x2aa   : >> { %v5398_v4 = vrot.slane %v5397_v27, 4  ;;  %5509 = vst.msk [vmem:[#allocation2 + $0x6c] sm:$0xe] %vm512_vm7, %v5397_v27  ;;  %v5399_v19 = vrot.slane %v10904_v31, 7  ;;  %v13960_v24 = vadd.f32 %v11142_v57, %v4904_v10 }
 0x2ab   : >> { %v5405_v44 = vsel %vm12328_vm10, %v5403_v33, %v5404_v2  ;;  %v5406_v45 = vrot.slane %v5404_v2, 4 }
 0x2ac   : >> { %5513 = vst.msk [vmem:[#allocation2 + $0x7c] sm:$0xf] %vm226_vm4, %v5405_v44  ;;  %v5400_v18 = vsel %vm12328_vm10, %v5398_v4, %v5399_v19  ;;  %v5401_v1 = vrot.slane %v5399_v19, 4 }
 0x2ad   : >> { %5514 = vst.msk [vmem:[#allocation2 + $0x80] sm:$0x1] %vm241_vm5, %v5406_v45 }
 0x2ae   : >> { %5510 = vst.msk [vmem:[#allocation2 + $0x70] sm:$0xf] %vm226_vm4, %v5400_v18 }
 0x2af   : >> { %5511 = vst.msk [vmem:[#allocation2 + $0x74] sm:$0x1] %vm241_vm5, %v5401_v1  ;;  %v11437_v13 = vpop.f32.mrb[68].mxu0 }
 0x2b0   : >> { %v5191_v25 = vadd.f32 %v11437_v13, %v13892_v51  ;;  %v5182_v41 = vpop.f32.mrb[69].mxu0 }
 0x2b1   : >> { %v5183_v22 = vadd.f32 %v5182_v41, %v13874_v3  ;;  %v11438_v59 = vpop.f32.mrb[70].mxu0 }
 0x2b2   : >> { %v5251_v30 = vmax.f32 %v5191_v25, 0.0  ;;  %v5194_v63 = vadd.f32 %v11438_v59, %v13895_v9  ;;  %v5185_v54 = vpop.f32.mrb[71].mxu0 }
 0x2b3   : >> { %v5249_v35 = vmax.f32 %v5183_v22, 0.0  ;;  %v5186_v62 = vadd.f32 %v5185_v54, %v13876_v55 }
 0x2b4   : >> { %v10909_v32 = vpack.c.bf16 %v5251_v30, %v5251_v30  ;;  %v5252_v16 = vmax.f32 %v5194_v63, 0.0 }
 0x2b5   : >> { %v10907_v58 = vpack.c.bf16 %v5249_v35, %v5249_v35  ;;  %v5250_v8 = vmax.f32 %v5186_v62, 0.0 }
 0x2b6   : >> { %v5412_v34 = vrot.slane %v10909_v32, 7  ;;  %v10910_v60 = vpack.c.bf16 %v5252_v16, %v5252_v16 }
 0x2b7   : >> { %v5407_v42 = vrot.slane %v10907_v58, 7  ;;  %v10908_v49 = vpack.c.bf16 %v5250_v8, %v5250_v8 }
 0x2b8   : >> { %v5413_v51 = vrot.slane %v5412_v34, 4  ;;  %5518 = vst.msk [vmem:[#allocation2 + $0x90] sm:$0xe] %vm512_vm7, %v5412_v34  ;;  %v5414_v3 = vrot.slane %v10910_v60, 7 }
 0x2b9   : >> { %v5408_v40 = vrot.slane %v5407_v42, 4  ;;  %5515 = vst.msk [vmem:[#allocation2 + $0x84] sm:$0xe] %vm512_vm7, %v5407_v42  ;;  %v5409_v9 = vrot.slane %v10908_v49, 7 }
 0x2ba   : >> { %v5415_v15 = vsel %vm12328_vm10, %v5413_v51, %v5414_v3  ;;  %v5416_v55 = vrot.slane %v5414_v3, 4  ;;  %v11860_v51 = vld [vmem:[#allocation2 + $0xc] sm:$0xff] (%p563_p4)  }
 0x2bb   : >> { %5519 = vst.msk [vmem:[#allocation2 + $0x94] sm:$0xf] %vm226_vm4, %v5415_v15  ;;  %v5410_v17 = vsel %vm12328_vm10, %v5408_v40, %v5409_v9  ;;  %v5411_v0 = vrot.slane %v5409_v9, 4  ;;  %v11441_v47 = vpop.f32.mrb[72].mxu0  ;;  %v6687_v15 = vrot.slane (%p563_p4), %v11860_v51, 7 }
 0x2bc   : >> { %5520 = vst.msk [vmem:[#allocation2 + $0x98] sm:$0x1] %vm241_vm5, %v5416_v55  ;;  %v5207_v52 = vadd.f32 %v11441_v47, %v13925_v11  ;;  %v5198_v43 = vpop.f32.mrb[73].mxu0 }
 0x2bd   : >> { %5516 = vst.msk [vmem:[#allocation2 + $0x88] sm:$0xf] %vm226_vm4, %v5410_v17  ;;  %v5199_v12 = vadd.f32 %v5198_v43, %v13906_v20  ;;  %v11442_v46 = vpop.f32.mrb[74].mxu0  ;;  %v11861_v17 = vld [vmem:[#allocation2 + $0x14] ss:$0 sps:$4 sm:$0x11] (%p563_p4)  }
 0x2be   : >> { %5517 = vst.msk [vmem:[#allocation2 + $0x8c] sm:$0x1] %vm241_vm5, %v5411_v0  ;;  %v5255_v38 = vmax.f32 %v5207_v52, 0.0  ;;  %v5210_v29 = vadd.f32 %v11442_v46, %v13928_v37  ;;  %v5201_v23 = vpop.f32.mrb[75].mxu0 }
 0x2bf   : >> { %v5253_v36 = vmax.f32 %v5199_v12, 0.0  ;;  %v5202_v56 = vadd.f32 %v5201_v23, %v13913_v14  ;;  %v5593_v47 = vld [vmem:[#allocation2 + $0x90] sm:$0xe] (%p563_p4)  ;;  %v6688_v12 = vrot.slane (%p563_p4), %v11861_v17, 7  ;;  %v5540_v17 = vld [vmem:[#allocation2 + $0x1c] sm:$0xf] (%p563_p4) }
 0x2c0   : >> { %v10913_v5 = vpack.c.bf16 %v5255_v38, %v5255_v38  ;;  %v5256_v53 = vmax.f32 %v5210_v29, 0.0  ;;  %v11863_v46 = vld [vmem:[#allocation2 + $0x8] ss:$0 sps:$4 sm:$0x11] (%p563_p4)   ;;  %v5534_v38 = vld [vmem:[#allocation2 + $0x4] sm:$0xf] (%p563_p4) }
 0x2c1   : >> { %v10911_v21 = vpack.c.bf16 %v5253_v36, %v5253_v36  ;;  %v5254_v10 = vmax.f32 %v5202_v56, 0.0  ;;  %v5581_v29 = vld [vmem:[#allocation2] sm:$0xe] (%p563_p4)  ;;  %v6689_v23 = vsel (%p563_p4), %vm380_vm8, %v6687_v15, %v6688_v12 }
 0x2c2   : >> { %v5422_v28 = vrot.slane %v10913_v5, 7  ;;  %v10914_v7 = vpack.c.bf16 %v5256_v53, %v5256_v53  ;;  %v5570_v0 = vld [vmem:[#allocation2 + $0x94] sm:$0xf] (%p563_p4) }
 0x2c3   : >> { %v5417_v11 = vrot.slane %v10911_v21, 7  ;;  %v10912_v26 = vpack.c.bf16 %v5254_v10, %v5254_v10  ;;  %v11858_v49 = vld [vmem:[#allocation2 + $0x98] ss:$0 sps:$4 sm:$0x11] (%p563_p4)   ;;  %v10649_v50 = vcombine.low (%p563_p4), %v5593_v47, %v5570_v0  ;;  %v10637_v21 = vcombine.low (%p563_p4), %v5581_v29, %v5534_v38  ;;  %v5583_v47 = vld [vmem:[#allocation2 + $0x18] sm:$0xe] (%p563_p4) }
 0x2c4   : >> { %v5423_v27 = vrot.slane %v5422_v28, 4  ;;  %5524 = vst.msk [vmem:[#allocation2 + $0xa8] sm:$0xe] %vm512_vm7, %v5422_v28  ;;  %v5424_v20 = vrot.slane %v10914_v7, 7  ;;  %v5954_v9 = vshrl.u32 (%p563_p4), %v11858_v49, 16  ;;  %v5950_v52 = vshll.u32 (%p563_p4), %v11858_v49, 16 }
 0x2c5   : >> { %v5418_v31 = vrot.slane %v5417_v11, 4  ;;  %5521 = vst.msk [vmem:[#allocation2 + $0x9c] sm:$0xe] %vm512_vm7, %v5417_v11  ;;  %v5419_v37 = vrot.slane %v10912_v26, 7  ;;  %v11445_v33 = vpop.f32.mrb[76].mxu0  ;;  %v5943_v36 = vshrl.u32 (%p563_p4), %v10649_v50, 16 }
 0x2c6   : >> { %v5425_v57 = vsel %vm12328_vm10, %v5423_v27, %v5424_v20  ;;  %v5426_v14 = vrot.slane %v5424_v20, 4  ;;  %v5223_v19 = vadd.f32 %v11445_v33, %v13956_v48  ;;  %v5214_v44 = vpop.f32.mrb[77].mxu0  ;;  %6048 = vrot.lane.b32.xlu1 (%p563_p4), %v5954_v9, %s12194_s13  ;;  %v5945_v56 = vshll.u32 (%p563_p4), %v10649_v50, 16 }
 0x2c7   : >> { %5525 = vst.msk [vmem:[#allocation2 + $0xac] sm:$0xf] %vm226_vm4, %v5425_v57  ;;  %v5420_v2 = vsel %vm12328_vm10, %v5418_v31, %v5419_v37  ;;  %v5421_v4 = vrot.slane %v5419_v37, 4  ;;  %v5215_v45 = vadd.f32 %v5214_v44, %v13943_v6  ;;  %v11446_v18 = vpop.f32.mrb[78].mxu0  ;;  %v5952_v53 = vrot.slane (%p563_p4), %v5950_v52, 1 }
 0x2c8   : >> { %5526 = vst.msk [vmem:[#allocation2 + $0xb0] sm:$0x1] %vm241_vm5, %v5426_v14  ;;  %v5259_v1 = vmax.f32 %v5223_v19, 0.0  ;;  %v5226_v13 = vadd.f32 %v11446_v18, %v13960_v24  ;;  %v5217_v25 = vpop.f32.mrb[79].mxu0  ;;  %v5782_v10 = vshll.u32 (%p563_p4), %v11863_v46, 16  ;;  %v5947_v28 = vrot.slane (%p563_p4), %v5945_v56, 1 }
 0x2c9   : >> { %5522 = vst.msk [vmem:[#allocation2 + $0xa0] sm:$0xf] %vm226_vm4, %v5420_v2  ;;  %v5257_v41 = vmax.f32 %v5215_v45, 0.0  ;;  %v5218_v22 = vadd.f32 %v5217_v25, %v13946_v39  ;;  %v5775_v11 = vshrl.u32 (%p563_p4), %v10637_v21, 16  ;;  %v5777_v26 = vshll.u32 (%p563_p4), %v10637_v21, 16  ;;  %v11877_v56 = vld [vmem:[#allocation2 + $0x24] sm:$0xff] (%p563_p4)  }
 0x2ca   : >> { %5523 = vst.msk [vmem:[#allocation2 + $0xa4] sm:$0x1] %vm241_vm5, %v5421_v4  ;;  %v10917_v59 = vpack.c.bf16 %v5259_v1, %v5259_v1  ;;  %v5260_v30 = vmax.f32 %v5226_v13, 0.0  ;;  %6737 = vrot.lane.b32.xlu1 (%p563_p4), %v6689_v23, %s12194_s13  ;;  %v5948_v20 = vor.u32 (%p563_p4), %v5947_v28, %v5943_v36  ;;  %v5786_v14 = vshrl.u32 (%p563_p4), %v11863_v46, 16 }
 0x2cb   : >> { %v10915_v48 = vpack.c.bf16 %v5257_v41, %v5257_v41  ;;  %v5258_v63 = vmax.f32 %v5218_v22, 0.0  ;;  %v5779_v33 = vrot.slane (%p563_p4), %v5777_v26, 1  ;;  %v5784_v2 = vrot.slane (%p563_p4), %v5782_v10, 1  ;;  %v11871_v25 = vld [vmem:[#allocation2 + $0x14] ss:$0 sps:$4 sm:$0x11] (%p563_p4)  }
 0x2cc   : >> { %v5432_v54 = vrot.slane %v10917_v59, 7  ;;  %v10918_v35 = vpack.c.bf16 %v5260_v30, %v5260_v30  ;;  %v5594_v57 = vld [vmem:[#allocation2 + $0x9c] sm:$0xe] (%p563_p4)  ;;  %v5953_v19 = vsel (%p563_p4), %vm807_vm11, %v5948_v20, %v5952_v53  ;;  %v5537_v41 = vld [vmem:[#allocation2 + $0x10] sm:$0xf] (%p563_p4)  ;;  %v10639_v46 = vcombine.low (%p563_p4), %v5583_v47, %v5540_v17 }
 0x2cd   : >> { %v5427_v62 = vrot.slane %v10915_v48, 7  ;;  %v10916_v32 = vpack.c.bf16 %v5258_v63, %v5258_v63  ;;  %v5780_v44 = vor.u32 (%p563_p4), %v5779_v33, %v5775_v11  ;;  %v5582_v30 = vld [vmem:[#allocation2 + $0xc] sm:$0xe] (%p563_p4)  ;;  %v14038_v53 = vld [vmem:[#allocation2 + $0x20] ss:$0 sps:$4 sm:$0x11] (%p563_p4)  }
 0x2ce   : >> { %v5433_v16 = vrot.slane %v5432_v54, 4  ;;  %5530 = vst.msk [vmem:[#allocation2 + $0xc0] sm:$0xe] %vm512_vm7, %v5432_v54  ;;  %v5434_v6 = vrot.slane %v10918_v35, 7  ;;  %565 = sbr.rel (!%p563_p4) target bundleno = 73 (0x49), region = 83  ;;  %v11865_v5 = vld [vmem:[#allocation2 + $0xa8] sm:$0xff] (%p563_p4)   ;;  %6046 = vrot.lane.b32.xlu1 (%p563_p4), %v5953_v19, %s12194_s13  ;;  %v10638_v48 = vcombine.low (%p563_p4), %v5582_v30, %v5537_v41 }
 0x2cf   : >> { %v5428_v58 = vrot.slane %v5427_v62, 4  ;;  %5527 = vst.msk [vmem:[#allocation2 + $0xb4] sm:$0xe] %vm512_vm7, %v5427_v62  ;;  %v5429_v24 = vrot.slane %v10916_v32, 7  ;;  %v6726_v31 = vrot.slane (%p563_p4), %v11865_v5, 7  ;;  %v5785_v22 = vsel (%p563_p4), %vm807_vm11, %v5780_v44, %v5784_v2  ;;  %v11869_v62 = vld [vmem:[#allocation2 + $0x18] sm:$0xff] (%p563_p4)  }
 0x2d0   : >> { %v5435_v8 = vsel %vm12328_vm10, %v5433_v16, %v5434_v6  ;;  %v5436_v39 = vrot.slane %v5434_v6, 4  ;;  %v11857_v42 = vld [vmem:[#allocation2 + $0x9c] sm:$0xff] (%p563_p4)   ;;  %v11866_v7 = vld [vmem:[#allocation2 + $0xb0] ss:$0 sps:$4 sm:$0x11] (%p563_p4)   ;;  %v5791_v16 = vshll.u32 (%p563_p4), %v10638_v48, 16 }
 0x2d1   : >> { %5531 = vst.msk [vmem:[#allocation2 + $0xc4] sm:$0xf] %vm226_vm4, %v5435_v8  ;;  %v5430_v34 = vsel %vm12328_vm10, %v5428_v58, %v5429_v24  ;;  %v5431_v60 = vrot.slane %v5429_v24, 4  ;;  %v6723_v3 = vrot.slane (%p563_p4), %v11857_v42, 7  ;;  %v5573_v37 = vld [vmem:[#allocation2 + $0xa0] sm:$0xf] (%p563_p4) }
 0x2d2   : >> { %5532 = vst.msk [vmem:[#allocation2 + $0xc8] sm:$0x1] %vm241_vm5, %v5436_v39  ;;  %v11859_v40 = vld [vmem:[#allocation2 + $0xa4] ss:$0 sps:$4 sm:$0x11] (%p563_p4)   ;;  %v10650_v4 = vcombine.low (%p563_p4), %v5594_v57, %v5573_v37  ;;  %v6727_v13 = vrot.slane (%p563_p4), %v11866_v7, 7  ;;  %6000 = vrot.lane.b32.xlu1 (%p563_p4), %v5786_v14, %s12194_s13 }
 0x2d3   : >> { %5528 = vst.msk [vmem:[#allocation2 + $0xb8] sm:$0xf] %vm226_vm4, %v5430_v34  ;;  %6783 = vrot.lane.b32.xlu0 (%p563_p4), %v6723_v3, %s12194_s13  ;;  %v6724_v55 = vrot.slane (%p563_p4), %v11859_v40, 7  ;;  %v11867_v27 = vld [vmem:[#allocation2 + $0xa4] ss:$0 sps:$4 sm:$0x11] (%p563_p4)  }
 0x2d4   : >> { %5529 = vst.msk [vmem:[#allocation2 + $0xbc] sm:$0x1] %vm241_vm5, %v5431_v60  ;;  %v5957_v45 = vshrl.u32 (%p563_p4), %v10650_v4, 16  ;;  %v5959_v18 = vshll.u32 (%p563_p4), %v10650_v4, 16  ;;  %v5964_v1 = vshll.u32 (%p563_p4), %v11867_v27, 16  ;;  %v6728_v35 = vsel (%p563_p4), %vm380_vm8, %v6726_v31, %v6727_v13  ;;  %v14054_v44 = vld [vmem:[#allocation2 + $0x30] sm:$0xff] (%p563_p4)  }
 0x2d5   : > { %v6725_v43 = vsel %vm380_vm8, %v6723_v3, %v6724_v55  ;;  %v11870_v32 = vld [vmem:[#allocation2 + $0x20] ss:$0 sps:$4 sm:$0x11]   ;;  %v5968_v6 = vshrl.u32 %v11867_v27, 16  ;;  %v5576_v58 = vld [vmem:[#allocation2 + $0xac] sm:$0xf] }
 0x2d6   : > { %v5961_v59 = vrot.slane %v5959_v18, 1  ;;  %v5966_v54 = vrot.slane %v5964_v1, 1  ;;  %v5595_v24 = vld [vmem:[#allocation2 + $0xa8] sm:$0xe]  ;;  %v5789_v8 = vshrl.u32 %v10638_v48, 16  ;;  %v5793_v39 = vrot.slane %v5791_v16, 1  ;;  %6789 = vrot.lane.b32.xlu1 %v6728_v35, %s12194_s13 }
 0x2d7   : > { %6785 = vrot.lane.b32.xlu0 %v6725_v43, %s12194_s13  ;;  %v5796_v34 = vshll.u32 %v11871_v25, 16  ;;  %v10651_v60 = vcombine.low %v5595_v24, %v5576_v58  ;;  %v6690_v49 = vrot.slane %v11869_v62, 7  ;;  %v6691_v51 = vrot.slane %v11870_v32, 7  ;;  %v11875_v9 = vld [vmem:[#allocation2 + $0xb0] ss:$0 sps:$4 sm:$0x11]  }
 0x2d8   : > { %v5962_v63 = vor.u32 %v5961_v59, %v5957_v45  ;;  %v5794_v0 = vor.u32 %v5793_v39, %v5789_v8  ;;  %v5800_v43 = vshrl.u32 %v11871_v25, 16  ;;  %v5978_v50 = vshll.u32 %v11875_v9, 16  ;;  %v5596_v7 = vld [vmem:[#allocation2 + $0xb4] sm:$0xe]  ;;  %v14042_v27 = vld [vmem:[#allocation2 + $0xc0] sm:$0xff]  }
 0x2d9   : > { %v5973_v55 = vshll.u32 %v10651_v60, 16  ;;  %v6692_v52 = vsel %vm380_vm8, %v6690_v49, %v6691_v51  ;;  %v5971_v23 = vshrl.u32 %v10651_v60, 16  ;;  %v5805_v21 = vshll.u32 %v10639_v46, 16  ;;  %v11878_v26 = vld [vmem:[#allocation2 + $0x2c] ss:$0 sps:$4 sm:$0x11]  }
 0x2da   : > { %v5967_v42 = vsel %vm807_vm11, %v5962_v63, %v5966_v54  ;;  %v11873_v3 = vld [vmem:[#allocation2 + $0xb4] sm:$0xff]   ;;  %6052 = vrot.lane.b32.xlu1 %v5968_v6, %s12194_s13  ;;  %v5980_v5 = vrot.slane %v5978_v50, 1  ;;  %v6693_v20 = vrot.slane %v11877_v56, 7  ;;  %v14046_v37 = vld [vmem:[#allocation2 + $0xc8] ss:$0 sps:$4 sm:$0x11]  }
 0x2db   : > { %6735 = vrot.lane.b32.xlu0 %v6687_v15, %s12194_s13  ;;  %v11874_v40 = vld [vmem:[#allocation2 + $0xbc] ss:$0 sps:$4 sm:$0x11]   ;;  %v5798_v15 = vrot.slane %v5796_v34, 1  ;;  %v6729_v12 = vrot.slane %v11873_v3, 7  ;;  %v5975_v36 = vrot.slane %v5973_v55, 1 }
 0x2dc   : > { %v6730_v29 = vrot.slane %v11874_v40, 7  ;;  %v5579_v28 = vld [vmem:[#allocation2 + $0xb8] sm:$0xf]  ;;  %v14048_v57 = vld [vmem:[#allocation2 + $0xbc] ss:$0 sps:$4 sm:$0x11]  }
 0x2dd   : > { %v5799_v38 = vsel %vm807_vm11, %v5794_v0, %v5798_v15  ;;  %v5976_v10 = vor.u32 %v5975_v36, %v5971_v23  ;;  %v14050_v14 = vcombine.low %v5596_v7, %v5579_v28  ;;  %v5982_v33 = vshrl.u32 %v11875_v9, 16  ;;  %v5543_v1 = vld [vmem:[#allocation2 + $0x28] sm:$0xf]  ;;  %v5584_v13 = vld [vmem:[#allocation2 + $0x24] sm:$0xe]  ;;  %v14061_v30 = vld [vmem:[#allocation2 + $0x3c] sm:$0xff]  }
 0x2de   : > { %6741 = vrot.lane.b32.xlu1 %v6692_v52, %s12194_s13  ;;  %v6731_v11 = vsel %vm380_vm8, %v6729_v12, %v6730_v29  ;;  %v5803_v4 = vshrl.u32 %v10639_v46, 16  ;;  %v5807_v19 = vrot.slane %v5805_v21, 1  ;;  %v6694_v45 = vrot.slane %v11878_v26, 7  ;;  %v14064_v63 = vld [vmem:[#allocation2 + $0x38] ss:$0 sps:$4 sm:$0x11]  }
 0x2df   : > { %5998 = vrot.lane.b32.xlu0 %v5785_v22, %s12194_s13  ;;  %v5981_v2 = vsel %vm807_vm11, %v5976_v10, %v5980_v5  ;;  %v6732_v18 = vrot.slane %v14042_v27, 7  ;;  %v5814_v25 = vshrl.u32 %v14038_v53, 16  ;;  %v5987_v22 = vshll.u32 %v14050_v14, 16  ;;  %v11913_v54 = vld [vmem:[%s15521_s3 + $0x40] sm:$0xff]   ;;  %v7907_v34 = vld [vmem:[#allocation2 + $0x1c] sm:$0xf] }
 0x2e0   : > { %v5992_v59 = vshll.u32 %v14048_v57, 16  ;;  %v5808_v48 = vor.u32 %v5807_v19, %v5803_v4  ;;  %v6695_v35 = vsel %vm380_vm8, %v6693_v20, %v6694_v45  ;;  %v6733_v62 = vrot.slane %v14046_v37, 7  ;;  %v14072_v16 = vld [vmem:[#allocation2 + $0x2c] ss:$0 sps:$4 sm:$0x11]   ;;  %v11914_v58 = vld [vmem:[%s15521_s3] sm:$0xff]   ;;  %11503 = vmatprep.subr.bf16.mxu1 %v11913_v54  ;;  %11163 = vmatprep.subr.bf16.mxu0 %v11913_v54 }
 0x2e1   : > { %v6696_v32 = vrot.slane %v14054_v44, 7  ;;  %v14074_v6 = vcombine.low %v5584_v13, %v5543_v1  ;;  %v5996_v24 = vshrl.u32 %v14048_v57, 16  ;;  %v14080_v8 = vld [vmem:[#allocation2 + $0x20] ss:$0 sps:$4 sm:$0x11]   ;;  %v5985_v39 = vshrl.u32 %v14050_v14, 16  ;;  %11511 = vmatpush3.bf16.msra.mxu1 %v11914_v58  ;;  %11164 = vmatpush3.bf16.msra.mxu0 %v11914_v58 }
 0x2e2   : > { %6004 = vrot.lane.b32.xlu1 %v5800_v43, %s12194_s13  ;;  %v7954_v60 = vld [vmem:[#allocation2 + $0x18] sm:$0xe]  ;;  %v5989_v51 = vrot.slane %v5987_v22, 1  ;;  %v5994_v3 = vrot.slane %v5992_v59, 1  ;;  %v6699_v40 = vrot.slane %v14061_v30, 7  ;;  %v14090_v9 = vld [vmem:[#allocation2 + $0x48] sm:$0xff]  }
 0x2e3   : > { %6787 = vrot.lane.b32.xlu0 %v6726_v31, %s12194_s13  ;;  %v5810_v31 = vshll.u32 %v14038_v53, 16  ;;  %v11916_v15 = vld [vmem:[%s15521_s3 + $0x8] sm:$0xff]   ;;  %v6697_v55 = vrot.slane %v14064_v63, 7  ;;  %v5828_v17 = vshrl.u32 %v14072_v16, 16  ;;  %v5819_v0 = vshll.u32 %v14074_v6, 16  ;;  %v14106_v46 = vld [vmem:[#allocation2 + $0x54] sm:$0xff]  }
 0x2e4   : > { %v5824_v47 = vshll.u32 %v14072_v16, 16  ;;  %v14099_v52 = vcombine.low %v7954_v60, %v7907_v34  ;;  %v8154_v43 = vshll.u32 %v14080_v8, 16  ;;  %v14104_v50 = vld [vmem:[#allocation2 + $0xc] sm:$0xfe]   ;;  %v5990_v36 = vor.u32 %v5989_v51, %v5985_v39  ;;  %v5546_v56 = vld [vmem:[#allocation2 + $0x34] sm:$0xf] }
 0x2e5   : > { %v5812_v41 = vrot.slane %v5810_v31, 1  ;;  %v14112_v29 = vld [vmem:[#allocation2 + $0x14] ss:$0 sps:$4 sm:$0x33]   ;;  %v5585_v5 = vld [vmem:[#allocation2 + $0x30] sm:$0xe]  ;;  %v6734_v53 = vsel %vm380_vm8, %v6732_v18, %v6733_v62 }
 0x2e6   : > { %6793 = vrot.lane.b32.xlu1 %v6731_v11, %s12194_s13  ;;  %v11921_v23 = vld [vmem:[%s15521_s3 + $0x10] sm:$0xff]   ;;  %v6702_v21 = vrot.slane %v14090_v9, 7  ;;  %v11926_v10 = vld [vmem:[%s15521_s3 + $0x58] sm:$0xff]   ;;  %v5817_v28 = vshrl.u32 %v14074_v6, 16  ;;  %v5826_v7 = vrot.slane %v5824_v47, 1  ;;  %v8158_v11 = vshrl.u32 %v14080_v8, 16 }
 0x2e7   : > { %6050 = vrot.lane.b32.xlu0 %v5967_v42, %s12194_s13  ;;  %v11915_v42 = vld [vmem:[%s15521_s3 + $0x48] sm:$0xff]   ;;  %v8149_v26 = vshll.u32 %v14099_v52, 16  ;;  %v8147_v31 = vshrl.u32 %v14099_v52, 16  ;;  %v7411_v37 = vshll.u32 %v14104_v50, 16  ;;  %v14133_v14 = vcombine.low %v5585_v5, %v5546_v56  ;;  %v11934_v62 = vld [vmem:[%s15521_s3 + $0x60] sm:$0xff]  }
 0x2e8   : > { %11504 = vmatprep.subr.bf16.mxu1 %v11915_v42  ;;  %11165 = vmatprep.subr.bf16.mxu0 %v11915_v42  ;;  %v14138_v19 = vld [vmem:[#allocation2 + $0x38] ss:$0 sps:$4 sm:$0x11]   ;;  %v6705_v27 = vrot.slane %v14106_v46, 7  ;;  %v7416_v45 = vshll.u32 %v14112_v29, 16  ;;  %v7409_v22 = vshrl.u32 %v14104_v50, 16  ;;  %v6698_v6 = vsel %vm380_vm8, %v6696_v32, %v6697_v55 }
 0x2e9   : > { %11512 = vmatpush3.bf16.msra.mxu1 %v11916_v15  ;;  %11166 = vmatpush3.bf16.msra.mxu0 %v11916_v15  ;;  %v8151_v1 = vrot.slane %v8149_v26, 1  ;;  %v7910_v13 = vld [vmem:[#allocation2 + $0x28] sm:$0xf]  ;;  %v7413_v59 = vrot.slane %v7411_v37, 1  ;;  %v7420_v63 = vshrl.u32 %v14112_v29, 16  ;;  %v5831_v57 = vshrl.u32 %v14133_v14, 16 }
 0x2ea   : > { %6056 = vrot.lane.b32.xlu1 %v5982_v33, %s12194_s13  ;;  %v5995_v33 = vsel %vm807_vm11, %v5990_v36, %v5994_v3  ;;  %v14161_v58 = vrot.slane %v7416_v45, 1  ;;  %v14169_v42 = vld [vmem:[#allocation2 + $0x50] ss:$0 sps:$4 sm:$0x11]   ;;  %v11935_v51 = vld [vmem:[%s15521_s3 + $0x20] sm:$0xff]   ;;  %v11938_v16 = vld [vmem:[%s15521_s3 + $0x28] sm:$0xff]  }
 0x2eb   : > { %6739 = vrot.lane.b32.xlu0 %v6690_v49, %s12194_s13  ;;  %v5813_v49 = vsel %vm807_vm11, %v5808_v48, %v5812_v41  ;;  %v11927_v41 = vld [vmem:[%s15521_s3 + $0x18] sm:$0xff]   ;;  %v5833_v48 = vshll.u32 %v14133_v14, 16  ;;  %v8152_v15 = vor.u32 %v8151_v1, %v8147_v31  ;;  %v14181_v47 = vld [vmem:[#allocation2 + $0x20] ss:$0 sps:$4 sm:$0x33]   ;;  %v6703_v36 = vrot.slane %v14169_v42, 7 }
 0x2ec   : > { %v14192_v56 = vld [vmem:[#allocation2 + $0x44] ss:$0 sps:$4 sm:$0x11]   ;;  %v7913_v26 = vld [vmem:[#allocation2 + $0x34] sm:$0xf]  ;;  %v7435_v31 = vshrl.u32 %v14181_v47, 16  ;;  %v7414_v8 = vor.u32 %v7413_v59, %v7409_v22 }
 0x2ed   : > { %v11943_v45 = vld [vmem:[%s15521_s3 + $0x70] sm:$0xff]   ;;  %v14250_v30 = vld [vmem:[#allocation2 + $0x60] sm:$0xff]  }
 0x2ee   : > { %6745 = vrot.lane.b32.xlu1 %v6695_v35, %s12194_s13  ;;  %v5838_v35 = vshll.u32 %v14138_v19, 16  ;;  %v11944_v22 = vld [vmem:[%s15521_s3 + $0x30] sm:$0xff]   ;;  %v7419_v59 = vsel %vm807_vm11, %v7414_v8, %v14161_v58 }
 0x2ef   : > { %6002 = vrot.lane.b32.xlu0 %v5799_v38, %s12194_s13  ;;  %v11920_v38 = vld [vmem:[%s15521_s3 + $0x50] sm:$0xff]  }
 0x2f0   : > { %11505 = vmatprep.subr.bf16.mxu1 %v11920_v38  ;;  %11167 = vmatprep.subr.bf16.mxu0 %v11920_v38  ;;  %v5840_v55 = vrot.slane %v5838_v35, 1  ;;  %v5549_v38 = vld [vmem:[#allocation2 + $0x40] sm:$0xf]  ;;  %v14264_v29 = vld [vmem:[#allocation2 + $0x50] ss:$0 sps:$4 sm:$0x11]  }
 0x2f1   : > { %11513 = vmatpush3.bf16.msra.mxu1 %v11921_v23  ;;  %11168 = vmatpush3.bf16.msra.mxu0 %v11921_v23  ;;  %v5586_v23 = vld [vmem:[#allocation2 + $0x3c] sm:$0xe]  ;;  %v5870_v42 = vshrl.u32 %v14264_v29, 16 }
 0x2f2   : > { %6008 = vrot.lane.b32.xlu1 %v5814_v25, %s12194_s13  ;;  %11506 = vmatprep.subr.bf16.mxu1 %v11926_v10  ;;  %v7955_v25 = vld [vmem:[#allocation2 + $0x24] sm:$0xe] }
 0x2f3   : > { %6791 = vrot.lane.b32.xlu0 %v6729_v12, %s12194_s13  ;;  %v14102_v12 = vld [vmem:[#allocation2 + $0x44] ss:$0 sps:$4 sm:$0x11]   ;;  %11169 = vmatprep.subr.bf16.mxu0 %v11926_v10  ;;  %v14163_v39 = vcombine.low %v7955_v25, %v7910_v13  ;;  %v7431_v10 = vshll.u32 %v14181_v47, 16  ;;  %v5852_v13 = vshll.u32 %v14192_v56, 16 }
 0x2f4   : > { %v6700_v4 = vrot.slane %v14102_v12, 7 }
 0x2f5   : > { %11514 = vmatpush3.bf16.msra.mxu1 %v11927_v41  ;;  %11170 = vmatpush3.bf16.msra.mxu0 %v11927_v41  ;;  %v8161_v52 = vshrl.u32 %v14163_v39, 16  ;;  %v8163_v44 = vshll.u32 %v14163_v39, 16  ;;  %v5856_v41 = vshrl.u32 %v14192_v56, 16  ;;  %v14256_v39 = vld [vmem:[#allocation2 + $0x5c] ss:$0 sps:$4 sm:$0x11]  }
 0x2f6   : > { %6797 = vrot.lane.b32.xlu1 %v6734_v53, %s12194_s13  ;;  %11507 = vmatprep.subr.bf16.mxu1 %v11934_v62  ;;  %v6701_v1 = vsel %vm380_vm8, %v6699_v40, %v6700_v4  ;;  %v14240_v4 = vld [vmem:[#allocation2 + $0x24] sm:$0xfe]  }
 0x2f7   : > { %6054 = vrot.lane.b32.xlu0 %v5981_v2, %s12194_s13  ;;  %v8156_v2 = vrot.slane %v8154_v43, 1  ;;  %11171 = vmatprep.subr.bf16.mxu0 %v11934_v62  ;;  %v11937_v43 = vld [vmem:[%s15521_s3 + $0x68] sm:$0xff]  }
 0x2f8   : > { %v14248_v62 = vld [vmem:[#allocation2 + $0x2c] ss:$0 sps:$4 sm:$0x33]  }
 0x2f9   : > { %11515 = vmatpush3.bf16.msra.mxu1 %v11935_v51  ;;  %11172 = vmatpush3.bf16.msra.mxu0 %v11935_v51  ;;  %v8157_v5 = vsel %vm807_vm11, %v8152_v15, %v8156_v2  ;;  %v14215_v2 = vld [vmem:[#allocation2 + $0x38] ss:$0 sps:$4 sm:$0x11]   ;;  %v7957_v51 = vld [vmem:[#allocation2 + $0x3c] sm:$0xe]  ;;  %v7446_v15 = vshll.u32 %v14248_v62, 16 }
 0x2fa   : > { %6060 = vrot.lane.b32.xlu1 %v5996_v24, %s12194_s13  ;;  %v5842_v24 = vshrl.u32 %v14138_v19, 16  ;;  %11508 = vmatprep.subr.bf16.mxu1 %v11937_v43  ;;  %v8182_v50 = vshll.u32 %v14215_v2, 16  ;;  %v7450_v19 = vshrl.u32 %v14248_v62, 16 }
 0x2fb   : > { %6743 = vrot.lane.b32.xlu0 %v6693_v20, %s12194_s13  ;;  %v5821_v20 = vrot.slane %v5819_v0, 1  ;;  %v14179_v0 = vld [vmem:[#allocation2 + $0x18] sm:$0xfe]   ;;  %11173 = vmatprep.subr.bf16.mxu0 %v11937_v43  ;;  %v5854_v43 = vrot.slane %v5852_v13, 1 }
 0x2fc   : > { %v7426_v53 = vshll.u32 %v14179_v0, 16  ;;  %v14301_v13 = vld [vmem:[#allocation2 + $0x68] ss:$0 sps:$4 sm:$0x11]  }
 0x2fd   : > { %v5822_v54 = vor.u32 %v5821_v20, %v5817_v28  ;;  %v8165_v28 = vrot.slane %v8163_v44, 1  ;;  %v14201_v20 = vcombine.low %v5586_v23, %v5549_v38  ;;  %11516 = vmatpush3.bf16.msra.mxu1 %v11938_v16  ;;  %11174 = vmatpush3.bf16.msra.mxu0 %v11938_v16  ;;  %v6708_v23 = vrot.slane %v14250_v30, 7 }
 0x2fe   : > { %6749 = vrot.lane.b32.xlu1 %v6698_v6, %s12194_s13  ;;  %v14211_v14 = vrot.slane %v7426_v53, 1  ;;  %11509 = vmatprep.subr.bf16.mxu1 %v11943_v45  ;;  %v6706_v53 = vrot.slane %v14256_v39, 7  ;;  %v5866_v16 = vshll.u32 %v14264_v29, 16 }
 0x2ff   : > { %6006 = vrot.lane.b32.xlu0 %v5813_v49, %s12194_s13  ;;  %v5835_v49 = vrot.slane %v5833_v48, 1  ;;  %v5827_v3 = vsel %vm807_vm11, %v5822_v54, %v5826_v7  ;;  %v7424_v7 = vshrl.u32 %v14179_v0, 16  ;;  %v5847_v25 = vshll.u32 %v14201_v20, 16  ;;  %11175 = vmatprep.subr.bf16.mxu0 %v11943_v45  ;;  %v5555_v0 = vld [vmem:[#allocation2 + $0x58] sm:$0xf] }
 0x300   : > { %v8186_v48 = vshrl.u32 %v14215_v2, 16  ;;  %v8166_v6 = vor.u32 %v8165_v28, %v8161_v52  ;;  %v5868_v9 = vrot.slane %v5866_v16, 1  ;;  %v14375_v2 = vld [vmem:[#allocation2 + $0x44] ss:$0 sps:$4 sm:$0x33]  }
 0x301   : > { %v5836_v37 = vor.u32 %v5835_v49, %v5831_v57  ;;  %11517 = vmatpush3.bf16.msra.mxu1 %v11944_v22  ;;  %11176 = vmatpush3.bf16.msra.mxu0 %v11944_v22  ;;  %v5587_v57 = vld [vmem:[#allocation2 + $0x48] sm:$0xe]  ;;  %v7916_v49 = vld [vmem:[#allocation2 + $0x40] sm:$0xf]  ;;  %v5849_v44 = vrot.slane %v5847_v25, 1  ;;  %v7429_v8 = vor.u32 %v14211_v14, %v7424_v7  ;;  %v11948_v25 = vld [vmem:[%s15521_s3 + $0x78] sm:$0xff]  }
 0x302   : > { %6012 = vrot.lane.b32.xlu1 %v5828_v17, %s12194_s13  ;;  %v7956_v17 = vld [vmem:[#allocation2 + $0x30] sm:$0xe]  ;;  %v14270_v52 = vcombine.low %v7957_v51, %v7916_v49  ;;  %11510 = vmatprep.subr.bf16.mxu1 %v11948_v25  ;;  %v11949_v7 = vld [vmem:[%s15521_s3 + $0x38] sm:$0xff]   ;;  %v7919_v49 = vld [vmem:[#allocation2 + $0x4c] sm:$0xf] }
 0x303   : > { %6795 = vrot.lane.b32.xlu0 %v6732_v18, %s12194_s13  ;;  %v14142_v18 = vld [vmem:[#allocation2 + $0x2c] ss:$0 sps:$4 sm:$0x11]   ;;  %v14232_v54 = vcombine.low %v7956_v17, %v7913_v26  ;;  %v5841_v12 = vsel %vm807_vm11, %v5836_v37, %v5840_v55  ;;  %v14281_v26 = vrot.slane %v7446_v15, 1  ;;  %11177 = vmatprep.subr.bf16.mxu0 %v11948_v25  ;;  %v11984_v15 = vld [vmem:[%s15521_s3 + $0xc0] sm:$0xff]  }
 0x304   : > { %v8168_v34 = vshll.u32 %v14142_v18, 16  ;;  %v8172_v60 = vshrl.u32 %v14142_v18, 16  ;;  %v8191_v17 = vshll.u32 %v14270_v52, 16  ;;  %v14308_v18 = vld [vmem:[#allocation2 + $0x6c] sm:$0xff]  }
 0x305   : > { %v8177_v35 = vshll.u32 %v14232_v54, 16  ;;  %v8175_v38 = vshrl.u32 %v14232_v54, 16  ;;  %v14306_v54 = vld [vmem:[#allocation2 + $0x30] sm:$0xfe]   ;;  %11518 = vmatpush3.bf16.msra.mxu1 %v11949_v7  ;;  %11178 = vmatpush3.bf16.msra.mxu0 %v11949_v7  ;;  %v6711_v51 = vrot.slane %v14308_v18, 7  ;;  %v7452_v46 = vor.u32 %v7450_v19, %v14281_v26 }
 0x306   : > { %8372 = vrot.lane.b32.xlu1 %v8158_v11, %s12194_s13  ;;  %v5845_v11 = vshrl.u32 %v14201_v20, 16  ;;  %v14325_v22 = vld [vmem:[#allocation2 + $0x38] ss:$0 sps:$4 sm:$0x33]   ;;  %11275 = vmatprep.subr.bf16.mxu1 %v11984_v15 }
 0x307   : > { %6058 = vrot.lane.b32.xlu0 %v5995_v33, %s12194_s13  ;;  %v14213_v33 = vrot.slane %v7431_v10, 1  ;;  %v7439_v10 = vshrl.u32 %v14240_v4, 16  ;;  %v7461_v47 = vshll.u32 %v14325_v22, 16  ;;  %v11946_v7 = vld [vmem:[#allocation2 + $0x74] ss:$0 sps:$4 sm:$0x11]  }
 0x308   : > { %v5850_v45 = vor.u32 %v5849_v44, %v5845_v11 }
 0x309   : > { %v7434_v14 = vsel %vm807_vm11, %v7429_v8, %v14213_v33  ;;  %v14357_v16 = vrot.slane %v7461_v47, 1  ;;  %v14409_v47 = vld [vmem:[#allocation2 + $0x5c] ss:$0 sps:$4 sm:$0x11]  }
 0x30a   : > { %6753 = vrot.lane.b32.xlu1 %v6701_v1, %s12194_s13  ;;  %v6704_v1 = vsel %vm380_vm8, %v6702_v21, %v6703_v36  ;;  %v5588_v36 = vld [vmem:[#allocation2 + $0x54] sm:$0xe] }
 0x30b   : > { %6747 = vrot.lane.b32.xlu0 %v6696_v32, %s12194_s13  ;;  %v14185_v32 = vrot.slane %v8168_v34, 1  ;;  %v5552_v34 = vld [vmem:[#allocation2 + $0x4c] sm:$0xf]  ;;  %v14334_v39 = vcombine.low %v5588_v36, %v5555_v0  ;;  %v14373_v0 = vld [vmem:[#allocation2 + $0x78] sm:$0xff]  }
 0x30d   : > { %v8171_v55 = vsel %vm807_vm11, %v8166_v6, %v14185_v32  ;;  %v8184_v32 = vrot.slane %v8182_v50, 1  ;;  %v14332_v6 = vld [vmem:[#allocation2 + $0x5c] ss:$0 sps:$4 sm:$0x11]   ;;  %v5873_v56 = vshrl.u32 %v14334_v39, 16 }
 0x30e   : > { %7648 = vrot.lane.b32.xlu1 %v7419_v59, %s12194_s13  ;;  %v7437_v59 = vor.u32 %v7435_v31, %v14213_v33  ;;  %v5875_v31 = vshll.u32 %v14334_v39, 16  ;;  %v14342_v33 = vld [vmem:[#allocation2 + $0x50] ss:$0 sps:$4 sm:$0x11]   ;;  %v5880_v44 = vshll.u32 %v14332_v6, 16  ;;  %v5884_v25 = vshrl.u32 %v14332_v6, 16 }
 0x30f   : > { %6010 = vrot.lane.b32.xlu0 %v5827_v3, %s12194_s13  ;;  %v7441_v3 = vshll.u32 %v14240_v4, 16 }
 0x310   : > { %v14370_v8 = vrot.slane %v5880_v44, 1 }
 0x311   : > { %v14279_v28 = vrot.slane %v7441_v3, 1  ;;  %v7958_v3 = vld [vmem:[#allocation2 + $0x48] sm:$0xe] }
 0x312   : > { %6016 = vrot.lane.b32.xlu1 %v5842_v24, %s12194_s13 }
 0x313   : > { %8370 = vrot.lane.b32.xlu0 %v8157_v5, %s12194_s13  ;;  %v8179_v5 = vrot.slane %v8177_v35, 1  ;;  %v8193_v35 = vrot.slane %v8191_v17, 1  ;;  %v7444_v17 = vor.u32 %v14279_v28, %v7439_v10  ;;  %v14381_v10 = vld [vmem:[#allocation2 + $0x68] ss:$0 sps:$4 sm:$0x11]  }
 0x314   : > { %v5894_v19 = vshll.u32 %v14381_v10, 16 }
 0x316   : > { %8376 = vrot.lane.b32.xlu1 %v8172_v60, %s12194_s13  ;;  %v5855_v60 = vsel %vm807_vm11, %v5850_v45, %v5854_v43  ;;  %v10801_v43 = vcombine.low %v7958_v3, %v7919_v49  ;;  %v8210_v45 = vshll.u32 %v14342_v33, 16  ;;  %v15525_v49 = vrot.slane %v14373_v0, 7 }
 0x317   : > { %6751 = vrot.lane.b32.xlu0 %v6699_v40, %s12194_s13  ;;  %v7422_v40 = vor.u32 %v7420_v63, %v14161_v58  ;;  %v14266_v63 = vcombine.low %v5587_v57, %v5552_v34  ;;  %v14268_v58 = vld [vmem:[#allocation2 + $0x44] ss:$0 sps:$4 sm:$0x11]   ;;  %v8180_v34 = vor.u32 %v8179_v5, %v8175_v38  ;;  %v7456_v57 = vshll.u32 %v14306_v54, 16  ;;  %v11950_v5 = vld [vmem:[#allocation2 + $0x3c] sm:$0xfe]  }
 0x318   : > { %v8196_v37 = vshll.u32 %v14268_v58, 16  ;;  %v6707_v38 = vsel %vm380_vm8, %v6705_v27, %v6706_v53  ;;  %v8212_v36 = vrot.slane %v8210_v45, 1  ;;  %v7469_v39 = vshrl.u32 %v11950_v5, 16 }
 0x319   : > { %v5859_v20 = vshrl.u32 %v14266_v63, 16  ;;  %v5861_v24 = vshll.u32 %v14266_v63, 16  ;;  %v8214_v63 = vshrl.u32 %v14342_v33, 16 }
 0x31a   : > { %6757 = vrot.lane.b32.xlu1 %v6704_v1, %s12194_s13  ;;  %v14323_v50 = vrot.slane %v8196_v37, 1  ;;  %v5877_v37 = vrot.slane %v5875_v31, 1  ;;  %v5589_v1 = vld [vmem:[#allocation2 + $0x60] sm:$0xe] }
 0x31b   : > { %6014 = vrot.lane.b32.xlu0 %v5841_v12, %s12194_s13  ;;  %v5863_v11 = vrot.slane %v5861_v24, 1  ;;  %v8189_v12 = vshrl.u32 %v14270_v52, 16  ;;  %v7454_v52 = vshrl.u32 %v14306_v54, 16  ;;  %v7458_v24 = vrot.slane %v7456_v57, 1  ;;  %v7959_v57 = vld [vmem:[#allocation2 + $0x54] sm:$0xe] }
 0x31c   : > { %v8205_v54 = vshll.u32 %v10801_v43, 16 }
 0x31d   : > { %v5864_v53 = vor.u32 %v5863_v11, %v5859_v20  ;;  %v8194_v4 = vor.u32 %v8193_v35, %v8189_v12  ;;  %v8203_v20 = vshrl.u32 %v10801_v43, 16  ;;  %v7449_v11 = vsel %vm807_vm11, %v7444_v17, %v14281_v26  ;;  %v14392_v35 = vld [vmem:[#allocation2 + $0x84] sm:$0xff]   ;;  %v14406_v26 = vld [vmem:[#allocation2] sm:$0xf]  ;;  %v14418_v17 = vld [vmem:[#allocation2 + $0x94] sm:$0xf] }
 0x31e   : > { %7652 = vrot.lane.b32.xlu1 %v7434_v14, %s12194_s13  ;;  %v8207_v12 = vrot.slane %v8205_v54, 1  ;;  %v7459_v15 = vor.u32 %v7458_v24, %v7454_v52  ;;  %v7480_v52 = vshrl.u32 %v14375_v2, 16  ;;  %v5896_v24 = vrot.slane %v5894_v19, 1  ;;  %v11925_v19 = vld [vmem:[#allocation2 + $0x8] ss:$0 sps:$4 sm:$0x33]  }
 0x31f   : > { %7650 = vrot.lane.b32.xlu0 %v7422_v40, %s12194_s13  ;;  %v6709_v40 = vrot.slane %v14301_v13, 7  ;;  %v5869_v28 = vsel %vm807_vm11, %v5864_v53, %v5868_v9  ;;  %v7476_v9 = vshll.u32 %v14375_v2, 16  ;;  %v8199_v3 = vsel %vm807_vm11, %v8194_v4, %v14323_v50  ;;  %v14414_v50 = vld [vmem:[#allocation2 + $0x9c] sm:$0xf]  ;;  %v14441_v4 = vld [vmem:[#allocation2 + $0x4] sm:$0xf] }
 0x320   : > { %v8208_v43 = vor.u32 %v8207_v12, %v8203_v20 }
 0x321   : > { %v14404_v62 = vsel %vm380_vm8, %v6708_v23, %v6709_v40 }
 0x322   : > { %6020 = vrot.lane.b32.xlu1 %v5856_v41, %s12194_s13  ;;  %v7465_v41 = vshrl.u32 %v14325_v22, 16  ;;  %v14450_v29 = vsel %vm807_vm11, %v8208_v43, %v8212_v36 }
 0x323   : > { %8374 = vrot.lane.b32.xlu0 %v8171_v55, %s12194_s13  ;;  %v8185_v55 = vsel %vm807_vm11, %v8180_v34, %v8184_v32  ;;  %v5558_v32 = vld [vmem:[#allocation2 + $0x64] sm:$0xf] }
 0x324   : > { %v14439_v2 = vor.u32 %v7465_v41, %v14357_v16  ;;  %v14456_v41 = vld [vmem:[#allocation2 + $0x80] ss:$0 sps:$4 sm:$0x11]  }
 0x326   : > { %8380 = vrot.lane.b32.xlu1 %v8186_v48, %s12194_s13  ;;  %v7471_v48 = vshll.u32 %v11950_v5, 16 }
 0x327   : > { %6755 = vrot.lane.b32.xlu0 %v6702_v21, %s12194_s13  ;;  %v8200_v21 = vshrl.u32 %v14268_v58, 16 }
 0x328   : > { %v7473_v34 = vrot.slane %v7471_v48, 1  ;;  %v14434_v48 = vsel %vm807_vm11, %v7459_v15, %v14357_v16 }
 0x32a   : > { %6761 = vrot.lane.b32.xlu1 %v6707_v38, %s12194_s13  ;;  %v6712_v38 = vrot.slane %v11946_v7, 7  ;;  %v7474_v45 = vor.u32 %v7473_v34, %v7469_v39  ;;  %v5561_v34 = vld [vmem:[#allocation2 + $0x70] sm:$0xf] }
 0x32b   : > { %6018 = vrot.lane.b32.xlu0 %v5855_v60, %s12194_s13  ;;  %v10645_v60 = vcombine.low %v5589_v1, %v5558_v32  ;;  %v11919_v32 = vld [vmem:[#allocation2 + $0x90] sm:$0xfe]   ;;  %v7478_v1 = vrot.slane %v7476_v9, 1  ;;  %v5590_v9 = vld [vmem:[#allocation2 + $0x6c] sm:$0xe] }
 0x32d   : > { %v5889_v14 = vshll.u32 %v10645_v60, 16  ;;  %v5887_v13 = vshrl.u32 %v10645_v60, 16  ;;  %v8224_v60 = vshll.u32 %v14409_v47, 16  ;;  %v14466_v36 = vsel %vm807_vm11, %v7474_v45, %v7478_v1  ;;  %v14486_v45 = vld [vmem:[#allocation2 + $0x74] ss:$0 sps:$4 sm:$0x11]  }
 0x32e   : > { %7656 = vrot.lane.b32.xlu1 %v7449_v11, %s12194_s13  ;;  %v14458_v11 = vld [vmem:[#allocation2 + $0x50] ss:$0 sps:$4 sm:$0x33]   ;;  %v14468_v12 = vor.u32 %v7480_v52, %v7478_v1  ;;  %v10646_v1 = vcombine.low %v5590_v9, %v5561_v34  ;;  %v6715_v9 = vrot.slane %v14456_v41, 7 }
 0x32f   : > { %7654 = vrot.lane.b32.xlu0 %v7437_v59, %s12194_s13  ;;  %v7922_v59 = vld [vmem:[#allocation2 + $0x58] sm:$0xf]  ;;  %v5891_v44 = vrot.slane %v5889_v14, 1  ;;  %v11964_v14 = vld [vmem:[#allocation2 + $0x48] sm:$0xfe]   ;;  %v8226_v15 = vrot.slane %v8224_v60, 1 }
 0x330   : > { %v14411_v31 = vcombine.low %v7959_v57, %v7922_v59  ;;  %v14470_v59 = vld [vmem:[#allocation2 + $0x10] sm:$0xf] }
 0x331   : > { %v5892_v20 = vor.u32 %v5891_v44, %v5887_v13  ;;  %v7484_v13 = vshrl.u32 %v11964_v14, 16  ;;  %v7486_v44 = vshll.u32 %v11964_v14, 16 }
 0x332   : > { %v8219_v40 = vshll.u32 %v14411_v31, 16  ;;  %v8217_v54 = vshrl.u32 %v14411_v31, 16  ;;  %6024 = vrot.lane.b32.xlu1 %v5870_v42, %s12194_s13  ;;  %v14452_v42 = vld [vmem:[#allocation2 + $0xa0] sm:$0xf] }
 0x333   : > { %8378 = vrot.lane.b32.xlu0 %v8185_v55, %s12194_s13  ;;  %v5878_v55 = vor.u32 %v5877_v37, %v5873_v56  ;;  %v14425_v37 = vld [vmem:[#allocation2 + $0xc] sm:$0xf]  ;;  %v10631_v22 = vcombine.low %v14414_v50, %v14452_v42  ;;  %v12100_v31 = vld [vmem:[#allocation2 + $0x98] ss:$0 sps:$4 sm:$0x11]   ;;  %v7488_v39 = vrot.slane %v7486_v44, 1 }
 0x334   : > { %v8221_v16 = vrot.slane %v8219_v40, 1  ;;  %v14483_v40 = vsel %vm807_vm11, %v5892_v20, %v5896_v24  ;;  %v5903_v24 = vshll.u32 %v10646_v1, 16 }
 0x335   : > { %v14447_v7 = vsel %vm807_vm11, %v5878_v55, %v14370_v8  ;;  %v14463_v8 = vsel %vm380_vm8, %v6711_v51, %v6712_v38  ;;  %v14476_v55 = vld [vmem:[#allocation2 + $0xa8] sm:$0xf] }
 0x336   : > { %8384 = vrot.lane.b32.xlu1 %v8200_v21, %s12194_s13  ;;  %v8222_v58 = vor.u32 %v8221_v16, %v8217_v54  ;;  %v14489_v21 = vld [vmem:[#allocation2 + $0xac] sm:$0xf] }
 0x337   : > { %6759 = vrot.lane.b32.xlu0 %v6705_v27, %s12194_s13  ;;  %v14390_v27 = vld [vmem:[#allocation2 + $0x90] sm:$0xf] }
 0x338   : > { %v10629_v53 = vcombine.low %v14390_v27, %v14418_v17  ;;  %v6049_v38 = vpop.permute.xlu1 %6048 }
 0x339   : > { %v6127_v14 = vsel %vm1096_vm12, %v12100_v31, %v6049_v38  ;;  %v5901_v31 = vshrl.u32 %v10646_v1, 16  ;;  %v7489_v38 = vor.u32 %v7488_v39, %v7484_v13  ;;  %v5905_v1 = vrot.slane %v5903_v24, 1  ;;  %v7925_v13 = vld [vmem:[#allocation2 + $0x64] sm:$0xf]  ;;  %v7960_v24 = vld [vmem:[#allocation2 + $0x60] sm:$0xe] }
 0x33a   : > { %v6269_v56 = vshll.u32 %v6127_v14, 16  ;;  %6765 = vrot.lane.b32.xlu1 %v14404_v62, %s12194_s13  ;;  %v14510_v39 = vsel %vm807_vm11, %v8222_v58, %v8226_v15 }
 0x33b   : > { %6022 = vrot.lane.b32.xlu0 %v5869_v28, %s12194_s13  ;;  %v10605_v28 = vcombine.low %v14406_v26, %v14441_v4 }
 0x33c   : > { %v6738_v16 = vpop.permute.xlu1 %6737  ;;  %v14503_v14 = vrot.slane %v6269_v56, 1  ;;  %v14515_v56 = vsel %vm380_vm8, %v15525_v49, %v6715_v9 }
 0x33d   : > { %v6804_v41 = vsel %vm1096_vm12, %v11925_v19, %v6738_v16  ;;  %v14517_v19 = vld [vmem:[#allocation2 + $0x18] sm:$0xf] }
 0x33e   : > { %7660 = vrot.lane.b32.xlu1 %v14434_v48, %s12194_s13 }
 0x33f   : > { %7658 = vrot.lane.b32.xlu0 %v7452_v46, %s12194_s13  ;;  %v11924_v46 = vld [vmem:[#allocation2 + $0x98] ss:$0 sps:$4 sm:$0x33]  }
 0x342   : > { %6028 = vrot.lane.b32.xlu1 %v5884_v25, %s12194_s13 }
 0x343   : > { %8382 = vrot.lane.b32.xlu0 %v8199_v3, %s12194_s13  ;;  %v7491_v3 = vshll.u32 %v14458_v11, 16 }
 0x345   : > { %v6784_v57 = vpop.permute.xlu0 %6783 }
 0x346   : > { %v6873_v43 = vsel %vm1096_vm12, %v11919_v32, %v6784_v57  ;;  %v14497_v57 = vrot.slane %v7491_v3, 1  ;;  %v6903_v3 = vshrl.u32 %v6804_v41, 16  ;;  %v6906_v32 = vshll.u32 %v6804_v41, 16  ;;  %v6047_v41 = vpop.permute.xlu1 %6046  ;;  %8388 = vrot.lane.b32.xlu1 %v8214_v63, %s12194_s13 }
 0x347   : > { %v7076_v52 = vshrl.u32 %v6873_v43, 16  ;;  %v7079_v60 = vshll.u32 %v6873_v43, 16  ;;  %6763 = vrot.lane.b32.xlu0 %v6708_v23, %s12194_s13  ;;  %v11932_v43 = vld [vmem:[#allocation2] sm:$0xfe]  }
 0x348   : > { %v14524_v15 = vsel %vm807_vm11, %v7489_v38, %v14497_v57  ;;  %v6908_v16 = vrot.slane %v6906_v32, 2 }
 0x349   : > { %v7078_v20 = vrot.slane %v7076_v52, 1  ;;  %v6786_v34 = vpop.permute.xlu0 %6785  ;;  %v7081_v44 = vrot.slane %v7079_v60, 2  ;;  %v5908_v52 = vshll.u32 %v14486_v45, 16  ;;  %v5906_v60 = vor.u32 %v5905_v1, %v5901_v31  ;;  %v14539_v31 = vld [vmem:[#allocation2 + $0x1c] sm:$0xf] }
 0x34a   : > { %v6876_v54 = vsel %vm1096_vm12, %v11924_v46, %v6786_v34  ;;  %v6001_v6 = vpop.permute.xlu1 %6000  ;;  %6769 = vrot.lane.b32.xlu1 %v14463_v8, %s12194_s13 }
 0x34b   : > { %v7083_v30 = vshrl.u32 %v6876_v54, 16  ;;  %v7086_v23 = vshll.u32 %v6876_v54, 16  ;;  %6026 = vrot.lane.b32.xlu0 %v14447_v7, %s12194_s13  ;;  %v7082_v34 = vor.u32 %v7081_v44, %v7078_v20  ;;  %v6905_v54 = vrot.slane %v6903_v3, 1 }
 0x34c   : > { %v5910_v49 = vrot.slane %v5908_v52, 1  ;;  %v7495_v20 = vshrl.u32 %v14458_v11, 16  ;;  %v10803_v44 = vcombine.low %v7960_v24, %v7925_v13  ;;  %v11942_v11 = vld [vmem:[#allocation2 + $0x9c] sm:$0xfe]   ;;  %v10609_v52 = vcombine.low %v14517_v19, %v14539_v31  ;;  %v5592_v19 = vld [vmem:[#allocation2 + $0x84] sm:$0xe] }
 0x34d   : > { %v7085_v5 = vrot.slane %v7083_v30, 1  ;;  %v7088_v62 = vrot.slane %v7086_v23, 2  ;;  %v6736_v46 = vpop.permute.xlu0 %6735  ;;  %v14526_v23 = vld [vmem:[#allocation2 + $0x68] ss:$0 sps:$4 sm:$0x11]   ;;  %v6909_v27 = vor.u32 %v6908_v16, %v6905_v54 }
 0x34e   : > { %v6801_v7 = vsel %vm1096_vm12, %v11932_v43, %v6736_v46  ;;  %v8233_v1 = vshll.u32 %v10803_v44, 16  ;;  %v8231_v46 = vshrl.u32 %v10803_v44, 16  ;;  %v14544_v13 = vld [vmem:[#allocation2 + $0x8c] ss:$0 sps:$4 sm:$0x11]   ;;  %7664 = vrot.lane.b32.xlu1 %v14466_v36, %s12194_s13  ;;  %v11998_v36 = vld [vmem:[%s15521_s3 + $0xd8] sm:$0xff]  }
 0x34f   : > { %v7089_v58 = vor.u32 %v7088_v62, %v7085_v5  ;;  %v6896_v30 = vshrl.u32 %v6801_v7, 16  ;;  %v6899_v9 = vshll.u32 %v6801_v7, 16  ;;  %v6125_v5 = vsel %vm1096_vm12, %v10629_v53, %v6047_v41  ;;  %7662 = vrot.lane.b32.xlu0 %v14439_v2, %s12194_s13  ;;  %v11941_v62 = vld [vmem:[#allocation2 + $0xa4] ss:$0 sps:$4 sm:$0x33]  }
 0x350   : > { %v6263_v32 = vshrl.u32 %v6125_v5, 16  ;;  %v6265_v38 = vshll.u32 %v6125_v5, 16  ;;  %v8238_v2 = vshll.u32 %v14526_v23, 16  ;;  %v8235_v7 = vrot.slane %v8233_v1, 1  ;;  %v14560_v41 = vld [vmem:[#allocation2 + $0x54] sm:$0xfe]   ;;  %v6790_v5 = vpop.permute.xlu1 %6789 }
 0x351   : > { %v7090_v48 = vsel %vm1929_vm13, %v7082_v34, %v7089_v58  ;;  %v6898_v3 = vrot.slane %v6896_v30, 1  ;;  %v6901_v43 = vrot.slane %v6899_v9, 2  ;;  %v5999_v53 = vpop.permute.xlu0 %5998  ;;  %v14551_v34 = vsel %vm807_vm11, %v5906_v60, %v5910_v49  ;;  %v12103_v58 = vld [vmem:[#allocation2 + $0x8] ss:$0 sps:$4 sm:$0x11]   ;;  %v11985_v60 = vld [vmem:[%s15521_s3 + $0x80] sm:$0xff]  }
 0x352   : > { %9836 = vmatprep.mubr.bf16.mxu1 %v7090_v48  ;;  %v6267_v24 = vrot.slane %v6265_v38, 1  ;;  %v6065_v25 = vsel %vm1096_vm12, %v10605_v28, %v5999_v53  ;;  %v6067_v16 = vsel %vm1096_vm12, %v12103_v58, %v6001_v6  ;;  %v14558_v9 = vor.u32 %v7495_v20, %v14497_v57  ;;  %v14579_v1 = vld [vmem:[#allocation2 + $0xb4] sm:$0xf] }
 0x353   : > { %v6902_v17 = vor.u32 %v6901_v43, %v6898_v3  ;;  %v6145_v30 = vshll.u32 %v6065_v25, 16  ;;  %8386 = vrot.lane.b32.xlu0 %v14450_v29, %s12194_s13  ;;  %v6149_v4 = vshll.u32 %v6067_v16, 16  ;;  %v6143_v28 = vshrl.u32 %v6065_v25, 16  ;;  %v11987_v29 = vld [vmem:[%s15521_s3 + $0xc8] sm:$0xff]  }
 0x354   : > { %v6268_v26 = vor.u32 %v6267_v24, %v6263_v32  ;;  %v8242_v49 = vshrl.u32 %v14526_v23, 16  ;;  %v8236_v44 = vor.u32 %v8235_v7, %v8231_v46  ;;  %v8240_v48 = vrot.slane %v8238_v2, 1  ;;  %v14572_v3 = vld [vmem:[#allocation2 + $0x5c] ss:$0 sps:$4 sm:$0x33]  }
 0x355   : > { %v6910_v54 = vsel %vm1929_vm13, %v6902_v17, %v6909_v27  ;;  %v6147_v57 = vrot.slane %v6145_v30, 1  ;;  %v6788_v20 = vpop.permute.xlu0 %6787  ;;  %v7501_v33 = vshll.u32 %v14560_v41, 16  ;;  %v6151_v43 = vrot.slane %v6149_v4, 1  ;;  %v11988_v27 = vld [vmem:[%s15521_s3 + $0x88] sm:$0xff]  }
 0x356   : > { %9740 = vmatprep.mubr.bf16.mxu0 %v6910_v54  ;;  %v6272_v63 = vsel %vm807_vm11, %v6268_v26, %v14503_v14  ;;  %v6879_v32 = vsel %vm1096_vm12, %v11942_v11, %v6788_v20  ;;  %v6718_v38 = vrot.slane %v14544_v13, 7  ;;  %v6882_v53 = vsel %vm1096_vm12, %v11941_v62, %v6790_v5  ;;  %v5564_v14 = vld [vmem:[#allocation2 + $0x7c] sm:$0xf]  ;;  %v5591_v11 = vld [vmem:[#allocation2 + $0x78] sm:$0xe]  ;;  %v11992_v13 = vld [vmem:[%s15521_s3 + $0xd0] sm:$0xff]  }
 0x357   : > { %v6148_v17 = vor.u32 %v6147_v57, %v6143_v28  ;;  %v7091_v46 = vshrl.u32 %v6879_v32, 16  ;;  %v7094_v2 = vshll.u32 %v6879_v32, 16  ;;  %6767 = vrot.lane.b32.xlu0 %v6711_v51, %s12194_s13  ;;  %9837 = vmatmul.mubr.bf16.vlgmr.msra.gmra.mrb[0].mxu1 %v6272_v63  ;;  %v7098_v24 = vshrl.u32 %v6882_v53, 16  ;;  %v11955_v25 = vld [vmem:[#allocation2 + $0xc] sm:$0xfe]   ;;  %v6053_v28 = vpop.permute.xlu1 %6052 }
 0x358   : > { %v7101_v6 = vshll.u32 %v6882_v53, 16  ;;  %v7499_v62 = vshrl.u32 %v14560_v41, 16  ;;  %v7503_v7 = vrot.slane %v7501_v33, 1  ;;  %11276 = vmatpush3.bf16.msra.mxu1 %v11985_v60  ;;  %v7506_v16 = vshll.u32 %v14572_v3, 16  ;;  %v14602_v41 = vld [vmem:[#allocation2 + $0xb8] sm:$0xf] }
 0x359   : > { %v6152_v18 = vsel %vm807_vm11, %v6148_v17, %v6151_v43  ;;  %v7093_v51 = vrot.slane %v7091_v46, 1  ;;  %v7096_v54 = vrot.slane %v7094_v2, 2  ;;  %v6051_v58 = vpop.permute.xlu0 %6050  ;;  %v14596_v30 = vld [vmem:[#allocation2 + $0x80] ss:$0 sps:$4 sm:$0x11]   ;;  %11277 = vmatprep.subr.bf16.mxu1 %v11987_v29  ;;  %v7100_v26 = vrot.slane %v7098_v24, 1 }
 0x35a   : > { %v7103_v4 = vrot.slane %v7101_v6, 2  ;;  %v6130_v8 = vsel %vm1096_vm12, %v10631_v22, %v6051_v58  ;;  %9741 = vmatmul.mubr.bf16.vlgmr.msra.gmra.mrb[0].mxu0 %v6152_v18  ;;  %v10635_v60 = vcombine.low %v14579_v1, %v14602_v41  ;;  %v12105_v20 = vld [vmem:[#allocation2 + $0xa4] ss:$0 sps:$4 sm:$0x11]   ;;  %v14610_v43 = vsel %vm807_vm11, %v8236_v44, %v8240_v48  ;;  %v11999_v24 = vld [vmem:[%s15521_s3 + $0x98] sm:$0xff]  }
 0x35b   : > { %v7097_v57 = vor.u32 %v7096_v54, %v7093_v51  ;;  %v6132_v33 = vsel %vm1096_vm12, %v12105_v20, %v6053_v28  ;;  %v6275_v63 = vshll.u32 %v6130_v8, 16  ;;  %6030 = vrot.lane.b32.xlu0 %v14483_v40, %s12194_s13  ;;  %v11954_v29 = vld [vmem:[#allocation2 + $0x14] ss:$0 sps:$4 sm:$0x33]   ;;  %v15543_v22 = vrot.slane %v14392_v35, 7  ;;  %v12005_v18 = vld [vmem:[%s15521_s3 + $0xe0] sm:$0xff]  }
 0x35c   : > { %v7104_v50 = vor.u32 %v7103_v4, %v7100_v26  ;;  %v6279_v42 = vshll.u32 %v6132_v33, 16  ;;  %v14619_v32 = vcombine.low %v5591_v11, %v5564_v14  ;;  %11278 = vmatpush3.bf16.msra.mxu1 %v11988_v27  ;;  %v11993_v40 = vld [vmem:[%s15521_s3 + $0x90] sm:$0xff]   ;;  %v6273_v17 = vshrl.u32 %v6130_v8, 16  ;;  %v6742_v14 = vpop.permute.xlu1 %6741  ;;  %v12047_v20 = vld [vmem:[%s15521_s3 + $0x100] sm:$0xff]  }
 0x35d   : > { %v14617_v5 = vsel %vm380_vm8, %v15543_v22, %v6718_v38  ;;  %v6277_v44 = vrot.slane %v6275_v63, 1  ;;  %v6740_v48 = vpop.permute.xlu0 %6739  ;;  %v7504_v53 = vor.u32 %v7503_v7, %v7499_v62  ;;  %v14624_v46 = vrot.slane %v7506_v16, 1  ;;  %11279 = vmatprep.subr.bf16.mxu1 %v11992_v13  ;;  %v11959_v8 = vld [vmem:[#allocation2 + $0xb0] ss:$0 sps:$4 sm:$0x33]   ;;  %v12006_v22 = vld [vmem:[%s15521_s3 + $0xa0] sm:$0xff]   ;;  %11447 = vmatprep.subr.bf16.mxu0 %v12047_v20 }
 0x35e   : > { %v7105_v38 = vsel %vm1929_vm13, %v7097_v57, %v7104_v50  ;;  %v6281_v2 = vrot.slane %v6279_v42, 1  ;;  %v6807_v27 = vsel %vm1096_vm12, %v11955_v25, %v6740_v48  ;;  %v5922_v11 = vshll.u32 %v14596_v30, 16  ;;  %v11960_v50 = vld [vmem:[#allocation2 + $0xa8] sm:$0xfe]   ;;  %11448 = vmatpush3.bf16.msra.mxu0 %v12047_v20 }
 0x35f   : > { %v6278_v6 = vor.u32 %v6277_v44, %v6273_v17  ;;  %v6810_v62 = vsel %vm1096_vm12, %v11954_v29, %v6742_v14  ;;  %v6911_v13 = vshrl.u32 %v6807_v27, 16  ;;  %v6914_v7 = vshll.u32 %v6807_v27, 16  ;;  %7666 = vrot.lane.b32.xlu0 %v14468_v12, %s12194_s13  ;;  %9844 = vmatprep.mubr.bf16.mxu1 %v7105_v38  ;;  %v14774_v23 = vld [vmem:[#allocation2 + $0x8c] ss:$0 sps:$4 sm:$0x11]  }
 0x360   : > { %v6918_v25 = vshrl.u32 %v6810_v62, 16  ;;  %v6921_v51 = vshll.u32 %v6810_v62, 16  ;;  %v15544_v54 = vshrl.u32 %v14381_v10, 16  ;;  %v5917_v58 = vshll.u32 %v14619_v32, 16  ;;  %11280 = vmatpush3.bf16.msra.mxu1 %v11993_v40  ;;  %v6005_v63 = vpop.permute.xlu1 %6004  ;;  %v12067_v62 = vld [vmem:[%s15521_s3 + $0x108] sm:$0xff]  }
 0x361   : > { %v7510_v16 = vshrl.u32 %v14572_v3, 16  ;;  %v6282_v26 = vsel %vm807_vm11, %v6278_v6, %v6281_v2  ;;  %v6913_v4 = vrot.slane %v6911_v13, 1  ;;  %v6916_v12 = vrot.slane %v6914_v7, 2  ;;  %v6003_v28 = vpop.permute.xlu0 %6002  ;;  %11281 = vmatprep.subr.bf16.mxu1 %v11998_v36  ;;  %v12106_v40 = vld [vmem:[#allocation2 + $0x14] ss:$0 sps:$4 sm:$0x11]   ;;  %11449 = vmatprep.subr.bf16.mxu0 %v12067_v62 }
 0x362   : > { %6032 = vrot.lane.b32.xlu1 %v15544_v54, %s12194_s13  ;;  %v5915_v57 = vshrl.u32 %v14619_v32, 16  ;;  %v6920_v10 = vrot.slane %v6918_v25, 1  ;;  %v6923_v33 = vrot.slane %v6921_v51, 2  ;;  %v15545_v3 = vcombine.low %v14425_v37, %v14470_v59  ;;  %9845 = vmatmul.mubr.bf16.gmra.mrb[4].mxu1 %v6282_v26  ;;  %v14662_v37 = vld [vmem:[#allocation2 + $0x74] ss:$0 sps:$4 sm:$0x11]  }
 0x363   : > { %v5919_v42 = vrot.slane %v5917_v58, 1  ;;  %v6917_v32 = vor.u32 %v6916_v12, %v6913_v4  ;;  %v6072_v17 = vsel %vm1096_vm12, %v12106_v40, %v6005_v63  ;;  %8390 = vrot.lane.b32.xlu0 %v14510_v39, %s12194_s13  ;;  %v5926_v48 = vshrl.u32 %v14596_v30, 16  ;;  %v7928_v59 = vld [vmem:[#allocation2 + $0x70] sm:$0xf]  ;;  %v7961_v36 = vld [vmem:[#allocation2 + $0x6c] sm:$0xe]  ;;  %11450 = vmatpush3.bf16.msra.mxu0 %v12067_v62 }
 0x364   : > { %v6070_v29 = vsel %vm1096_vm12, %v15545_v3, %v6003_v28  ;;  %v6924_v38 = vor.u32 %v6923_v33, %v6920_v10  ;;  %v6159_v2 = vshll.u32 %v6072_v17, 16  ;;  %v15546_v14 = vshrl.u32 %v14409_v47, 16  ;;  %11282 = vmatpush3.bf16.msra.mxu1 %v11999_v24  ;;  %v12008_v39 = vld [vmem:[%s15521_s3 + $0xe8] sm:$0xff]   ;;  %v6794_v24 = vpop.permute.xlu1 %6793  ;;  %v14686_v26 = vld [vmem:[#allocation2 + $0x24] sm:$0xf]  ;;  %v14695_v10 = vld [vmem:[#allocation2 + $0x90] sm:$0xff]  }
 0x365   : > { %v6155_v44 = vshll.u32 %v6070_v29, 16  ;;  %v14669_v27 = vsel %vm807_vm11, %v7504_v53, %v14624_v46  ;;  %v14671_v6 = vrot.slane %v5922_v11, 1  ;;  %v6153_v13 = vshrl.u32 %v6070_v29, 16  ;;  %v6792_v25 = vpop.permute.xlu0 %6791  ;;  %11283 = vmatprep.subr.bf16.mxu1 %v12005_v18  ;;  %v12009_v4 = vld [vmem:[%s15521_s3 + $0xa8] sm:$0xff]   ;;  %v12013_v40 = vld [vmem:[%s15521_s3 + $0xf0] sm:$0xff]  }
 0x366   : > { %8392 = vrot.lane.b32.xlu1 %v15546_v14, %s12194_s13  ;;  %v14679_v47 = vor.u32 %v5919_v42, %v5915_v57  ;;  %v10804_v51 = vcombine.low %v7961_v36, %v7928_v59  ;;  %v6925_v53 = vsel %vm1929_vm13, %v6917_v32, %v6924_v38  ;;  %v6161_v11 = vrot.slane %v6159_v2, 1  ;;  %v11968_v42 = vld [vmem:[#allocation2 + $0x20] ss:$0 sps:$4 sm:$0x33]   ;;  %v11969_v32 = vld [vmem:[#allocation2 + $0x18] sm:$0xfe]  }
 0x367   : > { %v6157_v7 = vrot.slane %v6155_v44, 1  ;;  %v6885_v54 = vsel %vm1096_vm12, %v11960_v50, %v6792_v25  ;;  %v14684_v58 = vor.u32 %v7510_v16, %v14624_v46  ;;  %v6888_v18 = vsel %vm1096_vm12, %v11959_v8, %v6794_v24  ;;  %9748 = vmatprep.mubr.bf16.mxu0 %v6925_v53  ;;  %v11995_v38 = vld [vmem:[#allocation2 + $0x98] ss:$0 sps:$4 sm:$0x11]   ;;  %v14711_v62 = vld [vmem:[#allocation2 + $0x28] sm:$0xf] }
 0x368   : > { %v7106_v28 = vshrl.u32 %v6885_v54, 16  ;;  %v7109_v57 = vshll.u32 %v6885_v54, 16  ;;  %v15547_v20 = vrot.slane %v14373_v0, 7  ;;  %v7113_v46 = vshrl.u32 %v6888_v18, 16  ;;  %11284 = vmatpush3.bf16.msra.mxu1 %v12006_v22  ;;  %v6057_v44 = vpop.permute.xlu1 %6056  ;;  %v14715_v25 = vld [vmem:[#allocation2 + $0x18] sm:$0xf] }
 0x369   : > { %v6158_v12 = vor.u32 %v6157_v7, %v6153_v13  ;;  %v7116_v16 = vshll.u32 %v6888_v18, 16  ;;  %v8245_v33 = vshrl.u32 %v10804_v51, 16  ;;  %v8247_v63 = vshll.u32 %v10804_v51, 16  ;;  %v6055_v50 = vpop.permute.xlu0 %6054  ;;  %11285 = vmatprep.subr.bf16.mxu1 %v12008_v39  ;;  %v12107_v14 = vld [vmem:[#allocation2 + $0xb0] ss:$0 sps:$4 sm:$0x11]  }
 0x36a   : > { %6771 = vrot.lane.b32.xlu0 %v15547_v20, %s12194_s13  ;;  %6773 = vrot.lane.b32.xlu1 %v14515_v56, %s12194_s13  ;;  %v7108_v8 = vrot.slane %v7106_v28, 1  ;;  %v7111_v29 = vrot.slane %v7109_v57, 2  ;;  %v8252_v0 = vshll.u32 %v14662_v37, 16  ;;  %v7115_v17 = vrot.slane %v7113_v46, 1  ;;  %v12019_v28 = vld [vmem:[%s15521_s3 + $0xf8] sm:$0xff]  }
 0x36b   : > { %v6162_v3 = vsel %vm807_vm11, %v6158_v12, %v6161_v11  ;;  %v7118_v56 = vrot.slane %v7116_v16, 2  ;;  %v15548_v22 = vcombine.low %v14476_v55, %v14489_v21  ;;  %v8249_v36 = vrot.slane %v8247_v63, 1  ;;  %v12020_v16 = vld [vmem:[%s15521_s3 + $0xb8] sm:$0xff]  }
 0x36c   : > { %9749 = vmatmul.mubr.bf16.gmra.mrb[4].mxu0 %v6162_v3  ;;  %v7112_v2 = vor.u32 %v7111_v29, %v7108_v8  ;;  %v6137_v39 = vsel %vm1096_vm12, %v12107_v14, %v6057_v44  ;;  %v10611_v7 = vcombine.low %v14686_v26, %v14711_v62  ;;  %v8256_v53 = vshrl.u32 %v14662_v37, 16  ;;  %11286 = vmatpush3.bf16.msra.mxu1 %v12009_v4  ;;  %v6746_v20 = vpop.permute.xlu1 %6745  ;;  %v11974_v14 = vld [vmem:[#allocation2 + $0xb4] sm:$0xfe]  }
 0x36d   : > { %v6135_v59 = vsel %vm1096_vm12, %v15548_v22, %v6055_v50  ;;  %v7119_v55 = vor.u32 %v7118_v56, %v7115_v17  ;;  %v6289_v21 = vshll.u32 %v6137_v39, 16  ;;  %v6744_v24 = vpop.permute.xlu0 %6743  ;;  %v8250_v54 = vor.u32 %v8249_v36, %v8245_v33  ;;  %11287 = vmatprep.subr.bf16.mxu1 %v12013_v40  ;;  %v14743_v40 = vld [vmem:[#allocation2 + $0x1c] sm:$0xf]  ;;  %v12000_v17 = vld [vmem:[#allocation2 + $0x60] sm:$0xfe]  }
 0x36e   : > { %v6285_v13 = vshll.u32 %v6135_v59, 16  ;;  %6034 = vrot.lane.b32.xlu0 %v14551_v34, %s12194_s13  ;;  %v6283_v51 = vshrl.u32 %v6135_v59, 16  ;;  %7668 = vrot.lane.b32.xlu1 %v14524_v15, %s12194_s13  ;;  %v12014_v34 = vld [vmem:[%s15521_s3 + $0xb0] sm:$0xff]   ;;  %v8254_v12 = vrot.slane %v8252_v0, 1  ;;  %v6720_v18 = vrot.slane %v14695_v10, 7  ;;  %v12084_v10 = vld [vmem:[%s15521_s3 + $0x118] sm:$0xff]  }
 0x36f   : > { %v7120_v15 = vsel %vm1929_vm13, %v7112_v2, %v7119_v55  ;;  %v6291_v57 = vrot.slane %v6289_v21, 1  ;;  %v6813_v4 = vsel %vm1096_vm12, %v11969_v32, %v6744_v24  ;;  %v6721_v46 = vrot.slane %v11995_v38, 7  ;;  %v11973_v59 = vld [vmem:[#allocation2 + $0xbc] ss:$0 sps:$4 sm:$0x33]  }
 0x370   : > { %v6287_v11 = vrot.slane %v6285_v13, 1  ;;  %v6816_v63 = vsel %vm1096_vm12, %v11968_v42, %v6746_v20  ;;  %v6926_v3 = vshrl.u32 %v6813_v4, 16  ;;  %v6929_v8 = vshll.u32 %v6813_v4, 16  ;;  %9852 = vmatprep.mubr.bf16.mxu1 %v7120_v15  ;;  %11288 = vmatpush3.bf16.msra.mxu1 %v12014_v34  ;;  %v14751_v36 = vld [vmem:[#allocation2 + $0x68] ss:$0 sps:$4 sm:$0x33]   ;;  %v6009_v38 = vpop.permute.xlu1 %6008 }
 0x371   : > { %v6933_v29 = vshrl.u32 %v6816_v63, 16  ;;  %v6936_v50 = vshll.u32 %v6816_v63, 16  ;;  %v15549_v0 = vshrl.u32 %v14486_v45, 16  ;;  %v14741_v32 = vsel %vm807_vm11, %v14679_v47, %v14671_v6  ;;  %v6007_v22 = vpop.permute.xlu0 %6006  ;;  %11289 = vmatprep.subr.bf16.mxu1 %v12019_v28  ;;  %v5567_v13 = vld [vmem:[#allocation2 + $0x88] sm:$0xf] }
 0x372   : > { %v6288_v33 = vor.u32 %v6287_v11, %v6283_v51  ;;  %7670 = vrot.lane.b32.xlu0 %v14558_v9, %s12194_s13  ;;  %v10765_v42 = vcombine.low %v14715_v25, %v14743_v40  ;;  %v6928_v56 = vrot.slane %v6926_v3, 1  ;;  %v6931_v44 = vrot.slane %v6929_v8, 2  ;;  %v12110_v21 = vld [vmem:[#allocation2 + $0x20] ss:$0 sps:$4 sm:$0x11]  }
 0x373   : > { %6036 = vrot.lane.b32.xlu1 %v15549_v0, %s12194_s13  ;;  %v14749_v45 = vsel %vm807_vm11, %v8250_v54, %v8254_v12  ;;  %v6935_v6 = vrot.slane %v6933_v29, 1  ;;  %v6938_v47 = vrot.slane %v6936_v50, 2  ;;  %v6075_v2 = vsel %vm1096_vm12, %v10609_v52, %v6007_v22  ;;  %v11997_v26 = vld [vmem:[#allocation2 + $0x30] sm:$0xfe]  }
 0x374   : > { %v6292_v9 = vsel %vm807_vm11, %v6288_v33, %v6291_v57  ;;  %v14760_v39 = vsel %vm380_vm8, %v6720_v18, %v6721_v46  ;;  %v6932_v55 = vor.u32 %v6931_v44, %v6928_v56  ;;  %v6077_v51 = vsel %vm1096_vm12, %v12110_v21, %v6009_v38  ;;  %11290 = vmatpush3.bf16.msra.mxu1 %v12020_v16  ;;  %v6798_v46 = vpop.permute.xlu1 %6797  ;;  %v14782_v44 = vld [vmem:[#allocation2 + $0x30] sm:$0xf] }
 0x375   : > { %9853 = vmatmul.mubr.bf16.gmra.mrb[8].mxu1 %v6292_v9  ;;  %v6165_v34 = vshll.u32 %v6075_v2, 16  ;;  %v7514_v11 = vshrl.u32 %v12000_v17, 16  ;;  %v6939_v31 = vor.u32 %v6938_v47, %v6935_v6  ;;  %v6169_v52 = vshll.u32 %v6077_v51, 16  ;;  %v6796_v15 = vpop.permute.xlu0 %6795  ;;  %v11982_v47 = vld [vmem:[#allocation2 + $0x2c] ss:$0 sps:$4 sm:$0x33]  }
 0x376   : > { %8394 = vrot.lane.b32.xlu0 %v14610_v43, %s12194_s13  ;;  %v7516_v24 = vshll.u32 %v12000_v17, 16  ;;  %v7521_v54 = vshll.u32 %v14751_v36, 16  ;;  %v6163_v12 = vshrl.u32 %v6075_v2, 16  ;;  %v14769_v57 = vcombine.low %v5592_v19, %v5567_v13  ;;  %v11983_v17 = vld [vmem:[#allocation2 + $0x24] sm:$0xfe]   ;;  %v12076_v38 = vld [vmem:[%s15521_s3 + $0x110] sm:$0xff]  }
 0x377   : > { %8396 = vrot.lane.b32.xlu1 %v8242_v49, %s12194_s13  ;;  %v6167_v28 = vrot.slane %v6165_v34, 1  ;;  %v7525_v20 = vshrl.u32 %v14751_v36, 16  ;;  %v6940_v43 = vsel %vm1929_vm13, %v6932_v55, %v6939_v31  ;;  %v6171_v4 = vrot.slane %v6169_v52, 1  ;;  %v12111_v51 = vld [vmem:[#allocation2 + $0xbc] ss:$0 sps:$4 sm:$0x11]   ;;  %11451 = vmatprep.subr.bf16.mxu0 %v12076_v38 }
 0x378   : > { %v6891_v33 = vsel %vm1096_vm12, %v11974_v14, %v6796_v15  ;;  %v7518_v63 = vrot.slane %v7516_v24, 1  ;;  %v6894_v3 = vsel %vm1096_vm12, %v11973_v59, %v6798_v46  ;;  %v15550_v29 = vrot.slane %v14392_v35, 7  ;;  %9756 = vmatprep.mubr.bf16.mxu0 %v6940_v43  ;;  %11452 = vmatpush3.bf16.msra.mxu0 %v12076_v38  ;;  %v14810_v15 = vld [vmem:[#allocation2 + $0x80] ss:$0 sps:$4 sm:$0x11]  }
 0x379   : > { %v6168_v49 = vor.u32 %v6167_v28, %v6163_v12  ;;  %v7121_v16 = vshrl.u32 %v6891_v33, 16  ;;  %v7124_v8 = vshll.u32 %v6891_v33, 16  ;;  %v7128_v50 = vshrl.u32 %v6894_v3, 16  ;;  %v6059_v6 = vpop.permute.xlu0 %6058  ;;  %11453 = vmatprep.subr.bf16.mxu0 %v12084_v10 }
 0x37a   : > { %6775 = vrot.lane.b32.xlu0 %v15550_v29, %s12194_s13  ;;  %v7131_v0 = vshll.u32 %v6894_v3, 16  ;;  %v7519_v9 = vor.u32 %v7518_v63, %v7514_v11  ;;  %v7523_v56 = vrot.slane %v7521_v54, 1  ;;  %v5929_v35 = vshrl.u32 %v14769_v57, 16  ;;  %v14803_v54 = vld [vmem:[#allocation2 + $0x34] sm:$0xf] }
 0x37b   : > { %6777 = vrot.lane.b32.xlu1 %v14617_v5, %s12194_s13  ;;  %v6172_v22 = vsel %vm807_vm11, %v6168_v49, %v6171_v4  ;;  %v7123_v59 = vrot.slane %v7121_v16, 1  ;;  %v7126_v36 = vrot.slane %v7124_v8, 2  ;;  %v7130_v2 = vrot.slane %v7128_v50, 1  ;;  %v6061_v5 = vpop.permute.xlu1 %6060  ;;  %v7962_v16 = vld [vmem:[#allocation2 + $0x78] sm:$0xe] }
 0x37c   : > { %v7133_v14 = vrot.slane %v7131_v0, 2  ;;  %v6140_v13 = vsel %vm1096_vm12, %v10635_v60, %v6059_v6  ;;  %9757 = vmatmul.mubr.bf16.gmra.mrb[8].mxu0 %v6172_v22  ;;  %v14794_v55 = vsel %vm807_vm11, %v7519_v9, %v7523_v56  ;;  %v6142_v34 = vsel %vm1096_vm12, %v12111_v51, %v6061_v5 }
 0x37d   : > { %v7127_v21 = vor.u32 %v7126_v36, %v7123_v59  ;;  %v6293_v11 = vshrl.u32 %v6140_v13, 16  ;;  %v6295_v19 = vshll.u32 %v6140_v13, 16  ;;  %v6299_v52 = vshll.u32 %v6142_v34, 16  ;;  %v6748_v24 = vpop.permute.xlu0 %6747  ;;  %11454 = vmatpush3.bf16.msra.mxu0 %v12084_v10 }
 0x37e   : > { %6038 = vrot.lane.b32.xlu0 %v14741_v32, %s12194_s13  ;;  %v7134_v31 = vor.u32 %v7133_v14, %v7130_v2  ;;  %v5931_v1 = vshll.u32 %v14769_v57, 16  ;;  %v5936_v41 = vshll.u32 %v14774_v23, 16  ;;  %v10613_v12 = vcombine.low %v14782_v44, %v14803_v54  ;;  %v12113_v2 = vld [vmem:[#allocation2 + $0x2c] ss:$0 sps:$4 sm:$0x11]  }
 0x37f   : > { %7672 = vrot.lane.b32.xlu1 %v14669_v27, %s12194_s13  ;;  %v6297_v60 = vrot.slane %v6295_v19, 1  ;;  %v5940_v32 = vshrl.u32 %v14774_v23, 16  ;;  %v14808_v28 = vor.u32 %v7525_v20, %v7523_v56  ;;  %v6301_v43 = vrot.slane %v6299_v52, 1  ;;  %v6750_v57 = vpop.permute.xlu1 %6749  ;;  %v7931_v20 = vld [vmem:[#allocation2 + $0x7c] sm:$0xf] }
 0x380   : > { %v7135_v27 = vsel %vm1929_vm13, %v7127_v21, %v7134_v31  ;;  %v6819_v4 = vsel %vm1096_vm12, %v11983_v17, %v6748_v24  ;;  %v5933_v46 = vrot.slane %v5931_v1, 1  ;;  %v6822_v63 = vsel %vm1096_vm12, %v11982_v47, %v6750_v57  ;;  %v14820_v17 = vld [vmem:[#allocation2 + $0x24] sm:$0xf]  ;;  %v11996_v19 = vld [vmem:[#allocation2 + $0x38] ss:$0 sps:$4 sm:$0x33]  }
 0x381   : > { %v6298_v33 = vor.u32 %v6297_v60, %v6293_v11  ;;  %v6941_v49 = vshrl.u32 %v6819_v4, 16  ;;  %v6944_v3 = vshll.u32 %v6819_v4, 16  ;;  %9860 = vmatprep.mubr.bf16.mxu1 %v7135_v27  ;;  %v6948_v8 = vshrl.u32 %v6822_v63, 16  ;;  %v6011_v59 = vpop.permute.xlu0 %6010  ;;  %v14836_v31 = vld [vmem:[#allocation2 + $0x28] sm:$0xf] }
 0x382   : > { %7674 = vrot.lane.b32.xlu0 %v14684_v58, %s12194_s13  ;;  %v6951_v29 = vshll.u32 %v6822_v63, 16  ;;  %v5934_v50 = vor.u32 %v5933_v46, %v5929_v35  ;;  %v5938_v0 = vrot.slane %v5936_v41, 1  ;;  %v8270_v58 = vshrl.u32 %v14810_v15, 16  ;;  %v12015_v35 = vld [vmem:[#allocation2 + $0x74] ss:$0 sps:$4 sm:$0x33]  }
 0x383   : > { %6040 = vrot.lane.b32.xlu1 %v5926_v48, %s12194_s13  ;;  %v6302_v9 = vsel %vm807_vm11, %v6298_v33, %v6301_v43  ;;  %v6943_v56 = vrot.slane %v6941_v49, 1  ;;  %v6946_v22 = vrot.slane %v6944_v3, 2  ;;  %v6950_v36 = vrot.slane %v6948_v8, 1  ;;  %v6013_v47 = vpop.permute.xlu1 %6012  ;;  %v14840_v41 = vld [vmem:[#allocation2 + $0x6c] sm:$0xfe]  }
 0x384   : > { %v6953_v6 = vrot.slane %v6951_v29, 2  ;;  %v6080_v30 = vsel %vm1096_vm12, %v10611_v7, %v6011_v59  ;;  %9861 = vmatmul.mubr.bf16.gmra.mrb[12].mxu1 %v6302_v9  ;;  %v5939_v48 = vsel %vm807_vm11, %v5934_v50, %v5938_v0  ;;  %v6082_v14 = vsel %vm1096_vm12, %v12113_v2, %v6013_v47  ;;  %v12115_v57 = vld [vmem:[#allocation2 + $0x20] ss:$0 sps:$4 sm:$0x11]   ;;  %v7934_v2 = vld [vmem:[#allocation2 + $0x88] sm:$0xf] }
 0x385   : > { %v6947_v38 = vor.u32 %v6946_v22, %v6943_v56  ;;  %v6173_v5 = vshrl.u32 %v6080_v30, 16  ;;  %v6175_v13 = vshll.u32 %v6080_v30, 16  ;;  %v6179_v51 = vshll.u32 %v6082_v14, 16  ;;  %v8371_v11 = vpop.permute.xlu0 %8370  ;;  %v12007_v30 = vld [vmem:[#allocation2 + $0x14] ss:$0 sps:$4 sm:$0x11]  }
 0x386   : > { %8398 = vrot.lane.b32.xlu0 %v14749_v45, %s12194_s13  ;;  %v6954_v21 = vor.u32 %v6953_v6, %v6950_v36  ;;  %v10805_v62 = vcombine.low %v7962_v16, %v7931_v20  ;;  %v8266_v7 = vshll.u32 %v14810_v15, 16  ;;  %v10767_v52 = vcombine.low %v14820_v17, %v14836_v31  ;;  %v14867_v36 = vld [vmem:[#allocation2 + $0x8c] ss:$0 sps:$4 sm:$0x11]  }
 0x387   : > { %8400 = vrot.lane.b32.xlu1 %v8256_v53, %s12194_s13  ;;  %v6177_v34 = vrot.slane %v6175_v13, 1  ;;  %v7536_v1 = vshll.u32 %v12015_v35, 16  ;;  %v7540_v45 = vshrl.u32 %v12015_v35, 16  ;;  %v6181_v37 = vrot.slane %v6179_v51, 1  ;;  %v8373_v53 = vpop.permute.xlu1 %8372  ;;  %v7963_v51 = vld [vmem:[#allocation2 + $0x84] sm:$0xe] }
 0x388   : > { %v6955_v60 = vsel %vm1929_vm13, %v6947_v38, %v6954_v21  ;;  %v8436_v24 = vsel %vm1096_vm12, %v10765_v42, %v8371_v11  ;;  %v8259_v27 = vshrl.u32 %v10805_v62, 16  ;;  %v8438_v4 = vsel %vm1096_vm12, %v12115_v57, %v8373_v53  ;;  %v14878_v11 = vld [vmem:[#allocation2 + $0x3c] sm:$0xf]  ;;  %v14887_v57 = vld [vmem:[#allocation2 + $0x40] sm:$0xf] }
 0x389   : > { %v6178_v43 = vor.u32 %v6177_v34, %v6173_v5  ;;  %v8514_v46 = vshrl.u32 %v8436_v24, 16  ;;  %v8516_v33 = vshll.u32 %v8436_v24, 16  ;;  %9764 = vmatprep.mubr.bf16.mxu0 %v6955_v60  ;;  %v8520_v63 = vshll.u32 %v8438_v4, 16  ;;  %v6752_v20 = vpop.permute.xlu0 %6751 }
 0x38a   : > { %6779 = vrot.lane.b32.xlu0 %v6720_v18, %s12194_s13  ;;  %v8261_v49 = vshll.u32 %v10805_v62, 16  ;;  %v8268_v25 = vrot.slane %v8266_v7, 1  ;;  %v14853_v40 = vrot.slane %v7536_v1, 1  ;;  %v7529_v16 = vshrl.u32 %v14840_v41, 16  ;;  %v12116_v1 = vld [vmem:[#allocation2 + $0xc] sm:$0xfe]  }
 0x38b   : > { %6781 = vrot.lane.b32.xlu1 %v14760_v39, %s12194_s13  ;;  %v6182_v42 = vsel %vm807_vm11, %v6178_v43, %v6181_v37  ;;  %v8518_v3 = vrot.slane %v8516_v33, 1  ;;  %v7531_v8 = vshll.u32 %v14840_v41, 16  ;;  %v8522_v18 = vrot.slane %v8520_v63, 1  ;;  %v6754_v29 = vpop.permute.xlu1 %6753  ;;  %v12024_v37 = vld [vmem:[#allocation2 + $0x80] ss:$0 sps:$4 sm:$0x33]  }
 0x38c   : > { %v6825_v39 = vsel %vm1096_vm12, %v11997_v26, %v6752_v20  ;;  %9765 = vmatmul.mubr.bf16.gmra.mrb[12].mxu0 %v6182_v42  ;;  %v8263_v50 = vrot.slane %v8261_v49, 1  ;;  %v14863_v0 = vor.u32 %v7540_v45, %v14853_v40  ;;  %v6828_v56 = vsel %vm1096_vm12, %v11996_v19, %v6754_v29  ;;  %v12118_v42 = vld [vmem:[#allocation2 + $0x38] ss:$0 sps:$4 sm:$0x11]  }
 0x38d   : > { %v8519_v9 = vor.u32 %v8518_v3, %v8514_v46  ;;  %v6956_v22 = vshrl.u32 %v6825_v39, 16  ;;  %v6959_v59 = vshll.u32 %v6825_v39, 16  ;;  %v6963_v6 = vshrl.u32 %v6828_v56, 16  ;;  %v6015_v21 = vpop.permute.xlu0 %6014 }
 0x38e   : > { %6042 = vrot.lane.b32.xlu0 %v5939_v48, %s12194_s13  ;;  %v6966_v47 = vshll.u32 %v6828_v56, 16  ;;  %v8264_v35 = vor.u32 %v8263_v50, %v8259_v27  ;;  %v7533_v38 = vrot.slane %v7531_v8, 1  ;;  %v8284_v48 = vshrl.u32 %v14867_v36, 16  ;;  %v7937_v8 = vld [vmem:[#allocation2 + $0x94] sm:$0xf] }
 0x38f   : > { %7676 = vrot.lane.b32.xlu1 %v14794_v55, %s12194_s13  ;;  %v8523_v14 = vsel %vm807_vm11, %v8519_v9, %v8522_v18  ;;  %v6958_v5 = vrot.slane %v6956_v22, 1  ;;  %v6961_v13 = vrot.slane %v6959_v59, 2  ;;  %v6965_v26 = vrot.slane %v6963_v6, 1  ;;  %v7649_v7 = vpop.permute.xlu1 %7648  ;;  %v12018_v56 = vld [vmem:[#allocation2 + $0x3c] sm:$0xfe]  }
 0x390   : > { %v6968_v62 = vrot.slane %v6966_v47, 2  ;;  %v6085_v55 = vsel %vm1096_vm12, %v10613_v12, %v6015_v21  ;;  %v8269_v34 = vsel %vm807_vm11, %v8264_v35, %v8268_v25  ;;  %9901 = vmatprep.mubr.bf16.mxu1 %v8523_v14  ;;  %v7713_v45 = vsel %vm1096_vm12, %v12116_v1, %v7649_v7  ;;  %v12017_v21 = vld [vmem:[#allocation2 + $0x44] ss:$0 sps:$4 sm:$0x33]  }
 0x391   : > { %v6962_v19 = vor.u32 %v6961_v13, %v6958_v5  ;;  %v6183_v41 = vshrl.u32 %v6085_v55, 16  ;;  %v6185_v60 = vshll.u32 %v6085_v55, 16  ;;  %v7825_v24 = vrot.slane %v7713_v45, 1  ;;  %v7651_v27 = vpop.permute.xlu0 %7650 }
 0x392   : > { %7678 = vrot.lane.b32.xlu0 %v14808_v28, %s12194_s13  ;;  %v6969_v53 = vor.u32 %v6968_v62, %v6965_v26  ;;  %v7534_v44 = vor.u32 %v7533_v38, %v7529_v16  ;;  %v10806_v54 = vcombine.low %v7963_v51, %v7934_v2  ;;  %v8280_v43 = vshll.u32 %v14867_v36, 16  ;;  %v12025_v28 = vld [vmem:[#allocation2 + $0x78] sm:$0xfe]   ;;  %v12119_v2 = vld [vmem:[#allocation2 + $0x2c] ss:$0 sps:$4 sm:$0x11]  }
 0x393   : > { %6044 = vrot.lane.b32.xlu1 %v5940_v32, %s12194_s13  ;;  %v6187_v12 = vrot.slane %v6185_v60, 1  ;;  %v10615_v4 = vcombine.low %v14878_v11, %v14887_v57  ;;  %v7551_v46 = vshll.u32 %v12024_v37, 16  ;;  %v6017_v63 = vpop.permute.xlu1 %6016  ;;  %v7716_v49 = vsel %vm1096_vm12, %v12007_v30, %v7651_v27  ;;  %v12121_v57 = vld [vmem:[#allocation2 + $0x34] sm:$0xf] }
 0x394   : > { %v6970_v33 = vsel %vm1929_vm13, %v6962_v19, %v6969_v53  ;;  %v7539_v23 = vsel %vm807_vm11, %v7534_v44, %v14853_v40  ;;  %v8273_v32 = vshrl.u32 %v10806_v54, 16  ;;  %v6087_v3 = vsel %vm1096_vm12, %v12118_v42, %v6017_v63  ;;  %v7964_v40 = vld [vmem:[#allocation2 + $0x90] sm:$0xe] }
 0x395   : > { %v6188_v25 = vor.u32 %v6187_v12, %v6183_v41  ;;  %v7826_v20 = vrot.slane %v7716_v49, 1  ;;  %9772 = vmatprep.mubr.bf16.mxu0 %v6970_v33  ;;  %v8275_v16 = vshll.u32 %v10806_v54, 16  ;;  %v6189_v10 = vshll.u32 %v6087_v3, 16  ;;  %v8375_v9 = vpop.permute.xlu0 %8374  ;;  %v14918_v54 = vld [vmem:[#allocation2 + $0x30] sm:$0xf] }
 0x396   : > { %8402 = vrot.lane.b32.xlu0 %v8269_v34, %s12194_s13  ;;  %v8282_v18 = vrot.slane %v8280_v43, 1  ;;  %v7553_v29 = vrot.slane %v7551_v46, 1  ;;  %v7555_v39 = vshrl.u32 %v12024_v37, 16  ;;  %v7544_v59 = vshrl.u32 %v12025_v28, 16 }
 0x397   : > { %8404 = vrot.lane.b32.xlu1 %v8270_v58, %s12194_s13  ;;  %v7827_v50 = vsel %vm2858_vm14, %v7825_v24, %v7826_v20  ;;  %v8277_v22 = vrot.slane %v8275_v16, 1  ;;  %v7546_v6 = vshll.u32 %v12025_v28, 16  ;;  %v6191_v47 = vrot.slane %v6189_v10, 1  ;;  %v8377_v30 = vpop.permute.xlu1 %8376  ;;  %v14905_v58 = vld [vmem:[#allocation2 + $0x98] ss:$0 sps:$4 sm:$0x11]  }
 0x398   : > { %v8441_v35 = vsel %vm1096_vm12, %v10767_v52, %v8375_v9  ;;  %9902 = vmatmul.mubr.bf16.vlgmr.msra.gmra.mrb[16].mxu1 %v7827_v50  ;;  %v7557_v15 = vor.u32 %v7555_v39, %v7553_v29  ;;  %v10807_v38 = vcombine.low %v7964_v40, %v7937_v8  ;;  %v8443_v14 = vsel %vm1096_vm12, %v12119_v2, %v8377_v30  ;;  %v12030_v12 = vld [vmem:[#allocation2 + $0x8c] ss:$0 sps:$4 sm:$0x33]   ;;  %v12026_v28 = vld [vmem:[#allocation2 + $0x20] ss:$0 sps:$4 sm:$0x11]  }
 0x399   : > { %v8524_v5 = vshrl.u32 %v8441_v35, 16  ;;  %v8526_v13 = vshll.u32 %v8441_v35, 16  ;;  %v8278_v51 = vor.u32 %v8277_v22, %v8273_v32  ;;  %v6192_v26 = vsel %vm807_vm11, %v6188_v25, %v6191_v47  ;;  %v6756_v7 = vpop.permute.xlu0 %6755  ;;  %v12120_v10 = vld [vmem:[#allocation2 + $0x18] sm:$0xfe]  }
 0x39a   : > { %7680 = vrot.lane.b32.xlu0 %v7539_v23, %s12194_s13  ;;  %v8530_v62 = vshll.u32 %v8443_v14, 16  ;;  %v7548_v17 = vrot.slane %v7546_v6, 1  ;;  %v8298_v31 = vshrl.u32 %v14905_v58, 16  ;;  %9773 = vmatmul.mubr.bf16.gmra.mrb[16].mxu0 %v6192_v26  ;;  %v8287_v34 = vshrl.u32 %v10807_v38, 16  ;;  %v7965_v22 = vld [vmem:[#allocation2 + $0x9c] sm:$0xe] }
 0x39b   : > { %7682 = vrot.lane.b32.xlu1 %v14863_v0, %s12194_s13  ;;  %v8528_v52 = vrot.slane %v8526_v13, 1  ;;  %v8283_v55 = vsel %vm807_vm11, %v8278_v51, %v8282_v18  ;;  %v8289_v19 = vshll.u32 %v10807_v38, 16  ;;  %v6758_v45 = vpop.permute.xlu1 %6757  ;;  %v6831_v41 = vsel %vm1096_vm12, %v12018_v56, %v6756_v7  ;;  %v14931_v40 = vld [vmem:[#allocation2 + $0xa4] ss:$0 sps:$4 sm:$0x11]  }
 0x39c   : > { %v8532_v1 = vrot.slane %v8530_v62, 1  ;;  %v7549_v60 = vor.u32 %v7548_v17, %v7544_v59  ;;  %v8294_v37 = vshll.u32 %v14905_v58, 16  ;;  %v6834_v0 = vsel %vm1096_vm12, %v12017_v21, %v6758_v45  ;;  %v7940_v56 = vld [vmem:[#allocation2 + $0xa0] sm:$0xf]  ;;  %v14936_v38 = vld [vmem:[#allocation2 + $0x48] sm:$0xf] }
 0x39d   : > { %v8529_v53 = vor.u32 %v8528_v52, %v8524_v5  ;;  %v6971_v24 = vshrl.u32 %v6831_v41, 16  ;;  %v6974_v44 = vshll.u32 %v6831_v41, 16  ;;  %v6978_v27 = vshrl.u32 %v6834_v0, 16  ;;  %v6019_v32 = vpop.permute.xlu0 %6018  ;;  %v12122_v51 = vld [vmem:[#allocation2 + $0x44] ss:$0 sps:$4 sm:$0x11]  }
 0x39e   : > { %8406 = vrot.lane.b32.xlu0 %v8283_v55, %s12194_s13  ;;  %v6981_v43 = vshll.u32 %v6834_v0, 16  ;;  %v7554_v46 = vsel %vm807_vm11, %v7549_v60, %v7553_v29  ;;  %v8291_v33 = vrot.slane %v8289_v19, 1  ;;  %v8296_v25 = vrot.slane %v8294_v37, 1  ;;  %v12037_v52 = vld [vmem:[#allocation2 + $0x98] ss:$0 sps:$4 sm:$0x33]  }
 0x39f   : > { %8408 = vrot.lane.b32.xlu1 %v8284_v48, %s12194_s13  ;;  %v8533_v63 = vsel %vm807_vm11, %v8529_v53, %v8532_v1  ;;  %v6973_v49 = vrot.slane %v6971_v24, 1  ;;  %v6976_v23 = vrot.slane %v6974_v44, 2  ;;  %v6980_v42 = vrot.slane %v6978_v27, 1  ;;  %v7653_v20 = vpop.permute.xlu1 %7652  ;;  %v12031_v48 = vld [vmem:[#allocation2 + $0x84] sm:$0xfe]  }
 0x3a0   : > { %v6983_v3 = vrot.slane %v6981_v43, 2  ;;  %v6090_v16 = vsel %vm1096_vm12, %v10615_v4, %v6019_v32  ;;  %v8292_v36 = vor.u32 %v8291_v33, %v8287_v34  ;;  %9909 = vmatprep.mubr.bf16.mxu1 %v8533_v63  ;;  %v7718_v18 = vsel %vm1096_vm12, %v12120_v10, %v7653_v20  ;;  %v12032_v60 = vld [vmem:[#allocation2 + $0x50] ss:$0 sps:$4 sm:$0x33]   ;;  %v12123_v37 = vld [vmem:[#allocation2 + $0x4c] sm:$0xf] }
 0x3a1   : > { %v6977_v8 = vor.u32 %v6976_v23, %v6973_v49  ;;  %v6193_v29 = vshrl.u32 %v6090_v16, 16  ;;  %v6195_v39 = vshll.u32 %v6090_v16, 16  ;;  %v7828_v9 = vrot.slane %v7718_v18, 1  ;;  %v7655_v6 = vpop.permute.xlu0 %7654  ;;  %v12033_v58 = vld [vmem:[#allocation2 + $0x48] sm:$0xfe]  }
 0x3a2   : > { %7684 = vrot.lane.b32.xlu0 %v7554_v46, %s12194_s13  ;;  %v6984_v50 = vor.u32 %v6983_v3, %v6980_v42  ;;  %v8297_v11 = vsel %vm807_vm11, %v8292_v36, %v8296_v25  ;;  %v10769_v4 = vcombine.low %v14918_v54, %v12121_v57  ;;  %v7566_v47 = vshll.u32 %v12030_v12, 16  ;;  %v12038_v27 = vld [vmem:[#allocation2 + $0x90] sm:$0xfe]   ;;  %v12124_v43 = vld [vmem:[#allocation2 + $0x38] ss:$0 sps:$4 sm:$0x11]  }
 0x3a3   : > { %7686 = vrot.lane.b32.xlu1 %v7557_v15, %s12194_s13  ;;  %v6197_v59 = vrot.slane %v6195_v39, 1  ;;  %v7570_v30 = vshrl.u32 %v12030_v12, 16  ;;  %v7559_v35 = vshrl.u32 %v12031_v48, 16  ;;  %v6021_v14 = vpop.permute.xlu1 %6020  ;;  %v7721_v5 = vsel %vm1096_vm12, %v12026_v28, %v7655_v6  ;;  %v7943_v6 = vld [vmem:[#allocation2 + $0xac] sm:$0xf] }
 0x3a4   : > { %v6985_v2 = vsel %vm1929_vm13, %v6977_v8, %v6984_v50  ;;  %v7561_v15 = vshll.u32 %v12031_v48, 16  ;;  %v8312_v13 = vshrl.u32 %v14931_v40, 16  ;;  %v6092_v26 = vsel %vm1096_vm12, %v12122_v51, %v6021_v14 }
 0x3a5   : > { %v6198_v21 = vor.u32 %v6197_v59, %v6193_v29  ;;  %v7829_v62 = vrot.slane %v7721_v5, 1  ;;  %v7568_v17 = vrot.slane %v7566_v47, 1  ;;  %9780 = vmatprep.mubr.bf16.mxu0 %v6985_v2  ;;  %v6199_v7 = vshll.u32 %v6092_v26, 16  ;;  %v8379_v45 = vpop.permute.xlu0 %8378  ;;  %v12039_v59 = vld [vmem:[#allocation2 + $0x2c] ss:$0 sps:$4 sm:$0x11]  }
 0x3a6   : > { %8410 = vrot.lane.b32.xlu0 %v8297_v11, %s12194_s13  ;;  %v7563_v55 = vrot.slane %v7561_v15, 1  ;;  %v10808_v34 = vcombine.low %v7965_v22, %v7940_v56  ;;  %v8308_v19 = vshll.u32 %v14931_v40, 16  ;;  %v10617_v53 = vcombine.low %v14936_v38, %v12123_v37  ;;  %v12040_v11 = vld [vmem:[#allocation2 + $0xb0] ss:$0 sps:$4 sm:$0x11]  }
 0x3a7   : > { %8412 = vrot.lane.b32.xlu1 %v8298_v31, %s12194_s13  ;;  %v7830_v1 = vsel %vm2858_vm14, %v7828_v9, %v7829_v62  ;;  %v7572_v41 = vor.u32 %v7570_v30, %v7568_v17  ;;  %v7581_v0 = vshll.u32 %v12037_v52, 16  ;;  %v6201_v24 = vrot.slane %v6199_v7, 1  ;;  %v8381_v44 = vpop.permute.xlu1 %8380  ;;  %v7966_v47 = vld [vmem:[#allocation2 + $0xa8] sm:$0xe]  ;;  %v7915_v62 = vld [vmem:[#allocation2 + $0x3c] sm:$0xf] }
 0x3a8   : > { %v8446_v54 = vsel %vm1096_vm12, %v10769_v4, %v8379_v45  ;;  %v7564_v12 = vor.u32 %v7563_v55, %v7559_v35  ;;  %v8301_v31 = vshrl.u32 %v10808_v34, 16  ;;  %9910 = vmatmul.mubr.bf16.gmra.mrb[20].mxu1 %v7830_v1  ;;  %v8448_v46 = vsel %vm1096_vm12, %v12124_v43, %v8381_v44  ;;  %v14958_v30 = vld [vmem:[#allocation2 + $0xa4] ss:$0 sps:$4 sm:$0x33]  }
 0x3a9   : > { %v8534_v28 = vshrl.u32 %v8446_v54, 16  ;;  %v8536_v33 = vshll.u32 %v8446_v54, 16  ;;  %v8303_v63 = vshll.u32 %v10808_v34, 16  ;;  %v6202_v49 = vsel %vm807_vm11, %v6198_v21, %v6201_v24  ;;  %v6760_v3 = vpop.permute.xlu0 %6759  ;;  %v12126_v24 = vld [vmem:[#allocation2 + $0x40] sm:$0xf] }
 0x3aa   : > { %v8540_v23 = vshll.u32 %v8448_v46, 16  ;;  %v7569_v32 = vsel %vm807_vm11, %v7564_v12, %v7568_v17  ;;  %v8310_v25 = vrot.slane %v8308_v19, 1  ;;  %v7583_v16 = vrot.slane %v7581_v0, 1  ;;  %9781 = vmatmul.mubr.bf16.gmra.mrb[20].mxu0 %v6202_v49  ;;  %v12044_v54 = vld [vmem:[#allocation2 + $0x9c] sm:$0xfe]  }
 0x3ab   : > { %7690 = vrot.lane.b32.xlu1 %v7572_v41, %s12194_s13  ;;  %v8538_v42 = vrot.slane %v8536_v33, 1  ;;  %7688 = vrot.lane.b32.xlu0 %v7569_v32, %s12194_s13  ;;  %v8305_v20 = vrot.slane %v8303_v63, 1  ;;  %v7585_v36 = vshrl.u32 %v12037_v52, 16  ;;  %v6762_v8 = vpop.permute.xlu1 %6761  ;;  %v6837_v10 = vsel %vm1096_vm12, %v12033_v58, %v6760_v3  ;;  %v12125_v52 = vld [vmem:[#allocation2 + $0x24] sm:$0xfe]  }
 0x3ac   : > { %v8542_v48 = vrot.slane %v8540_v23, 1  ;;  %v7574_v18 = vshrl.u32 %v12038_v27, 16  ;;  %v7576_v29 = vshll.u32 %v12038_v27, 16  ;;  %v6840_v40 = vsel %vm1096_vm12, %v12032_v60, %v6762_v8  ;;  %v7946_v23 = vld [vmem:[#allocation2 + $0xb8] sm:$0xf] }
 0x3ad   : > { %v8539_v39 = vor.u32 %v8538_v42, %v8534_v28  ;;  %v6986_v50 = vshrl.u32 %v6837_v10, 16  ;;  %v6989_v9 = vshll.u32 %v6837_v10, 16  ;;  %v6993_v57 = vshrl.u32 %v6840_v40, 16  ;;  %v6023_v14 = vpop.permute.xlu0 %6022  ;;  %v12127_v28 = vld [vmem:[#allocation2 + $0x50] ss:$0 sps:$4 sm:$0x11]  }
 0x3ae   : > { %v6996_v4 = vshll.u32 %v6840_v40, 16  ;;  %v8306_v56 = vor.u32 %v8305_v20, %v8301_v31  ;;  %v7587_v22 = vor.u32 %v7585_v36, %v7583_v16  ;;  %v7578_v5 = vrot.slane %v7576_v29, 1  ;;  %v7967_v20 = vld [vmem:[#allocation2 + $0xb4] sm:$0xe] }
 0x3af   : > { %8416 = vrot.lane.b32.xlu1 %v8312_v13, %s12194_s13  ;;  %v8543_v35 = vsel %vm807_vm11, %v8539_v39, %v8542_v48  ;;  %v6988_v38 = vrot.slane %v6986_v50, 1  ;;  %v6991_v2 = vrot.slane %v6989_v9, 2  ;;  %v6995_v15 = vrot.slane %v6993_v57, 1  ;;  %v7657_v26 = vpop.permute.xlu1 %7656  ;;  %v12046_v9 = vld [vmem:[#allocation2 + $0x54] sm:$0xfe]  }
 0x3b0   : > { %v6998_v21 = vrot.slane %v6996_v4, 2  ;;  %v8311_v51 = vsel %vm807_vm11, %v8306_v56, %v8310_v25  ;;  %v6095_v13 = vsel %vm1096_vm12, %v10617_v53, %v6023_v14  ;;  %9917 = vmatprep.mubr.bf16.mxu1 %v8543_v35  ;;  %v7723_v7 = vsel %vm1096_vm12, %v12125_v52, %v7657_v26  ;;  %v12128_v57 = vld [vmem:[#allocation2 + $0x44] ss:$0 sps:$4 sm:$0x11]  }
 0x3b1   : > { %v6992_v17 = vor.u32 %v6991_v2, %v6988_v38  ;;  %8414 = vrot.lane.b32.xlu0 %v8311_v51, %s12194_s13  ;;  %v6203_v55 = vshrl.u32 %v6095_v13, 16  ;;  %v6205_v34 = vshll.u32 %v6095_v13, 16  ;;  %v7831_v1 = vrot.slane %v7723_v7, 1  ;;  %v7659_v37 = vpop.permute.xlu0 %7658  ;;  %v12051_v52 = vld [vmem:[#allocation2 + $0xb0] ss:$0 sps:$4 sm:$0x33]  }
 0x3b2   : > { %v6999_v19 = vor.u32 %v6998_v21, %v6995_v15  ;;  %v7579_v45 = vor.u32 %v7578_v5, %v7574_v18  ;;  %v8326_v41 = vshrl.u32 %v12040_v11, 16  ;;  %v10809_v0 = vcombine.low %v7966_v47, %v7943_v6  ;;  %v12045_v18 = vld [vmem:[#allocation2 + $0x5c] ss:$0 sps:$4 sm:$0x33]  }
 0x3b3   : > { %7694 = vrot.lane.b32.xlu1 %v7587_v22, %s12194_s13  ;;  %v6207_v60 = vrot.slane %v6205_v34, 1  ;;  %v8322_v53 = vshll.u32 %v12040_v11, 16  ;;  %v10771_v44 = vcombine.low %v7915_v62, %v12126_v24  ;;  %v6025_v31 = vpop.permute.xlu1 %6024  ;;  %v7726_v27 = vsel %vm1096_vm12, %v12039_v59, %v7659_v37  ;;  %v12048_v6 = vld [vmem:[#allocation2 + $0xbc] ss:$0 sps:$4 sm:$0x11]  }
 0x3b4   : > { %v7000_v12 = vsel %vm1929_vm13, %v6992_v17, %v6999_v19  ;;  %v7584_v58 = vsel %vm807_vm11, %v7579_v45, %v7583_v16  ;;  %v7596_v43 = vshll.u32 %v14958_v30, 16  ;;  %v6097_v33 = vsel %vm1096_vm12, %v12127_v28, %v6025_v31 }
 0x3b5   : > { %v6208_v46 = vor.u32 %v6207_v60, %v6203_v55  ;;  %7692 = vrot.lane.b32.xlu0 %v7584_v58, %s12194_s13  ;;  %v7832_v63 = vrot.slane %v7726_v27, 1  ;;  %v8315_v49 = vshrl.u32 %v10809_v0, 16  ;;  %9788 = vmatprep.mubr.bf16.mxu0 %v7000_v12  ;;  %v6209_v32 = vshll.u32 %v6097_v33, 16  ;;  %v8383_v36 = vpop.permute.xlu0 %8382  ;;  %v12053_v12 = vld [vmem:[#allocation2 + $0x38] ss:$0 sps:$4 sm:$0x11]  }
 0x3b6   : > { %v8317_v25 = vshll.u32 %v10809_v0, 16  ;;  %v8324_v42 = vrot.slane %v8322_v53, 1  ;;  %v7598_v3 = vrot.slane %v7596_v43, 1  ;;  %v7600_v48 = vshrl.u32 %v14958_v30, 16  ;;  %v12052_v33 = vld [vmem:[#allocation2 + $0xa8] sm:$0xfe]  }
 0x3b7   : > { %8420 = vrot.lane.b32.xlu1 %v8326_v41, %s12194_s13  ;;  %v7833_v16 = vsel %vm2858_vm14, %v7831_v1, %v7832_v63  ;;  %v7589_v8 = vshrl.u32 %v12044_v54, 16  ;;  %v7591_v10 = vshll.u32 %v12044_v54, 16  ;;  %v6211_v29 = vrot.slane %v6209_v32, 1  ;;  %v8385_v40 = vpop.permute.xlu1 %8384  ;;  %v5554_v1 = vld [vmem:[#allocation2 + $0x54] sm:$0xf] }
 0x3b8   : > { %v8319_v39 = vrot.slane %v8317_v25, 1  ;;  %v8451_v50 = vsel %vm1096_vm12, %v10771_v44, %v8383_v36  ;;  %v10810_v11 = vcombine.low %v7967_v20, %v7946_v23  ;;  %9918 = vmatmul.mubr.bf16.gmra.mrb[24].mxu1 %v7833_v16  ;;  %v8453_v4 = vsel %vm1096_vm12, %v12128_v57, %v8385_v40  ;;  %v12130_v23 = vld [vmem:[#allocation2 + $0x30] sm:$0xfe]   ;;  %v7968_v20 = vld [vmem:[#allocation2 + $0xc0] sm:$0xe] }
 0x3b9   : > { %v8544_v56 = vshrl.u32 %v8451_v50, 16  ;;  %v8546_v22 = vshll.u32 %v8451_v50, 16  ;;  %v7602_v59 = vor.u32 %v7600_v48, %v7598_v3  ;;  %v6212_v47 = vsel %vm807_vm11, %v6208_v46, %v6211_v29  ;;  %v6764_v14 = vpop.permute.xlu0 %6763  ;;  %v12129_v46 = vld [vmem:[#allocation2 + $0x58] sm:$0xf]  ;;  %v7918_v50 = vld [vmem:[#allocation2 + $0x48] sm:$0xf] }
 0x3ba   : > { %v8320_v30 = vor.u32 %v8319_v39, %v8315_v49  ;;  %v8550_v35 = vshll.u32 %v8453_v4, 16  ;;  %v7593_v38 = vrot.slane %v7591_v10, 1  ;;  %v8340_v5 = vshrl.u32 %v12048_v6, 16  ;;  %9789 = vmatmul.mubr.bf16.gmra.mrb[24].mxu0 %v6212_v47 }
 0x3bb   : > { %v8548_v2 = vrot.slane %v8546_v22, 1  ;;  %7698 = vrot.lane.b32.xlu1 %v7602_v59, %s12194_s13  ;;  %v8329_v15 = vshrl.u32 %v10810_v11, 16  ;;  %v8331_v21 = vshll.u32 %v10810_v11, 16  ;;  %v6766_v62 = vpop.permute.xlu1 %6765  ;;  %v6843_v17 = vsel %vm1096_vm12, %v12046_v9, %v6764_v14 }
 0x3bc   : > { %v8325_v51 = vsel %vm807_vm11, %v8320_v30, %v8324_v42  ;;  %v8552_v26 = vrot.slane %v8550_v35, 1  ;;  %v7594_v13 = vor.u32 %v7593_v38, %v7589_v8  ;;  %v6846_v55 = vsel %vm1096_vm12, %v12045_v18, %v6766_v62  ;;  %v12054_v42 = vld [vmem:[#allocation2 + $0xc8] ss:$0 sps:$4 sm:$0x11]  }
 0x3bd   : > { %8418 = vrot.lane.b32.xlu0 %v8325_v51, %s12194_s13  ;;  %v8549_v7 = vor.u32 %v8548_v2, %v8544_v56  ;;  %v7001_v34 = vshrl.u32 %v6843_v17, 16  ;;  %v7004_v19 = vshll.u32 %v6843_v17, 16  ;;  %v7008_v41 = vshrl.u32 %v6846_v55, 16  ;;  %v6027_v54 = vpop.permute.xlu0 %6026  ;;  %v12057_v35 = vld [vmem:[#allocation2 + $0xbc] ss:$0 sps:$4 sm:$0x33]  }
 0x3be   : > { %v7599_v45 = vsel %vm807_vm11, %v7594_v13, %v7598_v3  ;;  %v7011_v60 = vshll.u32 %v6846_v55, 16  ;;  %v8333_v37 = vrot.slane %v8331_v21, 1  ;;  %v8336_v44 = vshll.u32 %v12048_v6, 16  ;;  %v7949_v3 = vld [vmem:[#allocation2 + $0xc4] sm:$0xf] }
 0x3bf   : > { %v8553_v0 = vsel %vm807_vm11, %v8549_v7, %v8552_v26  ;;  %v7003_v53 = vrot.slane %v7001_v34, 1  ;;  %v7006_v24 = vrot.slane %v7004_v19, 2  ;;  %8424 = vrot.lane.b32.xlu1 %v8340_v5, %s12194_s13  ;;  %v7010_v58 = vrot.slane %v7008_v41, 1  ;;  %v7661_v43 = vpop.permute.xlu1 %7660  ;;  %v12131_v6 = vld [vmem:[#allocation2 + $0x5c] ss:$0 sps:$4 sm:$0x11]  }
 0x3c0   : > { %v7013_v31 = vrot.slane %v7011_v60, 2  ;;  %v8334_v27 = vor.u32 %v8333_v37, %v8329_v15  ;;  %v10619_v28 = vcombine.low %v5554_v1, %v12129_v46  ;;  %9925 = vmatprep.mubr.bf16.mxu1 %v8553_v0  ;;  %v8338_v49 = vrot.slane %v8336_v44, 1  ;;  %v12132_v26 = vld [vmem:[#allocation2 + $0x4c] sm:$0xf]  ;;  %v12058_v17 = vld [vmem:[#allocation2 + $0xb4] sm:$0xfe]  }
 0x3c1   : > { %7696 = vrot.lane.b32.xlu0 %v7599_v45, %s12194_s13  ;;  %v7007_v63 = vor.u32 %v7006_v24, %v7003_v53  ;;  %v7728_v32 = vsel %vm1096_vm12, %v12130_v23, %v7661_v43  ;;  %v7611_v25 = vshll.u32 %v12051_v52, 16  ;;  %v7615_v8 = vshrl.u32 %v12051_v52, 16  ;;  %v7663_v40 = vpop.permute.xlu0 %7662  ;;  %v12059_v52 = vld [vmem:[#allocation2 + $0x68] ss:$0 sps:$4 sm:$0x33]  }
 0x3c2   : > { %v7014_v16 = vor.u32 %v7013_v31, %v7010_v58  ;;  %v7834_v36 = vrot.slane %v7728_v32, 1  ;;  %v6100_v48 = vsel %vm1096_vm12, %v10619_v28, %v6027_v54  ;;  %v8339_v10 = vsel %vm807_vm11, %v8334_v27, %v8338_v49  ;;  %v12133_v41 = vld [vmem:[#allocation2 + $0x50] ss:$0 sps:$4 sm:$0x11]   ;;  %v12060_v53 = vld [vmem:[#allocation2 + $0x60] sm:$0xfe]  }
 0x3c3   : > { %v6213_v18 = vshrl.u32 %v6100_v48, 16  ;;  %v6215_v29 = vshll.u32 %v6100_v48, 16  ;;  %v7613_v39 = vrot.slane %v7611_v25, 1  ;;  %v7604_v11 = vshrl.u32 %v12052_v33, 16  ;;  %v6029_v4 = vpop.permute.xlu1 %6028  ;;  %v7952_v58 = vld [vmem:[#allocation2 + $0xd0] sm:$0xf] }
 0x3c4   : > { %v7015_v9 = vsel %vm1929_vm13, %v7007_v63, %v7014_v16  ;;  %v7606_v57 = vshll.u32 %v12052_v33, 16  ;;  %v7731_v56 = vsel %vm1096_vm12, %v12053_v12, %v7663_v40  ;;  %v6102_v47 = vsel %vm1096_vm12, %v12131_v6, %v6029_v4  ;;  %v7969_v31 = vld [vmem:[#allocation2 + $0xcc] sm:$0xe] }
 0x3c5   : > { %8422 = vrot.lane.b32.xlu0 %v8339_v10, %s12194_s13  ;;  %v6217_v22 = vrot.slane %v6215_v29, 1  ;;  %v7617_v59 = vor.u32 %v7615_v8, %v7613_v39  ;;  %v7835_v30 = vrot.slane %v7731_v56, 1  ;;  %9796 = vmatprep.mubr.bf16.mxu0 %v7015_v9  ;;  %v6219_v2 = vshll.u32 %v6102_v47, 16  ;;  %v8387_v62 = vpop.permute.xlu0 %8386  ;;  %v5557_v29 = vld [vmem:[#allocation2 + $0x60] sm:$0xf] }
 0x3c6   : > { %v7608_v38 = vrot.slane %v7606_v57, 1  ;;  %v8354_v14 = vshrl.u32 %v12054_v42, 16  ;;  %v10811_v5 = vcombine.low %v7968_v20, %v7949_v3  ;;  %v8350_v51 = vshll.u32 %v12054_v42, 16  ;;  %v12061_v42 = vld [vmem:[#allocation2 + $0xd4] ss:$0 sps:$4 sm:$0x11]  }
 0x3c7   : > { %v6218_v15 = vor.u32 %v6217_v22, %v6213_v18  ;;  %7702 = vrot.lane.b32.xlu1 %v7617_v59, %s12194_s13  ;;  %v7836_v21 = vsel %vm2858_vm14, %v7834_v36, %v7835_v30  ;;  %v10773_v13 = vcombine.low %v7918_v50, %v12132_v26  ;;  %v6221_v55 = vrot.slane %v6219_v2, 1  ;;  %v8389_v1 = vpop.permute.xlu1 %8388  ;;  %v12065_v47 = vld [vmem:[#allocation2 + $0xc0] sm:$0xfe]  }
 0x3c8   : > { %v7609_v7 = vor.u32 %v7608_v38, %v7604_v11  ;;  %v8343_v34 = vshrl.u32 %v10811_v5, 16  ;;  %v8345_v19 = vshll.u32 %v10811_v5, 16  ;;  %9926 = vmatmul.mubr.bf16.gmra.mrb[28].mxu1 %v7836_v21  ;;  %v8352_v45 = vrot.slane %v8350_v51, 1 }
 0x3c9   : > { %v8458_v60 = vsel %vm1096_vm12, %v12133_v41, %v8389_v1  ;;  %v8456_v37 = vsel %vm1096_vm12, %v10773_v13, %v8387_v62  ;;  %v7626_v0 = vshll.u32 %v12057_v35, 16  ;;  %v6222_v44 = vsel %vm807_vm11, %v6218_v15, %v6221_v55  ;;  %v6768_v33 = vpop.permute.xlu0 %6767  ;;  %v12134_v62 = vld [vmem:[#allocation2 + $0x3c] sm:$0xfe]  }
 0x3ca   : > { %v7614_v24 = vsel %vm807_vm11, %v7609_v7, %v7613_v39  ;;  %v8347_v54 = vrot.slane %v8345_v19, 1  ;;  %v8560_v12 = vshll.u32 %v8458_v60, 16  ;;  %v8554_v27 = vshrl.u32 %v8456_v37, 16  ;;  %9797 = vmatmul.mubr.bf16.gmra.mrb[28].mxu0 %v6222_v44  ;;  %v12064_v39 = vld [vmem:[#allocation2 + $0xc8] ss:$0 sps:$4 sm:$0x33]  }
 0x3cb   : > { %7700 = vrot.lane.b32.xlu0 %v7614_v24, %s12194_s13  ;;  %8428 = vrot.lane.b32.xlu1 %v8354_v14, %s12194_s13  ;;  %v8556_v43 = vshll.u32 %v8456_v37, 16  ;;  %v7628_v46 = vrot.slane %v7626_v0, 1  ;;  %v7630_v28 = vshrl.u32 %v12057_v35, 16  ;;  %v7619_v23 = vshrl.u32 %v12058_v17, 16  ;;  %v6770_v25 = vpop.permute.xlu1 %6769 }
 0x3cc   : > { %v8348_v63 = vor.u32 %v8347_v54, %v8343_v34  ;;  %v8562_v49 = vrot.slane %v8560_v12, 1  ;;  %v7621_v32 = vshll.u32 %v12058_v17, 16  ;;  %v6852_v16 = vsel %vm1096_vm12, %v12059_v52, %v6770_v25  ;;  %v12066_v14 = vld [vmem:[#allocation2 + $0x44] ss:$0 sps:$4 sm:$0x11]  }
 0x3cd   : > { %v8558_v3 = vrot.slane %v8556_v43, 1  ;;  %v7632_v20 = vor.u32 %v7630_v28, %v7628_v46  ;;  %v6849_v36 = vsel %vm1096_vm12, %v12060_v53, %v6768_v33  ;;  %v7023_v10 = vshrl.u32 %v6852_v16, 16  ;;  %v6031_v57 = vpop.permute.xlu0 %6030  ;;  %v12135_v52 = vld [vmem:[#allocation2 + $0x64] sm:$0xf]  ;;  %v7921_v34 = vld [vmem:[#allocation2 + $0x54] sm:$0xf] }
 0x3ce   : > { %v8353_v48 = vsel %vm807_vm11, %v8348_v63, %v8352_v45  ;;  %v7623_v8 = vrot.slane %v7621_v32, 1  ;;  %v7026_v18 = vshll.u32 %v6852_v16, 16  ;;  %v7016_v50 = vshrl.u32 %v6849_v36, 16  ;;  %v12137_v28 = vld [vmem:[#allocation2 + $0x58] sm:$0xf] }
 0x3cf   : > { %8426 = vrot.lane.b32.xlu0 %v8353_v48, %s12194_s13  ;;  %v8559_v40 = vor.u32 %v8558_v3, %v8554_v27  ;;  %7706 = vrot.lane.b32.xlu1 %v7632_v20, %s12194_s13  ;;  %v7019_v9 = vshll.u32 %v6849_v36, 16  ;;  %v10812_v11 = vcombine.low %v7969_v31, %v7952_v58  ;;  %v7025_v56 = vrot.slane %v7023_v10, 1  ;;  %v7665_v6 = vpop.permute.xlu1 %7664  ;;  %v12136_v27 = vld [vmem:[#allocation2 + $0x68] ss:$0 sps:$4 sm:$0x11]  }
 0x3d0   : > { %v7624_v4 = vor.u32 %v7623_v8, %v7619_v23  ;;  %v7028_v22 = vrot.slane %v7026_v18, 2  ;;  %v8364_v59 = vshll.u32 %v12061_v42, 16  ;;  %v7018_v35 = vrot.slane %v7016_v50, 1  ;;  %v12070_v23 = vld [vmem:[#allocation2 + $0x6c] sm:$0xfe]  }
 0x3d1   : > { %v8563_v30 = vsel %vm807_vm11, %v8559_v40, %v8562_v49  ;;  %v7021_v38 = vrot.slane %v7019_v9, 2  ;;  %v8357_v2 = vshrl.u32 %v10812_v11, 16  ;;  %v8359_v21 = vshll.u32 %v10812_v11, 16  ;;  %v7667_v55 = vpop.permute.xlu0 %7666  ;;  %v12069_v49 = vld [vmem:[#allocation2 + $0x74] ss:$0 sps:$4 sm:$0x33]  }
 0x3d2   : > { %v7629_v5 = vsel %vm807_vm11, %v7624_v4, %v7628_v46  ;;  %v7029_v15 = vor.u32 %v7028_v22, %v7025_v56  ;;  %v8366_v51 = vrot.slane %v8364_v59, 1  ;;  %9933 = vmatprep.mubr.bf16.mxu1 %v8563_v30  ;;  %v8368_v13 = vshrl.u32 %v12061_v42, 16  ;;  %v12138_v48 = vld [vmem:[#allocation2 + $0x5c] ss:$0 sps:$4 sm:$0x11]  }
 0x3d3   : > { %7704 = vrot.lane.b32.xlu0 %v7629_v5, %s12194_s13  ;;  %v7022_v26 = vor.u32 %v7021_v38, %v7018_v35  ;;  %v7733_v17 = vsel %vm1096_vm12, %v12134_v62, %v7665_v6  ;;  %v10621_v7 = vcombine.low %v5557_v29, %v12135_v52  ;;  %v8361_v19 = vrot.slane %v8359_v21, 1  ;;  %v5560_v18 = vld [vmem:[#allocation2 + $0x6c] sm:$0xf]  ;;  %v12072_v62 = vld [vmem:[#allocation2 + $0x50] ss:$0 sps:$4 sm:$0x11]  }
 0x3d4   : > { %v7837_v1 = vrot.slane %v7733_v17, 1  ;;  %v7641_v45 = vshll.u32 %v12064_v39, 16  ;;  %v7645_v41 = vshrl.u32 %v12064_v39, 16  ;;  %v6033_v60 = vpop.permute.xlu1 %6032  ;;  %8432 = vrot.lane.b32.xlu1 %v8368_v13, %s12194_s13  ;;  %v7634_v53 = vshrl.u32 %v12065_v47, 16 }
 0x3d5   : > { %v7030_v37 = vsel %vm1929_vm13, %v7022_v26, %v7029_v15  ;;  %v6105_v0 = vsel %vm1096_vm12, %v10621_v7, %v6031_v57  ;;  %v7636_v24 = vshll.u32 %v12065_v47, 16  ;;  %v8362_v44 = vor.u32 %v8361_v19, %v8357_v2  ;;  %v8391_v63 = vpop.permute.xlu0 %8390  ;;  %v12139_v47 = vld [vmem:[#allocation2 + $0x70] sm:$0xf] }
 0x3d6   : > { %v6223_v54 = vshrl.u32 %v6105_v0, 16  ;;  %v6225_v12 = vshll.u32 %v6105_v0, 16  ;;  %v7643_v58 = vrot.slane %v7641_v45, 1  ;;  %9804 = vmatprep.mubr.bf16.mxu0 %v7030_v37  ;;  %v6107_v43 = vsel %vm1096_vm12, %v12136_v27, %v6033_v60  ;;  %v15029_v45 = vld [vmem:[#allocation2 + $0x78] sm:$0xf] }
 0x3d7   : > { %v7638_v31 = vrot.slane %v7636_v24, 1  ;;  %v7736_v46 = vsel %vm1096_vm12, %v12066_v14, %v7667_v55  ;;  %v10775_v33 = vcombine.low %v7921_v34, %v12137_v28  ;;  %v8367_v32 = vsel %vm807_vm11, %v8362_v44, %v8366_v51  ;;  %v12140_v60 = vld [vmem:[#allocation2 + $0x48] sm:$0xfe]   ;;  %v15034_v44 = vld [vmem:[#allocation2 + $0x84] sm:$0xf] }
 0x3d8   : > { %v6227_v25 = vrot.slane %v6225_v12, 1  ;;  %v7647_v42 = vor.u32 %v7645_v41, %v7643_v58  ;;  %v6229_v3 = vshll.u32 %v6107_v43, 16  ;;  %v8393_v20 = vpop.permute.xlu1 %8392  ;;  %8430 = vrot.lane.b32.xlu0 %v8367_v32, %s12194_s13  ;;  %v7838_v36 = vrot.slane %v7736_v46, 1  ;;  %v15032_v24 = vld [vmem:[#allocation2 + $0x6c] sm:$0xf] }
 0x3d9   : > { %v7639_v16 = vor.u32 %v7638_v31, %v7634_v53  ;;  %v8463_v8 = vsel %vm1096_vm12, %v12138_v48, %v8393_v20  ;;  %v8461_v10 = vsel %vm1096_vm12, %v10775_v33, %v8391_v63  ;;  %v10623_v30 = vcombine.low %v5560_v18, %v12139_v47  ;;  %v12141_v27 = vld [vmem:[#allocation2 + $0x64] sm:$0xf]  ;;  %v15038_v46 = vld [vmem:[#allocation2 + $0x78] sm:$0xf]  ;;  %v15047_v48 = vld [vmem:[#allocation2 + $0x88] sm:$0xf] }
 0x3da   : > { %v6228_v29 = vor.u32 %v6227_v25, %v6223_v54  ;;  %7710 = vrot.lane.b32.xlu1 %v7647_v42, %s12194_s13  ;;  %v6231_v39 = vrot.slane %v6229_v3, 1  ;;  %v8570_v40 = vshll.u32 %v8463_v8, 16  ;;  %v7839_v9 = vsel %vm2858_vm14, %v7837_v1, %v7838_v36  ;;  %v7924_v1 = vld [vmem:[#allocation2 + $0x60] sm:$0xf]  ;;  %v12143_v25 = vld [vmem:[#allocation2 + $0x7c] sm:$0xf] }
 0x3db   : > { %v7644_v50 = vsel %vm807_vm11, %v7639_v16, %v7643_v58  ;;  %v8564_v11 = vshrl.u32 %v8461_v10, 16  ;;  %v8566_v57 = vshll.u32 %v8461_v10, 16  ;;  %9934 = vmatmul.mubr.bf16.gmra.mrb[32].mxu1 %v7839_v9  ;;  %v10777_v43 = vcombine.low %v7924_v1, %v12141_v27  ;;  %v12142_v33 = vld [vmem:[#allocation2 + $0x74] ss:$0 sps:$4 sm:$0x11]  }
 0x3dc   : > { %v6772_v4 = vpop.permute.xlu0 %6771  ;;  %v6232_v56 = vsel %vm807_vm11, %v6228_v29, %v6231_v39  ;;  %v8572_v22 = vrot.slane %v8570_v40, 1  ;;  %v6774_v59 = vpop.permute.xlu1 %6773  ;;  %7708 = vrot.lane.b32.xlu0 %v7644_v50, %s12194_s13  ;;  %v10625_v42 = vcombine.low %v15029_v45, %v12143_v25  ;;  %v15043_v16 = vld [vmem:[#allocation2 + $0x70] sm:$0xf]  ;;  %v10627_v8 = vcombine.low %v15034_v44, %v15047_v48  ;;  %v15051_v10 = vld [vmem:[#allocation2 + $0x7c] sm:$0xf] }
 0x3dd   : > { %v6855_v6 = vsel %vm1096_vm12, %v12070_v23, %v6772_v4  ;;  %v8568_v35 = vrot.slane %v8566_v57, 1  ;;  %v6858_v38 = vsel %vm1096_vm12, %v12069_v49, %v6774_v59  ;;  %9805 = vmatmul.mubr.bf16.gmra.mrb[32].mxu0 %v6232_v56  ;;  %v10779_v36 = vcombine.low %v15032_v24, %v15043_v16  ;;  %v8706_v29 = vld [vmem:[#allocation2 + $0x18] sm:$0xe]  ;;  %v8707_v39 = vld [vmem:[#allocation2 + $0x1c] sm:$0xf] }
 0x3de   : > { %v7031_v2 = vshrl.u32 %v6855_v6, 16  ;;  %v7034_v14 = vshll.u32 %v6855_v6, 16  ;;  %v7038_v5 = vshrl.u32 %v6858_v38, 16  ;;  %v7041_v15 = vshll.u32 %v6858_v38, 16  ;;  %v12075_v57 = vld [vmem:[#allocation2 + $0x78] sm:$0xfe]  }
 0x3df   : > { %v8569_v21 = vor.u32 %v8568_v35, %v8564_v11  ;;  %v10781_v18 = vcombine.low %v15038_v46, %v15051_v10  ;;  %v8708_v4 = vld [vmem:[#allocation2 + $0x20] sm:$0x3]  ;;  %v8758_v56 = vshrl.u32 %v8706_v29, 16  ;;  %v8761_v35 = vshll.u32 %v8706_v29, 16 }
 0x3e0   : > { %v7033_v51 = vrot.slane %v7031_v2, 1  ;;  %v7036_v26 = vrot.slane %v7034_v14, 2  ;;  %v6035_v13 = vpop.permute.xlu0 %6034  ;;  %v7040_v17 = vrot.slane %v7038_v5, 1  ;;  %v7043_v52 = vrot.slane %v7041_v15, 2  ;;  %v7669_v7 = vpop.permute.xlu1 %7668 }
 0x3e1   : > { %v6110_v55 = vsel %vm1096_vm12, %v10623_v30, %v6035_v13  ;;  %v8573_v34 = vsel %vm807_vm11, %v8569_v21, %v8572_v22  ;;  %v7738_v37 = vsel %vm1096_vm12, %v12140_v60, %v7669_v7  ;;  %v12147_v22 = vld [vmem:[#allocation2 + $0x68] ss:$0 sps:$4 sm:$0x11]   ;;  %v12074_v30 = vld [vmem:[#allocation2 + $0x80] ss:$0 sps:$4 sm:$0x33]  }
 0x3e2   : > { %v7037_v19 = vor.u32 %v7036_v26, %v7033_v51  ;;  %v7044_v41 = vor.u32 %v7043_v52, %v7040_v17  ;;  %v6235_v0 = vshll.u32 %v6110_v55, 16  ;;  %9941 = vmatprep.mubr.bf16.mxu1 %v8573_v34  ;;  %v7840_v28 = vrot.slane %v7738_v37, 1  ;;  %v12078_v37 = vld [vmem:[#allocation2 + $0x5c] ss:$0 sps:$4 sm:$0x11]  }
 0x3e3   : > { %v6233_v23 = vshrl.u32 %v6110_v55, 16  ;;  %v8760_v14 = vrot.slane %v8758_v56, 5  ;;  %v8767_v5 = vshrl.u32 %v8707_v39, 16  ;;  %v8763_v51 = vrot.slane %v8761_v35, 6 }
 0x3e4   : > { %v7671_v53 = vpop.permute.xlu0 %7670  ;;  %v7045_v54 = vsel %vm1929_vm13, %v7037_v19, %v7044_v41  ;;  %v6237_v12 = vrot.slane %v6235_v0, 1  ;;  %v8770_v26 = vshll.u32 %v8707_v39, 16  ;;  %v8777_v13 = vshrl.u32 %v8708_v4, 16 }
 0x3e5   : > { %v6037_v58 = vpop.permute.xlu1 %6036  ;;  %v7741_v31 = vsel %vm1096_vm12, %v12072_v62, %v7671_v53  ;;  %9812 = vmatprep.mubr.bf16.mxu0 %v7045_v54  ;;  %v8769_v7 = vrot.slane %v8767_v5, 5  ;;  %v8780_v55 = vshll.u32 %v8708_v4, 16  ;;  %v8764_v0 = vor.u32 %v8763_v51, %v8760_v14  ;;  %v12149_v14 = vld [vmem:[#allocation2 + $0x80] ss:$0 sps:$4 sm:$0x11]  }
 0x3e6   : > { %v6112_v63 = vsel %vm1096_vm12, %v12142_v33, %v6037_v58  ;;  %v7841_v49 = vrot.slane %v7741_v31, 1  ;;  %v6238_v40 = vor.u32 %v6237_v12, %v6233_v23  ;;  %v8772_v53 = vrot.slane %v8770_v26, 6  ;;  %v15068_v26 = vld [vmem:[#allocation2 + $0x84] sm:$0xf] }
 0x3e7   : > { %v6239_v32 = vshll.u32 %v6112_v63, 16  ;;  %v8779_v27 = vrot.slane %v8777_v13, 5  ;;  %v8765_v23 = vrot.slane %v8764_v0, 4 }
 0x3e8   : > { %v7842_v3 = vsel %vm2858_vm14, %v7840_v28, %v7841_v49  ;;  %v8395_v20 = vpop.permute.xlu0 %8394 }
 0x3e9   : > { %v6241_v50 = vrot.slane %v6239_v32, 1  ;;  %v8397_v9 = vpop.permute.xlu1 %8396  ;;  %v8466_v11 = vsel %vm1096_vm12, %v10777_v43, %v8395_v20  ;;  %9942 = vmatmul.mubr.bf16.gmra.mrb[36].mxu1 %v7842_v3  ;;  %v8709_v43 = vld [vmem:[#allocation2 + $0x24] sm:$0xe]  ;;  %v8710_v32 = vld [vmem:[#allocation2 + $0x28] sm:$0xf] }
 0x3ea   : > { %v8468_v59 = vsel %vm1096_vm12, %v12147_v22, %v8397_v9  ;;  %v8574_v6 = vshrl.u32 %v8466_v11, 16  ;;  %v8576_v47 = vshll.u32 %v8466_v11, 16  ;;  %v12148_v3 = vld [vmem:[#allocation2 + $0x54] sm:$0xfe]   ;;  %v8773_v9 = vor.u32 %v8772_v53, %v8769_v7 }
 0x3eb   : > { %v6242_v38 = vsel %vm807_vm11, %v6238_v40, %v6241_v50  ;;  %v8580_v2 = vshll.u32 %v8468_v59, 16  ;;  %v8782_v11 = vrot.slane %v8780_v55, 6  ;;  %v8786_v56 = vshrl.u32 %v8709_v43, 16 }
 0x3ec   : > { %v8578_v15 = vrot.slane %v8576_v47, 1  ;;  %v6776_v21 = vpop.permute.xlu0 %6775  ;;  %9813 = vmatmul.mubr.bf16.gmra.mrb[36].mxu0 %v6242_v38  ;;  %v8789_v22 = vshll.u32 %v8709_v43, 16  ;;  %v8795_v59 = vshrl.u32 %v8710_v32, 16  ;;  %v8775_v35 = vrot.slane %v8773_v9, 4  ;;  %v8711_v38 = vld [vmem:[#allocation2 + $0x2c] sm:$0x3] }
 0x3ed   : > { %v8582_v62 = vrot.slane %v8580_v2, 1  ;;  %v6778_v17 = vpop.permute.xlu1 %6777  ;;  %v6861_v52 = vsel %vm1096_vm12, %v12075_v57, %v6776_v21  ;;  %v8783_v21 = vor.u32 %v8782_v11, %v8779_v27  ;;  %v8788_v13 = vrot.slane %v8786_v56, 5 }
 0x3ee   : > { %v8579_v34 = vor.u32 %v8578_v15, %v8574_v6  ;;  %v6864_v19 = vsel %vm1096_vm12, %v12074_v30, %v6778_v17  ;;  %v7046_v1 = vshrl.u32 %v6861_v52, 16  ;;  %v7049_v45 = vshll.u32 %v6861_v52, 16 }
 0x3ef   : > { %v7053_v41 = vshrl.u32 %v6864_v19, 16  ;;  %v7056_v60 = vshll.u32 %v6864_v19, 16  ;;  %v8774_v30 = vsel %vm13470_vm1, %v8765_v23, %v8773_v9  ;;  %v8797_v17 = vrot.slane %v8795_v59, 5 }
 0x3f0   : > { %v8583_v54 = vsel %vm807_vm11, %v8579_v34, %v8582_v62  ;;  %v7048_v12 = vrot.slane %v7046_v1, 1  ;;  %v7051_v58 = vrot.slane %v7049_v45, 2  ;;  %v6039_v31 = vpop.permute.xlu0 %6038  ;;  %v8791_v62 = vrot.slane %v8789_v22, 6  ;;  %v12083_v22 = vld [vmem:[#allocation2 + $0x68] ss:$0 sps:$4 sm:$0x11]  }
 0x3f1   : > { %v7055_v28 = vrot.slane %v7053_v41, 1  ;;  %v7058_v33 = vrot.slane %v7056_v60, 2  ;;  %v7673_v63 = vpop.permute.xlu1 %7672  ;;  %v6115_v49 = vsel %vm1096_vm12, %v10625_v42, %v6039_v31  ;;  %9949 = vmatprep.mubr.bf16.mxu1 %v8583_v54  ;;  %v8784_v55 = vsel %vm13470_vm1, %v8775_v35, %v8783_v21  ;;  %v12080_v60 = vld [vmem:[#allocation2 + $0x8c] ss:$0 sps:$4 sm:$0x33]  }
 0x3f2   : > { %v7052_v25 = vor.u32 %v7051_v58, %v7048_v12  ;;  %v7743_v20 = vsel %vm1096_vm12, %v12148_v3, %v7673_v63  ;;  %v6243_v29 = vshrl.u32 %v6115_v49, 16  ;;  %v6245_v39 = vshll.u32 %v6115_v49, 16  ;;  %v12150_v54 = vld [vmem:[#allocation2 + $0x74] ss:$0 sps:$4 sm:$0x11]  }
 0x3f3   : > { %v7059_v40 = vor.u32 %v7058_v33, %v7055_v28  ;;  %v7843_v50 = vrot.slane %v7743_v20, 1  ;;  %v8798_v34 = vshll.u32 %v8710_v32, 16  ;;  %v8805_v19 = vshrl.u32 %v8711_v38, 16  ;;  %v15078_v31 = vld [vmem:[#allocation2 + $0x88] sm:$0xf] }
 0x3f4   : > { %v6247_v57 = vrot.slane %v6245_v39, 1  ;;  %v7675_v4 = vpop.permute.xlu0 %7674  ;;  %v10813_v0 = vcombine.low %v8774_v30, %v8784_v55  ;;  %v8792_v53 = vor.u32 %v8791_v62, %v8788_v13  ;;  %v10783_v27 = vcombine.low %v15068_v26, %v15078_v31  ;;  %v8712_v28 = vld [vmem:[#allocation2 + $0x30] sm:$0xe] }
 0x3f5   : > { %v7060_v42 = vsel %vm1929_vm13, %v7052_v25, %v7059_v40  ;;  %v6041_v6 = vpop.permute.xlu1 %6040  ;;  %v7746_v47 = vsel %vm1096_vm12, %v12078_v37, %v7675_v4  ;;  %v12081_v37 = vld [vmem:[#allocation2 + $0x84] sm:$0xfe]   ;;  %v8800_v43 = vrot.slane %v8798_v34, 6  ;;  %v8807_v32 = vrot.slane %v8805_v19, 5 }
 0x3f6   : > { %v6248_v2 = vor.u32 %v6247_v57, %v6243_v29  ;;  %v6117_v5 = vsel %vm1096_vm12, %v12149_v14, %v6041_v6  ;;  %v7844_v15 = vrot.slane %v7746_v47, 1  ;;  %9820 = vmatprep.mubr.bf16.mxu0 %v7060_v42  ;;  %9269 = vst.msk [vmem:[#allocation3 + $0x20] sm:$0xff] %vm1096_vm12, %v10813_v0  ;;  %v8793_v33 = vrot.slane %v8792_v53, 4 }
 0x3f7   : > { %v6249_v51 = vshll.u32 %v6117_v5, 16  ;;  %v8801_v23 = vor.u32 %v8800_v43, %v8797_v17  ;;  %v8808_v25 = vshll.u32 %v8711_v38, 16  ;;  %v8814_v39 = vshrl.u32 %v8712_v28, 16  ;;  %v12152_v17 = vld [vmem:[#allocation2 + $0x60] sm:$0xfe]  }
 0x3f8   : > { %v7845_v52 = vsel %vm2858_vm14, %v7843_v50, %v7844_v15  ;;  %v8399_v7 = vpop.permute.xlu0 %8398  ;;  %v8817_v40 = vshll.u32 %v8712_v28, 16  ;;  %v12153_v28 = vld [vmem:[#allocation2 + $0x8c] ss:$0 sps:$4 sm:$0x11]  }
 0x3f9   : > { %v6251_v1 = vrot.slane %v6249_v51, 1  ;;  %v8401_v45 = vpop.permute.xlu1 %8400  ;;  %v8471_v41 = vsel %vm1096_vm12, %v10779_v36, %v8399_v7  ;;  %9950 = vmatmul.mubr.bf16.gmra.mrb[40].mxu1 %v7845_v52  ;;  %v8802_v59 = vsel %vm13470_vm1, %v8793_v33, %v8801_v23  ;;  %v8803_v42 = vrot.slane %v8801_v23, 4  ;;  %v8714_v51 = vld [vmem:[#allocation2 + $0x38] sm:$0x3] }
 0x3fa   : > { %v8473_v12 = vsel %vm1096_vm12, %v12150_v54, %v8401_v45  ;;  %v8586_v58 = vshll.u32 %v8471_v41, 16  ;;  %v8584_v36 = vshrl.u32 %v8471_v41, 16  ;;  %v8810_v38 = vrot.slane %v8808_v25, 6 }
 0x3fb   : > { %v6252_v24 = vsel %vm807_vm11, %v6248_v2, %v6251_v1  ;;  %v8590_v16 = vshll.u32 %v8473_v12, 16  ;;  %v8713_v2 = vld [vmem:[#allocation2 + $0x34] sm:$0xf]  ;;  %v8816_v13 = vrot.slane %v8814_v39, 5  ;;  %v8819_v45 = vrot.slane %v8817_v40, 6 }
 0x3fc   : > { %v8588_v63 = vrot.slane %v8586_v58, 1  ;;  %v6780_v49 = vpop.permute.xlu0 %6779  ;;  %9821 = vmatmul.mubr.bf16.gmra.mrb[40].mxu0 %v6252_v24  ;;  %v8811_v1 = vor.u32 %v8810_v38, %v8807_v32  ;;  %v8826_v0 = vshll.u32 %v8713_v2, 16  ;;  %v8833_v44 = vshrl.u32 %v8714_v51, 16  ;;  %v8715_v58 = vld [vmem:[#allocation2 + $0x3c] sm:$0xe] }
 0x3fd   : > { %v8592_v3 = vrot.slane %v8590_v16, 1  ;;  %v6782_v20 = vpop.permute.xlu1 %6781  ;;  %v6867_v29 = vsel %vm1096_vm12, %v12081_v37, %v6780_v49  ;;  %v8823_v37 = vshrl.u32 %v8713_v2, 16  ;;  %v8820_v12 = vor.u32 %v8819_v45, %v8816_v13 }
 0x3fe   : > { %v8589_v50 = vor.u32 %v8588_v63, %v8584_v36  ;;  %v6870_v9 = vsel %vm1096_vm12, %v12080_v60, %v6782_v20  ;;  %v7061_v11 = vshrl.u32 %v6867_v29, 16  ;;  %v7064_v57 = vshll.u32 %v6867_v29, 16 }
 0x3ff   : > { %v7068_v4 = vshrl.u32 %v6870_v9, 16  ;;  %v7071_v56 = vshll.u32 %v6870_v9, 16  ;;  %v8812_v54 = vsel %vm13470_vm1, %v8803_v42, %v8811_v1  ;;  %v8821_v63 = vrot.slane %v8820_v12, 4  ;;  %v12086_v9 = vld [vmem:[#allocation2 + $0x74] ss:$0 sps:$4 sm:$0x11]  }
 0x400   : > { %v8593_v6 = vsel %vm807_vm11, %v8589_v50, %v8592_v3  ;;  %v7063_v47 = vrot.slane %v7061_v11, 1  ;;  %v7066_v30 = vrot.slane %v7064_v57, 2  ;;  %v6043_v35 = vpop.permute.xlu0 %6042  ;;  %v10814_v36 = vcombine.low %v8802_v59, %v8812_v54  ;;  %v9289_v42 = vld [vmem:[#allocation3 + $0x20] sm:$0xff]  ;;  %v8718_v54 = vld [vmem:[#allocation2 + $0x48] sm:$0xe] }
 0x401   : > { %v7070_v14 = vrot.slane %v7068_v4, 1  ;;  %v7073_v5 = vrot.slane %v7071_v56, 2  ;;  %v7677_v15 = vpop.permute.xlu1 %7676  ;;  %v6120_v21 = vsel %vm1096_vm12, %v10627_v8, %v6043_v35  ;;  %9957 = vmatprep.mubr.bf16.mxu1 %v8593_v6  ;;  %v8825_v49 = vrot.slane %v8823_v37, 5  ;;  %v12154_v4 = vld [vmem:[#allocation2 + $0x80] ss:$0 sps:$4 sm:$0x11]  }
 0x402   : > { %v7067_v62 = vor.u32 %v7066_v30, %v7063_v47  ;;  %v7748_v52 = vsel %vm1096_vm12, %v12152_v17, %v7677_v15  ;;  %v6253_v7 = vshrl.u32 %v6120_v21, 16  ;;  %v6255_v55 = vshll.u32 %v6120_v21, 16  ;;  %9270 = vst.msk [vmem:[#allocation3 + $0x48] sm:$0xff] %vm1096_vm12, %v10814_v36  ;;  %v8716_v47 = vld [vmem:[#allocation2 + $0x40] sm:$0xf] }
 0x403   : > { %v7074_v34 = vor.u32 %v7073_v5, %v7070_v14  ;;  %v7846_v19 = vrot.slane %v7748_v52, 1  ;;  %v8828_v23 = vrot.slane %v8826_v0, 6  ;;  %v8835_v3 = vrot.slane %v8833_v44, 5 }
 0x404   : > { %v6257_v41 = vrot.slane %v6255_v55, 1  ;;  %v7679_v60 = vpop.permute.xlu0 %7678  ;;  %v8836_v20 = vshll.u32 %v8714_v51, 16  ;;  %v8842_v29 = vshrl.u32 %v8715_v58, 16  ;;  %v8845_v57 = vshll.u32 %v8715_v58, 16  ;;  %v12155_v51 = vld [vmem:[#allocation2 + $0x6c] sm:$0xfe]  }
 0x405   : > { %v7075_v48 = vsel %vm1929_vm13, %v7067_v62, %v7074_v34  ;;  %v6045_v8 = vpop.permute.xlu1 %6044  ;;  %v7751_v53 = vsel %vm1096_vm12, %v12083_v22, %v7679_v60  ;;  %v8829_v11 = vor.u32 %v8828_v23, %v8825_v49  ;;  %v8717_v62 = vld [vmem:[#allocation2 + $0x44] sm:$0x3]  ;;  %v8851_v17 = vshrl.u32 %v8716_v47, 16 }
 0x406   : > { %v6258_v43 = vor.u32 %v6257_v41, %v6253_v7  ;;  %v6122_v24 = vsel %vm1096_vm12, %v12153_v28, %v6045_v8  ;;  %v7847_v16 = vrot.slane %v7751_v53, 1  ;;  %9828 = vmatprep.mubr.bf16.mxu0 %v7075_v48  ;;  %v8838_v6 = vrot.slane %v8836_v20, 6  ;;  %v12156_v28 = vld [vmem:[#allocation2 + $0x94] sm:$0xf] }
 0x407   : > { %v6259_v33 = vshll.u32 %v6122_v24, 16  ;;  %v8830_v46 = vsel %vm13470_vm1, %v8821_v63, %v8829_v11  ;;  %v8831_v10 = vrot.slane %v8829_v11, 4  ;;  %v8844_v14 = vrot.slane %v8842_v29, 5 }
 0x408   : > { %v7848_v32 = vsel %vm2858_vm14, %v7846_v19, %v7847_v16  ;;  %v8403_v25 = vpop.permute.xlu0 %8402  ;;  %v8839_v2 = vor.u32 %v8838_v6, %v8835_v3  ;;  %v8847_v5 = vrot.slane %v8845_v57, 6  ;;  %v8854_v52 = vshll.u32 %v8716_v47, 16  ;;  %v15112_v19 = vld [vmem:[#allocation2 + $0x90] sm:$0xf] }
 0x409   : > { %v6261_v39 = vrot.slane %v6259_v33, 1  ;;  %v8405_v40 = vpop.permute.xlu1 %8404  ;;  %v8476_v50 = vsel %vm1096_vm12, %v10781_v18, %v8403_v25  ;;  %9958 = vmatmul.mubr.bf16.gmra.mrb[44].mxu1 %v7848_v32  ;;  %v8853_v37 = vrot.slane %v8851_v17, 5  ;;  %v8861_v8 = vshrl.u32 %v8717_v62, 16  ;;  %v9294_v16 = vld [vmem:[#allocation3 + $0x48] sm:$0xff] }
 0x40a   : > { %v8478_v56 = vsel %vm1096_vm12, %v12154_v4, %v8405_v40  ;;  %v8594_v22 = vshrl.u32 %v8476_v50, 16  ;;  %v8596_v59 = vshll.u32 %v8476_v50, 16  ;;  %v8840_v1 = vsel %vm13470_vm1, %v8831_v10, %v8839_v2  ;;  %v12157_v33 = vld [vmem:[#allocation2 + $0x8c] ss:$0 sps:$4 sm:$0x11]  }
 0x40b   : > { %v6262_v30 = vsel %vm807_vm11, %v6258_v43, %v6261_v39  ;;  %v8600_v35 = vshll.u32 %v8478_v56, 16  ;;  %v10815_v41 = vcombine.low %v8830_v46, %v8840_v1  ;;  %v8848_v60 = vor.u32 %v8847_v5, %v8844_v14  ;;  %v12088_v32 = vld [vmem:[#allocation2 + $0x80] ss:$0 sps:$4 sm:$0x11]   ;;  %v8719_v50 = vld [vmem:[#allocation2 + $0x4c] sm:$0xf] }
 0x40c   : > { %v8598_v18 = vrot.slane %v8596_v59, 1  ;;  %v7681_v38 = vpop.permute.xlu0 %7680  ;;  %9829 = vmatmul.mubr.bf16.gmra.mrb[44].mxu0 %v6262_v30  ;;  %v8856_v48 = vrot.slane %v8854_v52, 6  ;;  %v8864_v53 = vshll.u32 %v8717_v62, 16  ;;  %v10785_v24 = vcombine.low %v15112_v19, %v12156_v28  ;;  %v12158_v4 = vld [vmem:[#allocation2 + $0x78] sm:$0xfe]  }
 0x40d   : > { %v8602_v15 = vrot.slane %v8600_v35, 1  ;;  %v7683_v21 = vpop.permute.xlu1 %7682  ;;  %v7753_v13 = vsel %vm1096_vm12, %v12155_v51, %v7681_v38  ;;  %11455 = vmatprep.mubr.msk.bf16.mxu0 %vm1096_vm12, %v9289_v42  ;;  %9271 = vst.msk [vmem:[#allocation3 + $0x70] sm:$0xff] %vm1096_vm12, %v10815_v41  ;;  %v8849_v36 = vrot.slane %v8848_v60, 4  ;;  %v8863_v26 = vrot.slane %v8861_v8, 5  ;;  %v8720_v59 = vld [vmem:[#allocation2 + $0x50] sm:$0x3] }
 0x40e   : > { %v8599_v7 = vor.u32 %v8598_v18, %v8594_v22  ;;  %v7756_v55 = vsel %vm1096_vm12, %v12086_v9, %v7683_v21  ;;  %v7849_v34 = vrot.slane %v7753_v13, 1  ;;  %v8857_v25 = vor.u32 %v8856_v48, %v8853_v37  ;;  %v15130_v10 = vld [vmem:[#allocation2 + $0x9c] sm:$0xf]  ;;  %v8721_v19 = vld [vmem:[#allocation2 + $0x54] sm:$0xe] }
 0x40f   : > { %v7850_v45 = vrot.slane %v7756_v55, 1  ;;  %v8866_v31 = vrot.slane %v8864_v53, 6  ;;  %v8873_v9 = vshll.u32 %v8718_v54, 16  ;;  %v8879_v38 = vshrl.u32 %v8719_v50, 16  ;;  %v15139_v60 = vld [vmem:[#allocation2 + $0xa0] sm:$0xf] }
 0x410   : > { %v8603_v0 = vsel %vm807_vm11, %v8599_v7, %v8602_v15  ;;  %v8407_v44 = vpop.permute.xlu0 %8406  ;;  %v8858_v39 = vsel %vm13470_vm1, %v8849_v36, %v8857_v25  ;;  %v8859_v40 = vrot.slane %v8857_v25, 4  ;;  %v8882_v2 = vshll.u32 %v8719_v50, 16  ;;  %v12090_v15 = vld [vmem:[#allocation2 + $0x8c] ss:$0 sps:$4 sm:$0x11]  }
 0x411   : > { %v7851_v12 = vsel %vm2858_vm14, %v7849_v34, %v7850_v45  ;;  %v8409_v58 = vpop.permute.xlu1 %8408  ;;  %v8481_v43 = vsel %vm1096_vm12, %v10783_v27, %v8407_v44  ;;  %9965 = vmatprep.mubr.bf16.mxu1 %v8603_v0  ;;  %v8870_v27 = vshrl.u32 %v8718_v54, 16  ;;  %v8867_v22 = vor.u32 %v8866_v31, %v8863_v26  ;;  %v12159_v1 = vld [vmem:[#allocation2 + $0x98] ss:$0 sps:$4 sm:$0x11]   ;;  %v8723_v25 = vld [vmem:[#allocation2 + $0x5c] sm:$0x3] }
 0x412   : > { %v8483_v63 = vsel %vm1096_vm12, %v12157_v33, %v8409_v58  ;;  %v8604_v49 = vshrl.u32 %v8481_v43, 16  ;;  %v8606_v23 = vshll.u32 %v8481_v43, 16  ;;  %9966 = vmatmul.mubr.bf16.gmra.mrb[48].mxu1 %v7851_v12  ;;  %v8875_v35 = vrot.slane %v8873_v9, 6  ;;  %v8722_v44 = vld [vmem:[#allocation2 + $0x58] sm:$0xf] }
 0x413   : > { %v8610_v3 = vshll.u32 %v8483_v63, 16  ;;  %v8872_v42 = vrot.slane %v8870_v27, 5  ;;  %v8868_v18 = vsel %vm13470_vm1, %v8859_v40, %v8867_v22  ;;  %v8889_v62 = vshrl.u32 %v8720_v59, 16  ;;  %v12161_v27 = vld [vmem:[#allocation2 + $0x84] sm:$0xfe]  }
 0x414   : > { %v8608_v20 = vrot.slane %v8606_v23, 1  ;;  %v7685_v29 = vpop.permute.xlu0 %7684  ;;  %11456 = vmatmul.mubr.msk.bf16.vlgmr.msra.gmra.mrb[48].mxu0 %vm1096_vm12, %v9294_v16  ;;  %v9299_v21 = vld [vmem:[#allocation3 + $0x70] sm:$0xff]  ;;  %v10816_v51 = vcombine.low %v8858_v39, %v8868_v18  ;;  %v8881_v55 = vrot.slane %v8879_v38, 5  ;;  %v8884_v34 = vrot.slane %v8882_v2, 6 }
 0x415   : > { %v8612_v11 = vrot.slane %v8610_v3, 1  ;;  %v7687_v57 = vpop.permute.xlu1 %7686  ;;  %v7758_v56 = vsel %vm1096_vm12, %v12158_v4, %v7685_v29  ;;  %v8876_v13 = vor.u32 %v8875_v35, %v8872_v42  ;;  %11459 = vmatprep.mubr.msk.bf16.mxu0 %vm1096_vm12, %v9299_v21  ;;  %v10787_v37 = vcombine.low %v15130_v10, %v15139_v60  ;;  %v12162_v35 = vld [vmem:[#allocation2 + $0xa4] ss:$0 sps:$4 sm:$0x11]  }
 0x416   : > { %v8609_v6 = vor.u32 %v8608_v20, %v8604_v49  ;;  %v7761_v47 = vsel %vm1096_vm12, %v12088_v32, %v7687_v57  ;;  %v7852_v30 = vrot.slane %v7758_v56, 1  ;;  %9272 = vst.msk [vmem:[#allocation3 + $0x98] sm:$0xff] %vm1096_vm12, %v10816_v51  ;;  %v8885_v8 = vor.u32 %v8884_v34, %v8881_v55  ;;  %v8724_v57 = vld [vmem:[#allocation2 + $0x60] sm:$0xe] }
 0x417   : > { %v7853_v46 = vrot.slane %v7761_v47, 1  ;;  %v8877_v0 = vrot.slane %v8876_v13, 4  ;;  %v8891_v53 = vrot.slane %v8889_v62, 5  ;;  %v8892_v54 = vshll.u32 %v8720_v59, 16  ;;  %v8725_v47 = vld [vmem:[#allocation2 + $0x64] sm:$0xf] }
 0x418   : > { %v8613_v14 = vsel %vm807_vm11, %v8609_v6, %v8612_v11  ;;  %v8411_v5 = vpop.permute.xlu0 %8410  ;;  %v8898_v43 = vshrl.u32 %v8721_v19, 16  ;;  %v8901_v28 = vshll.u32 %v8721_v19, 16  ;;  %v8887_v36 = vrot.slane %v8885_v8, 4  ;;  %v12091_v10 = vld [vmem:[#allocation2 + $0x98] ss:$0 sps:$4 sm:$0x11]  }
 0x419   : > { %v7854_v17 = vsel %vm2858_vm14, %v7852_v30, %v7853_v46  ;;  %v8413_v52 = vpop.permute.xlu1 %8412  ;;  %v8486_v7 = vsel %vm1096_vm12, %v10785_v24, %v8411_v5  ;;  %9973 = vmatprep.mubr.bf16.mxu1 %v8613_v14  ;;  %v8894_v33 = vrot.slane %v8892_v54, 6  ;;  %v8907_v63 = vshrl.u32 %v8722_v44, 16 }
 0x41a   : > { %v8488_v45 = vsel %vm1096_vm12, %v12159_v1, %v8413_v52  ;;  %v8616_v41 = vshll.u32 %v8486_v7, 16  ;;  %9974 = vmatmul.mubr.bf16.gmra.mrb[52].mxu1 %v7854_v17  ;;  %v8614_v12 = vshrl.u32 %v8486_v7, 16  ;;  %v8900_v3 = vrot.slane %v8898_v43, 5  ;;  %v8726_v1 = vld [vmem:[#allocation2 + $0x68] sm:$0x3] }
 0x41b   : > { %v8620_v48 = vshll.u32 %v8488_v45, 16  ;;  %v8903_v26 = vrot.slane %v8901_v28, 6  ;;  %v8886_v29 = vsel %vm13470_vm1, %v8877_v0, %v8885_v8  ;;  %v8895_v39 = vor.u32 %v8894_v33, %v8891_v53  ;;  %v12163_v28 = vld [vmem:[#allocation2 + $0x90] sm:$0xfe]  }
 0x41c   : > { %v8618_v58 = vrot.slane %v8616_v41, 1  ;;  %v8910_v11 = vshll.u32 %v8722_v44, 16  ;;  %v8909_v59 = vrot.slane %v8907_v63, 5  ;;  %v8917_v42 = vshrl.u32 %v8723_v25, 16 }
 0x41d   : > { %v8622_v24 = vrot.slane %v8620_v48, 1  ;;  %v7691_v16 = vpop.permute.xlu1 %7690  ;;  %v7689_v32 = vpop.permute.xlu0 %7688  ;;  %v8904_v9 = vor.u32 %v8903_v26, %v8900_v3  ;;  %v9304_v56 = vld [vmem:[#allocation3 + $0x98] sm:$0xff]  ;;  %v8896_v22 = vsel %vm13470_vm1, %v8887_v36, %v8895_v39  ;;  %v8920_v6 = vshll.u32 %v8723_v25, 16  ;;  %v7942_v26 = vld [vmem:[#allocation2 + $0xa8] sm:$0xf] }
 0x41e   : > { %v8619_v49 = vor.u32 %v8618_v58, %v8614_v12  ;;  %v7766_v23 = vsel %vm1096_vm12, %v12090_v15, %v7691_v16  ;;  %v7763_v20 = vsel %vm1096_vm12, %v12161_v27, %v7689_v32  ;;  %11460 = vmatmul.mubr.msk.bf16.gmra.mrb[52].mxu0 %vm1096_vm12, %v9304_v56  ;;  %v10817_v18 = vcombine.low %v8886_v29, %v8896_v22  ;;  %v12164_v25 = vld [vmem:[#allocation2 + $0xb0] ss:$0 sps:$4 sm:$0x11]   ;;  %v12092_v27 = vld [vmem:[#allocation2 + $0xa4] ss:$0 sps:$4 sm:$0x11]  }
 0x41f   : > { %v7856_v31 = vrot.slane %v7766_v23, 1  ;;  %v7855_v50 = vrot.slane %v7763_v20, 1  ;;  %v8905_v38 = vrot.slane %v8904_v9, 4  ;;  %v8912_v14 = vrot.slane %v8910_v11, 6  ;;  %v8728_v9 = vld [vmem:[#allocation2 + $0x70] sm:$0xf] }
 0x420   : > { %v8623_v40 = vsel %vm807_vm11, %v8619_v49, %v8622_v24  ;;  %v8919_v5 = vrot.slane %v8917_v42, 5  ;;  %v8922_v15 = vrot.slane %v8920_v6, 6  ;;  %9273 = vst.msk [vmem:[#allocation3 + $0xc0] sm:$0xff] %vm1096_vm12, %v10817_v18  ;;  %v8926_v51 = vshrl.u32 %v8724_v57, 16  ;;  %v8727_v49 = vld [vmem:[#allocation2 + $0x6c] sm:$0xe] }
 0x421   : > { %v8417_v4 = vpop.permute.xlu1 %8416  ;;  %9981 = vmatprep.mubr.bf16.mxu1 %v8623_v40  ;;  %v7857_v30 = vsel %vm2858_vm14, %v7855_v50, %v7856_v31  ;;  %v8929_v13 = vshll.u32 %v8724_v57, 16  ;;  %v8935_v62 = vshrl.u32 %v8725_v47, 16  ;;  %v8938_v17 = vshll.u32 %v8725_v47, 16  ;;  %v8729_v56 = vld [vmem:[#allocation2 + $0x74] sm:$0x3] }
 0x422   : > { %v8493_v46 = vsel %vm1096_vm12, %v12162_v35, %v8417_v4  ;;  %9982 = vmatmul.mubr.bf16.gmra.mrb[56].mxu1 %v7857_v30  ;;  %v8913_v34 = vor.u32 %v8912_v14, %v8909_v59  ;;  %v8923_v19 = vor.u32 %v8922_v15, %v8919_v5  ;;  %v8928_v0 = vrot.slane %v8926_v51, 5  ;;  %v12165_v59 = vld [vmem:[#allocation2 + $0xac] sm:$0xf] }
 0x423   : > { %v8630_v2 = vshll.u32 %v8493_v46, 16  ;;  %v8415_v21 = vpop.permute.xlu0 %8414  ;;  %v8931_v53 = vrot.slane %v8929_v13, 6  ;;  %v8937_v58 = vrot.slane %v8935_v62, 5  ;;  %v8940_v43 = vrot.slane %v8938_v17, 6 }
 0x424   : > { %v8491_v7 = vsel %vm1096_vm12, %v10787_v37, %v8415_v21  ;;  %v8914_v48 = vsel %vm13470_vm1, %v8905_v38, %v8913_v34  ;;  %v8915_v8 = vrot.slane %v8913_v34, 4  ;;  %v8945_v37 = vshrl.u32 %v8726_v1, 16 }
 0x425   : > { %v8632_v52 = vrot.slane %v8630_v2, 1  ;;  %v7695_v55 = vpop.permute.xlu1 %7694  ;;  %v8624_v45 = vshrl.u32 %v8491_v7, 16  ;;  %v8626_v41 = vshll.u32 %v8491_v7, 16  ;;  %v8932_v33 = vor.u32 %v8931_v53, %v8928_v0 }
 0x426   : > { %v7771_v60 = vsel %vm1096_vm12, %v12091_v10, %v7695_v55  ;;  %v8924_v36 = vsel %vm13470_vm1, %v8915_v8, %v8923_v19  ;;  %v8948_v63 = vshll.u32 %v8726_v1, 16  ;;  %v8941_v40 = vor.u32 %v8940_v43, %v8937_v58  ;;  %v7945_v8 = vld [vmem:[#allocation2 + $0xb4] sm:$0xf]  ;;  %v12166_v43 = vld [vmem:[#allocation2 + $0xbc] ss:$0 sps:$4 sm:$0x11]  }
 0x427   : > { %v7859_v44 = vrot.slane %v7771_v60, 1  ;;  %v8628_v54 = vrot.slane %v8626_v41, 1  ;;  %v7693_v12 = vpop.permute.xlu0 %7692  ;;  %v10818_v31 = vcombine.low %v8914_v48, %v8924_v36  ;;  %v9309_v29 = vld [vmem:[#allocation3 + $0xc0] sm:$0xff]  ;;  %v8933_v39 = vrot.slane %v8932_v33, 4 }
 0x428   : > { %v7768_v24 = vsel %vm1096_vm12, %v12163_v28, %v7693_v12  ;;  %v8947_v50 = vrot.slane %v8945_v37, 5  ;;  %11463 = vmatprep.mubr.msk.bf16.mxu0 %vm1096_vm12, %v9309_v29  ;;  %v8950_v4 = vrot.slane %v8948_v63, 6  ;;  %v8954_v22 = vshrl.u32 %v8727_v49, 16 }
 0x429   : > { %v8421_v16 = vpop.permute.xlu1 %8420  ;;  %v8629_v23 = vor.u32 %v8628_v54, %v8624_v45  ;;  %v7858_v32 = vrot.slane %v7768_v24, 1  ;;  %9274 = vst.msk [vmem:[#allocation3 + $0xe8] sm:$0xff] %vm1096_vm12, %v10818_v31  ;;  %v10789_v42 = vcombine.low %v7942_v26, %v12165_v59  ;;  %v8942_v6 = vsel %vm13470_vm1, %v8933_v39, %v8941_v40  ;;  %v12167_v26 = vld [vmem:[#allocation2 + $0x9c] sm:$0xfe]  }
 0x42a   : > { %v8498_v3 = vsel %vm1096_vm12, %v12164_v25, %v8421_v16  ;;  %v8943_v47 = vrot.slane %v8941_v40, 4  ;;  %v8957_v30 = vshll.u32 %v8727_v49, 16  ;;  %v11251_v35 = vpop.f32.mrb[0].mxu1  ;;  %v8951_v10 = vor.u32 %v8950_v4, %v8947_v50  ;;  %v8730_v25 = vld [vmem:[#allocation2 + $0x78] sm:$0xe] }
 0x42b   : > { %v8640_v20 = vshll.u32 %v8498_v3, 16  ;;  %v8633_v11 = vsel %vm807_vm11, %v8629_v23, %v8632_v52  ;;  %v7860_v57 = vsel %vm2858_vm14, %v7858_v32, %v7859_v44  ;;  %v8956_v18 = vrot.slane %v8954_v22, 5  ;;  %v11252_v14 = vpop.f32.mrb[1].mxu1  ;;  %v8731_v40 = vld [vmem:[#allocation2 + $0x7c] sm:$0xf] }
 0x42c   : > { %9989 = vmatprep.mubr.bf16.mxu1 %v8633_v11  ;;  %v8963_v38 = vshrl.u32 %v8728_v9, 16  ;;  %v8966_v2 = vshll.u32 %v8728_v9, 16  ;;  %v8959_v15 = vrot.slane %v8957_v30, 6  ;;  %v8973_v21 = vshrl.u32 %v8729_v56, 16  ;;  %v11254_v13 = vpop.f32.mrb[2].mxu1 }
 0x42d   : > { %v7699_v46 = vpop.permute.xlu1 %7698  ;;  %9990 = vmatmul.mubr.bf16.gmra.mrb[60].mxu1 %v7860_v57  ;;  %v8976_v51 = vshll.u32 %v8729_v56, 16  ;;  %v8642_v62 = vrot.slane %v8640_v20, 1  ;;  %v8952_v52 = vsel %vm13470_vm1, %v8943_v47, %v8951_v10  ;;  %v11255_v34 = vpop.f32.mrb[3].mxu1  ;;  %v15175_v24 = vadd.f32 %v11252_v14, %v11251_v35  ;;  %v12168_v20 = vld [vmem:[#allocation2 + $0xb8] sm:$0xf] }
 0x42e   : > { %v7776_v5 = vsel %vm1096_vm12, %v12092_v27, %v7699_v46  ;;  %v8965_v7 = vrot.slane %v8963_v38, 5  ;;  %v8968_v55 = vrot.slane %v8966_v2, 6  ;;  %v10819_v1 = vcombine.low %v8942_v6, %v8952_v52  ;;  %v11179_v60 = vpop.f32.mrb[0].mxu0  ;;  %v12093_v4 = vld [vmem:[#allocation2 + $0xb0] ss:$0 sps:$4 sm:$0x11]  }
 0x42f   : > { %v8419_v17 = vpop.permute.xlu0 %8418  ;;  %v8960_v45 = vor.u32 %v8959_v15, %v8956_v18  ;;  %v8975_v41 = vrot.slane %v8973_v21, 5  ;;  %v7862_v44 = vrot.slane %v7776_v5, 1  ;;  %v8978_v54 = vrot.slane %v8976_v51, 6  ;;  %v11180_v12 = vpop.f32.mrb[1].mxu0  ;;  %v15185_v56 = vld [vmem:[#allocation2 + $0xc0] sm:$0xf] }
 0x430   : > { %v8496_v19 = vsel %vm1096_vm12, %v10789_v42, %v8419_v17  ;;  %v8969_v53 = vor.u32 %v8968_v55, %v8965_v7  ;;  %v9314_v58 = vld [vmem:[#allocation3 + $0xe8] sm:$0xff]  ;;  %9275 = vst.msk [vmem:[#allocation3 + $0x110] sm:$0xff] %vm1096_vm12, %v10819_v1  ;;  %v15177_v16 = vadd.f32 %v11255_v34, %v11254_v13  ;;  %v11182_v36 = vpop.f32.mrb[2].mxu0  ;;  %v10791_v29 = vcombine.low %v7945_v8, %v12168_v20 }
 0x431   : > { %v8636_v0 = vshll.u32 %v8496_v19, 16  ;;  %v8425_v48 = vpop.permute.xlu1 %8424  ;;  %v8961_v28 = vrot.slane %v8960_v45, 4  ;;  %v8634_v33 = vshrl.u32 %v8496_v19, 16  ;;  %11464 = vmatmul.mubr.msk.bf16.gmra.mrb[56].mxu0 %vm1096_vm12, %v9314_v58  ;;  %v8979_v32 = vor.u32 %v8978_v54, %v8975_v41  ;;  %v11183_v3 = vpop.f32.mrb[3].mxu0  ;;  %v8732_v30 = vld [vmem:[#allocation2 + $0x80] sm:$0x3] }
 0x432   : > { %v8503_v37 = vsel %vm1096_vm12, %v12166_v43, %v8425_v48  ;;  %v8971_v23 = vrot.slane %v8969_v53, 4  ;;  %v15187_v22 = vadd.f32 %v11180_v12, %v11179_v60  ;;  %v8982_v59 = vshrl.u32 %v8730_v25, 16  ;;  %v8733_v5 = vld [vmem:[#allocation2 + $0x84] sm:$0xe] }
 0x433   : > { %v8638_v63 = vrot.slane %v8636_v0, 1  ;;  %v7697_v49 = vpop.permute.xlu0 %7696  ;;  %v8650_v27 = vshll.u32 %v8503_v37, 16  ;;  %v8970_v39 = vsel %vm13470_vm1, %v8961_v28, %v8969_v53  ;;  %v8985_v35 = vshll.u32 %v8730_v25, 16  ;;  %v12171_v25 = vld [vmem:[#allocation2 + $0xc8] ss:$0 sps:$4 sm:$0x11]  }
 0x434   : > { %v7773_v31 = vsel %vm1096_vm12, %v12167_v26, %v7697_v49  ;;  %v8980_v11 = vsel %vm13470_vm1, %v8971_v23, %v8979_v32  ;;  %v8991_v46 = vshrl.u32 %v8731_v40, 16  ;;  %v8984_v2 = vrot.slane %v8982_v59, 5  ;;  %v12170_v23 = vld [vmem:[#allocation2 + $0xa8] sm:$0xfe]  }
 0x435   : > { %v8639_v50 = vor.u32 %v8638_v63, %v8634_v33  ;;  %v7861_v9 = vrot.slane %v7773_v31, 1  ;;  %v10820_v57 = vcombine.low %v8970_v39, %v8980_v11  ;;  %v15191_v10 = vpop.f32.mrb[4].mxu1  ;;  %v8652_v18 = vrot.slane %v8650_v27, 1  ;;  %v8734_v63 = vld [vmem:[#allocation2 + $0x88] sm:$0xf] }
 0x436   : > { %v8994_v14 = vshll.u32 %v8731_v40, 16  ;;  %v15195_v15 = vpop.f32.mrb[5].mxu1  ;;  %v8987_v52 = vrot.slane %v8985_v35, 6  ;;  %v8993_v7 = vrot.slane %v8991_v46, 5  ;;  %v9001_v1 = vshrl.u32 %v8732_v30, 16 }
 0x437   : > { %v8643_v42 = vsel %vm807_vm11, %v8639_v50, %v8642_v62  ;;  %v7863_v6 = vsel %vm2858_vm14, %v7861_v9, %v7862_v44  ;;  %v8423_v47 = vpop.permute.xlu0 %8422  ;;  %9276 = vst.msk [vmem:[#allocation3 + $0x138] sm:$0xff] %vm1096_vm12, %v10820_v57  ;;  %v9319_v51 = vld [vmem:[#allocation3 + $0x110] sm:$0xff]  ;;  %v12169_v62 = vld [vmem:[#allocation2 + $0xc4] sm:$0xf]  ;;  %v15198_v55 = vpop.f32.mrb[6].mxu1  ;;  %v9004_v45 = vshll.u32 %v8732_v30, 16  ;;  %v15204_v48 = vadd.f32 %v11183_v3, %v11182_v36 }
 0x438   : > { %v8501_v38 = vsel %vm1096_vm12, %v10791_v29, %v8423_v47  ;;  %9997 = vmatprep.mubr.bf16.mxu1 %v8643_v42  ;;  %v10793_v17 = vcombine.low %v15185_v56, %v12169_v62  ;;  %11467 = vmatprep.mubr.msk.bf16.mxu0 %vm1096_vm12, %v9319_v51  ;;  %v8996_v19 = vrot.slane %v8994_v14, 6  ;;  %v15202_v41 = vpop.f32.mrb[7].mxu1  ;;  %v8988_v44 = vor.u32 %v8987_v52, %v8984_v2  ;;  %v12094_v3 = vld [vmem:[#allocation2 + $0xbc] ss:$0 sps:$4 sm:$0x11]  }
 0x439   : > { %v8646_v21 = vshll.u32 %v8501_v38, 16  ;;  %v7703_v13 = vpop.permute.xlu1 %7702  ;;  %9998 = vmatmul.mubr.bf16.gmra.mrb[64].mxu1 %v7863_v6  ;;  %v8644_v60 = vshrl.u32 %v8501_v38, 16  ;;  %v9003_v53 = vrot.slane %v9001_v1, 5  ;;  %v9006_v54 = vrot.slane %v9004_v45, 6  ;;  %v8735_v50 = vld [vmem:[#allocation2 + $0x8c] sm:$0x3] }
 0x43a   : > { %v7781_v34 = vsel %vm1096_vm12, %v12093_v4, %v7703_v13  ;;  %v8997_v8 = vor.u32 %v8996_v19, %v8993_v7  ;;  %v9010_v12 = vshrl.u32 %v8733_v5, 16  ;;  %v8989_v33 = vrot.slane %v8988_v44, 4  ;;  %v8736_v14 = vld [vmem:[#allocation2 + $0x90] sm:$0xe] }
 0x43b   : > { %v8648_v0 = vrot.slane %v8646_v21, 1  ;;  %v7865_v43 = vrot.slane %v7781_v34, 1  ;;  %v9013_v49 = vshll.u32 %v8733_v5, 16  ;;  %v9007_v36 = vor.u32 %v9006_v54, %v9003_v53  ;;  %v12172_v53 = vld [vmem:[#allocation2 + $0xb4] sm:$0xfe]  }
 0x43c   : > { %v8999_v31 = vrot.slane %v8997_v8, 4  ;;  %v8998_v40 = vsel %vm13470_vm1, %v8989_v33, %v8997_v8  ;;  %v9012_v57 = vrot.slane %v9010_v12, 5  ;;  %v9019_v56 = vshrl.u32 %v8734_v63, 16  ;;  %v7951_v8 = vld [vmem:[#allocation2 + $0xcc] sm:$0xf] }
 0x43d   : > { %v8649_v58 = vor.u32 %v8648_v0, %v8644_v60  ;;  %v7701_v37 = vpop.permute.xlu0 %7700  ;;  %v8429_v28 = vpop.permute.xlu1 %8428  ;;  %v9015_v4 = vrot.slane %v9013_v49, 6  ;;  %v9022_v30 = vshll.u32 %v8734_v63, 16  ;;  %v9029_v2 = vshrl.u32 %v8735_v50, 16 }
 0x43e   : > { %v7778_v32 = vsel %vm1096_vm12, %v12170_v23, %v7701_v37  ;;  %v8508_v26 = vsel %vm1096_vm12, %v12171_v25, %v8429_v28  ;;  %v9324_v20 = vld [vmem:[#allocation3 + $0x138] sm:$0xff]  ;;  %v9008_v11 = vsel %vm13470_vm1, %v8999_v31, %v9007_v36  ;;  %v9021_v38 = vrot.slane %v9019_v56, 5 }
 0x43f   : > { %v8653_v27 = vsel %vm807_vm11, %v8649_v58, %v8652_v18  ;;  %v7864_v29 = vrot.slane %v7778_v32, 1  ;;  %v8660_v39 = vshll.u32 %v8508_v26, 16  ;;  %v15211_v9 = vpop.f32.mrb[4].mxu0  ;;  %11468 = vmatmul.mubr.msk.bf16.gmra.mrb[60].mxu0 %vm1096_vm12, %v9324_v20  ;;  %v10821_v47 = vcombine.low %v8998_v40, %v9008_v11  ;;  %v8737_v23 = vld [vmem:[#allocation2 + $0x94] sm:$0xf] }
 0x440   : > { %10005 = vmatprep.mubr.bf16.mxu1 %v8653_v27  ;;  %v15216_v59 = vpop.f32.mrb[5].mxu0  ;;  %v9016_v18 = vor.u32 %v9015_v4, %v9012_v57  ;;  %v9024_v13 = vrot.slane %v9022_v30, 6  ;;  %v9032_v62 = vshll.u32 %v8735_v50, 16  ;;  %v9031_v19 = vrot.slane %v9029_v2, 5  ;;  %v12173_v26 = vld [vmem:[#allocation2 + $0xd0] sm:$0xf] }
 0x441   : > { %v7866_v42 = vsel %vm2858_vm14, %v7864_v29, %v7865_v43  ;;  %v8427_v6 = vpop.permute.xlu0 %8426  ;;  %v7707_v35 = vpop.permute.xlu1 %7706  ;;  %v8662_v21 = vrot.slane %v8660_v39, 1  ;;  %9277 = vst.msk [vmem:[#allocation3 + $0x160] sm:$0xff] %vm1096_vm12, %v10821_v47  ;;  %v15229_v12 = vadd.f32 %v15195_v15, %v15191_v10  ;;  %v9038_v58 = vshrl.u32 %v8736_v14, 16  ;;  %v12174_v36 = vld [vmem:[#allocation2 + $0xd4] ss:$0 sps:$4 sm:$0x11]  }
 0x442   : > { %v8506_v46 = vsel %vm1096_vm12, %v10793_v17, %v8427_v6  ;;  %10006 = vmatmul.mubr.bf16.gmra.mrb[68].mxu1 %v7866_v42  ;;  %v15220_v5 = vpop.f32.mrb[6].mxu0  ;;  %v9017_v34 = vrot.slane %v9016_v18, 4  ;;  %v7786_v17 = vsel %vm1096_vm12, %v12094_v3, %v7707_v35  ;;  %v9025_v45 = vor.u32 %v9024_v13, %v9021_v38  ;;  %v8738_v10 = vld [vmem:[#allocation2 + $0x98] sm:$0x3]  ;;  %v8739_v18 = vld [vmem:[#allocation2 + $0x9c] sm:$0xe] }
 0x443   : > { %v8656_v51 = vshll.u32 %v8506_v46, 16  ;;  %v15223_v52 = vpop.f32.mrb[7].mxu0  ;;  %v8654_v7 = vshrl.u32 %v8506_v46, 16  ;;  %v9034_v60 = vrot.slane %v9032_v62, 6  ;;  %v7868_v0 = vrot.slane %v7786_v17, 1 }
 0x444   : > { %v9041_v43 = vshll.u32 %v8736_v14, 16  ;;  %v9026_v28 = vsel %vm13470_vm1, %v9017_v34, %v9025_v45  ;;  %v9027_v33 = vrot.slane %v9025_v45, 4  ;;  %v10795_v31 = vcombine.low %v7951_v8, %v12173_v26 }
 0x445   : > { %v8658_v1 = vrot.slane %v8656_v51, 1  ;;  %v7705_v44 = vpop.permute.xlu0 %7704  ;;  %v9035_v63 = vor.u32 %v9034_v60, %v9031_v19  ;;  %v9040_v15 = vrot.slane %v9038_v58, 5  ;;  %v9047_v56 = vshrl.u32 %v8737_v23, 16  ;;  %v8740_v51 = vld [vmem:[#allocation2 + $0xa0] sm:$0xf] }
 0x446   : > { %v7783_v54 = vsel %vm1096_vm12, %v12172_v53, %v7705_v44  ;;  %v8433_v49 = vpop.permute.xlu1 %8432  ;;  %v9043_v40 = vrot.slane %v9041_v43, 6  ;;  %v9050_v42 = vshll.u32 %v8737_v23, 16  ;;  %v9057_v35 = vshrl.u32 %v8738_v10, 16  ;;  %v8741_v19 = vld [vmem:[#allocation2 + $0xa4] sm:$0x3] }
 0x447   : > { %v8659_v37 = vor.u32 %v8658_v1, %v8654_v7  ;;  %v7867_v25 = vrot.slane %v7783_v54, 1  ;;  %v8513_v3 = vsel %vm1096_vm12, %v12174_v36, %v8433_v49  ;;  %v9036_v29 = vsel %vm13470_vm1, %v9027_v33, %v9035_v63 }
 0x448   : > { %v15233_v32 = vpop.f32.mrb[8].mxu1  ;;  %v8670_v39 = vshll.u32 %v8513_v3, 16  ;;  %v9329_v11 = vld [vmem:[#allocation3 + $0x160] sm:$0xff]  ;;  %v10822_v57 = vcombine.low %v9026_v28, %v9036_v29  ;;  %v9044_v30 = vor.u32 %v9043_v40, %v9040_v15  ;;  %v9060_v46 = vshll.u32 %v8738_v10, 16 }
 0x449   : > { %v15236_v27 = vpop.f32.mrb[9].mxu1  ;;  %v8663_v20 = vsel %vm807_vm11, %v8659_v37, %v8662_v21  ;;  %v7869_v4 = vsel %vm2858_vm14, %v7867_v25, %v7868_v0  ;;  %11471 = vmatprep.mubr.msk.bf16.mxu0 %vm1096_vm12, %v9329_v11  ;;  %v9049_v2 = vrot.slane %v9047_v56, 5  ;;  %v9052_v14 = vrot.slane %v9050_v42, 6  ;;  %v12095_v0 = vld [vmem:[#allocation2 + $0xc8] ss:$0 sps:$4 sm:$0x11]  }
 0x44a   : > { %v15241_v50 = vpop.f32.mrb[10].mxu1  ;;  %10013 = vmatprep.mubr.bf16.mxu1 %v8663_v20  ;;  %v8431_v47 = vpop.permute.xlu0 %8430  ;;  %9278 = vst.msk [vmem:[#allocation3 + $0x188] sm:$0xff] %vm1096_vm12, %v10822_v57  ;;  %v15251_v21 = vadd.f32 %v15202_v41, %v15198_v55  ;;  %v8672_v62 = vrot.slane %v8670_v39, 1  ;;  %v9045_v7 = vrot.slane %v9044_v30, 4  ;;  %v9059_v34 = vrot.slane %v9057_v35, 5 }
 0x44b   : > { %v15244_v6 = vpop.f32.mrb[11].mxu1  ;;  %10014 = vmatmul.mubr.bf16.gmra.mrb[72].mxu1 %v7869_v4  ;;  %v8511_v38 = vsel %vm1096_vm12, %v10795_v31, %v8431_v47  ;;  %v9053_v1 = vor.u32 %v9052_v14, %v9049_v2  ;;  %v9062_v45 = vrot.slane %v9060_v46, 6  ;;  %v9066_v60 = vshrl.u32 %v8739_v18, 16  ;;  %v8742_v4 = vld [vmem:[#allocation2 + $0xa8] sm:$0xe] }
 0x44c   : > { %v8666_v13 = vshll.u32 %v8511_v38, 16  ;;  %v8664_v17 = vshrl.u32 %v8511_v38, 16  ;;  %v9069_v8 = vshll.u32 %v8739_v18, 16  ;;  %v9075_v53 = vshrl.u32 %v8740_v51, 16  ;;  %v7711_v58 = vpop.permute.xlu1 %7710  ;;  %v8743_v56 = vld [vmem:[#allocation2 + $0xac] sm:$0xf] }
 0x44d   : > { %v9078_v54 = vshll.u32 %v8740_v51, 16  ;;  %v9054_v55 = vsel %vm13470_vm1, %v9045_v7, %v9053_v1  ;;  %v9055_v41 = vrot.slane %v9053_v1, 4  ;;  %v9063_v37 = vor.u32 %v9062_v45, %v9059_v34  ;;  %v12175_v35 = vld [vmem:[#allocation2 + $0xc0] sm:$0xfe]   ;;  %v8745_v45 = vld [vmem:[#allocation2 + $0xb4] sm:$0xe] }
 0x44e   : > { %v8668_v44 = vrot.slane %v8666_v13, 1  ;;  %v9068_v28 = vrot.slane %v9066_v60, 5  ;;  %v9071_v49 = vrot.slane %v9069_v8, 6  ;;  %v9077_v23 = vrot.slane %v9075_v53, 5  ;;  %v7709_v26 = vpop.permute.xlu0 %7708  ;;  %v8744_v13 = vld [vmem:[#allocation2 + $0xb0] sm:$0x3] }
 0x44f   : > { %v15253_v43 = vpop.f32.mrb[8].mxu0  ;;  %v9080_v25 = vrot.slane %v9078_v54, 6  ;;  %v9064_v36 = vsel %vm13470_vm1, %v9055_v41, %v9063_v37  ;;  %v9085_v3 = vshrl.u32 %v8741_v19, 16  ;;  %v9088_v10 = vshll.u32 %v8741_v19, 16  ;;  %v8746_v8 = vld [vmem:[#allocation2 + $0xb8] sm:$0xf] }
 0x450   : > { %v15257_v33 = vpop.f32.mrb[9].mxu0  ;;  %v8669_v63 = vor.u32 %v8668_v44, %v8664_v17  ;;  %v7791_v15 = vsel %vm1096_vm12, %v12095_v0, %v7711_v58  ;;  %v10823_v40 = vcombine.low %v9054_v55, %v9064_v36  ;;  %v9072_v11 = vor.u32 %v9071_v49, %v9068_v28 }
 0x451   : > { %v15259_v31 = vpop.f32.mrb[10].mxu0  ;;  %v9334_v29 = vld [vmem:[#allocation3 + $0x188] sm:$0xff]  ;;  %v9081_v57 = vor.u32 %v9080_v25, %v9077_v23  ;;  %v9087_v42 = vrot.slane %v9085_v3, 5  ;;  %v9090_v47 = vrot.slane %v9088_v10, 6  ;;  %v7871_v30 = vrot.slane %v7791_v15, 1 }
 0x452   : > { %v15264_v20 = vpop.f32.mrb[11].mxu0  ;;  %v8673_v39 = vsel %vm807_vm11, %v8669_v63, %v8672_v62  ;;  %11472 = vmatmul.mubr.msk.bf16.gmra.mrb[64].mxu0 %vm1096_vm12, %v9334_v29  ;;  %v7788_v46 = vsel %vm1096_vm12, %v12175_v35, %v7709_v26  ;;  %9279 = vst.msk [vmem:[#allocation3 + $0x1b0] sm:$0xff] %vm1096_vm12, %v10823_v40  ;;  %v9073_v18 = vrot.slane %v9072_v11, 4  ;;  %v15272_v14 = vadd.f32 %v15216_v59, %v15211_v9  ;;  %v8747_v10 = vld [vmem:[#allocation2 + $0xbc] sm:$0x3] }
 0x453   : > { %10021 = vmatprep.mubr.bf16.mxu1 %v8673_v39  ;;  %v9083_v38 = vrot.slane %v9081_v57, 4  ;;  %v7870_v2 = vrot.slane %v7788_v46, 1  ;;  %v9091_v51 = vor.u32 %v9090_v47, %v9087_v42  ;;  %v9094_v62 = vshrl.u32 %v8742_v4, 16  ;;  %v8749_v46 = vld [vmem:[#allocation2 + $0xc4] sm:$0xf] }
 0x454   : > { %v9097_v7 = vshll.u32 %v8742_v4, 16  ;;  %v9103_v34 = vshrl.u32 %v8743_v56, 16  ;;  %v9082_v19 = vsel %vm13470_vm1, %v9073_v18, %v9081_v57  ;;  %v9106_v1 = vshll.u32 %v8743_v56, 16  ;;  %v8748_v57 = vld [vmem:[#allocation2 + $0xc0] sm:$0xe] }
 0x455   : > { %v7872_v17 = vsel %vm2858_vm14, %v7870_v2, %v7871_v30  ;;  %v9092_v0 = vsel %vm13470_vm1, %v9083_v38, %v9091_v51  ;;  %v9096_v44 = vrot.slane %v9094_v62, 5  ;;  %v9113_v55 = vshrl.u32 %v8744_v13, 16  ;;  %v8750_v51 = vld [vmem:[#allocation2 + $0xc8] sm:$0x3] }
 0x456   : > { %v9099_v9 = vrot.slane %v9097_v7, 6  ;;  %v9105_v59 = vrot.slane %v9103_v34, 5  ;;  %10022 = vmatmul.mubr.bf16.gmra.mrb[76].mxu1 %v7872_v17  ;;  %v10824_v54 = vcombine.low %v9082_v19, %v9092_v0  ;;  %v9108_v58 = vrot.slane %v9106_v1, 6 }
 0x457   : > { %v15277_v60 = vpop.f32.mrb[12].mxu1  ;;  %v9116_v41 = vshll.u32 %v8744_v13, 16  ;;  %v15287_v63 = vadd.f32 %v15223_v52, %v15220_v5  ;;  %v9122_v49 = vshrl.u32 %v8745_v45, 16  ;;  %v9125_v23 = vshll.u32 %v8745_v45, 16 }
 0x458   : > { %v15281_v53 = vpop.f32.mrb[13].mxu1  ;;  %v9100_v28 = vor.u32 %v9099_v9, %v9096_v44  ;;  %9280 = vst.msk [vmem:[#allocation3 + $0x1d8] sm:$0xff] %vm1096_vm12, %v10824_v54  ;;  %v9109_v26 = vor.u32 %v9108_v58, %v9105_v59  ;;  %v9115_v36 = vrot.slane %v9113_v55, 5  ;;  %v9131_v15 = vshrl.u32 %v8746_v8, 16  ;;  %v8751_v9 = vld [vmem:[#allocation2 + $0xcc] sm:$0xe] }
 0x459   : > { %v15283_v37 = vpop.f32.mrb[14].mxu1  ;;  %v9118_v3 = vrot.slane %v9116_v41, 6  ;;  %v9339_v29 = vld [vmem:[#allocation3 + $0x1b0] sm:$0xff]  ;;  %v9124_v40 = vrot.slane %v9122_v49, 5  ;;  %v9127_v11 = vrot.slane %v9125_v23, 6  ;;  %v9134_v56 = vshll.u32 %v8746_v8, 16 }
 0x45a   : > { %v15289_v25 = vpop.f32.mrb[15].mxu1  ;;  %v9101_v39 = vrot.slane %v9100_v28, 4  ;;  %11475 = vmatprep.mubr.msk.bf16.mxu0 %vm1096_vm12, %v9339_v29  ;;  %v9111_v5 = vrot.slane %v9109_v26, 4  ;;  %v9133_v4 = vrot.slane %v9131_v15, 5  ;;  %v9141_v30 = vshrl.u32 %v8747_v10, 16 }
 0x45b   : > { %v9119_v52 = vor.u32 %v9118_v3, %v9115_v36  ;;  %v9128_v47 = vor.u32 %v9127_v11, %v9124_v40  ;;  %v9144_v35 = vshll.u32 %v8747_v10, 16  ;;  %v9136_v38 = vrot.slane %v9134_v56, 6  ;;  %v8752_v15 = vld [vmem:[#allocation2 + $0xd0] sm:$0xf]  ;;  %v8753_v11 = vld [vmem:[#allocation2 + $0xd4] sm:$0x3] }
 0x45c   : > { %v9110_v42 = vsel %vm13470_vm1, %v9101_v39, %v9109_v26  ;;  %v15299_v2 = vadd.f32 %v15236_v27, %v15233_v32  ;;  %v9150_v13 = vshrl.u32 %v8748_v57, 16  ;;  %v9143_v19 = vrot.slane %v9141_v30, 5 }
 0x45d   : > { %v9120_v18 = vsel %vm13470_vm1, %v9111_v5, %v9119_v52  ;;  %v9129_v34 = vrot.slane %v9128_v47, 4  ;;  %v9146_v17 = vrot.slane %v9144_v35, 6  ;;  %v9137_v45 = vor.u32 %v9136_v38, %v9133_v4 }
 0x45e   : > { %v10825_v7 = vcombine.low %v9110_v42, %v9120_v18  ;;  %v9152_v0 = vrot.slane %v9150_v13, 5  ;;  %v9153_v44 = vshll.u32 %v8748_v57, 16  ;;  %v9159_v32 = vshrl.u32 %v8749_v46, 16 }
 0x45f   : > { %v15301_v62 = vpop.f32.mrb[12].mxu0  ;;  %v9344_v8 = vld [vmem:[#allocation3 + $0x1d8] sm:$0xff]  ;;  %v9147_v54 = vor.u32 %v9146_v17, %v9143_v19  ;;  %v9162_v27 = vshll.u32 %v8749_v46, 16  ;;  %v9169_v58 = vshrl.u32 %v8750_v51, 16  ;;  %v9138_v41 = vsel %vm13470_vm1, %v9129_v34, %v9137_v45 }
 0x460   : > { %v11198_v1 = vpop.f32.mrb[13].mxu0  ;;  %9281 = vst.msk [vmem:[#allocation3 + $0x200] sm:$0xff] %vm1096_vm12, %v10825_v7  ;;  %11476 = vmatmul.mubr.msk.bf16.gmra.mrb[68].mxu0 %vm1096_vm12, %v9344_v8  ;;  %v9139_v28 = vrot.slane %v9137_v45, 4  ;;  %v9155_v49 = vrot.slane %v9153_v44, 6  ;;  %v9172_v23 = vshll.u32 %v8750_v51, 16  ;;  %v9161_v26 = vrot.slane %v9159_v32, 5 }
 0x461   : > { %v11200_v59 = vpop.f32.mrb[14].mxu0  ;;  %v9164_v36 = vrot.slane %v9162_v27, 6  ;;  %v9171_v3 = vrot.slane %v9169_v58, 5  ;;  %v15309_v10 = vadd.f32 %v15244_v6, %v15241_v50  ;;  %v9178_v57 = vshrl.u32 %v8751_v9, 16 }
 0x462   : > { %v11201_v55 = vpop.f32.mrb[15].mxu0  ;;  %v9148_v29 = vsel %vm13470_vm1, %v9139_v28, %v9147_v54  ;;  %v9156_v39 = vor.u32 %v9155_v49, %v9152_v0  ;;  %v9174_v40 = vrot.slane %v9172_v23, 6  ;;  %v9181_v4 = vshll.u32 %v8751_v9, 16 }
 0x463   : > { %v10826_v5 = vcombine.low %v9138_v41, %v9148_v29  ;;  %v9165_v52 = vor.u32 %v9164_v36, %v9161_v26  ;;  %v9180_v47 = vrot.slane %v9178_v57, 5  ;;  %v9187_v30 = vshrl.u32 %v8752_v15, 16 }
 0x464   : > { %v9157_v56 = vrot.slane %v9156_v39, 4  ;;  %v9175_v42 = vor.u32 %v9174_v40, %v9171_v3  ;;  %v9183_v50 = vrot.slane %v9181_v4, 6  ;;  %v9190_v6 = vshll.u32 %v8752_v15, 16 }
 0x465   : > { %9282 = vst.msk [vmem:[#allocation3 + $0x228] sm:$0xff] %vm1096_vm12, %v10826_v5  ;;  %v9167_v35 = vrot.slane %v9165_v52, 4  ;;  %v9197_v46 = vshrl.u32 %v8753_v11, 16  ;;  %v9189_v51 = vrot.slane %v9187_v30, 5  ;;  %v9200_v13 = vshll.u32 %v8753_v11, 16 }
 0x466   : > { %v9166_v38 = vsel %vm13470_vm1, %v9157_v56, %v9165_v52  ;;  %v15318_v7 = vadd.f32 %v15257_v33, %v15253_v43  ;;  %v9184_v19 = vor.u32 %v9183_v50, %v9180_v47  ;;  %v9192_v17 = vrot.slane %v9190_v6, 6 }
 0x467   : > { %v9349_v18 = vld [vmem:[#allocation3 + $0x200] sm:$0xff]  ;;  %v9176_v34 = vsel %vm13470_vm1, %v9167_v35, %v9175_v42  ;;  %v9199_v45 = vrot.slane %v9197_v46, 5  ;;  %v9202_v44 = vrot.slane %v9200_v13, 6  ;;  %v11196_v9 = vadd.f32 %v15264_v20, %v15259_v31  ;;  %v15340_v20 = vld [vmem:[%s15522_s4] ss:$0 sm:$0xff] }
 0x468   : > { %11479 = vmatprep.mubr.msk.bf16.mxu0 %vm1096_vm12, %v9349_v18  ;;  %v10827_v0 = vcombine.low %v9166_v38, %v9176_v34  ;;  %v9185_v54 = vrot.slane %v9184_v19, 4  ;;  %v9193_v32 = vor.u32 %v9192_v17, %v9189_v51  ;;  %v15327_v43 = vadd.f32 %v15281_v53, %v15277_v60 }
 0x469   : > { %v15331_v33 = vadd.f32 %v15289_v25, %v15283_v37  ;;  %v9203_v58 = vor.u32 %v9202_v44, %v9199_v45  ;;  %v11199_v41 = vadd.f32 %v11198_v1, %v15301_v62  ;;  %v15335_v28 = vadd.f32 %v11201_v55, %v11200_v59 }
 0x46a   : > { %9283 = vst.msk [vmem:[#allocation3 + $0x250] sm:$0xff] %vm1096_vm12, %v10827_v0  ;;  %v9194_v60 = vsel %vm13470_vm1, %v9185_v54, %v9193_v32  ;;  %v9195_v53 = vrot.slane %v9193_v32, 4  ;;  %v9743_v49 = vadd.f32 %v15187_v22, %v15340_v20  ;;  %v9746_v62 = vadd.f32 %v15204_v48, %v15340_v20 }
 0x46b   : > { %v11291_v8 = vpop.f32.mrb[16].mxu1  ;;  %v9751_v5 = vadd.f32 %v15272_v14, %v15340_v20  ;;  %v9754_v47 = vadd.f32 %v15287_v63, %v15340_v20  ;;  %v9759_v14 = vadd.f32 %v15318_v7, %v15340_v20  ;;  %v9762_v63 = vadd.f32 %v11196_v9, %v15340_v20 }
 0x46c   : > { %v11292_v27 = vpop.f32.mrb[17].mxu1  ;;  %v9354_v1 = vld [vmem:[#allocation3 + $0x228] sm:$0xff]  ;;  %v9204_v26 = vsel %vm13470_vm1, %v9195_v53, %v9203_v58  ;;  %v9767_v7 = vadd.f32 %v11199_v41, %v15340_v20  ;;  %v9770_v9 = vadd.f32 %v15335_v28, %v15340_v20 }
 0x46d   : > { %v11294_v31 = vpop.f32.mrb[18].mxu1  ;;  %v11203_v37 = vpop.f32.mrb[16].mxu0  ;;  %v11293_v59 = vadd.f32 %v11292_v27, %v11291_v8  ;;  %11480 = vmatmul.mubr.msk.bf16.gmra.mrb[72].mxu0 %vm1096_vm12, %v9354_v1  ;;  %v10828_v15 = vcombine.low %v9194_v60, %v9204_v26 }
 0x46e   : > { %v11295_v25 = vpop.f32.mrb[19].mxu1  ;;  %v11204_v55 = vpop.f32.mrb[17].mxu0 }
 0x46f   : > { %v11296_v23 = vadd.f32 %v11295_v25, %v11294_v31  ;;  %v15351_v36 = vadd.f32 %v11204_v55, %v11203_v37  ;;  %v11206_v3 = vpop.f32.mrb[18].mxu0  ;;  %v15353_v39 = vadd.f32 %v11293_v59, %v9743_v49  ;;  %9284 = vst.msk [vmem:[#allocation3 + $0x278] sm:$0xff] %vm1096_vm12, %v10828_v15 }
 0x470   : > { %v11207_v29 = vpop.f32.mrb[19].mxu0 }
 0x471   : > { %v15355_v22 = vadd.f32 %v11296_v23, %v9746_v62  ;;  %v15357_v40 = vadd.f32 %v11207_v29, %v11206_v3  ;;  %v9359_v48 = vld [vmem:[#allocation3 + $0x250] sm:$0xff] }
 0x472   : > { %11483 = vmatprep.mubr.msk.bf16.mxu0 %vm1096_vm12, %v9359_v48 }
 0x476   : > { %v9364_v11 = vld [vmem:[#allocation3 + $0x278] sm:$0xff] }
 0x477   : > { %11484 = vmatmul.mubr.msk.bf16.gmra.mrb[76].mxu0 %vm1096_vm12, %v9364_v11 }
 0x47b   : > { %v11297_v61 = vpop.f32.mrb[20].mxu1 }
 0x47c   : > { %v11298_v57 = vpop.f32.mrb[21].mxu1 }
 0x47d   : > { %v11299_v52 = vadd.f32 %v11298_v57, %v11297_v61  ;;  %v11300_v4 = vpop.f32.mrb[22].mxu1  ;;  %v11209_v56 = vpop.f32.mrb[20].mxu0  ;;  %v9775_v57 = vadd.f32 %v15351_v36, %v15340_v20 }
 0x47e   : > { %v11301_v42 = vpop.f32.mrb[23].mxu1  ;;  %v11210_v30 = vpop.f32.mrb[21].mxu0 }
 0x47f   : > { %v11302_v35 = vadd.f32 %v11301_v42, %v11300_v4  ;;  %v15366_v50 = vadd.f32 %v11299_v52, %v9751_v5  ;;  %v11211_v6 = vadd.f32 %v11210_v30, %v11209_v56  ;;  %v11212_v46 = vpop.f32.mrb[22].mxu0 }
 0x480   : > { %v11213_v18 = vpop.f32.mrb[23].mxu0 }
 0x481   : > { %v15368_v38 = vadd.f32 %v11302_v35, %v9754_v47  ;;  %v11214_v51 = vadd.f32 %v11213_v18, %v11212_v46  ;;  %v9778_v47 = vadd.f32 %v15357_v40, %v15340_v20  ;;  %v9783_v36 = vadd.f32 %v11211_v6, %v15340_v20 }
 0x48b   : > { %v11303_v13 = vpop.f32.mrb[24].mxu1 }
 0x48c   : > { %v11304_v34 = vpop.f32.mrb[25].mxu1 }
 0x48d   : > { %v11305_v19 = vadd.f32 %v11304_v34, %v11303_v13  ;;  %v11306_v17 = vpop.f32.mrb[26].mxu1  ;;  %v11215_v45 = vpop.f32.mrb[24].mxu0 }
 0x48e   : > { %v11307_v0 = vpop.f32.mrb[27].mxu1  ;;  %v11216_v44 = vpop.f32.mrb[25].mxu0 }
 0x48f   : > { %v11308_v8 = vadd.f32 %v11307_v0, %v11306_v17  ;;  %v15373_v54 = vadd.f32 %v11305_v19, %v9759_v14  ;;  %v11217_v32 = vadd.f32 %v11216_v44, %v11215_v45  ;;  %v11218_v27 = vpop.f32.mrb[26].mxu0 }
 0x490   : > { %v11219_v58 = vpop.f32.mrb[27].mxu0 }
 0x491   : > { %v15375_v31 = vadd.f32 %v11308_v8, %v9762_v63  ;;  %v11220_v60 = vadd.f32 %v11219_v58, %v11218_v27  ;;  %v9786_v63 = vadd.f32 %v11214_v51, %v15340_v20  ;;  %v9791_v6 = vadd.f32 %v11217_v32, %v15340_v20 }
 0x493   : > { %v9794_v51 = vadd.f32 %v11220_v60, %v15340_v20 }
 0x49b   : > { %v11309_v53 = vpop.f32.mrb[28].mxu1 }
 0x49c   : > { %v11310_v37 = vpop.f32.mrb[29].mxu1 }
 0x49d   : > { %v11311_v25 = vadd.f32 %v11310_v37, %v11309_v53  ;;  %v11312_v49 = vpop.f32.mrb[30].mxu1  ;;  %v11221_v1 = vpop.f32.mrb[28].mxu0 }
 0x49e   : > { %v11313_v62 = vpop.f32.mrb[31].mxu1  ;;  %v11222_v23 = vpop.f32.mrb[29].mxu0 }
 0x49f   : > { %v11314_v59 = vadd.f32 %v11313_v62, %v11312_v49  ;;  %v15380_v55 = vadd.f32 %v11311_v25, %v9767_v7  ;;  %v11223_v26 = vadd.f32 %v11222_v23, %v11221_v1  ;;  %v11224_v3 = vpop.f32.mrb[30].mxu0 }
 0x4a0   : > { %v11225_v29 = vpop.f32.mrb[31].mxu0 }
 0x4a1   : > { %v15382_v15 = vadd.f32 %v11314_v59, %v9770_v9  ;;  %v11226_v48 = vadd.f32 %v11225_v29, %v11224_v3  ;;  %v9799_v32 = vadd.f32 %v11223_v26, %v15340_v20 }
 0x4a3   : > { %v9802_v60 = vadd.f32 %v11226_v48, %v15340_v20 }
 0x4ae   : > { %v11315_v11 = vpop.f32.mrb[32].mxu1 }
 0x4af   : > { %v11316_v61 = vpop.f32.mrb[33].mxu1 }
 0x4b0   : > { %v11227_v41 = vpop.f32.mrb[32].mxu0  ;;  %v11317_v5 = vadd.f32 %v11316_v61, %v11315_v11  ;;  %v11318_v52 = vpop.f32.mrb[34].mxu1 }
 0x4b1   : > { %v11228_v28 = vpop.f32.mrb[33].mxu0  ;;  %v11319_v56 = vpop.f32.mrb[35].mxu1 }
 0x4b2   : > { %v11229_v4 = vadd.f32 %v11228_v28, %v11227_v41  ;;  %v11230_v42 = vpop.f32.mrb[34].mxu0  ;;  %v11320_v30 = vadd.f32 %v11319_v56, %v11318_v52  ;;  %v15388_v46 = vadd.f32 %v11317_v5, %v9775_v57 }
 0x4b3   : > { %v11231_v35 = vpop.f32.mrb[35].mxu0 }
 0x4b4   : > { %v11232_v18 = vadd.f32 %v11231_v35, %v11230_v42  ;;  %v15390_v13 = vadd.f32 %v11320_v30, %v9778_v47  ;;  %v9807_v26 = vadd.f32 %v11229_v4, %v15340_v20 }
 0x4bc   : > { %v11321_v34 = vpop.f32.mrb[36].mxu1 }
 0x4bd   : > { %v11322_v14 = vpop.f32.mrb[37].mxu1 }
 0x4be   : > { %v11323_v19 = vadd.f32 %v11322_v14, %v11321_v34  ;;  %v11324_v17 = vpop.f32.mrb[38].mxu1 }
 0x4bf   : > { %v11233_v45 = vpop.f32.mrb[36].mxu0  ;;  %v11325_v0 = vpop.f32.mrb[39].mxu1 }
 0x4c0   : > { %v11234_v44 = vpop.f32.mrb[37].mxu0  ;;  %v11326_v8 = vadd.f32 %v11325_v0, %v11324_v17  ;;  %v15394_v40 = vadd.f32 %v11323_v19, %v9783_v36 }
 0x4c1   : > { %v11235_v27 = vadd.f32 %v11234_v44, %v11233_v45  ;;  %v11236_v58 = vpop.f32.mrb[38].mxu0 }
 0x4c2   : > { %v11237_v53 = vpop.f32.mrb[39].mxu0  ;;  %v15396_v37 = vadd.f32 %v11326_v8, %v9786_v63 }
 0x4c3   : > { %v11238_v7 = vadd.f32 %v11237_v53, %v11236_v58 }
 0x4cc   : > { %v11327_v25 = vpop.f32.mrb[40].mxu1 }
 0x4cd   : > { %v11328_v49 = vpop.f32.mrb[41].mxu1 }
 0x4ce   : > { %v11329_v62 = vadd.f32 %v11328_v49, %v11327_v25  ;;  %v11330_v9 = vpop.f32.mrb[42].mxu1 }
 0x4cf   : > { %v11239_v1 = vpop.f32.mrb[40].mxu0  ;;  %v11331_v59 = vpop.f32.mrb[43].mxu1 }
 0x4d0   : > { %v11240_v23 = vpop.f32.mrb[41].mxu0  ;;  %v11332_v3 = vadd.f32 %v11331_v59, %v11330_v9  ;;  %v15400_v29 = vadd.f32 %v11329_v62, %v9791_v6  ;;  %v9810_v6 = vadd.f32 %v11232_v18, %v15340_v20  ;;  %v9815_v18 = vadd.f32 %v11235_v27, %v15340_v20 }
 0x4d1   : > { %v11241_v11 = vadd.f32 %v11240_v23, %v11239_v1  ;;  %v11242_v61 = vpop.f32.mrb[42].mxu0 }
 0x4d2   : > { %v11243_v41 = vpop.f32.mrb[43].mxu0  ;;  %v15402_v57 = vadd.f32 %v11332_v3, %v9794_v51 }
 0x4d3   : > { %v15404_v5 = vadd.f32 %v11243_v41, %v11242_v61 }
 0x4dc   : > { %v11333_v52 = vpop.f32.mrb[44].mxu1 }
 0x4dd   : > { %v11334_v28 = vpop.f32.mrb[45].mxu1 }
 0x4de   : > { %v11335_v56 = vadd.f32 %v11334_v28, %v11333_v52  ;;  %v11336_v42 = vpop.f32.mrb[46].mxu1  ;;  %v9818_v28 = vadd.f32 %v11238_v7, %v15340_v20 }
 0x4df   : > { %v11245_v47 = vpop.f32.mrb[44].mxu0  ;;  %v11337_v30 = vpop.f32.mrb[47].mxu1 }
 0x4e0   : > { %v11246_v35 = vpop.f32.mrb[45].mxu0  ;;  %v11338_v34 = vadd.f32 %v11337_v30, %v11336_v42  ;;  %v15408_v14 = vadd.f32 %v11335_v56, %v9799_v32 }
 0x4e1   : > { %v11247_v36 = vadd.f32 %v11246_v35, %v11245_v47  ;;  %v11248_v19 = vpop.f32.mrb[46].mxu0 }
 0x4e2   : > { %v11249_v17 = vpop.f32.mrb[47].mxu0  ;;  %v15410_v45 = vadd.f32 %v11338_v34, %v9802_v60  ;;  %v9823_v34 = vadd.f32 %v11241_v11, %v15340_v20 }
 0x4e3   : > { %v11250_v0 = vadd.f32 %v11249_v17, %v11248_v19 }
 0x4e5   : > { %v11339_v63 = vpop.f32.mrb[48].mxu1 }
 0x4e6   : > { %v11340_v44 = vpop.f32.mrb[49].mxu1 }
 0x4e7   : > { %v11341_v8 = vadd.f32 %v11340_v44, %v11339_v63  ;;  %v11457_v58 = vpop.f32.mrb[48].mxu0  ;;  %v11342_v48 = vpop.f32.mrb[50].mxu1 }
 0x4e8   : > { %v10073_v53 = vadd.f32 %v11457_v58, %v15366_v50  ;;  %v10064_v25 = vpop.f32.mrb[49].mxu0  ;;  %v11343_v49 = vpop.f32.mrb[51].mxu1 }
 0x4e9   : > { %v10065_v62 = vadd.f32 %v10064_v25, %v15353_v39  ;;  %v11344_v9 = vadd.f32 %v11343_v49, %v11342_v48  ;;  %v11458_v1 = vpop.f32.mrb[50].mxu0  ;;  %v15416_v59 = vadd.f32 %v11341_v8, %v9807_v26  ;;  %v9826_v26 = vadd.f32 %v15404_v5, %v15340_v20 }
 0x4ea   : > { %10193 = vst [vmem:[%s12321_s28 + $0x10] sm:$0xff] %v10073_v53  ;;  %v10076_v4 = vadd.f32 %v11458_v1, %v15368_v38  ;;  %v10067_v51 = vpop.f32.mrb[51].mxu0  ;;  %v9831_v48 = vadd.f32 %v11247_v36, %v15340_v20  ;;  %v9834_v5 = vadd.f32 %v11250_v0, %v15340_v20 }
 0x4eb   : > { %10191 = vst [vmem:[%s12321_s28] sm:$0xff] %v10065_v62  ;;  %v10068_v23 = vadd.f32 %v10067_v51, %v15355_v22  ;;  %v15422_v3 = vadd.f32 %v11344_v9, %v9810_v6 }
 0x4ec   : > { %10194 = vst [vmem:[%s12321_s28 + $0x18] sm:$0xff] %v10076_v4 }
 0x4ed   : > { %10192 = vst [vmem:[%s12321_s28 + $0x8] sm:$0xff] %v10068_v23  ;;  %v11345_v50 = vpop.f32.mrb[52].mxu1 }
 0x4ee   : > { %v11346_v61 = vpop.f32.mrb[53].mxu1 }
 0x4ef   : > { %v11347_v39 = vadd.f32 %v11346_v61, %v11345_v50  ;;  %v11348_v41 = vpop.f32.mrb[54].mxu1 }
 0x4f0   : > { %v11349_v52 = vpop.f32.mrb[55].mxu1 }
 0x4f1   : > { %v11350_v32 = vadd.f32 %v11349_v52, %v11348_v41  ;;  %v15428_v38 = vadd.f32 %v11347_v39, %v9815_v18  ;;  %v11461_v22 = vpop.f32.mrb[52].mxu0  ;;  %v9839_v39 = vadd.f32 %v15175_v24, %v15340_v20 }
 0x4f2   : > { %v10089_v42 = vadd.f32 %v11461_v22, %v15380_v55  ;;  %v10080_v47 = vpop.f32.mrb[53].mxu0 }
 0x4f3   : > { %v15430_v56 = vadd.f32 %v11350_v32, %v9818_v28  ;;  %v10081_v27 = vadd.f32 %v10080_v47, %v15373_v54  ;;  %v11462_v60 = vpop.f32.mrb[54].mxu0 }
 0x4f4   : > { %10197 = vst [vmem:[%s12321_s28 + $0x30] sm:$0xff] %v10089_v42  ;;  %v10092_v7 = vadd.f32 %v11462_v60, %v15382_v15  ;;  %v10083_v19 = vpop.f32.mrb[55].mxu0 }
 0x4f5   : > { %v11351_v30 = vpop.f32.mrb[56].mxu1  ;;  %10195 = vst [vmem:[%s12321_s28 + $0x20] sm:$0xff] %v10081_v27  ;;  %v10084_v44 = vadd.f32 %v10083_v19, %v15375_v31 }
 0x4f6   : > { %v11352_v35 = vpop.f32.mrb[57].mxu1  ;;  %10198 = vst [vmem:[%s12321_s28 + $0x38] sm:$0xff] %v10092_v7 }
 0x4f7   : > { %v11353_v17 = vadd.f32 %v11352_v35, %v11351_v30  ;;  %v11354_v63 = vpop.f32.mrb[58].mxu1  ;;  %10196 = vst [vmem:[%s12321_s28 + $0x28] sm:$0xff] %v10084_v44  ;;  %v9847_v35 = vadd.f32 %v15229_v12, %v15340_v20  ;;  %v9855_v12 = vadd.f32 %v15299_v2, %v15340_v20 }
 0x4f8   : > { %v11355_v55 = vpop.f32.mrb[59].mxu1 }
 0x4f9   : > { %v11356_v54 = vadd.f32 %v11355_v55, %v11354_v63  ;;  %v15442_v8 = vadd.f32 %v11353_v17, %v9823_v34 }
 0x4fb   : > { %v15445_v58 = vadd.f32 %v11356_v54, %v9826_v26 }
 0x500   : > { %v11357_v11 = vpop.f32.mrb[60].mxu1 }
 0x501   : > { %v11358_v15 = vpop.f32.mrb[61].mxu1 }
 0x502   : > { %v11359_v53 = vadd.f32 %v11358_v15, %v11357_v11  ;;  %v11360_v25 = vpop.f32.mrb[62].mxu1  ;;  %v9858_v11 = vadd.f32 %v15309_v10, %v15340_v20 }
 0x503   : > { %v11361_v31 = vpop.f32.mrb[63].mxu1 }
 0x504   : > { %v11362_v49 = vadd.f32 %v11361_v31, %v11360_v25  ;;  %v15449_v6 = vadd.f32 %v11359_v53, %v9831_v48  ;;  %v11465_v62 = vpop.f32.mrb[56].mxu0 }
 0x505   : > { %v10105_v1 = vadd.f32 %v11465_v62, %v15394_v40  ;;  %v10096_v4 = vpop.f32.mrb[57].mxu0 }
 0x506   : > { %v15451_v9 = vadd.f32 %v11362_v49, %v9834_v5  ;;  %v10097_v51 = vadd.f32 %v10096_v4, %v15388_v46  ;;  %v11466_v36 = vpop.f32.mrb[58].mxu0  ;;  %v9842_v46 = vadd.f32 %v15177_v16, %v15340_v20 }
 0x507   : > { %10201 = vst [vmem:[%s12321_s28 + $0x50] sm:$0xff] %v10105_v1  ;;  %v10108_v23 = vadd.f32 %v11466_v36, %v15396_v37  ;;  %v10099_v50 = vpop.f32.mrb[59].mxu0 }
 0x508   : > { %10199 = vst [vmem:[%s12321_s28 + $0x40] sm:$0xff] %v10097_v51  ;;  %v10100_v61 = vadd.f32 %v10099_v50, %v15390_v13  ;;  %v9863_v51 = vadd.f32 %v15327_v43, %v15340_v20 }
 0x509   : > { %10202 = vst [vmem:[%s12321_s28 + $0x58] sm:$0xff] %v10108_v23 }
 0x50a   : > { %10200 = vst [vmem:[%s12321_s28 + $0x48] sm:$0xff] %v10100_v61 }
 0x50c   : > { %v11363_v0 = vpop.f32.mrb[64].mxu1 }
 0x50d   : > { %v11364_v18 = vpop.f32.mrb[65].mxu1 }
 0x50e   : > { %v11365_v40 = vadd.f32 %v11364_v18, %v11363_v0  ;;  %v11366_v41 = vpop.f32.mrb[66].mxu1 }
 0x50f   : > { %v11367_v52 = vpop.f32.mrb[67].mxu1 }
 0x510   : > { %v11368_v37 = vadd.f32 %v11367_v52, %v11366_v41  ;;  %v15465_v28 = vadd.f32 %v11365_v40, %v9839_v39 }
 0x512   : > { %v15467_v32 = vadd.f32 %v11368_v37, %v9842_v46  ;;  %v11469_v13 = vpop.f32.mrb[60].mxu0 }
 0x513   : > { %v10121_v22 = vadd.f32 %v11469_v13, %v15408_v14  ;;  %v10112_v42 = vpop.f32.mrb[61].mxu0 }
 0x514   : > { %v10113_v24 = vadd.f32 %v10112_v42, %v15400_v29  ;;  %v11470_v47 = vpop.f32.mrb[62].mxu0  ;;  %v9850_v29 = vadd.f32 %v15251_v21, %v15340_v20 }
 0x515   : > { %v11369_v30 = vpop.f32.mrb[68].mxu1  ;;  %10205 = vst [vmem:[%s12321_s28 + $0x70] sm:$0xff] %v10121_v22  ;;  %v10124_v27 = vadd.f32 %v11470_v47, %v15410_v45  ;;  %v10115_v60 = vpop.f32.mrb[63].mxu0 }
 0x516   : > { %v11370_v16 = vpop.f32.mrb[69].mxu1  ;;  %10203 = vst [vmem:[%s12321_s28 + $0x60] sm:$0xff] %v10113_v24  ;;  %v10116_v34 = vadd.f32 %v10115_v60, %v15402_v57 }
 0x517   : > { %v11371_v7 = vadd.f32 %v11370_v16, %v11369_v30  ;;  %v11372_v19 = vpop.f32.mrb[70].mxu1  ;;  %10206 = vst [vmem:[%s12321_s28 + $0x78] sm:$0xff] %v10124_v27 }
 0x518   : > { %v11373_v14 = vpop.f32.mrb[71].mxu1  ;;  %10204 = vst [vmem:[%s12321_s28 + $0x68] sm:$0xff] %v10116_v34 }
 0x519   : > { %v11374_v17 = vadd.f32 %v11373_v14, %v11372_v19  ;;  %v10008_v63 = vadd.f32 %v11371_v7, %v9847_v35 }
 0x51b   : > { %v10011_v44 = vadd.f32 %v11374_v17, %v9850_v29 }
 0x51e   : > { %v11375_v45 = vpop.f32.mrb[72].mxu1 }
 0x51f   : > { %v11376_v55 = vpop.f32.mrb[73].mxu1 }
 0x520   : > { %v11377_v26 = vadd.f32 %v11376_v55, %v11375_v45  ;;  %v11378_v57 = vpop.f32.mrb[74].mxu1 }
 0x521   : > { %v11379_v54 = vpop.f32.mrb[75].mxu1 }
 0x522   : > { %v11380_v15 = vadd.f32 %v11379_v54, %v11378_v57  ;;  %v10016_v21 = vadd.f32 %v11377_v26, %v9855_v12 }
 0x524   : > { %v10019_v48 = vadd.f32 %v11380_v15, %v9858_v11 }
 0x525   : > { %v11473_v53 = vpop.f32.mrb[64].mxu0 }
 0x526   : > { %v10137_v25 = vadd.f32 %v11473_v53, %v15428_v38  ;;  %v10128_v31 = vpop.f32.mrb[65].mxu0 }
 0x527   : > { %v10129_v5 = vadd.f32 %v10128_v31, %v15416_v59  ;;  %v11474_v49 = vpop.f32.mrb[66].mxu0 }
 0x528   : > { %10209 = vst [vmem:[%s12321_s28 + $0x90] sm:$0xff] %v10137_v25  ;;  %v10140_v2 = vadd.f32 %v11474_v49, %v15430_v56  ;;  %v10131_v62 = vpop.f32.mrb[67].mxu0  ;;  %v9866_v56 = vadd.f32 %v15331_v33, %v15340_v20 }
 0x529   : > { %10207 = vst [vmem:[%s12321_s28 + $0x80] sm:$0xff] %v10129_v5  ;;  %v10132_v1 = vadd.f32 %v10131_v62, %v15422_v3  ;;  %v11381_v4 = vpop.f32.mrb[76].mxu1 }
 0x52a   : > { %10210 = vst [vmem:[%s12321_s28 + $0x98] sm:$0xff] %v10140_v2  ;;  %v11382_v10 = vpop.f32.mrb[77].mxu1 }
 0x52b   : > { %10208 = vst [vmem:[%s12321_s28 + $0x88] sm:$0xff] %v10132_v1  ;;  %v11383_v38 = vadd.f32 %v11382_v10, %v11381_v4  ;;  %v11384_v36 = vpop.f32.mrb[78].mxu1 }
 0x52c   : > { %v11385_v59 = vpop.f32.mrb[79].mxu1 }
 0x52d   : > { %v10024_v23 = vadd.f32 %v11383_v38, %v9863_v51  ;;  %v11386_v50 = vadd.f32 %v11385_v59, %v11384_v36 }
 0x52f   : > { %v10027_v3 = vadd.f32 %v11386_v50, %v9866_v56 }
 0x533   : > { %v11477_v61 = vpop.f32.mrb[68].mxu0 }
 0x534   : > { %v10153_v0 = vadd.f32 %v11477_v61, %v15449_v6  ;;  %v10144_v18 = vpop.f32.mrb[69].mxu0 }
 0x535   : > { %v10145_v43 = vadd.f32 %v10144_v18, %v15442_v8  ;;  %v11478_v39 = vpop.f32.mrb[70].mxu0 }
 0x536   : > { %10213 = vst [vmem:[%s12321_s28 + $0xb0] sm:$0xff] %v10153_v0  ;;  %v10156_v40 = vadd.f32 %v11478_v39, %v15451_v9  ;;  %v10147_v41 = vpop.f32.mrb[71].mxu0 }
 0x537   : > { %10211 = vst [vmem:[%s12321_s28 + $0xa0] sm:$0xff] %v10145_v43  ;;  %v10148_v33 = vadd.f32 %v10147_v41, %v15445_v58 }
 0x538   : > { %10214 = vst [vmem:[%s12321_s28 + $0xb8] sm:$0xff] %v10156_v40 }
 0x539   : > { %10212 = vst [vmem:[%s12321_s28 + $0xa8] sm:$0xff] %v10148_v33 }
 0x540   : > { %v11481_v20 = vpop.f32.mrb[72].mxu0 }
 0x541   : > { %v10169_v52 = vadd.f32 %v11481_v20, %v10008_v63  ;;  %v10160_v6 = vpop.f32.mrb[73].mxu0 }
 0x542   : > { %v10161_v46 = vadd.f32 %v10160_v6, %v15465_v28  ;;  %v11482_v8 = vpop.f32.mrb[74].mxu0 }
 0x543   : > { %10217 = vst [vmem:[%s12321_s28 + $0xd0] sm:$0xff] %v10169_v52  ;;  %v10172_v37 = vadd.f32 %v11482_v8, %v10011_v44  ;;  %v10163_v9 = vpop.f32.mrb[75].mxu0 }
 0x544   : > { %10215 = vst [vmem:[%s12321_s28 + $0xc0] sm:$0xff] %v10161_v46  ;;  %v10164_v13 = vadd.f32 %v10163_v9, %v15467_v32 }
 0x545   : > { %10218 = vst [vmem:[%s12321_s28 + $0xd8] sm:$0xff] %v10172_v37 }
 0x546   : > { %10216 = vst [vmem:[%s12321_s28 + $0xc8] sm:$0xff] %v10164_v13 }
 0x54a   : > { %v11485_v58 = vpop.f32.mrb[76].mxu0 }
 0x54b   : > { %v10185_v22 = vadd.f32 %v11485_v58, %v10024_v23  ;;  %v10176_v42 = vpop.f32.mrb[77].mxu0 }
 0x54c   : > { %v10177_v24 = vadd.f32 %v10176_v42, %v10016_v21  ;;  %v11486_v47 = vpop.f32.mrb[78].mxu0 }
 0x54d   : > { %10221 = vst [vmem:[%s12321_s28 + $0xf0] sm:$0xff] %v10185_v22  ;;  %v10188_v30 = vadd.f32 %v11486_v47, %v10027_v3  ;;  %v10179_v28 = vpop.f32.mrb[79].mxu0 }
 0x54e   : > { %10219 = vst [vmem:[%s12321_s28 + $0xe0] sm:$0xff] %v10177_v24  ;;  %v10180_v27 = vadd.f32 %v10179_v28, %v10019_v48 }
 0x54f   : > { %10222 = vst [vmem:[%s12321_s28 + $0xf8] sm:$0xff] %v10188_v30 }
 0x550   : > { %10220 = vst [vmem:[%s12321_s28 + $0xe8] sm:$0xff] %v10180_v27 }
 0x551 PF: > { %s15_s18 = sadd.s32 1, %s12186_s18  }
 0x552   : > { %p12_p5 = scmp.ge.s32.totalorder %s15_s18, 4  }
 0x554   :  { %14 = sbr.rel (!%p12_p5) target bundleno = 1 (0x1), region = 94 }

</bundles_post_ra>
